<compile_context>
chip_gen: v7x
topology: tpu7x:2x2x1
jax: 0.10.0
libtpu: 0.0.40
codegen_flags: <defaults>
</compile_context>

<pallas_src>
import math

import jax
import jax.numpy as jnp
from jax.experimental import pallas as pl
from jax.experimental.pallas import tpu as pltpu


# Layer sizes exactly as in simple_model.__init__ (16 Linear layers, W stored (in, out)).
_LAYER_DIMS = [
    (2, 200), (200, 500), (500, 1000),
    (1000, 1000), (1000, 1000), (1000, 1000), (1000, 1000),
    (1000, 1000), (1000, 1000), (1000, 1000), (1000, 1000),
    (1000, 500), (500, 200), (200, 100), (100, 50), (50, 2),
]
_N_HEAD = 3    # layers 0..2   (2 -> 200 -> 500 -> 1000)
_N_MID = 8     # layers 3..10  (1000 -> 1000), identical -> stacked & grid-streamed
_N_TAIL = 5    # layers 11..15 (1000 -> 500 -> 200 -> 100 -> 50 -> 2)
_MID_DIM = 1000


def _maybe_bf16(w):
    """Stream large weight matrices as bf16; keep tiny ones fp32 (negligible bytes)."""
    return w.astype(jnp.bfloat16) if min(w.shape) >= 100 else w


def _linear_relu(x, w, b):
    """y = relu(x @ W + b); MXU inputs in W's dtype, fp32 accumulation."""
    y = jnp.dot(x.astype(w.dtype), w, preferred_element_type=jnp.float32) + b
    return jnp.maximum(y, 0.0)


def _fused_mlp_kernel(x_ref, *rest):
    # Argument layout (inputs..., output, scratch):
    #   rest[0 : 2*_N_HEAD]              head (w, b) pairs (full, resident blocks)
    #   rest[2*_N_HEAD]                  middle weight block (1, 1000, 1000) bf16, pipelined
    #   rest[2*_N_HEAD + 1]              middle bias block   (1, 1, 1000) f32, pipelined
    #   rest[2*_N_HEAD+2 : -2]           tail (w, b) pairs (full, resident blocks)
    #   rest[-2]                         output ref (B, 2) f32 (resident, written at last step)
    #   rest[-1]                         activation scratch (B, 1000) f32
    head = rest[: 2 * _N_HEAD]
    mid_w_ref = rest[2 * _N_HEAD]
    mid_b_ref = rest[2 * _N_HEAD + 1]
    tail = rest[2 * _N_HEAD + 2: 2 * _N_HEAD + 2 + 2 * _N_TAIL]
    o_ref = rest[-2]
    act_ref = rest[-1]

    i = pl.program_id(0)

    @pl.when(i == 0)
    def _head():
        h = x_ref[...]
        for j in range(_N_HEAD):
            h = _linear_relu(h, head[2 * j][...], head[2 * j + 1][...])
        act_ref[...] = h

    # Middle layer i: the grid pipeline streams the ~2 MB weight of layer i+1
    # behind this step, so the kernel runs at the weight-DMA roofline.
    act_ref[...] = _linear_relu(act_ref[...], mid_w_ref[0], mid_b_ref[0])

    @pl.when(i == pl.num_programs(0) - 1)
    def _tail():
        h = act_ref[...]
        for j in range(_N_TAIL):
            h = _linear_relu(h, tail[2 * j][...], tail[2 * j + 1][...])
        # Trailing nn.Sigmoid (the ReLU after the last Linear is already applied above,
        # exactly as in the PyTorch module).
        o_ref[...] = (1.0 / (1.0 + jnp.exp(-h))).astype(o_ref.dtype)


def _const_spec(shape):
    """Full-array block whose index never changes -> DMA'd once, stays VMEM-resident."""
    zeros = (0,) * len(shape)
    return pl.BlockSpec(shape, lambda i, _z=zeros: _z)


@jax.jit
def simple_model_forward(x, head, mid_w, mid_b, tail):
    batch = x.shape[0]
    in_specs = (
        [_const_spec(x.shape)]
        + [_const_spec(a.shape) for a in head]
        + [pl.BlockSpec((1, _MID_DIM, _MID_DIM), lambda i: (i, 0, 0)),
           pl.BlockSpec((1, 1, _MID_DIM), lambda i: (i, 0, 0))]
        + [_const_spec(a.shape) for a in tail]
    )
    return pl.pallas_call(
        _fused_mlp_kernel,
        out_shape=jax.ShapeDtypeStruct((batch, 2), jnp.float32),
        grid_spec=pltpu.PrefetchScalarGridSpec(
            num_scalar_prefetch=0,
            grid=(_N_MID,),
            in_specs=in_specs,
            out_specs=_const_spec((batch, 2)),
            scratch_shapes=[pltpu.VMEM((batch, _MID_DIM), jnp.float32)],
        ),
        compiler_params=pltpu.CompilerParams(
            dimension_semantics=("arbitrary",),
            vmem_limit_bytes=32 << 20,
        ),
    )(x, *head, mid_w, mid_b, *tail)


def init_params(key):
    """nn.Linear default init: U(-1/sqrt(fan_in), 1/sqrt(fan_in)); W stored (in, out)."""
    params = []
    for fan_in, fan_out in _LAYER_DIMS:
        key, kw, kb = jax.random.split(key, 3)
        bound = 1.0 / math.sqrt(fan_in)
        w = jax.random.uniform(kw, (fan_in, fan_out), jnp.float32, -bound, bound)
        b = jax.random.uniform(kb, (fan_out,), jnp.float32, -bound, bound)
        params.append((w, b))
    return params


def prepare_params(params):
    """Pack per-layer fp32 params into the layout the fused kernel expects."""
    head = []
    for w, b in params[:_N_HEAD]:
        head += [_maybe_bf16(w), b.reshape(1, -1)]
    mid = params[_N_HEAD:_N_HEAD + _N_MID]
    mid_w = jnp.stack([w for w, _ in mid]).astype(jnp.bfloat16)           # (8, 1000, 1000)
    mid_b = jnp.stack([b for _, b in mid]).reshape(_N_MID, 1, _MID_DIM)   # (8, 1, 1000) f32
    tail = []
    for w, b in params[_N_HEAD + _N_MID:]:
        tail += [_maybe_bf16(w), b.reshape(1, -1)]
    return tuple(head), mid_w, mid_b, tuple(tail)


def reference_forward(x, params):
    """Pure-JAX reference with the same bf16/fp32 mixed-precision math."""
    h = x
    for w, b in params:
        w = _maybe_bf16(w)
        h = jnp.dot(h.astype(w.dtype), w, preferred_element_type=jnp.float32) + b
        h = jnp.maximum(h, 0.0)
    return 1.0 / (1.0 + jnp.exp(-h))


if __name__ == "__main__":
    key = jax.random.PRNGKey(0)
    kp, kx = jax.random.split(key)
    params = init_params(kp)
    head, mid_w, mid_b, tail = prepare_params(params)

    batch = 8
    x = jax.random.normal(kx, (batch, 2), dtype=jnp.float32)

    out = simple_model_forward(x, head, mid_w, mid_b, tail)
    out = jax.block_until_ready(out)

    ref = reference_forward(x, params)
    assert out.shape == (batch, 2), out.shape
    # bf16 weight streaming => tolerance relaxed vs a pure-fp32 reference; the
    # reference above uses the identical mixed-precision math, so this is generous.
    assert jnp.allclose(out, ref, atol=1e-2, rtol=1e-2), (
        "mismatch vs reference: max abs diff "
        f"{float(jnp.max(jnp.abs(out - ref)))}")

    print("KERNEL_OK")
</pallas_src>

<mosaic_0001>
module attributes {stable_mosaic.version = 11 : i64} {
  func.func @_fused_mlp_kernel(%arg0: i32, %arg1: memref<8x2xf32, #tpu.memory_space<vmem>>, %arg2: memref<2x200xf32, #tpu.memory_space<vmem>>, %arg3: memref<1x200xf32, #tpu.memory_space<vmem>>, %arg4: memref<200x500xbf16, #tpu.memory_space<vmem>>, %arg5: memref<1x500xf32, #tpu.memory_space<vmem>>, %arg6: memref<500x1000xbf16, #tpu.memory_space<vmem>>, %arg7: memref<1x1000xf32, #tpu.memory_space<vmem>>, %arg8: memref<1x1000x1000xbf16, #tpu.memory_space<vmem>>, %arg9: memref<1x1x1000xf32, #tpu.memory_space<vmem>>, %arg10: memref<1000x500xbf16, #tpu.memory_space<vmem>>, %arg11: memref<1x500xf32, #tpu.memory_space<vmem>>, %arg12: memref<500x200xbf16, #tpu.memory_space<vmem>>, %arg13: memref<1x200xf32, #tpu.memory_space<vmem>>, %arg14: memref<200x100xbf16, #tpu.memory_space<vmem>>, %arg15: memref<1x100xf32, #tpu.memory_space<vmem>>, %arg16: memref<100x50xf32, #tpu.memory_space<vmem>>, %arg17: memref<1x50xf32, #tpu.memory_space<vmem>>, %arg18: memref<50x2xf32, #tpu.memory_space<vmem>>, %arg19: memref<1x2xf32, #tpu.memory_space<vmem>>, %arg20: memref<8x2xf32, #tpu.memory_space<vmem>>, %arg21: memref<8x1000xf32, #tpu.memory_space<vmem>>) attributes {dimension_semantics = [#tpu.dimension_semantics<arbitrary>], iteration_bounds = array<i64: 8>, scalar_prefetch = 0 : i64, scratch_operands = 1 : i64, tpu.core_type = #tpu.core_type<tc>, window_params = [{pipeline_mode = #tpu.pipeline_mode<synchronous>, transform_indices = @transform_0, window_bounds = array<i64: 8, 2>}, {pipeline_mode = #tpu.pipeline_mode<synchronous>, transform_indices = @transform_1, window_bounds = array<i64: 2, 200>}, {pipeline_mode = #tpu.pipeline_mode<synchronous>, transform_indices = @transform_2, window_bounds = array<i64: 1, 200>}, {pipeline_mode = #tpu.pipeline_mode<synchronous>, transform_indices = @transform_3, window_bounds = array<i64: 200, 500>}, {pipeline_mode = #tpu.pipeline_mode<synchronous>, transform_indices = @transform_4, window_bounds = array<i64: 1, 500>}, {pipeline_mode = #tpu.pipeline_mode<synchronous>, transform_indices = @transform_5, window_bounds = array<i64: 500, 1000>}, {pipeline_mode = #tpu.pipeline_mode<synchronous>, transform_indices = @transform_6, window_bounds = array<i64: 1, 1000>}, {transform_indices = @transform_7, window_bounds = array<i64: 1, 1000, 1000>}, {transform_indices = @transform_8, window_bounds = array<i64: 1, 1, 1000>}, {pipeline_mode = #tpu.pipeline_mode<synchronous>, transform_indices = @transform_9, window_bounds = array<i64: 1000, 500>}, {pipeline_mode = #tpu.pipeline_mode<synchronous>, transform_indices = @transform_10, window_bounds = array<i64: 1, 500>}, {pipeline_mode = #tpu.pipeline_mode<synchronous>, transform_indices = @transform_11, window_bounds = array<i64: 500, 200>}, {pipeline_mode = #tpu.pipeline_mode<synchronous>, transform_indices = @transform_12, window_bounds = array<i64: 1, 200>}, {pipeline_mode = #tpu.pipeline_mode<synchronous>, transform_indices = @transform_13, window_bounds = array<i64: 200, 100>}, {pipeline_mode = #tpu.pipeline_mode<synchronous>, transform_indices = @transform_14, window_bounds = array<i64: 1, 100>}, {pipeline_mode = #tpu.pipeline_mode<synchronous>, transform_indices = @transform_15, window_bounds = array<i64: 100, 50>}, {pipeline_mode = #tpu.pipeline_mode<synchronous>, transform_indices = @transform_16, window_bounds = array<i64: 1, 50>}, {pipeline_mode = #tpu.pipeline_mode<synchronous>, transform_indices = @transform_17, window_bounds = array<i64: 50, 2>}, {pipeline_mode = #tpu.pipeline_mode<synchronous>, transform_indices = @transform_18, window_bounds = array<i64: 1, 2>}, {pipeline_mode = #tpu.pipeline_mode<synchronous>, transform_indices = @transform_19, window_bounds = array<i64: 8, 2>}]} {
    %c0_i32 = arith.constant 0 : i32
    %0 = arith.cmpi eq, %arg0, %c0_i32 : i32
    %1 = arith.extui %0 : i1 to i32
    %c0_i32_0 = arith.constant 0 : i32
    %2 = arith.cmpi ne, %1, %c0_i32_0 : i32
    scf.if %2 {
      %c0_12 = arith.constant 0 : index
      %c0_13 = arith.constant 0 : index
      %18 = vector.load %arg1[%c0_12, %c0_13] : memref<8x2xf32, #tpu.memory_space<vmem>>, vector<8x2xf32>
      %c0_14 = arith.constant 0 : index
      %c0_15 = arith.constant 0 : index
      %19 = vector.load %arg2[%c0_14, %c0_15] : memref<2x200xf32, #tpu.memory_space<vmem>>, vector<2x200xf32>
      %c0_16 = arith.constant 0 : index
      %c0_17 = arith.constant 0 : index
      %20 = vector.load %arg3[%c0_16, %c0_17] : memref<1x200xf32, #tpu.memory_space<vmem>>, vector<1x200xf32>
      %cst_18 = arith.constant dense<0.000000e+00> : vector<8x200xf32>
      %21 = tpu.matmul %18, %19, %cst_18 {dimension_numbers = #tpu.dot_dimension_numbers<[1], [0], [0], [1], [0, 0, 1, 1], [], []>} : vector<8x2xf32>, vector<2x200xf32>, vector<8x200xf32> -> vector<8x200xf32>
      %22 = vector.broadcast %20 : vector<1x200xf32> to vector<8x200xf32>
      %23 = arith.addf %21, %22 : vector<8x200xf32>
      %cst_19 = arith.constant 0.000000e+00 : f32
      %24 = vector.broadcast %cst_19 : f32 to vector<8x200xf32>
      %25 = arith.maximumf %23, %24 : vector<8x200xf32>
      %c0_20 = arith.constant 0 : index
      %c0_21 = arith.constant 0 : index
      %26 = vector.load %arg4[%c0_20, %c0_21] : memref<200x500xbf16, #tpu.memory_space<vmem>>, vector<200x500xbf16>
      %c0_22 = arith.constant 0 : index
      %c0_23 = arith.constant 0 : index
      %27 = vector.load %arg5[%c0_22, %c0_23] : memref<1x500xf32, #tpu.memory_space<vmem>>, vector<1x500xf32>
      %28 = arith.truncf %25 : vector<8x200xf32> to vector<8x200xbf16>
      %cst_24 = arith.constant dense<0.000000e+00> : vector<8x500xf32>
      %29 = tpu.matmul %28, %26, %cst_24 {dimension_numbers = #tpu.dot_dimension_numbers<[1], [0], [0], [1], [0, 0, 1, 1], [], []>} : vector<8x200xbf16>, vector<200x500xbf16>, vector<8x500xf32> -> vector<8x500xf32>
      %30 = vector.broadcast %27 : vector<1x500xf32> to vector<8x500xf32>
      %31 = arith.addf %29, %30 : vector<8x500xf32>
      %cst_25 = arith.constant 0.000000e+00 : f32
      %32 = vector.broadcast %cst_25 : f32 to vector<8x500xf32>
      %33 = arith.maximumf %31, %32 : vector<8x500xf32>
      %c0_26 = arith.constant 0 : index
      %c0_27 = arith.constant 0 : index
      %34 = vector.load %arg6[%c0_26, %c0_27] : memref<500x1000xbf16, #tpu.memory_space<vmem>>, vector<500x1000xbf16>
      %c0_28 = arith.constant 0 : index
      %c0_29 = arith.constant 0 : index
      %35 = vector.load %arg7[%c0_28, %c0_29] : memref<1x1000xf32, #tpu.memory_space<vmem>>, vector<1x1000xf32>
      %36 = arith.truncf %33 : vector<8x500xf32> to vector<8x500xbf16>
      %cst_30 = arith.constant dense<0.000000e+00> : vector<8x1000xf32>
      %37 = tpu.matmul %36, %34, %cst_30 {dimension_numbers = #tpu.dot_dimension_numbers<[1], [0], [0], [1], [0, 0, 1, 1], [], []>} : vector<8x500xbf16>, vector<500x1000xbf16>, vector<8x1000xf32> -> vector<8x1000xf32>
      %38 = vector.broadcast %35 : vector<1x1000xf32> to vector<8x1000xf32>
      %39 = arith.addf %37, %38 : vector<8x1000xf32>
      %cst_31 = arith.constant 0.000000e+00 : f32
      %40 = vector.broadcast %cst_31 : f32 to vector<8x1000xf32>
      %41 = arith.maximumf %39, %40 : vector<8x1000xf32>
      %c0_32 = arith.constant 0 : index
      %c0_33 = arith.constant 0 : index
      %42 = vector.load %arg21[%c0_32, %c0_33] : memref<8x1000xf32, #tpu.memory_space<vmem>>, vector<8x1000xf32>
      tpu.vector_store %arg21[%c0_32, %c0_33], %41 {strides = array<i32>} : memref<8x1000xf32, #tpu.memory_space<vmem>>, vector<8x1000xf32>,
    } else {
    }
    %c0 = arith.constant 0 : index
    %c0_1 = arith.constant 0 : index
    %3 = vector.load %arg21[%c0, %c0_1] : memref<8x1000xf32, #tpu.memory_space<vmem>>, vector<8x1000xf32>
    %c0_2 = arith.constant 0 : index
    %c0_3 = arith.constant 0 : index
    %c0_4 = arith.constant 0 : index
    %4 = vector.load %arg8[%c0_2, %c0_3, %c0_4] : memref<1x1000x1000xbf16, #tpu.memory_space<vmem>>, vector<1x1000x1000xbf16>
    %5 = vector.shape_cast %4 : vector<1x1000x1000xbf16> to vector<1000x1000xbf16>
    %c0_5 = arith.constant 0 : index
    %c0_6 = arith.constant 0 : index
    %c0_7 = arith.constant 0 : index
    %6 = vector.load %arg9[%c0_5, %c0_6, %c0_7] : memref<1x1x1000xf32, #tpu.memory_space<vmem>>, vector<1x1x1000xf32>
    %7 = vector.shape_cast %6 : vector<1x1x1000xf32> to vector<1x1000xf32>
    %8 = arith.truncf %3 : vector<8x1000xf32> to vector<8x1000xbf16>
    %cst = arith.constant dense<0.000000e+00> : vector<8x1000xf32>
    %9 = tpu.matmul %8, %5, %cst {dimension_numbers = #tpu.dot_dimension_numbers<[1], [0], [0], [1], [0, 0, 1, 1], [], []>} : vector<8x1000xbf16>, vector<1000x1000xbf16>, vector<8x1000xf32> -> vector<8x1000xf32>
    %10 = vector.broadcast %7 : vector<1x1000xf32> to vector<8x1000xf32>
    %11 = arith.addf %9, %10 : vector<8x1000xf32>
    %cst_8 = arith.constant 0.000000e+00 : f32
    %12 = vector.broadcast %cst_8 : f32 to vector<8x1000xf32>
    %13 = arith.maximumf %11, %12 : vector<8x1000xf32>
    %c0_9 = arith.constant 0 : index
    %c0_10 = arith.constant 0 : index
    %14 = vector.load %arg21[%c0_9, %c0_10] : memref<8x1000xf32, #tpu.memory_space<vmem>>, vector<8x1000xf32>
    tpu.vector_store %arg21[%c0_9, %c0_10], %13 {strides = array<i32>} : memref<8x1000xf32, #tpu.memory_space<vmem>>, vector<8x1000xf32>,
    %c7_i32 = arith.constant 7 : i32
    %15 = arith.cmpi eq, %arg0, %c7_i32 : i32
    %16 = arith.extui %15 : i1 to i32
    %c0_i32_11 = arith.constant 0 : i32
    %17 = arith.cmpi ne, %16, %c0_i32_11 : i32
    scf.if %17 {
      %c0_12 = arith.constant 0 : index
      %c0_13 = arith.constant 0 : index
      %18 = vector.load %arg21[%c0_12, %c0_13] : memref<8x1000xf32, #tpu.memory_space<vmem>>, vector<8x1000xf32>
      %c0_14 = arith.constant 0 : index
      %c0_15 = arith.constant 0 : index
      %19 = vector.load %arg10[%c0_14, %c0_15] : memref<1000x500xbf16, #tpu.memory_space<vmem>>, vector<1000x500xbf16>
      %c0_16 = arith.constant 0 : index
      %c0_17 = arith.constant 0 : index
      %20 = vector.load %arg11[%c0_16, %c0_17] : memref<1x500xf32, #tpu.memory_space<vmem>>, vector<1x500xf32>
      %21 = arith.truncf %18 : vector<8x1000xf32> to vector<8x1000xbf16>
      %cst_18 = arith.constant dense<0.000000e+00> : vector<8x500xf32>
      %22 = tpu.matmul %21, %19, %cst_18 {dimension_numbers = #tpu.dot_dimension_numbers<[1], [0], [0], [1], [0, 0, 1, 1], [], []>} : vector<8x1000xbf16>, vector<1000x500xbf16>, vector<8x500xf32> -> vector<8x500xf32>
      %23 = vector.broadcast %20 : vector<1x500xf32> to vector<8x500xf32>
      %24 = arith.addf %22, %23 : vector<8x500xf32>
      %cst_19 = arith.constant 0.000000e+00 : f32
      %25 = vector.broadcast %cst_19 : f32 to vector<8x500xf32>
      %26 = arith.maximumf %24, %25 : vector<8x500xf32>
      %c0_20 = arith.constant 0 : index
      %c0_21 = arith.constant 0 : index
      %27 = vector.load %arg12[%c0_20, %c0_21] : memref<500x200xbf16, #tpu.memory_space<vmem>>, vector<500x200xbf16>
      %c0_22 = arith.constant 0 : index
      %c0_23 = arith.constant 0 : index
      %28 = vector.load %arg13[%c0_22, %c0_23] : memref<1x200xf32, #tpu.memory_space<vmem>>, vector<1x200xf32>
      %29 = arith.truncf %26 : vector<8x500xf32> to vector<8x500xbf16>
      %cst_24 = arith.constant dense<0.000000e+00> : vector<8x200xf32>
      %30 = tpu.matmul %29, %27, %cst_24 {dimension_numbers = #tpu.dot_dimension_numbers<[1], [0], [0], [1], [0, 0, 1, 1], [], []>} : vector<8x500xbf16>, vector<500x200xbf16>, vector<8x200xf32> -> vector<8x200xf32>
      %31 = vector.broadcast %28 : vector<1x200xf32> to vector<8x200xf32>
      %32 = arith.addf %30, %31 : vector<8x200xf32>
      %cst_25 = arith.constant 0.000000e+00 : f32
      %33 = vector.broadcast %cst_25 : f32 to vector<8x200xf32>
      %34 = arith.maximumf %32, %33 : vector<8x200xf32>
      %c0_26 = arith.constant 0 : index
      %c0_27 = arith.constant 0 : index
      %35 = vector.load %arg14[%c0_26, %c0_27] : memref<200x100xbf16, #tpu.memory_space<vmem>>, vector<200x100xbf16>
      %c0_28 = arith.constant 0 : index
      %c0_29 = arith.constant 0 : index
      %36 = vector.load %arg15[%c0_28, %c0_29] : memref<1x100xf32, #tpu.memory_space<vmem>>, vector<1x100xf32>
      %37 = arith.truncf %34 : vector<8x200xf32> to vector<8x200xbf16>
      %cst_30 = arith.constant dense<0.000000e+00> : vector<8x100xf32>
      %38 = tpu.matmul %37, %35, %cst_30 {dimension_numbers = #tpu.dot_dimension_numbers<[1], [0], [0], [1], [0, 0, 1, 1], [], []>} : vector<8x200xbf16>, vector<200x100xbf16>, vector<8x100xf32> -> vector<8x100xf32>
      %39 = vector.broadcast %36 : vector<1x100xf32> to vector<8x100xf32>
      %40 = arith.addf %38, %39 : vector<8x100xf32>
      %cst_31 = arith.constant 0.000000e+00 : f32
      %41 = vector.broadcast %cst_31 : f32 to vector<8x100xf32>
      %42 = arith.maximumf %40, %41 : vector<8x100xf32>
      %c0_32 = arith.constant 0 : index
      %c0_33 = arith.constant 0 : index
      %43 = vector.load %arg16[%c0_32, %c0_33] : memref<100x50xf32, #tpu.memory_space<vmem>>, vector<100x50xf32>
      %c0_34 = arith.constant 0 : index
      %c0_35 = arith.constant 0 : index
      %44 = vector.load %arg17[%c0_34, %c0_35] : memref<1x50xf32, #tpu.memory_space<vmem>>, vector<1x50xf32>
      %cst_36 = arith.constant dense<0.000000e+00> : vector<8x50xf32>
      %45 = tpu.matmul %42, %43, %cst_36 {dimension_numbers = #tpu.dot_dimension_numbers<[1], [0], [0], [1], [0, 0, 1, 1], [], []>} : vector<8x100xf32>, vector<100x50xf32>, vector<8x50xf32> -> vector<8x50xf32>
      %46 = vector.broadcast %44 : vector<1x50xf32> to vector<8x50xf32>
      %47 = arith.addf %45, %46 : vector<8x50xf32>
      %cst_37 = arith.constant 0.000000e+00 : f32
      %48 = vector.broadcast %cst_37 : f32 to vector<8x50xf32>
      %49 = arith.maximumf %47, %48 : vector<8x50xf32>
      %c0_38 = arith.constant 0 : index
      %c0_39 = arith.constant 0 : index
      %50 = vector.load %arg18[%c0_38, %c0_39] : memref<50x2xf32, #tpu.memory_space<vmem>>, vector<50x2xf32>
      %c0_40 = arith.constant 0 : index
      %c0_41 = arith.constant 0 : index
      %51 = vector.load %arg19[%c0_40, %c0_41] : memref<1x2xf32, #tpu.memory_space<vmem>>, vector<1x2xf32>
      %cst_42 = arith.constant dense<0.000000e+00> : vector<8x2xf32>
      %52 = tpu.matmul %49, %50, %cst_42 {dimension_numbers = #tpu.dot_dimension_numbers<[1], [0], [0], [1], [0, 0, 1, 1], [], []>} : vector<8x50xf32>, vector<50x2xf32>, vector<8x2xf32> -> vector<8x2xf32>
      %53 = vector.broadcast %51 : vector<1x2xf32> to vector<8x2xf32>
      %54 = arith.addf %52, %53 : vector<8x2xf32>
      %cst_43 = arith.constant 0.000000e+00 : f32
      %55 = vector.broadcast %cst_43 : f32 to vector<8x2xf32>
      %56 = arith.maximumf %54, %55 : vector<8x2xf32>
      %cst_44 = arith.constant 0.000000e+00 : f32
      %57 = vector.broadcast %cst_44 : f32 to vector<8x2xf32>
      %58 = arith.subf %57, %56 : vector<8x2xf32>
      %59 = math.exp %58 : vector<8x2xf32>
      %cst_45 = arith.constant 1.000000e+00 : f32
      %60 = vector.broadcast %cst_45 : f32 to vector<8x2xf32>
      %61 = arith.addf %60, %59 : vector<8x2xf32>
      %cst_46 = arith.constant 1.000000e+00 : f32
      %62 = vector.broadcast %cst_46 : f32 to vector<8x2xf32>
      %63 = arith.divf %62, %61 : vector<8x2xf32>
      %c0_47 = arith.constant 0 : index
      %c0_48 = arith.constant 0 : index
      %64 = vector.load %arg20[%c0_47, %c0_48] : memref<8x2xf32, #tpu.memory_space<vmem>>, vector<8x2xf32>
      tpu.vector_store %arg20[%c0_47, %c0_48], %63 {strides = array<i32>} : memref<8x2xf32, #tpu.memory_space<vmem>>, vector<8x2xf32>,
    } else {
    }
    return
  }
  func.func @transform_0(%arg0: i32) -> (i32, i32) {
    %c0_i32 = arith.constant 0 : i32
    %c0_i32_0 = arith.constant 0 : i32
    %c0_i32_1 = arith.constant 0 : i32
    return %c0_i32, %c0_i32_0 : i32, i32
  }
  func.func @transform_1(%arg0: i32) -> (i32, i32) {
    %c0_i32 = arith.constant 0 : i32
    %c0_i32_0 = arith.constant 0 : i32
    %c0_i32_1 = arith.constant 0 : i32
    return %c0_i32, %c0_i32_0 : i32, i32
  }
  func.func @transform_2(%arg0: i32) -> (i32, i32) {
    %c0_i32 = arith.constant 0 : i32
    %c0_i32_0 = arith.constant 0 : i32
    %c0_i32_1 = arith.constant 0 : i32
    return %c0_i32, %c0_i32_0 : i32, i32
  }
  func.func @transform_3(%arg0: i32) -> (i32, i32) {
    %c0_i32 = arith.constant 0 : i32
    %c0_i32_0 = arith.constant 0 : i32
    %c0_i32_1 = arith.constant 0 : i32
    return %c0_i32, %c0_i32_0 : i32, i32
  }
  func.func @transform_4(%arg0: i32) -> (i32, i32) {
    %c0_i32 = arith.constant 0 : i32
    %c0_i32_0 = arith.constant 0 : i32
    %c0_i32_1 = arith.constant 0 : i32
    return %c0_i32, %c0_i32_0 : i32, i32
  }
  func.func @transform_5(%arg0: i32) -> (i32, i32) {
    %c0_i32 = arith.constant 0 : i32
    %c0_i32_0 = arith.constant 0 : i32
    %c0_i32_1 = arith.constant 0 : i32
    return %c0_i32, %c0_i32_0 : i32, i32
  }
  func.func @transform_6(%arg0: i32) -> (i32, i32) {
    %c0_i32 = arith.constant 0 : i32
    %c0_i32_0 = arith.constant 0 : i32
    %c0_i32_1 = arith.constant 0 : i32
    return %c0_i32, %c0_i32_0 : i32, i32
  }
  func.func @transform_7(%arg0: i32) -> (i32, i32, i32) {
    %c0_i32 = arith.constant 0 : i32
    %c0_i32_0 = arith.constant 0 : i32
    %c0_i32_1 = arith.constant 0 : i32
    return %arg0, %c0_i32, %c0_i32_0 : i32, i32, i32
  }
  func.func @transform_8(%arg0: i32) -> (i32, i32, i32) {
    %c0_i32 = arith.constant 0 : i32
    %c0_i32_0 = arith.constant 0 : i32
    %c0_i32_1 = arith.constant 0 : i32
    return %arg0, %c0_i32, %c0_i32_0 : i32, i32, i32
  }
  func.func @transform_9(%arg0: i32) -> (i32, i32) {
    %c0_i32 = arith.constant 0 : i32
    %c0_i32_0 = arith.constant 0 : i32
    %c0_i32_1 = arith.constant 0 : i32
    return %c0_i32, %c0_i32_0 : i32, i32
  }
  func.func @transform_10(%arg0: i32) -> (i32, i32) {
    %c0_i32 = arith.constant 0 : i32
    %c0_i32_0 = arith.constant 0 : i32
    %c0_i32_1 = arith.constant 0 : i32
    return %c0_i32, %c0_i32_0 : i32, i32
  }
  func.func @transform_11(%arg0: i32) -> (i32, i32) {
    %c0_i32 = arith.constant 0 : i32
    %c0_i32_0 = arith.constant 0 : i32
    %c0_i32_1 = arith.constant 0 : i32
    return %c0_i32, %c0_i32_0 : i32, i32
  }
  func.func @transform_12(%arg0: i32) -> (i32, i32) {
    %c0_i32 = arith.constant 0 : i32
    %c0_i32_0 = arith.constant 0 : i32
    %c0_i32_1 = arith.constant 0 : i32
    return %c0_i32, %c0_i32_0 : i32, i32
  }
  func.func @transform_13(%arg0: i32) -> (i32, i32) {
    %c0_i32 = arith.constant 0 : i32
    %c0_i32_0 = arith.constant 0 : i32
    %c0_i32_1 = arith.constant 0 : i32
    return %c0_i32, %c0_i32_0 : i32, i32
  }
  func.func @transform_14(%arg0: i32) -> (i32, i32) {
    %c0_i32 = arith.constant 0 : i32
    %c0_i32_0 = arith.constant 0 : i32
    %c0_i32_1 = arith.constant 0 : i32
    return %c0_i32, %c0_i32_0 : i32, i32
  }
  func.func @transform_15(%arg0: i32) -> (i32, i32) {
    %c0_i32 = arith.constant 0 : i32
    %c0_i32_0 = arith.constant 0 : i32
    %c0_i32_1 = arith.constant 0 : i32
    return %c0_i32, %c0_i32_0 : i32, i32
  }
  func.func @transform_16(%arg0: i32) -> (i32, i32) {
    %c0_i32 = arith.constant 0 : i32
    %c0_i32_0 = arith.constant 0 : i32
    %c0_i32_1 = arith.constant 0 : i32
    return %c0_i32, %c0_i32_0 : i32, i32
  }
  func.func @transform_17(%arg0: i32) -> (i32, i32) {
    %c0_i32 = arith.constant 0 : i32
    %c0_i32_0 = arith.constant 0 : i32
    %c0_i32_1 = arith.constant 0 : i32
    return %c0_i32, %c0_i32_0 : i32, i32
  }
  func.func @transform_18(%arg0: i32) -> (i32, i32) {
    %c0_i32 = arith.constant 0 : i32
    %c0_i32_0 = arith.constant 0 : i32
    %c0_i32_1 = arith.constant 0 : i32
    return %c0_i32, %c0_i32_0 : i32, i32
  }
  func.func @transform_19(%arg0: i32) -> (i32, i32) {
    %c0_i32 = arith.constant 0 : i32
    %c0_i32_0 = arith.constant 0 : i32
    %c0_i32_1 = arith.constant 0 : i32
    return %c0_i32, %c0_i32_0 : i32, i32
  }
}

</mosaic_0001>

<bundles_post_ra>
// kernel: simple_model_forward.1
= control target key start
LH: loop header
LB: loop body
LE: loop exit
PB: predicated region body
PF: predicated region fallthrough
CT: control target
= control target key end

     0   :  { %s14882_s0 = inlined_call_operand.vmem [shape: f32[8,2], index: 0, kind: input, shape index: {}]   ;;  %s14883_s1 = inlined_call_operand.hbm [shape: f32[2,200], index: 1, kind: input, shape index: {}]   ;;  %s14884_s2 = inlined_call_operand.hbm [shape: f32[1,200], index: 2, kind: input, shape index: {}]   ;;  %s14885_s3 = inlined_call_operand.hbm [shape: bf16[200,500], index: 3, kind: input, shape index: {}]   ;;  %s14886_s4 = inlined_call_operand.hbm [shape: f32[1,500], index: 4, kind: input, shape index: {}]   ;;  %s14887_s5 = inlined_call_operand.vmem [shape: bf16[500,1000], index: 5, kind: input, shape index: {}]   ;;  %s14888_s6 = inlined_call_operand.hbm [shape: f32[1,1000], index: 6, kind: input, shape index: {}]   ;;  %s14889_s7 = inlined_call_operand.hbm [shape: bf16[8,1000,1000], index: 7, kind: input, shape index: {}]   ;;  %s14890_s8 = inlined_call_operand.hbm [shape: f32[8,1,1000], index: 8, kind: input, shape index: {}]   ;;  %s14891_s9 = inlined_call_operand.hbm [shape: bf16[1000,500], index: 9, kind: input, shape index: {}]   ;;  %s14892_s10 = inlined_call_operand.hbm [shape: f32[1,500], index: 10, kind: input, shape index: {}]   ;;  %s14893_s11 = inlined_call_operand.vmem [shape: bf16[500,200], index: 11, kind: input, shape index: {}]   ;;  %s14894_s12 = inlined_call_operand.hbm [shape: f32[1,200], index: 12, kind: input, shape index: {}]   ;;  %s14895_s13 = inlined_call_operand.hbm [shape: bf16[200,100], index: 13, kind: input, shape index: {}]   ;;  %s14896_s14 = inlined_call_operand.hbm [shape: f32[1,100], index: 14, kind: input, shape index: {}]   ;;  %s14897_s15 = inlined_call_operand.vmem [shape: f32[100,50], index: 15, kind: input, shape index: {}]   ;;  %s14898_s16 = inlined_call_operand.hbm [shape: f32[1,50], index: 16, kind: input, shape index: {}]   ;;  %s14899_s17 = inlined_call_operand.vmem [shape: f32[50,2], index: 17, kind: input, shape index: {}]   ;;  %s14900_s18 = inlined_call_operand.hbm [shape: f32[1,2], index: 18, kind: input, shape index: {}]   ;;  %s14901_s19 = inlined_call_operand.vmem [shape: f32[8,2], index: 19, kind: output, shape index: {}]  }
   0x1   :  { %14924 = sst [smem:[#allocation34_spill]] %s14882_s0 }
   0x2   :  { %14925 = sst [smem:[#allocation35_spill]] %s14883_s1 }
   0x3   :  { %14926 = sst [smem:[#allocation36_spill]] %s14884_s2 }
   0x4   :  { %14927 = sst [smem:[#allocation37_spill]] %s14885_s3 }
   0x5   :  { %14928 = sst [smem:[#allocation38_spill]] %s14886_s4 }
   0x6   :  { %14929 = sst [smem:[#allocation39_spill]] %s14887_s5 }
   0x7   :  { %14930 = sst [smem:[#allocation40_spill]] %s14888_s6 }
   0x8   :  { %14931 = sst [smem:[#allocation41_spill]] %s14889_s7 }
   0x9   :  { %14932 = sst [smem:[#allocation42_spill]] %s14890_s8 }
   0xa   :  { %14933 = sst [smem:[#allocation43_spill]] %s14891_s9 }
   0xb   :  { %14934 = sst [smem:[#allocation44_spill]] %s14892_s10 }
   0xc   :  { %14935 = sst [smem:[#allocation45_spill]] %s14893_s11 }
   0xd   :  { %14936 = sst [smem:[#allocation46_spill]] %s14894_s12 }
   0xe   :  { %14937 = sst [smem:[#allocation47_spill]] %s14896_s14 }
   0xf   :  { %14938 = sst [smem:[#allocation48_spill]] %s14897_s15 }
  0x10   :  { %14939 = sst [smem:[#allocation49_spill]] %s14899_s17 }
  0x11   :  { %14940 = sst [smem:[#allocation50_spill]] %s14900_s18 }
  0x12   :  { %14941 = sst [smem:[#allocation51_spill]] %s14901_s19 }
  0x13   :  { %24 = vsyncpa [#allocation4], 0 }
  0x14   :  { %25 = vsyncpa [#allocation6], 0 }
  0x15   :  { %26 = vsyncpa [#allocation9], 0 }
  0x16   :  { %27 = vsyncpa [#allocation12], 0 }
  0x17   :  { %29 = vsyncpa [#allocation12 + $0x1], 0 }
  0x18   :  { %30 = vsyncpa [#allocation15], 0 }
  0x19   :  { %31 = vsyncpa [#allocation18], 0 }
  0x1a   :  { %32 = vsyncpa [#allocation21], 0 }
  0x1b   :  { %33 = vsyncpa [#allocation24], 0  ;;  %s12706_s0 = smov 0   ;;  %s12708_s30 = smov 0  }
  0x1c   :  { %s12710_s20 = smov 0   ;;  %s12712_s21 = smov 0  }
  0x1d LB: > { %s12581_s1 = smov [#allocation5]   ;;  %s12727_s2 = sadd.s32 4294967295, %s12579_s21   ;;  %s12579_s21 = sphi %s12712_s21, %s14996_s21   ;;  %s12575_s20 = sphi %s12710_s20, %s14995_s20   ;;  %s12571_s30 = sphi %s12708_s30, %s14994_s30   ;;  %s12567_s0 = sphi %s12706_s0, %s14993_s0  }
  0x1e   : > { %s501_s22 = sshll.u32 %s12581_s1, 4  ;;  %p9937_p0 = scmp.ge.s32.totalorder %s12579_s21, 1  ;;  %s502_s22 = int_to_ptr.vmem [resolvable:$true] %s501_s22 }
  0x1f   : > { %p14908_p1 = scmp.eq.s32.totalorder %s12727_s2, 0  ;;  %p474_p2 = scmp.lt.s32.totalorder %s12579_s21, 9 }
  0x20   : > { %s12582_s24 = smov [#allocation8]   ;;  %s12583_s26 = smov [#allocation14]  }
  0x21   : > { %p12733_p4 = pnand %p9937_p0, %p474_p2  ;;  %s525_s25 = sshll.u32 %s12582_s24, 4  ;;  %s12739_s25 = int_to_ptr.vmem [resolvable:$true] %s525_s25 }
  0x22   : > { %s549_s27 = sshll.u32 %s12583_s26, 4  ;;  %s14945_s1 = sld [smem:[#allocation36_spill]]  ;;  %s12747_s27 = int_to_ptr.vmem [resolvable:$true] %s549_s27 }
  0x23   : > { %s14942_s23 = scalar_select %p12733_p4, 1, 0 }
  0x24   : > { %p11417_p5 = pneg %p12733_p4 }
  0x25   : > { %14943 = sst [smem:[#allocation33_spill]] %s14942_s23 }
  0x26   : > { %p12743_p6 = pnand %p11417_p5, %p14908_p1 }
  0x28   : > { %s14944_s3 = scalar_select %p12743_p6, 1, 0 }
  0x29   : > { %s12121_s19 = scalar_lea.hbm %s14945_s1, 32  ;;  %p12757_p8 = pneg %p12743_p6 }
  0x2a   : > { %p12122_p7 = scmp.ne.s32.totalorder %s14945_s1, %s12121_s19  ;;  %p12128_p11 = scmp.lt.u32.totalorder %s12121_s19, %s14945_s1 }
  0x2c   : > { %p12124_p9 = pnand %p12757_p8, %p12122_p7 }
  0x2e   : > { %p12125_p10 = pneg %p12124_p9 }
  0x30   : > { %p12130_p12 = pnand %p12128_p11, %p12125_p10 }
  0x32   : > { %12133 = shalt.err (!%p12130_p12)
}
  0x33   : > { %s12134_s28 = scalar_lea.vmem %s502_s22, 32  ;;  %p12142_p5 = scmp.lt.s32.totalorder %s502_s22, %s502_s22 }
  0x34   : > { %p12135_p13 = scmp.ne.s32.totalorder %s502_s22, %s12134_s28  ;;  %p12143_p3 = scmp.lt.s32.totalorder %s12134_s28, %s12134_s28 }
  0x36   : > { %p12137_p0 = pnand %p12135_p13, %p12757_p8  ;;  %p12144_p1 = por %p12143_p3, %p12142_p5 }
  0x38   : > { %p12138_p2 = pneg %p12137_p0 }
  0x3a   : > { %p12145_p4 = pnand %p12144_p1, %p12138_p2 }
  0x3c   : > { %12148 = shalt.err (!%p12145_p4)
}
  0x3d   : > { %11423 = dma.hbm_to_vmem [thread:$0]  (!%p12743_p6), %s14945_s1, 32, %s502_s22, [#allocation6]  }
  0x3e   : > { %s14947_s4 = sld [smem:[#allocation38_spill]] }
  0x44   : > { %s12149_s29 = scalar_lea.hbm %s14947_s4, 64 }
  0x45   : > { %p12150_p7 = scmp.ne.s32.totalorder %s14947_s4, %s12149_s29  ;;  %p12156_p1 = scmp.lt.u32.totalorder %s12149_s29, %s14947_s4 }
  0x47   : > { %p12152_p9 = pnand %p12150_p7, %p12757_p8 }
  0x49   : > { %p12153_p3 = pneg %p12152_p9 }
  0x4b   : > { %p12158_p4 = pnand %p12156_p1, %p12153_p3 }
  0x4d   : > { %12161 = shalt.err (!%p12158_p4)
}
  0x4e   : > { %s12162_s22 = scalar_lea.vmem %s12739_s25, 64  ;;  %p12170_p13 = scmp.lt.s32.totalorder %s12739_s25, %s12739_s25 }
  0x4f   : > { %p12163_p10 = scmp.ne.s32.totalorder %s12739_s25, %s12162_s22  ;;  %p12171_p0 = scmp.lt.s32.totalorder %s12162_s22, %s12162_s22 }
  0x51   : > { %p12165_p11 = pnand %p12163_p10, %p12757_p8  ;;  %p12172_p2 = por %p12171_p0, %p12170_p13 }
  0x53   : > { %p12166_p12 = pneg %p12165_p11 }
  0x55   : > { %p12173_p5 = pnand %p12172_p2, %p12166_p12 }
  0x57   : > { %12176 = shalt.err (!%p12173_p5)
}
  0x58   : > { %11429 = dma.hbm_to_vmem [thread:$0]  (!%p12743_p6), %s14947_s4, 64, %s12739_s25, [#allocation9]  }
  0x59   : > { %s14948_s9 = sld [smem:[#allocation43_spill]] }
  0x5f   : > { %s12177_s11 = scalar_lea.hbm %s14948_s9, 32000 }
  0x60   : > { %p12178_p7 = scmp.ne.s32.totalorder %s14948_s9, %s12177_s11  ;;  %p12184_p1 = scmp.lt.u32.totalorder %s12177_s11, %s14948_s9 }
  0x62   : > { %p12180_p9 = pnand %p12178_p7, %p12757_p8 }
  0x64   : > { %p12181_p3 = pneg %p12180_p9 }
  0x66   : > { %p12186_p4 = pnand %p12184_p1, %p12181_p3 }
  0x68   : > { %12189 = shalt.err (!%p12186_p4)
}
  0x69   : > { %s12190_s25 = scalar_lea.vmem %s12747_s27, 32000  ;;  %p12198_p13 = scmp.lt.s32.totalorder %s12747_s27, %s12747_s27 }
  0x6a   : > { %p12191_p10 = scmp.ne.s32.totalorder %s12747_s27, %s12190_s25  ;;  %p12199_p0 = scmp.lt.s32.totalorder %s12190_s25, %s12190_s25 }
  0x6c   : > { %p12193_p11 = pnand %p12191_p10, %p12757_p8  ;;  %p12200_p2 = por %p12199_p0, %p12198_p13 }
  0x6e   : > { %p12194_p12 = pneg %p12193_p11 }
  0x70   : > { %p12201_p5 = pnand %p12200_p2, %p12194_p12 }
  0x72   : > { %12204 = shalt.err (!%p12201_p5)
}
  0x73   : > { %s14916_s22 = smov 256   ;;  %s14920_s5 = smov 16  }
  0x74   : > { %11435 = dma.hbm_to_vmem [thread:$0]  (!%p12743_p6), %s14948_s9, 32000, %s12747_s27, [#allocation15], %s14916_s22, %s14916_s22, %s14920_s5  }
  0x75   : > { %s12586_s17 = smov [#allocation17]   ;;  %s12587_s19 = smov [#allocation20]  }
  0x76   : > { %s577_s11 = sshll.u32 %s12586_s17, 4  ;;  %s601_s29 = sshll.u32 %s12587_s19, 4  ;;  %s578_s11 = int_to_ptr.vmem [resolvable:$true] %s577_s11  ;;  %s602_s29 = int_to_ptr.vmem [resolvable:$true] %s601_s29 }
  0x77   : > { %s14949_s12 = sld [smem:[#allocation46_spill]] }
  0x7d   : > { %s12205_s25 = scalar_lea.hbm %s14949_s12, 32 }
  0x7e   : > { %p12206_p7 = scmp.ne.s32.totalorder %s14949_s12, %s12205_s25  ;;  %p12212_p1 = scmp.lt.u32.totalorder %s12205_s25, %s14949_s12 }
  0x80   : > { %p12208_p9 = pnand %p12206_p7, %p12757_p8 }
  0x82   : > { %p12209_p3 = pneg %p12208_p9 }
  0x84   : > { %p12214_p4 = pnand %p12212_p1, %p12209_p3 }
  0x86   : > { %12217 = shalt.err (!%p12214_p4)
}
  0x87   : > { %s12218_s27 = scalar_lea.vmem %s578_s11, 32  ;;  %p12226_p13 = scmp.lt.s32.totalorder %s578_s11, %s578_s11 }
  0x88   : > { %p12219_p10 = scmp.ne.s32.totalorder %s578_s11, %s12218_s27  ;;  %p12227_p0 = scmp.lt.s32.totalorder %s12218_s27, %s12218_s27 }
  0x8a   : > { %p12221_p11 = pnand %p12219_p10, %p12757_p8  ;;  %p12228_p2 = por %p12227_p0, %p12226_p13 }
  0x8c   : > { %p12222_p12 = pneg %p12221_p11 }
  0x8e   : > { %p12229_p5 = pnand %p12228_p2, %p12222_p12 }
  0x90   : > { %12232 = shalt.err (!%p12229_p5)
}
  0x91   : > { %11441 = dma.hbm_to_vmem [thread:$0]  (!%p12743_p6), %s14949_s12, 32, %s578_s11, [#allocation18]  }
  0x92   : > { %s14950_s14 = sld [smem:[#allocation47_spill]] }
  0x98   : > { %s12233_s23 = scalar_lea.hbm %s14950_s14, 16 }
  0x99   : > { %p12234_p7 = scmp.ne.s32.totalorder %s14950_s14, %s12233_s23  ;;  %p12240_p1 = scmp.lt.u32.totalorder %s12233_s23, %s14950_s14 }
  0x9b   : > { %p12236_p9 = pnand %p12234_p7, %p12757_p8 }
  0x9d   : > { %p12237_p3 = pneg %p12236_p9 }
  0x9f   : > { %p12242_p4 = pnand %p12240_p1, %p12237_p3 }
  0xa1   : > { %12245 = shalt.err (!%p12242_p4)
}
  0xa2   : > { %s12246_s28 = scalar_lea.vmem %s602_s29, 16  ;;  %s12253_s11 = scalar_lea.vmem %s602_s29, 32 }
  0xa3   : > { %p12247_p10 = scmp.ne.s32.totalorder %s602_s29, %s12246_s28  ;;  %p12254_p13 = scmp.lt.s32.totalorder %s602_s29, %s602_s29 }
  0xa4   : > { %p12255_p0 = scmp.lt.s32.totalorder %s12253_s11, %s12246_s28 }
  0xa5   : > { %p12249_p11 = pnand %p12247_p10, %p12757_p8 }
  0xa6   : > { %p12256_p2 = por %p12255_p0, %p12254_p13 }
  0xa7   : > { %p12250_p12 = pneg %p12249_p11 }
  0xa9   : > { %p12257_p5 = pnand %p12256_p2, %p12250_p12 }
  0xab   : > { %12260 = shalt.err (!%p12257_p5)
}
  0xac   : > { %11447 = dma.hbm_to_vmem [thread:$0]  (!%p12743_p6), %s14950_s14, 16, %s602_s29, [#allocation21]  }
  0xad   : > { %s12859_s4 = sadd.s32 1, %s12579_s21   ;;  %s193_s8 = sadd.s32 1, %s12575_s20 }
  0xae   : > { %s190_s1 = ssub.s32 %s12579_s21, %s12859_s4  ;;  %p200_p9 = scmp.ne.s32.totalorder %s12575_s20, %s12571_s30 }
  0xaf   : > { %p191_p7 = scmp.eq.s32.totalorder %s190_s1, 0  ;;  %p201_p3 = scmp.eq.s32.totalorder %s12579_s21, 0 }
  0xb0   : > { %p206_p1 = scmp.ne.s32.totalorder %s12571_s30, %s12567_s0  ;;  %p14951_p10 = scmp.eq.s32.totalorder %s12727_s2, 0 }
  0xb1   : > { %s12870_s18 = scalar_select %p191_p7, %s12575_s20, %s193_s8  }
  0xb2   : > { %p202_p4 = por %p201_p3, %p200_p9  ;;  %p12874_p11 = por %p14951_p10, %p206_p1 }
  0xb3   : > { %p11473_p12 = scmp.lt.s32.totalorder %s12579_s21, 8  ;;  %s640_s29 = sand.u32 1, %s12579_s21  }
  0xb4   : > { %s14952_s23 = scalar_select %p12874_p11, 1, 0 }
  0xb5   : > { %s14915_s15 = sand.u32 1, %s12575_s20   ;;  %p12883_p13 = pnand %p11473_p12, %p202_p4 }
  0xb6   : > { %s11362_s17 = smul.u32 4000, %s14915_s15  ;;  %s14954_s7 = sld [smem:[#allocation41_spill]] }
  0xb7   : > { %s14953_s19 = scalar_select %p12883_p13, 1, 0 }
  0xb8   : > { %s11363_s0 = smul.u32 64000, %s12579_s21  ;;  %s644_s25 = scalar_lea.vmem [#allocation11], %s11362_s17 }
  0xb9   : > { %s651_s27 = sshll.u32 %s644_s25, 4  ;;  %s12895_s1 = scalar_lea.sflag [#allocation12], %s640_s29  ;;  %s12893_s27 = int_to_ptr.vmem [resolvable:$true] %s651_s27 }
  0xba   : > { %p14921_p2 = pneg %p12883_p13 }
  0xbc   : > { %s12891_s11 = scalar_lea.hbm %s14954_s7, %s11363_s0  ;;  %s12266_s28 = scalar_lea.hbm %s14954_s7, 512000 }
  0xbd   : > { %s12261_s8 = scalar_lea.hbm %s12891_s11, 64000  ;;  %p12267_p9 = scmp.lt.u32.totalorder %s12891_s11, %s14954_s7 }
  0xbe   : > { %p12262_p0 = scmp.ne.s32.totalorder %s12891_s11, %s12261_s8  ;;  %p12268_p3 = scmp.lt.u32.totalorder %s12266_s28, %s12261_s8 }
  0xbf   : > { %p12270_p4 = scmp.lt.u32.totalorder %s12261_s8, %s12891_s11 }
  0xc0   : > { %p12264_p5 = pnand %p14921_p2, %p12262_p0  ;;  %p12269_p1 = por %p12268_p3, %p12267_p9 }
  0xc2   : > { %p12265_p7 = pneg %p12264_p5  ;;  %p12271_p10 = por %p12270_p4, %p12269_p1 }
  0xc4   : > { %p12272_p12 = pnand %p12271_p10, %p12265_p7 }
  0xc6   : > { %12275 = shalt.err (!%p12272_p12)
}
  0xc7   : > { %s12276_s29 = scalar_lea.vmem %s12893_s27, 64000  ;;  %s12588_s17 = smov [#allocation11]  }
  0xc8   : > { %p12277_p0 = scmp.ne.s32.totalorder %s12893_s27, %s12276_s29  ;;  %s12281_s25 = sshll.u32 %s12588_s17, 4  ;;  %s12282_s25 = int_to_ptr.vmem [resolvable:$false] %s12281_s25 }
  0xc9   : > { %s12283_s22 = scalar_lea.vmem %s12282_s25, 128000  ;;  %p12284_p6 = scmp.lt.s32.totalorder %s12893_s27, %s12282_s25 }
  0xca   : > { %p12279_p5 = pnand %p12277_p0, %p14921_p2  ;;  %p12285_p9 = scmp.lt.s32.totalorder %s12283_s22, %s12276_s29 }
  0xcc   : > { %p12280_p11 = pneg %p12279_p5  ;;  %p12286_p3 = por %p12285_p9, %p12284_p6 }
  0xce   : > { %p12287_p1 = pnand %p12286_p3, %p12280_p11 }
  0xd0   : > { %12290 = shalt.err (!%p12287_p1)
}
  0xd1   : > { %s12589_s15 = smov 512   ;;  %s12590_s8 = smov 32  }
  0xd2   : > { %11457 = dma.hbm_to_vmem [thread:$0]  (!%p12883_p13), %s12891_s11, 64000, %s12893_s27, %s12895_s1, %s12589_s15, %s12589_s15, %s12590_s8  }
  0xd3   : > { %s12591_s0 = smov [#allocation3]   ;;  %s12592_s28 = smov [#allocation7]  }
  0xd4   : > { %s490_s26 = sshll.u32 %s12591_s0, 4  ;;  %s511_s17 = sshll.u32 %s12592_s28, 4  ;;  %s491_s26 = int_to_ptr.vmem [resolvable:$true] %s490_s26  ;;  %s12923_s17 = int_to_ptr.vmem [resolvable:$true] %s511_s17 }
  0xd5   : > { %s14955_s22 = sld [smem:[#allocation35_spill]] }
  0xdb   : > { %s12291_s5 = scalar_lea.hbm %s14955_s22, 64 }
  0xdc   : > { %p12292_p6 = scmp.ne.s32.totalorder %s14955_s22, %s12291_s5  ;;  %p12298_p4 = scmp.lt.u32.totalorder %s12291_s5, %s14955_s22 }
  0xde   : > { %p12294_p11 = pnand %p12292_p6, %p12757_p8 }
  0xe0   : > { %p12295_p7 = pneg %p12294_p11 }
  0xe2   : > { %p12300_p10 = pnand %p12298_p4, %p12295_p7 }
  0xe4   : > { %12303 = shalt.err (!%p12300_p10)
}
  0xe5   : > { %s12304_s27 = scalar_lea.vmem %s491_s26, 64  ;;  %p12312_p9 = scmp.lt.s32.totalorder %s491_s26, %s491_s26 }
  0xe6   : > { %p12305_p12 = scmp.ne.s32.totalorder %s491_s26, %s12304_s27  ;;  %p12313_p3 = scmp.lt.s32.totalorder %s12304_s27, %s12304_s27 }
  0xe8   : > { %p12307_p0 = pnand %p12305_p12, %p12757_p8  ;;  %p12314_p1 = por %p12313_p3, %p12312_p9 }
  0xea   : > { %p12308_p5 = pneg %p12307_p0 }
  0xec   : > { %p12315_p2 = pnand %p12314_p1, %p12308_p5 }
  0xee   : > { %12318 = shalt.err (!%p12315_p2)
}
  0xef   : > { %p14956_p6 = scmp.ne.s32.totalorder %s14944_s3, 0  ;;  %s14957_s15 = sld [smem:[#allocation37_spill]] }
  0xf1   : > { %11420 = dma.hbm_to_vmem [thread:$0]  (!%p14956_p6), %s14955_s22, 64, %s491_s26, [#allocation4]  }
  0xf5   : > { %s12319_s8 = scalar_lea.hbm %s14957_s15, 6400 }
  0xf6   : > { %p12320_p11 = scmp.ne.s32.totalorder %s14957_s15, %s12319_s8  ;;  %p12326_p2 = scmp.lt.u32.totalorder %s12319_s8, %s14957_s15 }
  0xf8   : > { %p12322_p7 = pnand %p12320_p11, %p12757_p8 }
  0xfa   : > { %p12323_p4 = pneg %p12322_p7 }
  0xfc   : > { %p12328_p10 = pnand %p12326_p2, %p12323_p4 }
  0xfe   : > { %12331 = shalt.err (!%p12328_p10)
}
  0xff   : > { %s12332_s26 = scalar_lea.vmem %s12923_s17, 6400  ;;  %p12340_p9 = scmp.lt.s32.totalorder %s12923_s17, %s12923_s17 }
 0x100   : > { %p12333_p12 = scmp.ne.s32.totalorder %s12923_s17, %s12332_s26  ;;  %p12341_p3 = scmp.lt.s32.totalorder %s12332_s26, %s12332_s26 }
 0x102   : > { %p12335_p0 = pnand %p12333_p12, %p12757_p8  ;;  %p12342_p1 = por %p12341_p3, %p12340_p9 }
 0x104   : > { %p12336_p5 = pneg %p12335_p0 }
 0x106   : > { %p12343_p11 = pnand %p12342_p1, %p12336_p5 }
 0x108   : > { %12346 = shalt.err (!%p12343_p11)
}
 0x109   : > { %s14958_s11 = smov 16   ;;  %s14959_s27 = smov 256  }
 0x10a   : > { %11426 = dma.hbm_to_vmem [thread:$0]  (!%p14956_p6), %s14957_s15, 6400, %s12923_s17, [#allocation6], %s14959_s27, %s14959_s27, %s14958_s11  }
 0x10b   : > { %s12593_s12 = smov [#allocation10]   ;;  %s12594_s8 = smov [#allocation16]  }
 0x10c   : > { %s539_s5 = sshll.u32 %s12593_s12, 4  ;;  %s563_s0 = sshll.u32 %s12594_s8, 4  ;;  %s540_s5 = int_to_ptr.vmem [resolvable:$true] %s539_s5  ;;  %s12969_s0 = int_to_ptr.vmem [resolvable:$true] %s563_s0 }
 0x10d   : > { %s14960_s6 = sld [smem:[#allocation40_spill]] }
 0x113   : > { %s12347_s25 = scalar_lea.hbm %s14960_s6, 128 }
 0x114   : > { %p12348_p7 = scmp.ne.s32.totalorder %s14960_s6, %s12347_s25  ;;  %p12354_p10 = scmp.lt.u32.totalorder %s12347_s25, %s14960_s6 }
 0x116   : > { %p12350_p4 = pnand %p12348_p7, %p12757_p8 }
 0x118   : > { %p12351_p2 = pneg %p12350_p4 }
 0x11a   : > { %p12356_p12 = pnand %p12354_p10, %p12351_p2 }
 0x11c   : > { %12359 = shalt.err (!%p12356_p12)
}
 0x11d   : > { %s12360_s11 = scalar_lea.vmem %s540_s5, 128  ;;  %p12368_p3 = scmp.lt.s32.totalorder %s540_s5, %s540_s5 }
 0x11e   : > { %p12361_p0 = scmp.ne.s32.totalorder %s540_s5, %s12360_s11  ;;  %p12369_p1 = scmp.lt.s32.totalorder %s12360_s11, %s12360_s11 }
 0x120   : > { %p12363_p5 = pnand %p12361_p0, %p12757_p8  ;;  %p12370_p11 = por %p12369_p1, %p12368_p3 }
 0x122   : > { %p12364_p9 = pneg %p12363_p5 }
 0x124   : > { %p12371_p13 = pnand %p12370_p11, %p12364_p9 }
 0x126   : > { %12374 = shalt.err (!%p12371_p13)
}
 0x127   : > { %11432 = dma.hbm_to_vmem [thread:$0]  (!%p14956_p6), %s14960_s6, 128, %s540_s5, [#allocation9]  }
 0x128   : > { %s14961_s10 = sld [smem:[#allocation44_spill]] }
 0x12e   : > { %s12375_s8 = scalar_lea.hbm %s14961_s10, 64 }
 0x12f   : > { %p12376_p7 = scmp.ne.s32.totalorder %s14961_s10, %s12375_s8  ;;  %p12382_p13 = scmp.lt.u32.totalorder %s12375_s8, %s14961_s10 }
 0x131   : > { %p12378_p4 = pnand %p12376_p7, %p12757_p8 }
 0x133   : > { %p12379_p2 = pneg %p12378_p4 }
 0x135   : > { %p12384_p10 = pnand %p12382_p13, %p12379_p2 }
 0x137   : > { %12387 = shalt.err (!%p12384_p10)
}
 0x138   : > { %s12388_s5 = scalar_lea.vmem %s12969_s0, 64  ;;  %p12396_p9 = scmp.lt.s32.totalorder %s12969_s0, %s12969_s0 }
 0x139   : > { %p12389_p12 = scmp.ne.s32.totalorder %s12969_s0, %s12388_s5  ;;  %p12397_p3 = scmp.lt.s32.totalorder %s12388_s5, %s12388_s5 }
 0x13b   : > { %p12391_p0 = pnand %p12389_p12, %p12757_p8  ;;  %p12398_p1 = por %p12397_p3, %p12396_p9 }
 0x13d   : > { %p12392_p5 = pneg %p12391_p0 }
 0x13f   : > { %p12399_p11 = pnand %p12398_p1, %p12392_p5 }
 0x141   : > { %12402 = shalt.err (!%p12399_p11)
}
 0x142   : > { %11438 = dma.hbm_to_vmem [thread:$0]  (!%p14956_p6), %s14961_s10, 64, %s12969_s0, [#allocation15]  }
 0x143   : > { %s12595_s11 = smov [#allocation19]   ;;  %s12403_s12 = scalar_lea.hbm %s14895_s13, 1600 }
 0x144   : > { %s587_s14 = sshll.u32 %s12595_s11, 4  ;;  %p12404_p7 = scmp.ne.s32.totalorder %s14895_s13, %s12403_s12  ;;  %s588_s14 = int_to_ptr.vmem [resolvable:$true] %s587_s14 }
 0x145   : > { %p12410_p13 = scmp.lt.u32.totalorder %s12403_s12, %s14895_s13 }
 0x146   : > { %p12406_p4 = pnand %p12404_p7, %p12757_p8 }
 0x148   : > { %p12407_p2 = pneg %p12406_p4 }
 0x14a   : > { %p12412_p10 = pnand %p12410_p13, %p12407_p2 }
 0x14c   : > { %12415 = shalt.err (!%p12412_p10)
}
 0x14d   : > { %s12416_s0 = scalar_lea.vmem %s588_s14, 1600  ;;  %p12424_p9 = scmp.lt.s32.totalorder %s588_s14, %s588_s14 }
 0x14e   : > { %p12417_p12 = scmp.ne.s32.totalorder %s588_s14, %s12416_s0  ;;  %p12425_p3 = scmp.lt.s32.totalorder %s12416_s0, %s12416_s0 }
 0x150   : > { %p12419_p0 = pnand %p12417_p12, %p12757_p8  ;;  %p12426_p1 = por %p12425_p3, %p12424_p9 }
 0x152   : > { %p12420_p5 = pneg %p12419_p0 }
 0x154   : > { %p12427_p11 = pnand %p12426_p1, %p12420_p5 }
 0x156   : > { %12430 = shalt.err (!%p12427_p11)
}
 0x157   : > { %s12596_s26 = smov 64   ;;  %s12597_s5 = smov 4  }
 0x158   : > { %11444 = dma.hbm_to_vmem [thread:$0]  (!%p14956_p6), %s14895_s13, 1600, %s588_s14, [#allocation18], %s12596_s26, %s12596_s26, %s12597_s5  }
 0x159   : > { %s12598_s11 = smov [#allocation22]   ;;  %s12599_s9 = smov [#allocation23]  }
 0x15a   : > { %s615_s27 = sshll.u32 %s12598_s11, 4  ;;  %s629_s12 = sshll.u32 %s12599_s9, 4  ;;  %s616_s27 = int_to_ptr.vmem [resolvable:$true] %s615_s27  ;;  %s630_s12 = int_to_ptr.vmem [resolvable:$true] %s629_s12 }
 0x15b   : > { %s12431_s29 = scalar_lea.hbm %s14898_s16, 16 }
 0x15c   : > { %p12432_p7 = scmp.ne.s32.totalorder %s14898_s16, %s12431_s29  ;;  %p12438_p13 = scmp.lt.u32.totalorder %s12431_s29, %s14898_s16 }
 0x15e   : > { %p12434_p4 = pnand %p12432_p7, %p12757_p8 }
 0x160   : > { %p12435_p2 = pneg %p12434_p4 }
 0x162   : > { %p12440_p10 = pnand %p12438_p13, %p12435_p2 }
 0x164   : > { %12443 = shalt.err (!%p12440_p10)
}
 0x165   : > { %s12444_s14 = scalar_lea.vmem %s616_s27, 16  ;;  %s12451_s26 = scalar_lea.vmem %s616_s27, 32 }
 0x166   : > { %p12445_p12 = scmp.ne.s32.totalorder %s616_s27, %s12444_s14  ;;  %p12452_p9 = scmp.lt.s32.totalorder %s616_s27, %s616_s27 }
 0x167   : > { %p12453_p3 = scmp.lt.s32.totalorder %s12451_s26, %s12444_s14 }
 0x168   : > { %p12447_p0 = pnand %p12445_p12, %p12757_p8 }
 0x169   : > { %p12454_p1 = por %p12453_p3, %p12452_p9 }
 0x16a   : > { %p12448_p5 = pneg %p12447_p0 }
 0x16c   : > { %p12455_p11 = pnand %p12454_p1, %p12448_p5 }
 0x16e   : > { %12458 = shalt.err (!%p12455_p11)
}
 0x16f   : > { %11450 = dma.hbm_to_vmem [thread:$0]  (!%p14956_p6), %s14898_s16, 16, %s616_s27, [#allocation21]  }
 0x170   : > { %s14962_s6 = sand.u32 1, %s12575_s20   ;;  %s14963_s9 = sld [smem:[#allocation50_spill]] }
 0x171   : > { %s9952_s10 = sshll.u32 %s14962_s6, 3 }
 0x176   : > { %s12459_s8 = scalar_lea.hbm %s14963_s9, 16 }
 0x177   : > { %p12460_p7 = scmp.ne.s32.totalorder %s14963_s9, %s12459_s8  ;;  %p12466_p13 = scmp.lt.u32.totalorder %s12459_s8, %s14963_s9 }
 0x179   : > { %p12462_p4 = pnand %p12460_p7, %p12757_p8 }
 0x17b   : > { %p12463_p2 = pneg %p12462_p4 }
 0x17d   : > { %p12468_p10 = pnand %p12466_p13, %p12463_p2 }
 0x17f   : > { %12471 = shalt.err (!%p12468_p10)
}
 0x180   : > { %s12472_s27 = scalar_lea.vmem %s630_s12, 16  ;;  %s12479_s14 = scalar_lea.vmem %s630_s12, 32 }
 0x181   : > { %p12473_p12 = scmp.ne.s32.totalorder %s630_s12, %s12472_s27  ;;  %p12480_p9 = scmp.lt.s32.totalorder %s630_s12, %s630_s12 }
 0x182   : > { %p12481_p3 = scmp.lt.s32.totalorder %s12479_s14, %s12472_s27 }
 0x183   : > { %p12475_p0 = pnand %p12473_p12, %p12757_p8 }
 0x184   : > { %p12482_p1 = por %p12481_p3, %p12480_p9 }
 0x185   : > { %p12476_p5 = pneg %p12475_p0 }
 0x187   : > { %p12483_p11 = pnand %p12482_p1, %p12476_p5 }
 0x189   : > { %12486 = shalt.err (!%p12483_p11)
}
 0x18a   : > { %11453 = dma.hbm_to_vmem [thread:$0]  (!%p14956_p6), %s14963_s9, 16, %s630_s12, [#allocation24]  }
 0x18b   : > { %s11152_s7 = sshll.u32 %s12579_s21, 7  ;;  %s14964_s24 = sld [smem:[#allocation42_spill]] }
 0x18c   : > { %s665_s8 = scalar_lea.vmem [#allocation13], %s9952_s10  ;;  %p14965_p7 = scmp.ne.s32.totalorder %s14953_s19, 0 }
 0x18d   : > { %s673_s28 = sshll.u32 %s665_s8, 4  ;;  %s674_s28 = int_to_ptr.vmem [resolvable:$true] %s673_s28 }
 0x18e   : > { %p14966_p4 = pneg %p14965_p7 }
 0x191   : > { %s13072_s11 = scalar_lea.hbm %s14964_s24, %s11152_s7  ;;  %s12492_s29 = scalar_lea.hbm %s14964_s24, 1024 }
 0x192   : > { %s12487_s3 = scalar_lea.hbm %s13072_s11, 128  ;;  %p12493_p6 = scmp.lt.u32.totalorder %s13072_s11, %s14964_s24 }
 0x193   : > { %p12488_p8 = scmp.ne.s32.totalorder %s13072_s11, %s12487_s3  ;;  %p12494_p10 = scmp.lt.u32.totalorder %s12492_s29, %s12487_s3 }
 0x194   : > { %p12496_p0 = scmp.lt.u32.totalorder %s12487_s3, %s13072_s11 }
 0x195   : > { %p12490_p2 = pnand %p12488_p8, %p14966_p4  ;;  %p12495_p12 = por %p12494_p10, %p12493_p6 }
 0x197   : > { %p12491_p13 = pneg %p12490_p2  ;;  %p12497_p5 = por %p12496_p0, %p12495_p12 }
 0x199   : > { %p12498_p9 = pnand %p12497_p5, %p12491_p13 }
 0x19b   : > { %12501 = shalt.err (!%p12498_p9)
}
 0x19c   : > { %s12502_s10 = scalar_lea.vmem %s674_s28, 128  ;;  %p14967_p1 = pmov %p14966_p4 }
 0x19d   : > { %p12503_p3 = scmp.ne.s32.totalorder %s674_s28, %s12502_s10  ;;  %s12600_s27 = smov [#allocation13]  }
 0x19e   : > { %s12507_s14 = sshll.u32 %s12600_s27, 4  ;;  %s12508_s14 = int_to_ptr.vmem [resolvable:$false] %s12507_s14 }
 0x19f   : > { %p12505_p11 = pnand %p12503_p3, %p14967_p1  ;;  %s12509_s26 = scalar_lea.vmem %s12508_s14, 256 }
 0x1a0   : > { %p12510_p4 = scmp.lt.s32.totalorder %s674_s28, %s12508_s14  ;;  %p12511_p2 = scmp.lt.s32.totalorder %s12509_s26, %s12502_s10 }
 0x1a1   : > { %p12506_p8 = pneg %p12505_p11 }
 0x1a2   : > { %p12512_p6 = por %p12511_p2, %p12510_p4 }
 0x1a4   : > { %p12513_p10 = pnand %p12512_p6, %p12506_p8 }
 0x1a6   : > { %12516 = shalt.err (!%p12513_p10)
}
 0x1a7   : > { %11460 = dma.hbm_to_vmem [thread:$0]  (!%p14965_p7), %s13072_s11, 128, %s674_s28, %s12895_s1  }
 0x1a8   : > { %s14968_s5 = sld [smem:[#allocation33_spill]] }
 0x1ae   : > { %p14969_p13 = scmp.ne.s32.totalorder %s14968_s5, 0 }
 0x1af   : > { %p14970_p12 = scmp.eq.s32.totalorder (!%p14969_p13), %s12727_s2, 0 }
 0x1b0   : > { %682 = sbr.rel (%p14969_p13) target bundleno = 3438 (0xd6e), region = 96 }
 0x1b7   : > { %12534 = dma.done.wait (%p14970_p12), [#allocation4], 64   ;;  %p14971_p0 = pmov %p14970_p12 }
 0x1b9   : > { %12536 = vsyncadd (%p14971_p0), [#allocation4], 4294967232  ;;  %p14972_p5 = pmov %p14971_p0 }
 0x1ba   : > { %p14973_p9 = pmov %p14971_p0 }
 0x1bb   : > { %12538 = dma.done.wait (%p14972_p5), [#allocation6], 6432  }
 0x1bc   : > { %12540 = vsyncadd (%p14973_p9), [#allocation6], 4294960864  ;;  %p14974_p3 = pmov %p14971_p0 }
 0x1bd   : > { %p14975_p7 = pmov %p14971_p0 }
 0x1be   : > { %12542 = dma.done.wait (%p14974_p3), [#allocation9], 192  }
 0x1bf   : > { %12544 = vsyncadd (%p14975_p7), [#allocation9], 4294967104  ;;  %s704_s19 = sand.u32 1, %s12727_s2   ;;  %s706_s1 = sand.u32 1, %s12571_s30  }
 0x1c0   : > { %s11364_s7 = smul.u32 4000, %s706_s1  ;;  %s705_s6 = scalar_lea.sflag [#allocation12], %s704_s19 }
 0x1c1   : > { %p14976_p1 = scmp.ne.s32.totalorder %s14952_s23, 0 }
 0x1c2   : > { %s13110_s17 = scalar_lea.vmem [#allocation11], %s11364_s7 }
 0x1c3   : > { %12546 = dma.done.wait (%p14976_p1), %s705_s6, 64128  }
 0x1c4   : > { %12548 = vsyncadd (%p14976_p1), %s705_s6, 4294903168  ;;  %s13116_s11 = sshll.u32 %s706_s1, 3  ;;  %p14977_p11 = pmov %p14971_p0 }
 0x1c5   : > { %s717_s8 = scalar_lea.vmem [#allocation13], %s13116_s11 }
 0x1c6   : > { %12550 = dma.done.wait (%p14977_p11), [#allocation15], 32064   ;;  %p14978_p8 = pmov %p14971_p0 }
 0x1c7   : > { %p14979_p4 = pmov %p14971_p0 }
 0x1c8   : > { %12552 = vsyncadd (%p14978_p8), [#allocation15], 4294935232 }
 0x1c9   : > { %12554 = dma.done.wait (%p14979_p4), [#allocation18], 1632   ;;  %p14980_p2 = pmov %p14971_p0 }
 0x1ca   : > { %p14981_p6 = pmov %p14971_p0 }
 0x1cb   : > { %12556 = vsyncadd (%p14980_p2), [#allocation18], 4294965664 }
 0x1cc   : > { %12558 = dma.done.wait (%p14981_p6), [#allocation21], 32   ;;  %p14982_p10 = pmov %p14971_p0 }
 0x1cd   : > { %p14983_p13 = pmov %p14971_p0 }
 0x1ce   : > { %12560 = vsyncadd (%p14982_p10), [#allocation21], 4294967264 }
 0x1cf   : > { %12562 = dma.done.wait (%p14983_p13), [#allocation24], 16   ;;  %p14984_p12 = pmov %p14971_p0 }
 0x1d0   : > { %p14985_p0 = scmp.ne.s32.totalorder %s12727_s2, 0 }
 0x1d1   : > { %12564 = vsyncadd (%p14984_p12), [#allocation24], 4294967280  ;;  %v9970_v0 = vld.sshfl [vmem:[#allocation3] sm:$0x33 pattern:$0x76325410] (!%p14985_p0) }
 0x1d2   : > { %804 = sbr.rel (%p14985_p0) target bundleno = 1324 (0x52c), region = 156  ;;  %vm832_vm0 = vcmask (!%p14985_p0), 1041408   ;;  %v827_v1 = vcombine.high (!%p14985_p0), %v9970_v0, %v9970_v0  ;;  %v12601_v2 = vmov (!%p14985_p0), 0.0   ;;  %s14986_s3 = sld [smem:[#allocation34_spill]] (!%p14985_p0)  ;;  %vm828_vm1 = vcmask (!%p14985_p0), 15360   ;;  %v958_v52 = vld [vmem:[#allocation7 + $0x180] sm:$0xff] (!%p14985_p0) }
 0x1d3   : > { %901 = vmatprep.mubr.f32.mxu0 (!%p14985_p0), %v12601_v2  ;;  %v11541_v4 = vld [vmem:[#allocation7 + $0x4] ss:$16 sps:$4 sm:$0xff] (!%p14985_p0)   ;;  %v11543_v5 = vld [vmem:[#allocation7 + $0x8] ss:$16 sps:$4 sm:$0xff] (!%p14985_p0)   ;;  %v11545_v6 = vld [vmem:[#allocation7 + $0xc] ss:$16 sps:$4 sm:$0xff] (!%p14985_p0)   ;;  %v10023_v54 = vcombine.high (!%p14985_p0), %v958_v52, %v958_v52  ;;  %v10022_v56 = vcombine.low (!%p14985_p0), %v958_v52, %v958_v52 }
 0x1d4   : > { %9971 = vmatprep.subr.msk.mxu0 (!%p14985_p0), %vm832_vm0, %v827_v1  ;;  %v11546_v7 = vld [vmem:[#allocation7] ss:$16 sps:$4 sm:$0xff] (!%p14985_p0)   ;;  %1251 = vmatprep.subr.bf16.mxu1 (!%p14985_p0), %v11541_v4  ;;  %v11547_v8 = vld [vmem:[#allocation7 + $0x24] ss:$16 sps:$4 sm:$0xff] (!%p14985_p0)   ;;  %v11549_v9 = vld [vmem:[#allocation7 + $0x28] ss:$16 sps:$4 sm:$0xff] (!%p14985_p0)   ;;  %v809_v4 = vlaneseq (!%p14985_p0) }
 0x1d5   : > { %9972 = vmatpush1.msk.msra.mxu0 (!%p14985_p0), %vm832_vm0, %v9970_v0  ;;  %1252 = vmatpush1.bf16.msra.mxu1 (!%p14985_p0), %v11546_v7  ;;  %v11551_v10 = vld [vmem:[#allocation7 + $0x2c] ss:$16 sps:$4 sm:$0xff] (!%p14985_p0)   ;;  %v11552_v11 = vld [vmem:[#allocation7 + $0x20] ss:$16 sps:$4 sm:$0xff] (!%p14985_p0)   ;;  %v11553_v12 = vld [vmem:[#allocation7 + $0x44] ss:$16 sps:$4 sm:$0xff] (!%p14985_p0)  }
 0x1d6   : > { %1292 = vmatprep.subr.bf16.mxu0 (!%p14985_p0), %v11545_v6  ;;  %1253 = vmatprep.subr.bf16.mxu1 (!%p14985_p0), %v11547_v8  ;;  %v11557_v13 = vld [vmem:[#allocation7 + $0x4c] ss:$16 sps:$4 sm:$0xff] (!%p14985_p0)   ;;  %v11555_v14 = vld [vmem:[#allocation7 + $0x48] ss:$16 sps:$4 sm:$0xff] (!%p14985_p0)   ;;  %v11558_v15 = vld [vmem:[#allocation7 + $0x40] ss:$16 sps:$4 sm:$0xff] (!%p14985_p0)  }
 0x1d7   : > { %v11559_v16 = vld [vmem:[#allocation7 + $0x64] ss:$16 sps:$4 sm:$0xff] (!%p14985_p0)   ;;  %v11563_v17 = vld [vmem:[#allocation7 + $0x6c] ss:$16 sps:$4 sm:$0xff] (!%p14985_p0)   ;;  %v11561_v18 = vld [vmem:[#allocation7 + $0x68] ss:$16 sps:$4 sm:$0xff] (!%p14985_p0)  }
 0x1d8   : > { %v805_v3 = vld [vmem:[%s14986_s3] sm:$0xff] (!%p14985_p0)  ;;  %v11565_v20 = vld [vmem:[#allocation7 + $0x84] ss:$16 sps:$4 sm:$0xff] (!%p14985_p0)   ;;  %v959_v53 = vld [vmem:[#allocation7 + $0x188] sm:$0xff] (!%p14985_p0)  ;;  %vm1238_vm2 = vcmask (!%p14985_p0), 1043456   ;;  %s14987_s29 = sld [smem:[#allocation39_spill]] (!%p14985_p0) }
 0x1d9   : > { %9973 = vmatmul.mubr.msk.f32.vlgmr.msra.gmra.mrb[0].mxu0 %vm828_vm1, %v805_v3  ;;  %1254 = vmatpush1.bf16.msra.mxu1 %v11552_v11  ;;  %v11564_v19 = vld [vmem:[#allocation7 + $0x60] ss:$16 sps:$4 sm:$0xff]   ;;  %v11569_v21 = vld [vmem:[#allocation7 + $0x8c] ss:$16 sps:$4 sm:$0xff]   ;;  %v11567_v22 = vld [vmem:[#allocation7 + $0x88] ss:$16 sps:$4 sm:$0xff]   ;;  %v10025_v55 = vcombine.high %v959_v53, %v959_v53  ;;  %v10024_v57 = vcombine.low %v959_v53, %v959_v53 }
 0x1da   : > { %1293 = vmatpush1.bf16.msra.mxu0 %v11543_v5  ;;  %1255 = vmatprep.subr.bf16.mxu1 %v11553_v12  ;;  %v11570_v23 = vld [vmem:[#allocation7 + $0x80] ss:$16 sps:$4 sm:$0xff]   ;;  %v11571_v24 = vld [vmem:[#allocation7 + $0xa4] ss:$16 sps:$4 sm:$0xff]   ;;  %v11575_v25 = vld [vmem:[#allocation7 + $0xac] ss:$16 sps:$4 sm:$0xff]  }
 0x1db   : > { %1294 = vmatprep.subr.bf16.mxu0 %v11551_v10  ;;  %v11573_v26 = vld [vmem:[#allocation7 + $0xa8] ss:$16 sps:$4 sm:$0xff]   ;;  %v11576_v27 = vld [vmem:[#allocation7 + $0xa0] ss:$16 sps:$4 sm:$0xff]   ;;  %v11577_v28 = vld [vmem:[#allocation7 + $0xc4] ss:$16 sps:$4 sm:$0xff]  }
 0x1dc   : > { %v11581_v29 = vld [vmem:[#allocation7 + $0xcc] ss:$16 sps:$4 sm:$0xff]   ;;  %v11579_v30 = vld [vmem:[#allocation7 + $0xc8] ss:$16 sps:$4 sm:$0xff]   ;;  %v11582_v31 = vld [vmem:[#allocation7 + $0xc0] ss:$16 sps:$4 sm:$0xff]  }
 0x1dd   : > { %1256 = vmatpush1.bf16.msra.mxu1 %v11558_v15  ;;  %v11583_v32 = vld [vmem:[#allocation7 + $0xe4] ss:$16 sps:$4 sm:$0xff]   ;;  %v11587_v33 = vld [vmem:[#allocation7 + $0xec] ss:$16 sps:$4 sm:$0xff]   ;;  %v11585_v34 = vld [vmem:[#allocation7 + $0xe8] ss:$16 sps:$4 sm:$0xff]  }
 0x1de   : > { %1295 = vmatpush1.bf16.msra.mxu0 %v11549_v9  ;;  %1257 = vmatprep.subr.bf16.mxu1 %v11559_v16  ;;  %v11588_v35 = vld [vmem:[#allocation7 + $0xe0] ss:$16 sps:$4 sm:$0xff]   ;;  %v11589_v36 = vld [vmem:[#allocation7 + $0x104] ss:$16 sps:$4 sm:$0xff]   ;;  %v11593_v37 = vld [vmem:[#allocation7 + $0x10c] ss:$16 sps:$4 sm:$0xff]  }
 0x1df   : > { %1296 = vmatprep.subr.bf16.mxu0 %v11557_v13  ;;  %v11591_v38 = vld [vmem:[#allocation7 + $0x108] ss:$16 sps:$4 sm:$0xff]   ;;  %v11594_v39 = vld [vmem:[#allocation7 + $0x100] ss:$16 sps:$4 sm:$0xff]   ;;  %v11595_v40 = vld [vmem:[#allocation7 + $0x124] ss:$16 sps:$4 sm:$0xff]  }
 0x1e0   : > { %v11599_v41 = vld [vmem:[#allocation7 + $0x12c] ss:$16 sps:$4 sm:$0xff]   ;;  %v11597_v42 = vld [vmem:[#allocation7 + $0x128] ss:$16 sps:$4 sm:$0xff]   ;;  %v11600_v43 = vld [vmem:[#allocation7 + $0x120] ss:$16 sps:$4 sm:$0xff]  }
 0x1e1   : > { %1258 = vmatpush1.bf16.msra.mxu1 %v11564_v19  ;;  %v11601_v44 = vld [vmem:[#allocation7 + $0x144] ss:$16 sps:$4 sm:$0xff]   ;;  %v11605_v45 = vld [vmem:[#allocation7 + $0x14c] ss:$16 sps:$4 sm:$0xff]   ;;  %v11603_v46 = vld [vmem:[#allocation7 + $0x148] ss:$16 sps:$4 sm:$0xff]  }
 0x1e2   : > { %1297 = vmatpush1.bf16.msra.mxu0 %v11555_v14  ;;  %1259 = vmatprep.subr.bf16.mxu1 %v11565_v20  ;;  %v11606_v47 = vld [vmem:[#allocation7 + $0x140] ss:$16 sps:$4 sm:$0xff]   ;;  %v11607_v48 = vld [vmem:[#allocation7 + $0x164] ss:$16 sps:$4 sm:$0xff]   ;;  %v11611_v49 = vld [vmem:[#allocation7 + $0x16c] ss:$16 sps:$4 sm:$0xff]  }
 0x1e3   : > { %1298 = vmatprep.subr.bf16.mxu0 %v11563_v17  ;;  %v11609_v50 = vld [vmem:[#allocation7 + $0x168] ss:$16 sps:$4 sm:$0xff]   ;;  %v11612_v51 = vld [vmem:[#allocation7 + $0x160] ss:$16 sps:$4 sm:$0xff]   ;;  %v1240_v58 = vsel %vm1238_vm2, %v10022_v56, 0  ;;  %v1246_v59 = vsel %vm1238_vm2, %v10024_v57, 0 }
 0x1e4   : > { %v1337_v60 = vld [vmem:[%s14987_s29] sm:$0xff]  ;;  %v1338_v62 = vld [vmem:[%s14987_s29 + $0x8] sm:$0xff]  ;;  %v13154_v5 = vshrl.u32 %v809_v4, 7  ;;  %vm1234_vm3 = vcmask 588800   ;;  %vm2895_vm4 = vcmask 949248   ;;  %vm3266_vm5 = vcmask 850944  }
 0x1e5   : > { %1260 = vmatpush1.bf16.msra.mxu1 %v11570_v23  ;;  %v1341_v61 = vld [vmem:[%s14987_s29 + $0x20] sm:$0xff]  ;;  %v1342_v1 = vld [vmem:[%s14987_s29 + $0x28] sm:$0xff] }
 0x1e6   : > { %1299 = vmatpush1.bf16.msra.mxu0 %v11561_v18  ;;  %1261 = vmatprep.subr.bf16.mxu1 %v11571_v24  ;;  %v10030_v63 = vcombine.low %v1337_v60, %v1341_v61  ;;  %v10031_v0 = vcombine.high %v1337_v60, %v1341_v61  ;;  %v10032_v2 = vcombine.low %v1338_v62, %v1342_v1  ;;  %v13157_v6 = vsub.s32 0, %v13154_v5  ;;  %v807_v7 = vld [vmem:[#allocation5] sm:$0x3]  ;;  %v1346_v19 = vld [vmem:[%s14987_s29 + $0x48] sm:$0xff] }
 0x1e7   : > { %1300 = vmatprep.subr.bf16.mxu0 %v11569_v21  ;;  %v10033_v3 = vcombine.high %v1338_v62, %v1342_v1  ;;  %v13160_v8 = vsub.s32 1, %v13154_v5  ;;  %v1345_v16 = vld [vmem:[%s14987_s29 + $0x40] sm:$0xff]  ;;  %v1350_v20 = vld [vmem:[%s14987_s29 + $0x68] sm:$0xff] }
 0x1e8   : > { %v812_v9 = vrot.slane %v807_v7, %v13157_v6  ;;  %v1349_v18 = vld [vmem:[%s14987_s29 + $0x60] sm:$0xff]  ;;  %v10041_v24 = vcombine.high %v1346_v19, %v1350_v20  ;;  %v1382_v52 = vld [vmem:[%s14987_s29 + $0x168] sm:$0xff] }
 0x1e9   : > { %1262 = vmatpush1.bf16.msra.mxu1 %v11576_v27  ;;  %v816_v10 = vrot.slane %v807_v7, %v13160_v8  ;;  %v10039_v23 = vcombine.high %v1345_v16, %v1349_v18  ;;  %v1354_v27 = vld [vmem:[%s14987_s29 + $0x88] sm:$0xff]  ;;  %v1385_v57 = vld [vmem:[%s14987_s29 + $0x180] sm:$0xff] }
 0x1ea   : > { %1301 = vmatpush1.bf16.msra.mxu0 %v11567_v22  ;;  %1263 = vmatprep.subr.bf16.mxu1 %v11577_v28  ;;  %v1358_v28 = vld [vmem:[%s14987_s29 + $0xa8] sm:$0xff]  ;;  %v1393_v1 = vld [vmem:[%s14987_s29 + $0x1c0] sm:$0xff] }
 0x1eb   : > { %1302 = vmatprep.subr.bf16.mxu0 %v11575_v25  ;;  %v1353_v25 = vld [vmem:[%s14987_s29 + $0x80] sm:$0xff]  ;;  %v1390_v60 = vld [vmem:[%s14987_s29 + $0x1a8] sm:$0xff] }
 0x1ec   : > { %v1398_v4 = vld [vmem:[%s14987_s29 + $0x1e8] sm:$0xff] }
 0x1ed   : > { %1264 = vmatpush1.bf16.msra.mxu1 %v11582_v31 }
 0x1ee   : > { %1303 = vmatpush1.bf16.msra.mxu0 %v11573_v26  ;;  %1265 = vmatprep.subr.bf16.mxu1 %v11583_v32  ;;  %v1357_v26 = vld [vmem:[%s14987_s29 + $0xa0] sm:$0xff]  ;;  %v10049_v32 = vcombine.high %v1354_v27, %v1358_v28 }
 0x1ef   : > { %1304 = vmatprep.subr.bf16.mxu0 %v11581_v29  ;;  %v10038_v29 = vcombine.low %v1345_v16, %v1349_v18  ;;  %v10047_v31 = vcombine.high %v1353_v25, %v1357_v26 }
 0x1f1   : > { %1266 = vmatpush1.bf16.msra.mxu1 %v11588_v35  ;;  %v1362_v35 = vld [vmem:[%s14987_s29 + $0xc8] sm:$0xff] }
 0x1f2   : > { %1305 = vmatpush1.bf16.msra.mxu0 %v11579_v30  ;;  %1267 = vmatprep.subr.bf16.mxu1 %v11589_v36  ;;  %v10040_v30 = vcombine.low %v1346_v19, %v1350_v20  ;;  %v1366_v36 = vld [vmem:[%s14987_s29 + $0xe8] sm:$0xff]  ;;  %v1409_v20 = vld [vmem:[%s14987_s29 + $0x240] sm:$0xff] }
 0x1f3   : > { %1306 = vmatprep.subr.bf16.mxu0 %v11587_v33  ;;  %v1361_v33 = vld [vmem:[%s14987_s29 + $0xc0] sm:$0xff] }
 0x1f5   : > { %1268 = vmatpush1.bf16.msra.mxu1 %v11594_v39 }
 0x1f6   : > { %1307 = vmatpush1.bf16.msra.mxu0 %v11585_v34  ;;  %1269 = vmatprep.subr.bf16.mxu1 %v11595_v40  ;;  %v1365_v34 = vld [vmem:[%s14987_s29 + $0xe0] sm:$0xff]  ;;  %v10057_v40 = vcombine.high %v1362_v35, %v1366_v36 }
 0x1f7   : > { %1308 = vmatprep.subr.bf16.mxu0 %v11593_v37  ;;  %v10046_v37 = vcombine.low %v1353_v25, %v1357_v26  ;;  %v10055_v39 = vcombine.high %v1361_v33, %v1365_v34 }
 0x1f9   : > { %1270 = vmatpush1.bf16.msra.mxu1 %v11600_v43  ;;  %v1370_v43 = vld [vmem:[%s14987_s29 + $0x108] sm:$0xff] }
 0x1fa   : > { %1309 = vmatpush1.bf16.msra.mxu0 %v11591_v38  ;;  %1271 = vmatprep.subr.bf16.mxu1 %v11601_v44  ;;  %v10048_v38 = vcombine.low %v1354_v27, %v1358_v28  ;;  %v1374_v44 = vld [vmem:[%s14987_s29 + $0x128] sm:$0xff]  ;;  %v1417_v28 = vld [vmem:[%s14987_s29 + $0x280] sm:$0xff] }
 0x1fb   : > { %1310 = vmatprep.subr.bf16.mxu0 %v11599_v41  ;;  %v1369_v41 = vld [vmem:[%s14987_s29 + $0x100] sm:$0xff] }
 0x1fd   : > { %1272 = vmatpush1.bf16.msra.mxu1 %v11606_v47 }
 0x1fe   : > { %1311 = vmatpush1.bf16.msra.mxu0 %v11597_v42  ;;  %1273 = vmatprep.subr.bf16.mxu1 %v11607_v48  ;;  %v1373_v42 = vld [vmem:[%s14987_s29 + $0x120] sm:$0xff]  ;;  %v10065_v48 = vcombine.high %v1370_v43, %v1374_v44 }
 0x1ff   : > { %1312 = vmatprep.subr.bf16.mxu0 %v11605_v45  ;;  %v10054_v45 = vcombine.low %v1361_v33, %v1365_v34  ;;  %v10063_v47 = vcombine.high %v1369_v41, %v1373_v42  ;;  %v10062_v53 = vcombine.low %v1369_v41, %v1373_v42 }
 0x201   : > { %1274 = vmatpush1.bf16.msra.mxu1 %v11612_v51  ;;  %v1378_v51 = vld [vmem:[%s14987_s29 + $0x148] sm:$0xff] }
 0x202   : > { %1313 = vmatpush1.bf16.msra.mxu0 %v11603_v46  ;;  %10026 = vmatprep.subr.msk.bf16.mxu1 %vm1238_vm2, %v10023_v54  ;;  %v10056_v46 = vcombine.low %v1362_v35, %v1366_v36  ;;  %v10064_v54 = vcombine.low %v1370_v43, %v1374_v44  ;;  %v10073_v56 = vcombine.high %v1378_v51, %v1382_v52  ;;  %v1425_v36 = vld [vmem:[%s14987_s29 + $0x2c0] sm:$0xff] }
 0x203   : > { %1314 = vmatprep.subr.bf16.mxu0 %v11611_v49  ;;  %v1377_v49 = vld [vmem:[%s14987_s29 + $0x140] sm:$0xff]  ;;  %v10072_v62 = vcombine.low %v1378_v51, %v1382_v52 }
 0x204   : > { %v1433_v44 = vld [vmem:[%s14987_s29 + $0x300] sm:$0xff] }
 0x205   : > { %1276 = vmatpush1.bf16.msra.mxu1 %v1240_v58  ;;  %v1389_v58 = vld [vmem:[%s14987_s29 + $0x1a0] sm:$0xff] }
 0x206   : > { %1315 = vmatpush1.bf16.msra.mxu0 %v11609_v50  ;;  %2923 = vmatprep.subr.bf16.mxu1 %v10031_v0  ;;  %v1381_v50 = vld [vmem:[%s14987_s29 + $0x160] sm:$0xff]  ;;  %v10078_v7 = vcombine.low %v1385_v57, %v1389_v58 }
 0x207   : > { %10028 = vmatprep.subr.msk.bf16.mxu0 %vm1238_vm2, %v10025_v55  ;;  %v10071_v55 = vcombine.high %v1377_v49, %v1381_v50  ;;  %v10070_v61 = vcombine.low %v1377_v49, %v1381_v50  ;;  %v1441_v52 = vld [vmem:[%s14987_s29 + $0x340] sm:$0xff] }
 0x20a   : > { %1317 = vmatpush1.bf16.msra.mxu0 %v1246_v59  ;;  %v1386_v59 = vld [vmem:[%s14987_s29 + $0x188] sm:$0xff] }
 0x20b   : > { %3005 = vmatprep.subr.bf16.mxu0 %v10033_v3  ;;  %v10081_v0 = vcombine.high %v1386_v59, %v1390_v60  ;;  %v1394_v3 = vld [vmem:[%s14987_s29 + $0x1c8] sm:$0xff] }
 0x2ac   : > { %v903_v11 = vpop.f32.mrb[0].mxu0 }
 0x2ad   : > { %v904_v12 = vadd.f32 %v903_v11, %v812_v9  ;;  %v905_v13 = vpop.f32.mrb[1].mxu0  ;;  %v10080_v9 = vcombine.low %v1386_v59, %v1390_v60  ;;  %v10089_v11 = vcombine.high %v1394_v3, %v1398_v4 }
 0x2ae   : > { %v906_v14 = vadd.f32 %v905_v13, %v816_v10  ;;  %v1405_v13 = vld [vmem:[%s14987_s29 + $0x220] sm:$0xff] }
 0x2af   : > { %v908_v15 = vmax.f32 %v904_v12, 0.0  ;;  %v1401_v12 = vld [vmem:[%s14987_s29 + $0x200] sm:$0xff] }
 0x2b0   : > { %v909_v17 = vmax.f32 %v906_v14, 0.0  ;;  %v1402_v14 = vld [vmem:[%s14987_s29 + $0x208] sm:$0xff]  ;;  %v10095_v18 = vcombine.high %v1401_v12, %v1405_v13 }
 0x2b1   : > { %v961_v22 = vpack.c.bf16 %v908_v15, %v908_v15  ;;  %v1406_v15 = vld [vmem:[%s14987_s29 + $0x228] sm:$0xff] }
 0x2b2   : > { %v962_v21 = vpack.c.bf16 %v909_v17, %v909_v17  ;;  %v10088_v17 = vcombine.low %v1394_v3, %v1398_v4  ;;  %v10097_v19 = vcombine.high %v1402_v14, %v1406_v15  ;;  %v10096_v25 = vcombine.low %v1402_v14, %v1406_v15 }
 0x2b4   : > { %10027 = vmatprep.mubr.msk.bf16.mxu1 %vm1234_vm3, %v962_v21  ;;  %10029 = vmatprep.mubr.msk.bf16.mxu0 %vm1234_vm3, %v962_v21  ;;  %v1413_v21 = vld [vmem:[%s14987_s29 + $0x260] sm:$0xff] }
 0x2b5   : > { %1284 = vmatmul.mubr.bf16.vlgmr.msra.gmra.mrb[0].mxu1 %v961_v22  ;;  %1325 = vmatmul.mubr.bf16.vlgmr.msra.gmra.mrb[4].mxu0 %v961_v22  ;;  %v1410_v22 = vld [vmem:[%s14987_s29 + $0x248] sm:$0xff]  ;;  %v10103_v26 = vcombine.high %v1409_v20, %v1413_v21 }
 0x2b6   : > { %2924 = vmatpush1.bf16.msra.mxu1 %v10030_v63  ;;  %3006 = vmatpush1.bf16.msra.mxu0 %v10032_v2  ;;  %v10079_v63 = vcombine.high %v1385_v57, %v1389_v58  ;;  %v1397_v2 = vld [vmem:[%s14987_s29 + $0x1e0] sm:$0xff] }
 0x2b7   : > { %2925 = vmatprep.subr.bf16.mxu1 %v10039_v23  ;;  %3007 = vmatprep.subr.bf16.mxu0 %v10041_v24  ;;  %v10087_v10 = vcombine.high %v1393_v1, %v1397_v2  ;;  %v10086_v16 = vcombine.low %v1393_v1, %v1397_v2  ;;  %v1414_v23 = vld [vmem:[%s14987_s29 + $0x268] sm:$0xff]  ;;  %v10094_v24 = vcombine.low %v1401_v12, %v1405_v13 }
 0x2b8   : > { %v10105_v27 = vcombine.high %v1410_v22, %v1414_v23  ;;  %v10104_v33 = vcombine.low %v1410_v22, %v1414_v23  ;;  %v1454_v2 = vld [vmem:[%s14987_s29 + $0x3a8] sm:$0xff] }
 0x2b9   : > { %v1462_v13 = vld [vmem:[%s14987_s29 + $0x3e8] sm:$0xff] }
 0x2ba   : > { %2926 = vmatpush1.bf16.msra.mxu1 %v10038_v29  ;;  %3008 = vmatpush1.bf16.msra.mxu0 %v10040_v30  ;;  %v1421_v29 = vld [vmem:[%s14987_s29 + $0x2a0] sm:$0xff]  ;;  %v1418_v30 = vld [vmem:[%s14987_s29 + $0x288] sm:$0xff] }
 0x2bb   : > { %2927 = vmatprep.subr.bf16.mxu1 %v10047_v31  ;;  %3009 = vmatprep.subr.bf16.mxu0 %v10049_v32  ;;  %v1422_v31 = vld [vmem:[%s14987_s29 + $0x2a8] sm:$0xff]  ;;  %v10102_v32 = vcombine.low %v1409_v20, %v1413_v21  ;;  %v10111_v34 = vcombine.high %v1417_v28, %v1421_v29 }
 0x2bc   : > { %v10113_v35 = vcombine.high %v1418_v30, %v1422_v31  ;;  %v10112_v41 = vcombine.low %v1418_v30, %v1422_v31  ;;  %v1470_v21 = vld [vmem:[%s14987_s29 + $0x428] sm:$0xff] }
 0x2be   : > { %2928 = vmatpush1.bf16.msra.mxu1 %v10046_v37  ;;  %3010 = vmatpush1.bf16.msra.mxu0 %v10048_v38  ;;  %v1429_v37 = vld [vmem:[%s14987_s29 + $0x2e0] sm:$0xff]  ;;  %v1426_v38 = vld [vmem:[%s14987_s29 + $0x2c8] sm:$0xff] }
 0x2bf   : > { %2929 = vmatprep.subr.bf16.mxu1 %v10055_v39  ;;  %3011 = vmatprep.subr.bf16.mxu0 %v10057_v40  ;;  %v1430_v39 = vld [vmem:[%s14987_s29 + $0x2e8] sm:$0xff]  ;;  %v10110_v40 = vcombine.low %v1417_v28, %v1421_v29  ;;  %v10119_v42 = vcombine.high %v1425_v36, %v1429_v37 }
 0x2c0   : > { %v10121_v43 = vcombine.high %v1426_v38, %v1430_v39  ;;  %v10120_v49 = vcombine.low %v1426_v38, %v1430_v39 }
 0x2c2   : > { %2930 = vmatpush1.bf16.msra.mxu1 %v10054_v45  ;;  %3012 = vmatpush1.bf16.msra.mxu0 %v10056_v46  ;;  %v1437_v45 = vld [vmem:[%s14987_s29 + $0x320] sm:$0xff]  ;;  %v1434_v46 = vld [vmem:[%s14987_s29 + $0x308] sm:$0xff] }
 0x2c3   : > { %2931 = vmatprep.subr.bf16.mxu1 %v10063_v47  ;;  %3013 = vmatprep.subr.bf16.mxu0 %v10065_v48  ;;  %v1438_v47 = vld [vmem:[%s14987_s29 + $0x328] sm:$0xff]  ;;  %v10118_v48 = vcombine.low %v1425_v36, %v1429_v37  ;;  %v10127_v50 = vcombine.high %v1433_v44, %v1437_v45 }
 0x2c4   : > { %v10129_v51 = vcombine.high %v1434_v46, %v1438_v47  ;;  %v10128_v57 = vcombine.low %v1434_v46, %v1438_v47  ;;  %v1474_v46 = vld [vmem:[%s14987_s29 + $0x448] sm:$0xff] }
 0x2c5   : > { %v1478_v47 = vld [vmem:[%s14987_s29 + $0x468] sm:$0xff] }
 0x2c6   : > { %2932 = vmatpush1.bf16.msra.mxu1 %v10062_v53  ;;  %3014 = vmatpush1.bf16.msra.mxu0 %v10064_v54  ;;  %v1445_v53 = vld [vmem:[%s14987_s29 + $0x360] sm:$0xff]  ;;  %v1442_v54 = vld [vmem:[%s14987_s29 + $0x348] sm:$0xff] }
 0x2c7   : > { %2933 = vmatprep.subr.bf16.mxu1 %v10071_v55  ;;  %3015 = vmatprep.subr.bf16.mxu0 %v10073_v56  ;;  %v1446_v55 = vld [vmem:[%s14987_s29 + $0x368] sm:$0xff]  ;;  %v10126_v56 = vcombine.low %v1433_v44, %v1437_v45  ;;  %v10135_v58 = vcombine.high %v1441_v52, %v1445_v53  ;;  %v10134_v60 = vcombine.low %v1441_v52, %v1445_v53  ;;  %v1477_v45 = vld [vmem:[%s14987_s29 + $0x460] sm:$0xff] }
 0x2c8   : > { %v10137_v59 = vcombine.high %v1442_v54, %v1446_v55  ;;  %v10169_v52 = vcombine.high %v1474_v46, %v1478_v47  ;;  %v1485_v53 = vld [vmem:[%s14987_s29 + $0x4a0] sm:$0xff] }
 0x2ca   : > { %2934 = vmatpush1.bf16.msra.mxu1 %v10070_v61  ;;  %3016 = vmatpush1.bf16.msra.mxu0 %v10072_v62  ;;  %v10136_v61 = vcombine.low %v1442_v54, %v1446_v55  ;;  %v1449_v62 = vld [vmem:[%s14987_s29 + $0x380] sm:$0xff]  ;;  %v1482_v54 = vld [vmem:[%s14987_s29 + $0x488] sm:$0xff] }
 0x2cb   : > { %2935 = vmatprep.subr.bf16.mxu1 %v10079_v63  ;;  %3017 = vmatprep.subr.bf16.mxu0 %v10081_v0  ;;  %v1453_v63 = vld [vmem:[%s14987_s29 + $0x3a0] sm:$0xff]  ;;  %v1450_v0 = vld [vmem:[%s14987_s29 + $0x388] sm:$0xff] }
 0x2cc   : > { %v10143_v1 = vcombine.high %v1449_v62, %v1453_v63  ;;  %v10142_v3 = vcombine.low %v1449_v62, %v1453_v63  ;;  %v10144_v4 = vcombine.low %v1450_v0, %v1454_v2  ;;  %v1486_v55 = vld [vmem:[%s14987_s29 + $0x4a8] sm:$0xff]  ;;  %v1493_v62 = vld [vmem:[%s14987_s29 + $0x4e0] sm:$0xff] }
 0x2cd   : > { %v1490_v63 = vld [vmem:[%s14987_s29 + $0x4c8] sm:$0xff] }
 0x2ce   : > { %2936 = vmatpush1.bf16.msra.mxu1 %v10078_v7  ;;  %3018 = vmatpush1.bf16.msra.mxu0 %v10080_v9  ;;  %v10145_v7 = vcombine.high %v1450_v0, %v1454_v2  ;;  %v1457_v9 = vld [vmem:[%s14987_s29 + $0x3c0] sm:$0xff]  ;;  %v1494_v0 = vld [vmem:[%s14987_s29 + $0x4e8] sm:$0xff]  ;;  %v10176_v2 = vcombine.low %v1482_v54, %v1486_v55 }
 0x2cf   : > { %2937 = vmatprep.subr.bf16.mxu1 %v10087_v10  ;;  %3019 = vmatprep.subr.bf16.mxu0 %v10089_v11  ;;  %v1461_v10 = vld [vmem:[%s14987_s29 + $0x3e0] sm:$0xff]  ;;  %v1458_v11 = vld [vmem:[%s14987_s29 + $0x3c8] sm:$0xff] }
 0x2d0   : > { %v10151_v12 = vcombine.high %v1457_v9, %v1461_v10  ;;  %v10150_v14 = vcombine.low %v1457_v9, %v1461_v10  ;;  %v10152_v15 = vcombine.low %v1458_v11, %v1462_v13  ;;  %v1501_v9 = vld [vmem:[%s14987_s29 + $0x520] sm:$0xff]  ;;  %v1498_v10 = vld [vmem:[%s14987_s29 + $0x508] sm:$0xff] }
 0x2d2   : > { %2938 = vmatpush1.bf16.msra.mxu1 %v10086_v16  ;;  %3020 = vmatpush1.bf16.msra.mxu0 %v10088_v17  ;;  %v10153_v16 = vcombine.high %v1458_v11, %v1462_v13  ;;  %v1465_v17 = vld [vmem:[%s14987_s29 + $0x400] sm:$0xff]  ;;  %v1502_v11 = vld [vmem:[%s14987_s29 + $0x528] sm:$0xff]  ;;  %v10184_v13 = vcombine.low %v1490_v63, %v1494_v0 }
 0x2d3   : > { %2939 = vmatprep.subr.bf16.mxu1 %v10095_v18  ;;  %3021 = vmatprep.subr.bf16.mxu0 %v10097_v19  ;;  %v1469_v18 = vld [vmem:[%s14987_s29 + $0x420] sm:$0xff]  ;;  %v1466_v19 = vld [vmem:[%s14987_s29 + $0x408] sm:$0xff] }
 0x2d4   : > { %v10159_v20 = vcombine.high %v1465_v17, %v1469_v18  ;;  %v10158_v22 = vcombine.low %v1465_v17, %v1469_v18  ;;  %v10160_v23 = vcombine.low %v1466_v19, %v1470_v21  ;;  %v1509_v17 = vld [vmem:[%s14987_s29 + $0x560] sm:$0xff]  ;;  %v1506_v18 = vld [vmem:[%s14987_s29 + $0x548] sm:$0xff] }
 0x2d6   : > { %2940 = vmatpush1.bf16.msra.mxu1 %v10094_v24  ;;  %3022 = vmatpush1.bf16.msra.mxu0 %v10096_v25  ;;  %v10161_v24 = vcombine.high %v1466_v19, %v1470_v21  ;;  %v13356_v25 = vld [vmem:[#allocation8] sm:$0xf]  ;;  %v1510_v19 = vld [vmem:[%s14987_s29 + $0x568] sm:$0xff]  ;;  %v10192_v21 = vcombine.low %v1498_v10, %v1502_v11 }
 0x2d7   : > { %2941 = vmatprep.subr.bf16.mxu1 %v10103_v26  ;;  %3023 = vmatprep.subr.bf16.mxu0 %v10105_v27  ;;  %v978_v26 = vsub.s32 3, %v13154_v5  ;;  %v967_v27 = vrot.slane %v13356_v25, %v13157_v6  ;;  %v971_v28 = vrot.slane %v13356_v25, %v13160_v8 }
 0x2d9   : > { %v979_v29 = vrot.slane %v13356_v25, %v978_v26 }
 0x2da   : > { %2942 = vmatpush1.bf16.msra.mxu1 %v10102_v32  ;;  %3024 = vmatpush1.bf16.msra.mxu0 %v10104_v33 }
 0x2db   : > { %2943 = vmatprep.subr.bf16.mxu1 %v10111_v34  ;;  %3025 = vmatprep.subr.bf16.mxu0 %v10113_v35 }
 0x2de   : > { %2944 = vmatpush1.bf16.msra.mxu1 %v10110_v40  ;;  %3026 = vmatpush1.bf16.msra.mxu0 %v10112_v41 }
 0x2df   : > { %2945 = vmatprep.subr.bf16.mxu1 %v10119_v42  ;;  %3027 = vmatprep.subr.bf16.mxu0 %v10121_v43  ;;  %v1473_v43 = vld [vmem:[%s14987_s29 + $0x440] sm:$0xff] }
 0x2e2   : > { %2946 = vmatpush1.bf16.msra.mxu1 %v10118_v48  ;;  %3028 = vmatpush1.bf16.msra.mxu0 %v10120_v49 }
 0x2e3   : > { %2947 = vmatprep.subr.bf16.mxu1 %v10127_v50  ;;  %3029 = vmatprep.subr.bf16.mxu0 %v10129_v51  ;;  %v1481_v50 = vld [vmem:[%s14987_s29 + $0x480] sm:$0xff]  ;;  %v10167_v51 = vcombine.high %v1473_v43, %v1477_v45 }
 0x2e6   : > { %2948 = vmatpush1.bf16.msra.mxu1 %v10126_v56  ;;  %3030 = vmatpush1.bf16.msra.mxu0 %v10128_v57  ;;  %v10166_v57 = vcombine.low %v1473_v43, %v1477_v45  ;;  %v1529_v43 = vld [vmem:[%s14987_s29 + $0x600] sm:$0xff]  ;;  %v1530_v45 = vld [vmem:[%s14987_s29 + $0x608] sm:$0xff] }
 0x2e7   : > { %2949 = vmatprep.subr.bf16.mxu1 %v10135_v58  ;;  %3031 = vmatprep.subr.bf16.mxu0 %v10137_v59  ;;  %v10168_v58 = vcombine.low %v1474_v46, %v1478_v47  ;;  %v10175_v59 = vcombine.high %v1481_v50, %v1485_v53  ;;  %v1534_v46 = vld [vmem:[%s14987_s29 + $0x628] sm:$0xff] }
 0x2ea   : > { %2950 = vmatpush1.bf16.msra.mxu1 %v10134_v60  ;;  %3032 = vmatpush1.bf16.msra.mxu0 %v10136_v61  ;;  %v10177_v60 = vcombine.high %v1482_v54, %v1486_v55  ;;  %v1489_v61 = vld [vmem:[%s14987_s29 + $0x4c0] sm:$0xff]  ;;  %v1538_v55 = vld [vmem:[%s14987_s29 + $0x648] sm:$0xff] }
 0x2eb   : > { %2951 = vmatprep.subr.bf16.mxu1 %v10143_v1  ;;  %3033 = vmatprep.subr.bf16.mxu0 %v10145_v7  ;;  %v10174_v1 = vcombine.low %v1481_v50, %v1485_v53  ;;  %v1497_v7 = vld [vmem:[%s14987_s29 + $0x500] sm:$0xff] }
 0x2ec   : > { %v1537_v53 = vld [vmem:[%s14987_s29 + $0x640] sm:$0xff] }
 0x2ed   : > { %v1541_v54 = vld [vmem:[%s14987_s29 + $0x660] sm:$0xff] }
 0x2ee   : > { %2952 = vmatpush1.bf16.msra.mxu1 %v10142_v3  ;;  %3034 = vmatpush1.bf16.msra.mxu0 %v10144_v4  ;;  %v10183_v3 = vcombine.high %v1489_v61, %v1493_v62  ;;  %v10185_v4 = vcombine.high %v1490_v63, %v1494_v0  ;;  %v1549_v63 = vld [vmem:[%s14987_s29 + $0x6a0] sm:$0xff]  ;;  %v1546_v0 = vld [vmem:[%s14987_s29 + $0x688] sm:$0xff] }
 0x2ef   : > { %2953 = vmatprep.subr.bf16.mxu1 %v10151_v12  ;;  %3035 = vmatprep.subr.bf16.mxu0 %v10153_v16  ;;  %v10182_v12 = vcombine.low %v1489_v61, %v1493_v62  ;;  %v1505_v16 = vld [vmem:[%s14987_s29 + $0x540] sm:$0xff] }
 0x2f0   : > { %v1545_v62 = vld [vmem:[%s14987_s29 + $0x680] sm:$0xff] }
 0x2f2   : > { %2954 = vmatpush1.bf16.msra.mxu1 %v10150_v14  ;;  %3036 = vmatpush1.bf16.msra.mxu0 %v10152_v15  ;;  %v10191_v14 = vcombine.high %v1497_v7, %v1501_v9  ;;  %v10193_v15 = vcombine.high %v1498_v10, %v1502_v11  ;;  %v1557_v10 = vld [vmem:[%s14987_s29 + $0x6e0] sm:$0xff]  ;;  %v1554_v11 = vld [vmem:[%s14987_s29 + $0x6c8] sm:$0xff] }
 0x2f3   : > { %2964 = vmatprep.subr.bf16.mxu1 %v10159_v20  ;;  %3046 = vmatprep.subr.bf16.mxu0 %v10161_v24  ;;  %v10190_v20 = vcombine.low %v1497_v7, %v1501_v9  ;;  %v1513_v24 = vld [vmem:[%s14987_s29 + $0x580] sm:$0xff] }
 0x2f4   : > { %v1553_v9 = vld [vmem:[%s14987_s29 + $0x6c0] sm:$0xff] }
 0x388   : > { %v1285_v30 = vpop.f32.mrb[0].mxu1  ;;  %v13366_v31 = vpop.f32.mrb[4].mxu0 }
 0x389   : > { %v1286_v32 = vadd.f32 %v1285_v30, %v967_v27  ;;  %v1287_v33 = vpop.f32.mrb[1].mxu1  ;;  %v1328_v34 = vpop.f32.mrb[5].mxu0  ;;  %v1517_v27 = vld [vmem:[%s14987_s29 + $0x5a0] sm:$0xff]  ;;  %v10198_v30 = vcombine.low %v1505_v16, %v1509_v17 }
 0x38a   : > { %v1288_v35 = vadd.f32 %v1287_v33, %v971_v28  ;;  %v1329_v36 = vadd.f32 %v1328_v34, %v979_v29  ;;  %v1289_v37 = vpop.f32.mrb[2].mxu1  ;;  %v1330_v38 = vpop.f32.mrb[6].mxu0  ;;  %v1514_v28 = vld [vmem:[%s14987_s29 + $0x588] sm:$0xff]  ;;  %v10207_v33 = vcombine.high %v1513_v24, %v1517_v27 }
 0x38b   : > { %v1333_v39 = vmax.f32 %v1286_v32, 0.0  ;;  %v1290_v40 = vpop.f32.mrb[3].mxu1  ;;  %v1331_v41 = vpop.f32.mrb[7].mxu0  ;;  %v1518_v29 = vld [vmem:[%s14987_s29 + $0x5a8] sm:$0xff]  ;;  %v10200_v32 = vcombine.low %v1506_v18, %v1510_v19 }
 0x38c   : > { %v1334_v42 = vmax.f32 %v1288_v35, 0.0  ;;  %v1336_v44 = vmax.f32 %v1329_v36, 0.0  ;;  %v10209_v34 = vcombine.high %v1514_v28, %v1518_v29  ;;  %v1521_v35 = vld [vmem:[%s14987_s29 + $0x5c0] sm:$0xff]  ;;  %v1522_v37 = vld [vmem:[%s14987_s29 + $0x5c8] sm:$0xff]  ;;  %v10208_v40 = vcombine.low %v1514_v28, %v1518_v29 }
 0x38d   : > { %v13382_v49 = vpack.c.bf16 %v1333_v39, %v1333_v39  ;;  %v1525_v36 = vld [vmem:[%s14987_s29 + $0x5e0] sm:$0xff]  ;;  %v1526_v38 = vld [vmem:[%s14987_s29 + $0x5e8] sm:$0xff]  ;;  %v10206_v39 = vcombine.low %v1513_v24, %v1517_v27 }
 0x38e   : > { %v13380_v48 = vpack.c.bf16 %v1334_v42, %v1334_v42  ;;  %v13398_v56 = vpack.c.bf16 %v1336_v44, %v1336_v44  ;;  %v10215_v41 = vcombine.high %v1521_v35, %v1525_v36  ;;  %v10217_v42 = vcombine.high %v1522_v37, %v1526_v38  ;;  %v1533_v44 = vld [vmem:[%s14987_s29 + $0x620] sm:$0xff]  ;;  %v1570_v29 = vld [vmem:[%s14987_s29 + $0x748] sm:$0xff] }
 0x38f   : > { %v10214_v47 = vcombine.low %v1521_v35, %v1525_v36  ;;  %v10216_v50 = vcombine.low %v1522_v37, %v1526_v38  ;;  %v1569_v27 = vld [vmem:[%s14987_s29 + $0x740] sm:$0xff] }
 0x390   : > { %2955 = vmatprep.mubr.bf16.mxu1 %v13380_v48  ;;  %3037 = vmatprep.mubr.bf16.mxu0 %v13380_v48  ;;  %v1573_v28 = vld [vmem:[%s14987_s29 + $0x760] sm:$0xff] }
 0x391   : > { %2956 = vmatmul.mubr.bf16.vlgmr.msra.gmra.mrb[4].mxu1 %v13382_v49  ;;  %3038 = vmatmul.mubr.bf16.vlgmr.msra.gmra.mrb[8].mxu0 %v13382_v49  ;;  %v10263_v35 = vcombine.high %v1569_v27, %v1573_v28  ;;  %v1577_v37 = vld [vmem:[%s14987_s29 + $0x780] sm:$0xff] }
 0x392   : > { %2965 = vmatpush1.bf16.msra.mxu1 %v10158_v22  ;;  %3047 = vmatpush1.bf16.msra.mxu0 %v10160_v23  ;;  %v10199_v22 = vcombine.high %v1505_v16, %v1509_v17  ;;  %v10201_v23 = vcombine.high %v1506_v18, %v1510_v19  ;;  %v1561_v17 = vld [vmem:[%s14987_s29 + $0x700] sm:$0xff]  ;;  %v1562_v19 = vld [vmem:[%s14987_s29 + $0x708] sm:$0xff] }
 0x393   : > { %10287 = vmatprep.mubr.msk.bf16.mxu1 %vm2895_vm4, %v13398_v56  ;;  %10289 = vmatprep.mubr.msk.bf16.mxu0 %vm2895_vm4, %v13398_v56  ;;  %v1565_v18 = vld [vmem:[%s14987_s29 + $0x720] sm:$0xff] }
 0x394   : > { %2966 = vmatprep.subr.bf16.mxu1 %v10167_v51  ;;  %3048 = vmatprep.subr.bf16.mxu0 %v10169_v52  ;;  %v10223_v51 = vcombine.high %v1529_v43, %v1533_v44  ;;  %v10225_v52 = vcombine.high %v1530_v45, %v1534_v46  ;;  %v1581_v38 = vld [vmem:[%s14987_s29 + $0x7a0] sm:$0xff] }
 0x396   : > { %2967 = vmatpush1.bf16.msra.mxu1 %v10166_v57  ;;  %3049 = vmatpush1.bf16.msra.mxu0 %v10168_v58  ;;  %v1542_v57 = vld [vmem:[%s14987_s29 + $0x668] sm:$0xff]  ;;  %v10222_v58 = vcombine.low %v1529_v43, %v1533_v44  ;;  %v10271_v44 = vcombine.high %v1577_v37, %v1581_v38 }
 0x397   : > { %2968 = vmatprep.subr.bf16.mxu1 %v10175_v59  ;;  %3050 = vmatprep.subr.bf16.mxu0 %v10177_v60  ;;  %v10224_v59 = vcombine.low %v1530_v45, %v1534_v46  ;;  %v10231_v60 = vcombine.high %v1537_v53, %v1541_v54  ;;  %v10233_v61 = vcombine.high %v1538_v55, %v1542_v57  ;;  %v1585_v46 = vld [vmem:[%s14987_s29 + $0x7c0] sm:$0x33] }
 0x39a   : > { %2969 = vmatpush1.bf16.msra.mxu1 %v10174_v1  ;;  %3051 = vmatpush1.bf16.msra.mxu0 %v10176_v2  ;;  %v1550_v1 = vld [vmem:[%s14987_s29 + $0x6a8] sm:$0xff]  ;;  %v10230_v2 = vcombine.low %v1537_v53, %v1541_v54  ;;  %v10278_v53 = vcombine.low %v1585_v46, %v1585_v46 }
 0x39b   : > { %2970 = vmatprep.subr.bf16.mxu1 %v10183_v3  ;;  %3052 = vmatprep.subr.bf16.mxu0 %v10185_v4  ;;  %v10232_v3 = vcombine.low %v1538_v55, %v1542_v57  ;;  %v10239_v4 = vcombine.high %v1545_v62, %v1549_v63  ;;  %v10241_v7 = vcombine.high %v1546_v0, %v1550_v1  ;;  %v1339_v57 = vld [vmem:[%s14987_s29 + $0x10] sm:$0xff] }
 0x39e   : > { %2971 = vmatpush1.bf16.msra.mxu1 %v10182_v12  ;;  %3053 = vmatpush1.bf16.msra.mxu0 %v10184_v13  ;;  %v1558_v12 = vld [vmem:[%s14987_s29 + $0x6e8] sm:$0xff]  ;;  %v10238_v13 = vcombine.low %v1545_v62, %v1549_v63 }
 0x39f   : > { %2972 = vmatprep.subr.bf16.mxu1 %v10191_v14  ;;  %3054 = vmatprep.subr.bf16.mxu0 %v10193_v15  ;;  %v10240_v14 = vcombine.low %v1546_v0, %v1550_v1  ;;  %v10247_v15 = vcombine.high %v1553_v9, %v1557_v10  ;;  %v10249_v16 = vcombine.high %v1554_v11, %v1558_v12  ;;  %v1347_v1 = vld [vmem:[%s14987_s29 + $0x50] sm:$0xff] }
 0x3a2   : > { %2973 = vmatpush1.bf16.msra.mxu1 %v10190_v20  ;;  %3055 = vmatpush1.bf16.msra.mxu0 %v10192_v21  ;;  %v1566_v20 = vld [vmem:[%s14987_s29 + $0x728] sm:$0xff]  ;;  %v10246_v21 = vcombine.low %v1553_v9, %v1557_v10 }
 0x3a3   : > { %2974 = vmatprep.subr.bf16.mxu1 %v10199_v22  ;;  %3056 = vmatprep.subr.bf16.mxu0 %v10201_v23  ;;  %v10248_v22 = vcombine.low %v1554_v11, %v1558_v12  ;;  %v10255_v23 = vcombine.high %v1561_v17, %v1565_v18  ;;  %v10257_v24 = vcombine.high %v1562_v19, %v1566_v20 }
 0x3a6   : > { %2975 = vmatpush1.bf16.msra.mxu1 %v10198_v30  ;;  %3057 = vmatpush1.bf16.msra.mxu0 %v10200_v32  ;;  %v1574_v30 = vld [vmem:[%s14987_s29 + $0x768] sm:$0xff]  ;;  %v10254_v32 = vcombine.low %v1561_v17, %v1565_v18 }
 0x3a7   : > { %2976 = vmatprep.subr.bf16.mxu1 %v10207_v33  ;;  %3058 = vmatprep.subr.bf16.mxu0 %v10209_v34  ;;  %v10256_v33 = vcombine.low %v1562_v19, %v1566_v20  ;;  %v974_v34 = vsub.s32 2, %v13154_v5  ;;  %v10265_v36 = vcombine.high %v1570_v29, %v1574_v30 }
 0x3a9   : > { %v975_v43 = vrot.slane %v13356_v25, %v974_v34 }
 0x3aa   : > { %2977 = vmatpush1.bf16.msra.mxu1 %v10206_v39  ;;  %3059 = vmatpush1.bf16.msra.mxu0 %v10208_v40  ;;  %v1578_v39 = vld [vmem:[%s14987_s29 + $0x788] sm:$0xff] }
 0x3ab   : > { %2978 = vmatprep.subr.bf16.mxu1 %v10215_v41  ;;  %3060 = vmatprep.subr.bf16.mxu0 %v10217_v42  ;;  %v1582_v40 = vld [vmem:[%s14987_s29 + $0x7a8] sm:$0xff]  ;;  %v10262_v41 = vcombine.low %v1569_v27, %v1573_v28  ;;  %v10264_v42 = vcombine.low %v1570_v29, %v1574_v30  ;;  %v1327_v25 = vadd.f32 %v13366_v31, %v975_v43  ;;  %v1344_v31 = vld [vmem:[%s14987_s29 + $0x38] sm:$0xff]  ;;  %v1371_v30 = vld [vmem:[%s14987_s29 + $0x110] sm:$0xff] }
 0x3ac   : > { %v10273_v45 = vcombine.high %v1578_v39, %v1582_v40  ;;  %v1384_v43 = vld [vmem:[%s14987_s29 + $0x178] sm:$0xff] }
 0x3ae   : > { %2979 = vmatpush1.bf16.msra.mxu1 %v10214_v47  ;;  %3061 = vmatpush1.bf16.msra.mxu0 %v10216_v50  ;;  %v1586_v47 = vld [vmem:[%s14987_s29 + $0x7c8] sm:$0x33]  ;;  %v10270_v50 = vcombine.low %v1577_v37, %v1581_v38 }
 0x3af   : > { %2980 = vmatprep.subr.bf16.mxu1 %v10223_v51  ;;  %3062 = vmatprep.subr.bf16.mxu0 %v10225_v52  ;;  %v10272_v51 = vcombine.low %v1578_v39, %v1582_v40  ;;  %v10279_v52 = vcombine.high %v1585_v46, %v1585_v46  ;;  %v10281_v54 = vcombine.high %v1586_v47, %v1586_v47  ;;  %v1379_v40 = vld [vmem:[%s14987_s29 + $0x150] sm:$0xff] }
 0x3b0   : > { %v10280_v55 = vcombine.low %v1586_v47, %v1586_v47 }
 0x3b2   : > { %2981 = vmatpush1.bf16.msra.mxu1 %v10222_v58  ;;  %3063 = vmatpush1.bf16.msra.mxu0 %v10224_v59  ;;  %v1343_v58 = vld [vmem:[%s14987_s29 + $0x30] sm:$0xff]  ;;  %v1340_v59 = vld [vmem:[%s14987_s29 + $0x18] sm:$0xff]  ;;  %v2906_v62 = vsel %vm832_vm0, %v10280_v55, 0 }
 0x3b3   : > { %2982 = vmatprep.subr.bf16.mxu1 %v10231_v60  ;;  %3064 = vmatprep.subr.bf16.mxu0 %v10233_v61  ;;  %v2900_v60 = vsel %vm832_vm0, %v10278_v53, 0  ;;  %v1335_v61 = vmax.f32 %v1327_v25, 0.0  ;;  %v10035_v63 = vcombine.high %v1339_v57, %v1343_v58  ;;  %v10037_v0 = vcombine.high %v1340_v59, %v1344_v31  ;;  %v1392_v53 = vld [vmem:[%s14987_s29 + $0x1b8] sm:$0xff] }
 0x3b4   : > { %v10036_v10 = vcombine.low %v1340_v59, %v1344_v31  ;;  %v1399_v59 = vld [vmem:[%s14987_s29 + $0x1f0] sm:$0xff]  ;;  %v1396_v31 = vld [vmem:[%s14987_s29 + $0x1d8] sm:$0xff] }
 0x3b5   : > { %v13589_v9 = vpack.c.bf16 %v1335_v61, %v1335_v61 }
 0x3b6   : > { %2983 = vmatpush1.bf16.msra.mxu1 %v10230_v2  ;;  %3065 = vmatpush1.bf16.msra.mxu0 %v10232_v3  ;;  %v1351_v2 = vld [vmem:[%s14987_s29 + $0x70] sm:$0xff]  ;;  %v1348_v3 = vld [vmem:[%s14987_s29 + $0x58] sm:$0xff] }
 0x3b7   : > { %2984 = vmatprep.subr.bf16.mxu1 %v10239_v4  ;;  %3066 = vmatprep.subr.bf16.mxu0 %v10241_v7  ;;  %v1352_v4 = vld [vmem:[%s14987_s29 + $0x78] sm:$0xff]  ;;  %v10034_v7 = vcombine.low %v1339_v57, %v1343_v58  ;;  %v10043_v11 = vcombine.high %v1347_v1, %v1351_v2  ;;  %v10042_v17 = vcombine.low %v1347_v1, %v1351_v2  ;;  %v1395_v58 = vld [vmem:[%s14987_s29 + $0x1d0] sm:$0xff] }
 0x3b8   : > { %v10045_v12 = vcombine.high %v1348_v3, %v1352_v4  ;;  %v10044_v18 = vcombine.low %v1348_v3, %v1352_v4  ;;  %v1403_v1 = vld [vmem:[%s14987_s29 + $0x210] sm:$0xff]  ;;  %v1404_v3 = vld [vmem:[%s14987_s29 + $0x218] sm:$0xff] }
 0x3b9   : > { %v1407_v2 = vld [vmem:[%s14987_s29 + $0x230] sm:$0xff]  ;;  %v1408_v4 = vld [vmem:[%s14987_s29 + $0x238] sm:$0xff] }
 0x3ba   : > { %2985 = vmatpush1.bf16.msra.mxu1 %v10238_v13  ;;  %3067 = vmatpush1.bf16.msra.mxu0 %v10240_v14  ;;  %v1355_v13 = vld [vmem:[%s14987_s29 + $0x90] sm:$0xff] }
 0x3bb   : > { %2986 = vmatprep.subr.bf16.mxu1 %v10247_v15  ;;  %3068 = vmatprep.subr.bf16.mxu0 %v10249_v16  ;;  %v1359_v14 = vld [vmem:[%s14987_s29 + $0xb0] sm:$0xff]  ;;  %v1356_v15 = vld [vmem:[%s14987_s29 + $0x98] sm:$0xff] }
 0x3bc   : > { %v1360_v16 = vld [vmem:[%s14987_s29 + $0xb8] sm:$0xff]  ;;  %v10051_v19 = vcombine.high %v1355_v13, %v1359_v14 }
 0x3bd   : > { %v10053_v20 = vcombine.high %v1356_v15, %v1360_v16  ;;  %v10052_v27 = vcombine.low %v1356_v15, %v1360_v16  ;;  %v1412_v15 = vld [vmem:[%s14987_s29 + $0x258] sm:$0xff] }
 0x3be   : > { %2987 = vmatpush1.bf16.msra.mxu1 %v10246_v21  ;;  %3069 = vmatpush1.bf16.msra.mxu0 %v10248_v22  ;;  %v1363_v21 = vld [vmem:[%s14987_s29 + $0xd0] sm:$0xff]  ;;  %v1416_v16 = vld [vmem:[%s14987_s29 + $0x278] sm:$0xff] }
 0x3bf   : > { %2988 = vmatprep.subr.bf16.mxu1 %v10255_v23  ;;  %3070 = vmatprep.subr.bf16.mxu0 %v10257_v24  ;;  %v1367_v22 = vld [vmem:[%s14987_s29 + $0xf0] sm:$0xff]  ;;  %v1364_v23 = vld [vmem:[%s14987_s29 + $0xd8] sm:$0xff]  ;;  %v10050_v24 = vcombine.low %v1355_v13, %v1359_v14 }
 0x3c0   : > { %v10059_v28 = vcombine.high %v1363_v21, %v1367_v22  ;;  %v1411_v13 = vld [vmem:[%s14987_s29 + $0x250] sm:$0xff] }
 0x3c1   : > { %v1415_v14 = vld [vmem:[%s14987_s29 + $0x270] sm:$0xff] }
 0x3c2   : > { %2989 = vmatpush1.bf16.msra.mxu1 %v10254_v32  ;;  %3071 = vmatpush1.bf16.msra.mxu0 %v10256_v33  ;;  %v1375_v32 = vld [vmem:[%s14987_s29 + $0x130] sm:$0xff]  ;;  %v1372_v33 = vld [vmem:[%s14987_s29 + $0x118] sm:$0xff] }
 0x3c3   : > { %2990 = vmatprep.subr.bf16.mxu1 %v10263_v35  ;;  %3072 = vmatprep.subr.bf16.mxu0 %v10265_v36  ;;  %v1376_v35 = vld [vmem:[%s14987_s29 + $0x138] sm:$0xff]  ;;  %v10058_v36 = vcombine.low %v1363_v21, %v1367_v22  ;;  %v10067_v38 = vcombine.high %v1371_v30, %v1375_v32  ;;  %v1419_v21 = vld [vmem:[%s14987_s29 + $0x290] sm:$0xff] }
 0x3c4   : > { %v10069_v39 = vcombine.high %v1372_v33, %v1376_v35  ;;  %v1423_v22 = vld [vmem:[%s14987_s29 + $0x2b0] sm:$0xff] }
 0x3c6   : > { %2991 = vmatpush1.bf16.msra.mxu1 %v10262_v41  ;;  %3073 = vmatpush1.bf16.msra.mxu0 %v10264_v42  ;;  %v1383_v41 = vld [vmem:[%s14987_s29 + $0x170] sm:$0xff]  ;;  %v1380_v42 = vld [vmem:[%s14987_s29 + $0x158] sm:$0xff] }
 0x3c7   : > { %2992 = vmatprep.subr.bf16.mxu1 %v10271_v44  ;;  %3074 = vmatprep.subr.bf16.mxu0 %v10273_v45  ;;  %v10066_v44 = vcombine.low %v1371_v30, %v1375_v32  ;;  %v10068_v45 = vcombine.low %v1372_v33, %v1376_v35  ;;  %v10075_v46 = vcombine.high %v1379_v40, %v1383_v41  ;;  %v1427_v30 = vld [vmem:[%s14987_s29 + $0x2d0] sm:$0xff]  ;;  %v1428_v33 = vld [vmem:[%s14987_s29 + $0x2d8] sm:$0xff] }
 0x3c8   : > { %v10077_v47 = vcombine.high %v1380_v42, %v1384_v43  ;;  %v10074_v25 = vcombine.low %v1379_v40, %v1383_v41  ;;  %v1431_v32 = vld [vmem:[%s14987_s29 + $0x2f0] sm:$0xff]  ;;  %v1432_v35 = vld [vmem:[%s14987_s29 + $0x2f8] sm:$0xff] }
 0x3c9   : > { %v1435_v40 = vld [vmem:[%s14987_s29 + $0x310] sm:$0xff] }
 0x3ca   : > { %2993 = vmatpush1.bf16.msra.mxu1 %v10270_v50  ;;  %3075 = vmatpush1.bf16.msra.mxu0 %v10272_v51  ;;  %v1387_v50 = vld [vmem:[%s14987_s29 + $0x190] sm:$0xff] }
 0x3cb   : > { %10286 = vmatprep.subr.msk.bf16.mxu1 %vm832_vm0, %v10279_v52  ;;  %10288 = vmatprep.subr.msk.bf16.mxu0 %vm832_vm0, %v10281_v54  ;;  %v1391_v51 = vld [vmem:[%s14987_s29 + $0x1b0] sm:$0xff]  ;;  %v1388_v52 = vld [vmem:[%s14987_s29 + $0x198] sm:$0xff]  ;;  %v10076_v54 = vcombine.low %v1380_v42, %v1384_v43 }
 0x3cc   : > { %v10083_v55 = vcombine.high %v1387_v50, %v1391_v51  ;;  %v10085_v57 = vcombine.high %v1388_v52, %v1392_v53  ;;  %v10082_v61 = vcombine.low %v1387_v50, %v1391_v51  ;;  %v1439_v41 = vld [vmem:[%s14987_s29 + $0x330] sm:$0xff]  ;;  %v1436_v42 = vld [vmem:[%s14987_s29 + $0x318] sm:$0xff] }
 0x3cd   : > { %v1440_v43 = vld [vmem:[%s14987_s29 + $0x338] sm:$0xff]  ;;  %v1443_v50 = vld [vmem:[%s14987_s29 + $0x350] sm:$0xff] }
 0x3ce   : > { %2995 = vmatpush1.bf16.msra.mxu1 %v2900_v60  ;;  %3077 = vmatpush1.bf16.msra.mxu0 %v2906_v62  ;;  %v1400_v60 = vld [vmem:[%s14987_s29 + $0x1f8] sm:$0xff]  ;;  %v10084_v62 = vcombine.low %v1388_v52, %v1392_v53  ;;  %v1447_v51 = vld [vmem:[%s14987_s29 + $0x370] sm:$0xff] }
 0x3cf   : > { %3087 = vmatprep.subr.bf16.mxu1 %v10035_v63  ;;  %3169 = vmatprep.subr.bf16.mxu0 %v10037_v0  ;;  %v10091_v63 = vcombine.high %v1395_v58, %v1399_v59  ;;  %v10093_v0 = vcombine.high %v1396_v31, %v1400_v60  ;;  %v1444_v52 = vld [vmem:[%s14987_s29 + $0x358] sm:$0xff] }
 0x3d0   : > { %v1448_v53 = vld [vmem:[%s14987_s29 + $0x378] sm:$0xff] }
 0x3d1   : > { %2997 = vmatmul.mubr.bf16.vlgmr.msra.gmra.mrb[4].mxu1 %v13589_v9  ;;  %3079 = vmatmul.mubr.bf16.vlgmr.msra.gmra.mrb[8].mxu0 %v13589_v9 }
 0x3d2   : > { %3088 = vmatpush1.bf16.msra.mxu1 %v10034_v7  ;;  %3119 = vmatprep.mubr.bf16.mxu1 %v13380_v48  ;;  %v10090_v7 = vcombine.low %v1395_v58, %v1399_v59  ;;  %v1451_v58 = vld [vmem:[%s14987_s29 + $0x390] sm:$0xff] }
 0x3d3   : > { %3170 = vmatpush1.bf16.msra.mxu0 %v10036_v10  ;;  %3201 = vmatprep.mubr.bf16.mxu0 %v13380_v48  ;;  %v1368_v48 = vld [vmem:[%s14987_s29 + $0xf8] sm:$0xff]  ;;  %v10092_v10 = vcombine.low %v1396_v31, %v1400_v60  ;;  %v1455_v59 = vld [vmem:[%s14987_s29 + $0x3b0] sm:$0xff] }
 0x3d4   : > { %3089 = vmatprep.subr.bf16.mxu1 %v10043_v11  ;;  %3171 = vmatprep.subr.bf16.mxu0 %v10045_v12  ;;  %v10061_v29 = vcombine.high %v1364_v23, %v1368_v48  ;;  %v10060_v37 = vcombine.low %v1364_v23, %v1368_v48  ;;  %v10099_v11 = vcombine.high %v1403_v1, %v1407_v2  ;;  %v1420_v23 = vld [vmem:[%s14987_s29 + $0x298] sm:$0xff] }
 0x3d5   : > { %v10101_v12 = vcombine.high %v1404_v3, %v1408_v4  ;;  %v1424_v48 = vld [vmem:[%s14987_s29 + $0x2b8] sm:$0xff] }
 0x3d6   : > { %3090 = vmatpush1.bf16.msra.mxu1 %v10042_v17  ;;  %v10098_v17 = vcombine.low %v1403_v1, %v1407_v2  ;;  %v1452_v31 = vld [vmem:[%s14987_s29 + $0x398] sm:$0xff]  ;;  %v1459_v1 = vld [vmem:[%s14987_s29 + $0x3d0] sm:$0xff] }
 0x3d7   : > { %3172 = vmatpush1.bf16.msra.mxu0 %v10044_v18  ;;  %3091 = vmatprep.subr.bf16.mxu1 %v10051_v19  ;;  %v10100_v18 = vcombine.low %v1404_v3, %v1408_v4  ;;  %v10107_v19 = vcombine.high %v1411_v13, %v1415_v14  ;;  %v1456_v60 = vld [vmem:[%s14987_s29 + $0x3b8] sm:$0xff]  ;;  %v1463_v2 = vld [vmem:[%s14987_s29 + $0x3f0] sm:$0xff] }
 0x3d8   : > { %3173 = vmatprep.subr.bf16.mxu0 %v10053_v20  ;;  %v10109_v20 = vcombine.high %v1412_v15, %v1416_v16  ;;  %v1460_v3 = vld [vmem:[%s14987_s29 + $0x3d8] sm:$0xff] }
 0x3d9   : > { %v1464_v4 = vld [vmem:[%s14987_s29 + $0x3f8] sm:$0xff] }
 0x3da   : > { %3092 = vmatpush1.bf16.msra.mxu1 %v10050_v24  ;;  %v10106_v24 = vcombine.low %v1411_v13, %v1415_v14  ;;  %v1467_v13 = vld [vmem:[%s14987_s29 + $0x410] sm:$0xff] }
 0x3db   : > { %3174 = vmatpush1.bf16.msra.mxu0 %v10052_v27  ;;  %3093 = vmatprep.subr.bf16.mxu1 %v10059_v28  ;;  %v10108_v27 = vcombine.low %v1412_v15, %v1416_v16  ;;  %v10115_v28 = vcombine.high %v1419_v21, %v1423_v22  ;;  %v1471_v14 = vld [vmem:[%s14987_s29 + $0x430] sm:$0xff]  ;;  %v1468_v15 = vld [vmem:[%s14987_s29 + $0x418] sm:$0xff] }
 0x3dc   : > { %3175 = vmatprep.subr.bf16.mxu0 %v10061_v29  ;;  %v10117_v29 = vcombine.high %v1420_v23, %v1424_v48  ;;  %v1472_v16 = vld [vmem:[%s14987_s29 + $0x438] sm:$0xff] }
 0x3de   : > { %3094 = vmatpush1.bf16.msra.mxu1 %v10058_v36  ;;  %v10114_v36 = vcombine.low %v1419_v21, %v1423_v22  ;;  %v1475_v21 = vld [vmem:[%s14987_s29 + $0x450] sm:$0xff] }
 0x3df   : > { %3176 = vmatpush1.bf16.msra.mxu0 %v10060_v37  ;;  %3095 = vmatprep.subr.bf16.mxu1 %v10067_v38  ;;  %v10116_v37 = vcombine.low %v1420_v23, %v1424_v48  ;;  %v10123_v38 = vcombine.high %v1427_v30, %v1431_v32  ;;  %v1479_v22 = vld [vmem:[%s14987_s29 + $0x470] sm:$0xff]  ;;  %v10162_v23 = vcombine.low %v1467_v13, %v1471_v14  ;;  %v1476_v48 = vld [vmem:[%s14987_s29 + $0x458] sm:$0xff] }
 0x3e0   : > { %3177 = vmatprep.subr.bf16.mxu0 %v10069_v39  ;;  %v10125_v39 = vcombine.high %v1428_v33, %v1432_v35 }
 0x3e2   : > { %3096 = vmatpush1.bf16.msra.mxu1 %v10066_v44  ;;  %v10122_v44 = vcombine.low %v1427_v30, %v1431_v32  ;;  %v1487_v30 = vld [vmem:[%s14987_s29 + $0x4b0] sm:$0xff] }
 0x3e3   : > { %3178 = vmatpush1.bf16.msra.mxu0 %v10068_v45  ;;  %3097 = vmatprep.subr.bf16.mxu1 %v10075_v46  ;;  %v10124_v45 = vcombine.low %v1428_v33, %v1432_v35  ;;  %v10131_v46 = vcombine.high %v1435_v40, %v1439_v41  ;;  %v1484_v33 = vld [vmem:[%s14987_s29 + $0x498] sm:$0xff] }
 0x3e4   : > { %3179 = vmatprep.subr.bf16.mxu0 %v10077_v47  ;;  %v10133_v47 = vcombine.high %v1436_v42, %v1440_v43  ;;  %v1488_v35 = vld [vmem:[%s14987_s29 + $0x4b8] sm:$0xff] }
 0x3e6   : > { %3098 = vmatpush1.bf16.msra.mxu1 %v10074_v25  ;;  %v10130_v25 = vcombine.low %v1435_v40, %v1439_v41  ;;  %v1491_v40 = vld [vmem:[%s14987_s29 + $0x4d0] sm:$0xff]  ;;  %v1492_v41 = vld [vmem:[%s14987_s29 + $0x4d8] sm:$0xff] }
 0x3e7   : > { %3180 = vmatpush1.bf16.msra.mxu0 %v10076_v54  ;;  %3099 = vmatprep.subr.bf16.mxu1 %v10083_v55  ;;  %v10132_v54 = vcombine.low %v1436_v42, %v1440_v43  ;;  %v10139_v55 = vcombine.high %v1443_v50, %v1447_v51  ;;  %v1496_v42 = vld [vmem:[%s14987_s29 + $0x4f8] sm:$0xff]  ;;  %v10180_v43 = vcombine.low %v1484_v33, %v1488_v35 }
 0x3e8   : > { %3181 = vmatprep.subr.bf16.mxu0 %v10085_v57  ;;  %v10141_v57 = vcombine.high %v1444_v52, %v1448_v53 }
 0x3ea   : > { %3100 = vmatpush1.bf16.msra.mxu1 %v10082_v61  ;;  %v10138_v61 = vcombine.low %v1443_v50, %v1447_v51  ;;  %v1500_v50 = vld [vmem:[%s14987_s29 + $0x518] sm:$0xff] }
 0x3eb   : > { %3182 = vmatpush1.bf16.msra.mxu0 %v10084_v62  ;;  %3101 = vmatprep.subr.bf16.mxu1 %v10091_v63  ;;  %v10140_v62 = vcombine.low %v1444_v52, %v1448_v53  ;;  %v10147_v63 = vcombine.high %v1451_v58, %v1455_v59  ;;  %v1504_v51 = vld [vmem:[%s14987_s29 + $0x538] sm:$0xff]  ;;  %v10188_v53 = vcombine.low %v1492_v41, %v1496_v42 }
 0x3ec   : > { %3183 = vmatprep.subr.bf16.mxu0 %v10093_v0  ;;  %v10149_v0 = vcombine.high %v1452_v31, %v1456_v60 }
 0x3ee   : > { %3102 = vmatpush1.bf16.msra.mxu1 %v10090_v7  ;;  %v10146_v7 = vcombine.low %v1451_v58, %v1455_v59  ;;  %v1508_v58 = vld [vmem:[%s14987_s29 + $0x558] sm:$0xff] }
 0x3ef   : > { %3184 = vmatpush1.bf16.msra.mxu0 %v10092_v10  ;;  %3103 = vmatprep.subr.bf16.mxu1 %v10099_v11  ;;  %v10148_v10 = vcombine.low %v1452_v31, %v1456_v60  ;;  %v10155_v11 = vcombine.high %v1459_v1, %v1463_v2  ;;  %v1512_v59 = vld [vmem:[%s14987_s29 + $0x578] sm:$0xff]  ;;  %v10196_v60 = vcombine.low %v1500_v50, %v1504_v51 }
 0x3f0   : > { %3185 = vmatprep.subr.bf16.mxu0 %v10101_v12  ;;  %v10157_v12 = vcombine.high %v1460_v3, %v1464_v4 }
 0x3f2   : > { %3104 = vmatpush1.bf16.msra.mxu1 %v10098_v17  ;;  %v10154_v17 = vcombine.low %v1459_v1, %v1463_v2  ;;  %v1516_v1 = vld [vmem:[%s14987_s29 + $0x598] sm:$0xff] }
 0x3f3   : > { %3186 = vmatpush1.bf16.msra.mxu0 %v10100_v18  ;;  %3105 = vmatprep.subr.bf16.mxu1 %v10107_v19  ;;  %v10156_v18 = vcombine.low %v1460_v3, %v1464_v4  ;;  %v10163_v19 = vcombine.high %v1467_v13, %v1471_v14  ;;  %v1520_v2 = vld [vmem:[%s14987_s29 + $0x5b8] sm:$0xff]  ;;  %v10204_v4 = vcombine.low %v1508_v58, %v1512_v59 }
 0x3f4   : > { %3187 = vmatprep.subr.bf16.mxu0 %v10109_v20  ;;  %v10165_v20 = vcombine.high %v1468_v15, %v1472_v16  ;;  %v1524_v13 = vld [vmem:[%s14987_s29 + $0x5d8] sm:$0xff] }
 0x3f5   : > { %v1528_v14 = vld [vmem:[%s14987_s29 + $0x5f8] sm:$0xff] }
 0x3f6   : > { %3106 = vmatpush1.bf16.msra.mxu1 %v10106_v24  ;;  %v1480_v24 = vld [vmem:[%s14987_s29 + $0x478] sm:$0xff] }
 0x3f7   : > { %3188 = vmatpush1.bf16.msra.mxu0 %v10108_v27  ;;  %3107 = vmatprep.subr.bf16.mxu1 %v10115_v28  ;;  %v10164_v27 = vcombine.low %v1468_v15, %v1472_v16  ;;  %v10171_v28 = vcombine.high %v1475_v21, %v1479_v22  ;;  %v10173_v32 = vcombine.high %v1476_v48, %v1480_v24 }
 0x3f8   : > { %3189 = vmatprep.subr.bf16.mxu0 %v10117_v29  ;;  %v1483_v29 = vld [vmem:[%s14987_s29 + $0x490] sm:$0xff]  ;;  %v10212_v16 = vcombine.low %v1516_v1, %v1520_v2 }
 0x3fa   : > { %3108 = vmatpush1.bf16.msra.mxu1 %v10114_v36  ;;  %v10170_v36 = vcombine.low %v1475_v21, %v1479_v22  ;;  %v1532_v21 = vld [vmem:[%s14987_s29 + $0x618] sm:$0xff] }
 0x3fb   : > { %3190 = vmatpush1.bf16.msra.mxu0 %v10116_v37  ;;  %3109 = vmatprep.subr.bf16.mxu1 %v10123_v38  ;;  %v10172_v37 = vcombine.low %v1476_v48, %v1480_v24  ;;  %v10179_v38 = vcombine.high %v1483_v29, %v1487_v30  ;;  %v1536_v22 = vld [vmem:[%s14987_s29 + $0x638] sm:$0xff]  ;;  %v10220_v48 = vcombine.low %v1524_v13, %v1528_v14 }
 0x3fc   : > { %3191 = vmatprep.subr.bf16.mxu0 %v10125_v39  ;;  %v10181_v39 = vcombine.high %v1484_v33, %v1488_v35  ;;  %v10228_v35 = vcombine.low %v1532_v21, %v1536_v22 }
 0x3fe   : > { %3110 = vmatpush1.bf16.msra.mxu1 %v10122_v44 }
 0x3ff   : > { %3192 = vmatpush1.bf16.msra.mxu0 %v10124_v45  ;;  %3111 = vmatprep.subr.bf16.mxu1 %v10131_v46  ;;  %v10189_v45 = vcombine.high %v1492_v41, %v1496_v42  ;;  %v1499_v46 = vld [vmem:[%s14987_s29 + $0x510] sm:$0xff] }
 0x400   : > { %3193 = vmatprep.subr.bf16.mxu0 %v10133_v47  ;;  %v1503_v47 = vld [vmem:[%s14987_s29 + $0x530] sm:$0xff] }
 0x401   : > { %v10194_v31 = vcombine.low %v1499_v46, %v1503_v47 }
 0x402   : > { %3112 = vmatpush1.bf16.msra.mxu1 %v10130_v25  ;;  %v10195_v25 = vcombine.high %v1499_v46, %v1503_v47  ;;  %v1556_v46 = vld [vmem:[%s14987_s29 + $0x6d8] sm:$0xff] }
 0x403   : > { %3194 = vmatpush1.bf16.msra.mxu0 %v10132_v54  ;;  %3113 = vmatprep.subr.bf16.mxu1 %v10139_v55  ;;  %v10197_v54 = vcombine.high %v1500_v50, %v1504_v51  ;;  %v1507_v55 = vld [vmem:[%s14987_s29 + $0x550] sm:$0xff]  ;;  %v1560_v47 = vld [vmem:[%s14987_s29 + $0x6f8] sm:$0xff] }
 0x404   : > { %3195 = vmatprep.subr.bf16.mxu0 %v10141_v57  ;;  %v1511_v57 = vld [vmem:[%s14987_s29 + $0x570] sm:$0xff] }
 0x405   : > { %v10202_v3 = vcombine.low %v1507_v55, %v1511_v57 }
 0x406   : > { %3114 = vmatpush1.bf16.msra.mxu1 %v10138_v61  ;;  %v10203_v61 = vcombine.high %v1507_v55, %v1511_v57  ;;  %v1564_v55 = vld [vmem:[%s14987_s29 + $0x718] sm:$0xff] }
 0x407   : > { %3196 = vmatpush1.bf16.msra.mxu0 %v10140_v62  ;;  %3115 = vmatprep.subr.bf16.mxu1 %v10147_v63  ;;  %v10205_v62 = vcombine.high %v1508_v58, %v1512_v59  ;;  %v1515_v63 = vld [vmem:[%s14987_s29 + $0x590] sm:$0xff]  ;;  %v1568_v57 = vld [vmem:[%s14987_s29 + $0x738] sm:$0xff]  ;;  %v10252_v59 = vcombine.low %v1556_v46, %v1560_v47 }
 0x408   : > { %3197 = vmatprep.subr.bf16.mxu0 %v10149_v0  ;;  %v1519_v0 = vld [vmem:[%s14987_s29 + $0x5b0] sm:$0xff] }
 0x409   : > { %v10210_v15 = vcombine.low %v1515_v63, %v1519_v0 }
 0x40a   : > { %3116 = vmatpush1.bf16.msra.mxu1 %v10146_v7  ;;  %v10211_v7 = vcombine.high %v1515_v63, %v1519_v0  ;;  %v1572_v63 = vld [vmem:[%s14987_s29 + $0x758] sm:$0xff] }
 0x40b   : > { %3198 = vmatpush1.bf16.msra.mxu0 %v10148_v10  ;;  %3117 = vmatprep.subr.bf16.mxu1 %v10155_v11  ;;  %v10213_v10 = vcombine.high %v1516_v1, %v1520_v2  ;;  %v1523_v11 = vld [vmem:[%s14987_s29 + $0x5d0] sm:$0xff]  ;;  %v1576_v0 = vld [vmem:[%s14987_s29 + $0x778] sm:$0xff]  ;;  %v10260_v2 = vcombine.low %v1564_v55, %v1568_v57 }
 0x40c   : > { %3199 = vmatprep.subr.bf16.mxu0 %v10157_v12  ;;  %v1527_v12 = vld [vmem:[%s14987_s29 + $0x5f0] sm:$0xff] }
 0x40e   : > { %3118 = vmatpush1.bf16.msra.mxu1 %v10154_v17  ;;  %v10219_v17 = vcombine.high %v1523_v11, %v1527_v12 }
 0x40f   : > { %3200 = vmatpush1.bf16.msra.mxu0 %v10156_v18  ;;  %3128 = vmatprep.subr.bf16.mxu1 %v10163_v19  ;;  %v10221_v18 = vcombine.high %v1524_v13, %v1528_v14  ;;  %v1531_v19 = vld [vmem:[%s14987_s29 + $0x610] sm:$0xff]  ;;  %v10268_v14 = vcombine.low %v1572_v63, %v1576_v0 }
 0x410   : > { %3210 = vmatprep.subr.bf16.mxu0 %v10165_v20  ;;  %v1535_v20 = vld [vmem:[%s14987_s29 + $0x630] sm:$0xff] }
 0x411   : > { %3120 = vmatmul.mubr.bf16.vlgmr.msra.gmra.mrb[8].mxu1 %v13382_v49  ;;  %v10227_v24 = vcombine.high %v1531_v19, %v1535_v20  ;;  %v10226_v33 = vcombine.low %v1531_v19, %v1535_v20 }
 0x412   : > { %3202 = vmatmul.mubr.bf16.vlgmr.msra.gmra.mrb[12].mxu0 %v13382_v49  ;;  %3129 = vmatpush1.bf16.msra.mxu1 %v10162_v23  ;;  %v1495_v49 = vld [vmem:[%s14987_s29 + $0x4f0] sm:$0xff]  ;;  %v10218_v23 = vcombine.low %v1523_v11, %v1527_v12  ;;  %v1580_v11 = vld [vmem:[%s14987_s29 + $0x798] sm:$0xff] }
 0x413   : > { %10291 = vmatprep.mubr.msk.bf16.mxu1 %vm2895_vm4, %v13398_v56  ;;  %3211 = vmatpush1.bf16.msra.mxu0 %v10164_v27  ;;  %v10187_v44 = vcombine.high %v1491_v40, %v1495_v49  ;;  %v10186_v52 = vcombine.low %v1491_v40, %v1495_v49  ;;  %v10229_v27 = vcombine.high %v1532_v21, %v1536_v22  ;;  %v1548_v40 = vld [vmem:[%s14987_s29 + $0x698] sm:$0xff] }
 0x414   : > { %10293 = vmatprep.mubr.msk.bf16.mxu0 %vm2895_vm4, %v13398_v56  ;;  %3130 = vmatprep.subr.bf16.mxu1 %v10171_v28  ;;  %v10178_v56 = vcombine.low %v1483_v29, %v1487_v30  ;;  %v1539_v28 = vld [vmem:[%s14987_s29 + $0x650] sm:$0xff]  ;;  %v1540_v30 = vld [vmem:[%s14987_s29 + $0x658] sm:$0xff] }
 0x415   : > { %3212 = vmatprep.subr.bf16.mxu0 %v10173_v32  ;;  %v1543_v29 = vld [vmem:[%s14987_s29 + $0x670] sm:$0xff]  ;;  %v1544_v32 = vld [vmem:[%s14987_s29 + $0x678] sm:$0xff] }
 0x416   : > { %3131 = vmatpush1.bf16.msra.mxu1 %v10170_v36  ;;  %v10235_v36 = vcombine.high %v1539_v28, %v1543_v29  ;;  %v1552_v49 = vld [vmem:[%s14987_s29 + $0x6b8] sm:$0xff]  ;;  %v10234_v41 = vcombine.low %v1539_v28, %v1543_v29  ;;  %v10236_v42 = vcombine.low %v1540_v30, %v1544_v32 }
 0x417   : > { %3213 = vmatpush1.bf16.msra.mxu0 %v10172_v37  ;;  %3132 = vmatprep.subr.bf16.mxu1 %v10179_v38  ;;  %v10237_v37 = vcombine.high %v1540_v30, %v1544_v32  ;;  %v1547_v38 = vld [vmem:[%s14987_s29 + $0x690] sm:$0xff]  ;;  %v10244_v51 = vcombine.low %v1548_v40, %v1552_v49  ;;  %v1584_v12 = vld [vmem:[%s14987_s29 + $0x7b8] sm:$0xff] }
 0x418   : > { %3214 = vmatprep.subr.bf16.mxu0 %v10181_v39  ;;  %v1551_v39 = vld [vmem:[%s14987_s29 + $0x6b0] sm:$0xff]  ;;  %v10276_v20 = vcombine.low %v1580_v11, %v1584_v12  ;;  %v1589_v28 = vld [vmem:[#allocation10] sm:$0xff] }
 0x419   : > { %v10242_v50 = vcombine.low %v1547_v38, %v1551_v39  ;;  %v1598_v29 = vrot.slane %v1589_v28, %v13157_v6  ;;  %v1606_v30 = vrot.slane %v1589_v28, %v974_v34  ;;  %v1602_v32 = vrot.slane %v1589_v28, %v13160_v8 }
 0x41a   : > { %3133 = vmatpush1.bf16.msra.mxu1 %v10178_v56  ;;  %v10243_v56 = vcombine.high %v1547_v38, %v1551_v39  ;;  %v1613_v8 = vsub.s32 4, %v13154_v5 }
 0x41b   : > { %3215 = vmatpush1.bf16.msra.mxu0 %v10180_v43  ;;  %3134 = vmatprep.subr.bf16.mxu1 %v10187_v44  ;;  %v10245_v43 = vcombine.high %v1548_v40, %v1552_v49  ;;  %v1555_v44 = vld [vmem:[%s14987_s29 + $0x6d0] sm:$0xff] }
 0x41c   : > { %3216 = vmatprep.subr.bf16.mxu0 %v10189_v45  ;;  %v1559_v45 = vld [vmem:[%s14987_s29 + $0x6f0] sm:$0xff] }
 0x41d   : > { %v10250_v58 = vcombine.low %v1555_v44, %v1559_v45 }
 0x41e   : > { %3135 = vmatpush1.bf16.msra.mxu1 %v10186_v52  ;;  %v10251_v52 = vcombine.high %v1555_v44, %v1559_v45 }
 0x41f   : > { %3217 = vmatpush1.bf16.msra.mxu0 %v10188_v53  ;;  %3136 = vmatprep.subr.bf16.mxu1 %v10195_v25  ;;  %v10253_v53 = vcombine.high %v1556_v46, %v1560_v47  ;;  %v1563_v25 = vld [vmem:[%s14987_s29 + $0x710] sm:$0xff]  ;;  %v1617_v46 = vsub.s32 5, %v13154_v5  ;;  %v1625_v47 = vsub.s32 7, %v13154_v5 }
 0x420   : > { %3218 = vmatprep.subr.bf16.mxu0 %v10197_v54  ;;  %v1567_v54 = vld [vmem:[%s14987_s29 + $0x730] sm:$0xff] }
 0x421   : > { %v10258_v1 = vcombine.low %v1563_v25, %v1567_v54 }
 0x422   : > { %3137 = vmatpush1.bf16.msra.mxu1 %v10194_v31  ;;  %v10259_v31 = vcombine.high %v1563_v25, %v1567_v54 }
 0x423   : > { %3219 = vmatpush1.bf16.msra.mxu0 %v10196_v60  ;;  %3138 = vmatprep.subr.bf16.mxu1 %v10203_v61  ;;  %v10261_v60 = vcombine.high %v1564_v55, %v1568_v57  ;;  %v1571_v61 = vld [vmem:[%s14987_s29 + $0x750] sm:$0xff] }
 0x424   : > { %3220 = vmatprep.subr.bf16.mxu0 %v10205_v62  ;;  %v1575_v62 = vld [vmem:[%s14987_s29 + $0x770] sm:$0xff] }
 0x425   : > { %v10266_v13 = vcombine.low %v1571_v61, %v1575_v62 }
 0x426   : > { %3139 = vmatpush1.bf16.msra.mxu1 %v10202_v3  ;;  %v10267_v3 = vcombine.high %v1571_v61, %v1575_v62 }
 0x427   : > { %3221 = vmatpush1.bf16.msra.mxu0 %v10204_v4  ;;  %3140 = vmatprep.subr.bf16.mxu1 %v10211_v7  ;;  %v10269_v4 = vcombine.high %v1572_v63, %v1576_v0  ;;  %v1579_v7 = vld [vmem:[%s14987_s29 + $0x790] sm:$0xff] }
 0x428   : > { %3222 = vmatprep.subr.bf16.mxu0 %v10213_v10  ;;  %v1583_v10 = vld [vmem:[%s14987_s29 + $0x7b0] sm:$0xff] }
 0x429   : > { %v10274_v19 = vcombine.low %v1579_v7, %v1583_v10 }
 0x42a   : > { %3141 = vmatpush1.bf16.msra.mxu1 %v10210_v15  ;;  %v10275_v15 = vcombine.high %v1579_v7, %v1583_v10 }
 0x42b   : > { %3223 = vmatpush1.bf16.msra.mxu0 %v10212_v16  ;;  %3142 = vmatprep.subr.bf16.mxu1 %v10219_v17  ;;  %v10277_v16 = vcombine.high %v1580_v11, %v1584_v12  ;;  %v1587_v17 = vld [vmem:[%s14987_s29 + $0x7d0] sm:$0x33] }
 0x42c   : > { %3224 = vmatprep.subr.bf16.mxu0 %v10221_v18  ;;  %v1588_v18 = vld [vmem:[%s14987_s29 + $0x7d8] sm:$0x33]  ;;  %v10283_v21 = vcombine.high %v1587_v17, %v1587_v17  ;;  %v10282_v22 = vcombine.low %v1587_v17, %v1587_v17 }
 0x42e   : > { %3143 = vmatpush1.bf16.msra.mxu1 %v10218_v23  ;;  %v10285_v23 = vcombine.high %v1588_v18, %v1588_v18 }
 0x42f   : > { %3225 = vmatpush1.bf16.msra.mxu0 %v10220_v48  ;;  %3144 = vmatprep.subr.bf16.mxu1 %v10227_v24  ;;  %v10284_v48 = vcombine.low %v1588_v18, %v1588_v18  ;;  %v2912_v24 = vsel %vm832_vm0, %v10282_v22, 0 }
 0x430   : > { %3226 = vmatprep.subr.bf16.mxu0 %v10229_v27 }
 0x431   : > { %v2918_v27 = vsel %vm832_vm0, %v10284_v48, 0 }
 0x432   : > { %3145 = vmatpush1.bf16.msra.mxu1 %v10226_v33  ;;  %v1610_v33 = vrot.slane %v1589_v28, %v978_v26  ;;  %v1621_v26 = vsub.s32 6, %v13154_v5 }
 0x433   : > { %3227 = vmatpush1.bf16.msra.mxu0 %v10228_v35  ;;  %3146 = vmatprep.subr.bf16.mxu1 %v10235_v36 }
 0x434   : > { %3228 = vmatprep.subr.bf16.mxu0 %v10237_v37 }
 0x436   : > { %3147 = vmatpush1.bf16.msra.mxu1 %v10234_v41 }
 0x437   : > { %3229 = vmatpush1.bf16.msra.mxu0 %v10236_v42  ;;  %3148 = vmatprep.subr.bf16.mxu1 %v10243_v56 }
 0x438   : > { %3230 = vmatprep.subr.bf16.mxu0 %v10245_v43 }
 0x43a   : > { %3149 = vmatpush1.bf16.msra.mxu1 %v10242_v50  ;;  %v1614_v50 = vrot.slane %v1589_v28, %v1613_v8 }
 0x43b   : > { %3231 = vmatpush1.bf16.msra.mxu0 %v10244_v51  ;;  %3150 = vmatprep.subr.bf16.mxu1 %v10251_v52  ;;  %v1622_v51 = vrot.slane %v1589_v28, %v1621_v26  ;;  %v1618_v52 = vrot.slane %v1589_v28, %v1617_v46 }
 0x43c   : > { %3232 = vmatprep.subr.bf16.mxu0 %v10253_v53  ;;  %v1626_v53 = vrot.slane %v1589_v28, %v1625_v47 }
 0x43e   : > { %3151 = vmatpush1.bf16.msra.mxu1 %v10250_v58 }
 0x43f   : > { %3233 = vmatpush1.bf16.msra.mxu0 %v10252_v59  ;;  %3152 = vmatprep.subr.bf16.mxu1 %v10259_v31 }
 0x440   : > { %3234 = vmatprep.subr.bf16.mxu0 %v10261_v60 }
 0x442   : > { %3153 = vmatpush1.bf16.msra.mxu1 %v10258_v1 }
 0x443   : > { %3235 = vmatpush1.bf16.msra.mxu0 %v10260_v2  ;;  %3154 = vmatprep.subr.bf16.mxu1 %v10267_v3 }
 0x444   : > { %3236 = vmatprep.subr.bf16.mxu0 %v10269_v4 }
 0x446   : > { %3155 = vmatpush1.bf16.msra.mxu1 %v10266_v13 }
 0x447   : > { %3237 = vmatpush1.bf16.msra.mxu0 %v10268_v14  ;;  %3156 = vmatprep.subr.bf16.mxu1 %v10275_v15 }
 0x448   : > { %3238 = vmatprep.subr.bf16.mxu0 %v10277_v16 }
 0x44a   : > { %3157 = vmatpush1.bf16.msra.mxu1 %v10274_v19 }
 0x44b   : > { %3239 = vmatpush1.bf16.msra.mxu0 %v10276_v20  ;;  %10290 = vmatprep.subr.msk.bf16.mxu1 %vm832_vm0, %v10283_v21 }
 0x44c   : > { %10292 = vmatprep.subr.msk.bf16.mxu0 %vm832_vm0, %v10285_v23 }
 0x44e   : > { %3159 = vmatpush1.bf16.msra.mxu1 %v2912_v24 }
 0x44f   : > { %3241 = vmatpush1.bf16.msra.mxu0 %v2918_v27 }
 0x451   : > { %3161 = vmatmul.mubr.bf16.vlgmr.msra.gmra.mrb[8].mxu1 %v13589_v9 }
 0x452   : > { %3243 = vmatmul.mubr.bf16.vlgmr.msra.gmra.mrb[12].mxu0 %v13589_v9 }
 0x4a4   : > { %v2998_v35 = vpop.f32.mrb[4].mxu1  ;;  %v3080_v36 = vpop.f32.mrb[8].mxu0 }
 0x4a5   : > { %v11248_v37 = vadd.f32 %v2998_v35, %v1598_v29  ;;  %v11250_v38 = vadd.f32 %v3080_v36, %v1606_v30  ;;  %v3000_v39 = vpop.f32.mrb[5].mxu1  ;;  %v3082_v40 = vpop.f32.mrb[9].mxu0 }
 0x4a6   : > { %v11249_v49 = vadd.f32 %v3000_v39, %v1602_v32  ;;  %v11251_v41 = vadd.f32 %v3082_v40, %v1610_v33  ;;  %v3002_v9 = vpop.f32.mrb[6].mxu1  ;;  %v3084_v42 = vpop.f32.mrb[10].mxu0 }
 0x4a7   : > { %v3251_v56 = vmax.f32 %v11248_v37, 0.0  ;;  %v3253_v6 = vmax.f32 %v11250_v38, 0.0  ;;  %v3003_v43 = vpop.f32.mrb[7].mxu1  ;;  %v3085_v44 = vpop.f32.mrb[11].mxu0 }
 0x4a8   : > { %v3252_v34 = vmax.f32 %v11249_v49, 0.0  ;;  %v3254_v45 = vmax.f32 %v11251_v41, 0.0 }
 0x4a9   : > { %3259 = vst [vmem:[#allocation2] sm:$0xff] %v3251_v56  ;;  %3261 = vst [vmem:[#allocation2 + $0x10] sm:$0xff] %v3253_v6 }
 0x4aa   : > { %3260 = vst [vmem:[#allocation2 + $0x8] sm:$0xff] %v3252_v34  ;;  %3262 = vst [vmem:[#allocation2 + $0x18] sm:$0xff] %v3254_v45 }
 0x524   : > { %v3162_v25 = vpop.f32.mrb[8].mxu1 }
 0x525   : > { %v11252_v54 = vadd.f32 %v3162_v25, %v1614_v50  ;;  %v3244_v55 = vpop.f32.mrb[12].mxu0  ;;  %v3164_v57 = vpop.f32.mrb[9].mxu1 }
 0x526   : > { %v11254_v58 = vadd.f32 %v3244_v55, %v1622_v51  ;;  %v11253_v59 = vadd.f32 %v3164_v57, %v1618_v52  ;;  %v3246_v31 = vpop.f32.mrb[13].mxu0  ;;  %v3166_v60 = vpop.f32.mrb[10].mxu1 }
 0x527   : > { %v3255_v61 = vmax.f32 %v11252_v54, 0.0  ;;  %v11255_v62 = vadd.f32 %v3246_v31, %v1626_v53  ;;  %v3248_v63 = vpop.f32.mrb[14].mxu0  ;;  %v3167_v0 = vpop.f32.mrb[11].mxu1 }
 0x528   : > { %v3257_v1 = vmax.f32 %v11254_v58, 0.0  ;;  %v3256_v2 = vmax.f32 %v11253_v59, 0.0  ;;  %v3249_v5 = vpop.f32.mrb[15].mxu0 }
 0x529   : > { %3263 = vst [vmem:[#allocation2 + $0x20] sm:$0xff] %v3255_v61  ;;  %v3258_v3 = vmax.f32 %v11255_v62, 0.0 }
 0x52a   : > { %3265 = vst [vmem:[#allocation2 + $0x30] sm:$0xff] %v3257_v1  ;;  %3264 = vst [vmem:[#allocation2 + $0x28] sm:$0xff] %v3256_v2 }
 0x52b   : > { %3267 = vst.msk [vmem:[#allocation2 + $0x38] sm:$0xff] %vm3266_vm5, %v3258_v3 }
 0x52c PF: > { %v3276_v4 = vld [vmem:[%s13110_s17] sm:$0xff]  ;;  %v3277_v10 = vld [vmem:[%s13110_s17 + $0x8] sm:$0xff]  ;;  %vm6326_vm6 = vcmask 850944   ;;  %vm6330_vm7 = vcmask 1043456   ;;  %p10806_p5 = scmp.ne.s32.totalorder %s12727_s2, 7 }
 0x52d   : > { %v3280_v7 = vld [vmem:[%s13110_s17 + $0x20] sm:$0xff]  ;;  %v3281_v12 = vld [vmem:[%s13110_s17 + $0x28] sm:$0xff]  ;;  %s14988_s11 = sld [smem:[#allocation45_spill]] (!%p10806_p5)  ;;  %vm9310_vm8 = vcmask (!%p10806_p5), 949248   ;;  %vm9314_vm9 = vcmask (!%p10806_p5), 1041408   ;;  %s14989_s0 = sld [smem:[#allocation48_spill]] (!%p10806_p5) }
 0x52e   : > { %v10295_v11 = vcombine.high %v3276_v4, %v3280_v7  ;;  %v10294_v13 = vcombine.low %v3276_v4, %v3280_v7  ;;  %v3284_v14 = vld [vmem:[%s13110_s17 + $0x40] sm:$0xff]  ;;  %v10297_v16 = vcombine.high %v3277_v10, %v3281_v12  ;;  %v10296_v17 = vcombine.low %v3277_v10, %v3281_v12  ;;  %v3285_v19 = vld [vmem:[%s13110_s17 + $0x48] sm:$0xff]  ;;  %s14991_s1 = sld [smem:[#allocation49_spill]] (!%p10806_p5) }
 0x52f   : > { %v3288_v15 = vld [vmem:[%s13110_s17 + $0x60] sm:$0xff]  ;;  %v3289_v20 = vld [vmem:[%s13110_s17 + $0x68] sm:$0xff]  ;;  %vm9514_vm10 = vcmask (!%p10806_p5), 588800   ;;  %vm12605_vm11 = vmmov (!%p10806_p5), 0   ;;  %vm9582_vm12 = vcmask (!%p10806_p5), 818176   ;;  %vm9674_vm13 = vcmask (!%p10806_p5), 408576  }
 0x530   : > { %v10303_v18 = vcombine.high %v3284_v14, %v3288_v15  ;;  %v3292_v21 = vld [vmem:[%s13110_s17 + $0x80] sm:$0xff]  ;;  %6355 = vmatprep.subr.bf16.mxu0 %v10295_v11  ;;  %v10305_v22 = vcombine.high %v3285_v19, %v3289_v20  ;;  %v3293_v48 = vld [vmem:[%s13110_s17 + $0x88] sm:$0xff]  ;;  %6519 = vmatprep.subr.bf16.mxu1 %v10297_v16  ;;  %v10302_v27 = vcombine.low %v3284_v14, %v3288_v15  ;;  %vm9758_vm14 = vcmask (!%p10806_p5), 15360  }
 0x531   : > { %v3296_v23 = vld [vmem:[%s13110_s17 + $0xa0] sm:$0xff]  ;;  %v3297_v24 = vld [vmem:[%s13110_s17 + $0xa8] sm:$0xff]  ;;  %6356 = vmatpush1.bf16.msra.mxu0 %v10294_v13  ;;  %6520 = vmatpush1.bf16.msra.mxu1 %v10296_v17  ;;  %v10304_v28 = vcombine.low %v3285_v19, %v3289_v20 }
 0x532   : > { %6357 = vmatprep.subr.bf16.mxu0 %v10303_v18  ;;  %v10311_v29 = vcombine.high %v3292_v21, %v3296_v23  ;;  %6521 = vmatprep.subr.bf16.mxu1 %v10305_v22  ;;  %v10313_v30 = vcombine.high %v3293_v48, %v3297_v24  ;;  %v3300_v32 = vld [vmem:[%s13110_s17 + $0xc0] sm:$0xff]  ;;  %v3301_v35 = vld [vmem:[%s13110_s17 + $0xc8] sm:$0xff]  ;;  %v10310_v37 = vcombine.low %v3292_v21, %v3296_v23 }
 0x533   : > { %v3304_v33 = vld [vmem:[%s13110_s17 + $0xe0] sm:$0xff]  ;;  %v3305_v36 = vld [vmem:[%s13110_s17 + $0xe8] sm:$0xff]  ;;  %v10312_v38 = vcombine.low %v3293_v48, %v3297_v24  ;;  %s14990_s10 = smov (!%p10806_p5), %s14989_s0 }
 0x534   : > { %v10319_v39 = vcombine.high %v3300_v32, %v3304_v33  ;;  %v10321_v40 = vcombine.high %v3301_v35, %v3305_v36  ;;  %v3308_v49 = vld [vmem:[%s13110_s17 + $0x100] sm:$0xff]  ;;  %v3309_v9 = vld [vmem:[%s13110_s17 + $0x108] sm:$0xff]  ;;  %v10318_v56 = vcombine.low %v3300_v32, %v3304_v33  ;;  %v10320_v6 = vcombine.low %v3301_v35, %v3305_v36 }
 0x535   : > { %6358 = vmatpush1.bf16.msra.mxu0 %v10302_v27  ;;  %6522 = vmatpush1.bf16.msra.mxu1 %v10304_v28  ;;  %v3312_v41 = vld [vmem:[%s13110_s17 + $0x120] sm:$0xff]  ;;  %v3313_v42 = vld [vmem:[%s13110_s17 + $0x128] sm:$0xff] }
 0x536   : > { %6359 = vmatprep.subr.bf16.mxu0 %v10311_v29  ;;  %6523 = vmatprep.subr.bf16.mxu1 %v10313_v30  ;;  %v10327_v43 = vcombine.high %v3308_v49, %v3312_v41  ;;  %v10329_v44 = vcombine.high %v3309_v9, %v3313_v42  ;;  %v3316_v34 = vld [vmem:[%s13110_s17 + $0x140] sm:$0xff]  ;;  %v3317_v8 = vld [vmem:[%s13110_s17 + $0x148] sm:$0xff]  ;;  %v10326_v46 = vcombine.low %v3308_v49, %v3312_v41 }
 0x537   : > { %v3320_v45 = vld [vmem:[%s13110_s17 + $0x160] sm:$0xff]  ;;  %v3321_v26 = vld [vmem:[%s13110_s17 + $0x168] sm:$0xff]  ;;  %v10328_v47 = vcombine.low %v3309_v9, %v3313_v42 }
 0x538   : > { %v10335_v50 = vcombine.high %v3316_v34, %v3320_v45  ;;  %v10337_v51 = vcombine.high %v3317_v8, %v3321_v26  ;;  %v3324_v52 = vld [vmem:[%s13110_s17 + $0x180] sm:$0xff]  ;;  %v3325_v25 = vld [vmem:[%s13110_s17 + $0x188] sm:$0xff]  ;;  %v10334_v55 = vcombine.low %v3316_v34, %v3320_v45  ;;  %v10336_v57 = vcombine.low %v3317_v8, %v3321_v26 }
 0x539   : > { %6360 = vmatpush1.bf16.msra.mxu0 %v10310_v37  ;;  %6524 = vmatpush1.bf16.msra.mxu1 %v10312_v38  ;;  %v3328_v53 = vld [vmem:[%s13110_s17 + $0x1a0] sm:$0xff]  ;;  %v3329_v54 = vld [vmem:[%s13110_s17 + $0x1a8] sm:$0xff] }
 0x53a   : > { %6361 = vmatprep.subr.bf16.mxu0 %v10319_v39  ;;  %6525 = vmatprep.subr.bf16.mxu1 %v10321_v40  ;;  %v10343_v58 = vcombine.high %v3324_v52, %v3328_v53  ;;  %v3269_v59 = vld [vmem:[#allocation2 + $0x8] sm:$0xff]  ;;  %v10345_v31 = vcombine.high %v3325_v25, %v3329_v54  ;;  %v10342_v1 = vcombine.low %v3324_v52, %v3328_v53 }
 0x53b   : > { %v3332_v60 = vld [vmem:[%s13110_s17 + $0x1c0] sm:$0xff]  ;;  %v14001_v62 = vpack.c.bf16 %v3269_v59, %v3269_v59  ;;  %v3333_v63 = vld [vmem:[%s13110_s17 + $0x1c8] sm:$0xff]  ;;  %v10344_v2 = vcombine.low %v3325_v25, %v3329_v54 }
 0x53c   : > { %v3336_v61 = vld [vmem:[%s13110_s17 + $0x1e0] sm:$0xff]  ;;  %v3337_v0 = vld [vmem:[%s13110_s17 + $0x1e8] sm:$0xff] }
 0x53d   : > { %6362 = vmatpush1.bf16.msra.mxu0 %v10318_v56  ;;  %6526 = vmatpush1.bf16.msra.mxu1 %v10320_v6  ;;  %v10351_v5 = vcombine.high %v3332_v60, %v3336_v61  ;;  %v10353_v3 = vcombine.high %v3333_v63, %v3337_v0  ;;  %v3340_v4 = vld [vmem:[%s13110_s17 + $0x200] sm:$0xff]  ;;  %v3341_v10 = vld [vmem:[%s13110_s17 + $0x208] sm:$0xff]  ;;  %v10350_v12 = vcombine.low %v3332_v60, %v3336_v61 }
 0x53e   : > { %6363 = vmatprep.subr.bf16.mxu0 %v10327_v43  ;;  %6527 = vmatprep.subr.bf16.mxu1 %v10329_v44  ;;  %v3344_v7 = vld [vmem:[%s13110_s17 + $0x220] sm:$0xff]  ;;  %v3345_v11 = vld [vmem:[%s13110_s17 + $0x228] sm:$0xff]  ;;  %v10352_v13 = vcombine.low %v3333_v63, %v3337_v0 }
 0x53f   : > { %6387 = vmatprep.mubr.bf16.mxu0 %v14001_v62  ;;  %6551 = vmatprep.mubr.bf16.mxu1 %v14001_v62  ;;  %v10359_v14 = vcombine.high %v3340_v4, %v3344_v7  ;;  %v10361_v15 = vcombine.high %v3341_v10, %v3345_v11  ;;  %v3348_v16 = vld [vmem:[%s13110_s17 + $0x240] sm:$0xff]  ;;  %v3349_v18 = vld [vmem:[%s13110_s17 + $0x248] sm:$0xff]  ;;  %v10358_v20 = vcombine.low %v3340_v4, %v3344_v7 }
 0x540   : > { %v3352_v17 = vld [vmem:[%s13110_s17 + $0x260] sm:$0xff]  ;;  %v3353_v19 = vld [vmem:[%s13110_s17 + $0x268] sm:$0xff]  ;;  %v10360_v21 = vcombine.low %v3341_v10, %v3345_v11 }
 0x541   : > { %6364 = vmatpush1.bf16.msra.mxu0 %v10326_v46  ;;  %6528 = vmatpush1.bf16.msra.mxu1 %v10328_v47  ;;  %v10367_v22 = vcombine.high %v3348_v16, %v3352_v17  ;;  %v10369_v23 = vcombine.high %v3349_v18, %v3353_v19  ;;  %v3356_v48 = vld [vmem:[%s13110_s17 + $0x280] sm:$0xff]  ;;  %v3357_v27 = vld [vmem:[%s13110_s17 + $0x288] sm:$0xff]  ;;  %v10366_v29 = vcombine.low %v3348_v16, %v3352_v17 }
 0x542   : > { %6365 = vmatprep.subr.bf16.mxu0 %v10335_v50  ;;  %6529 = vmatprep.subr.bf16.mxu1 %v10337_v51  ;;  %v3360_v24 = vld [vmem:[%s13110_s17 + $0x2a0] sm:$0xff]  ;;  %v3361_v28 = vld [vmem:[%s13110_s17 + $0x2a8] sm:$0xff]  ;;  %v10368_v30 = vcombine.low %v3349_v18, %v3353_v19 }
 0x543   : > { %v10375_v32 = vcombine.high %v3356_v48, %v3360_v24  ;;  %v10377_v33 = vcombine.high %v3357_v27, %v3361_v28  ;;  %v3364_v35 = vld [vmem:[%s13110_s17 + $0x2c0] sm:$0xff]  ;;  %v3365_v37 = vld [vmem:[%s13110_s17 + $0x2c8] sm:$0xff]  ;;  %v10374_v39 = vcombine.low %v3356_v48, %v3360_v24  ;;  %v10376_v40 = vcombine.low %v3357_v27, %v3361_v28 }
 0x544   : > { %v3368_v36 = vld [vmem:[%s13110_s17 + $0x2e0] sm:$0xff]  ;;  %v3369_v38 = vld [vmem:[%s13110_s17 + $0x2e8] sm:$0xff] }
 0x545   : > { %6366 = vmatpush1.bf16.msra.mxu0 %v10334_v55  ;;  %6530 = vmatpush1.bf16.msra.mxu1 %v10336_v57  ;;  %v10383_v49 = vcombine.high %v3364_v35, %v3368_v36  ;;  %v10385_v41 = vcombine.high %v3365_v37, %v3369_v38  ;;  %v3372_v9 = vld [vmem:[%s13110_s17 + $0x300] sm:$0xff]  ;;  %v3373_v56 = vld [vmem:[%s13110_s17 + $0x308] sm:$0xff]  ;;  %v10382_v43 = vcombine.low %v3364_v35, %v3368_v36 }
 0x546   : > { %6367 = vmatprep.subr.bf16.mxu0 %v10343_v58  ;;  %6531 = vmatprep.subr.bf16.mxu1 %v10345_v31  ;;  %v3376_v42 = vld [vmem:[%s13110_s17 + $0x320] sm:$0xff]  ;;  %v3377_v6 = vld [vmem:[%s13110_s17 + $0x328] sm:$0xff]  ;;  %v10384_v44 = vcombine.low %v3365_v37, %v3369_v38 }
 0x547   : > { %v10391_v34 = vcombine.high %v3372_v9, %v3376_v42  ;;  %v10393_v45 = vcombine.high %v3373_v56, %v3377_v6  ;;  %v3380_v8 = vld [vmem:[%s13110_s17 + $0x340] sm:$0xff]  ;;  %v3381_v46 = vld [vmem:[%s13110_s17 + $0x348] sm:$0xff]  ;;  %v10390_v50 = vcombine.low %v3372_v9, %v3376_v42  ;;  %v10392_v51 = vcombine.low %v3373_v56, %v3377_v6 }
 0x548   : > { %v3384_v26 = vld [vmem:[%s13110_s17 + $0x360] sm:$0xff]  ;;  %v3385_v47 = vld [vmem:[%s13110_s17 + $0x368] sm:$0xff] }
 0x549   : > { %6368 = vmatpush1.bf16.msra.mxu0 %v10342_v1  ;;  %6532 = vmatpush1.bf16.msra.mxu1 %v10344_v2  ;;  %v10399_v52 = vcombine.high %v3380_v8, %v3384_v26  ;;  %v10401_v53 = vcombine.high %v3381_v46, %v3385_v47  ;;  %v3388_v25 = vld [vmem:[%s13110_s17 + $0x380] sm:$0xff]  ;;  %v3389_v55 = vld [vmem:[%s13110_s17 + $0x388] sm:$0xff]  ;;  %v10398_v58 = vcombine.low %v3380_v8, %v3384_v26 }
 0x54a   : > { %6369 = vmatprep.subr.bf16.mxu0 %v10351_v5  ;;  %6533 = vmatprep.subr.bf16.mxu1 %v10353_v3  ;;  %v3392_v54 = vld [vmem:[%s13110_s17 + $0x3a0] sm:$0xff]  ;;  %v3393_v57 = vld [vmem:[%s13110_s17 + $0x3a8] sm:$0xff]  ;;  %v10400_v59 = vcombine.low %v3381_v46, %v3385_v47 }
 0x54b   : > { %v10407_v31 = vcombine.high %v3388_v25, %v3392_v54  ;;  %v10409_v60 = vcombine.high %v3389_v55, %v3393_v57  ;;  %v3396_v61 = vld [vmem:[%s13110_s17 + $0x3c0] sm:$0xff]  ;;  %v3397_v0 = vld [vmem:[%s13110_s17 + $0x3c8] sm:$0xff]  ;;  %v10406_v2 = vcombine.low %v3388_v25, %v3392_v54  ;;  %v10408_v5 = vcombine.low %v3389_v55, %v3393_v57 }
 0x54c   : > { %v3400_v63 = vld [vmem:[%s13110_s17 + $0x3e0] sm:$0xff]  ;;  %v3401_v1 = vld [vmem:[%s13110_s17 + $0x3e8] sm:$0xff] }
 0x54d   : > { %6370 = vmatpush1.bf16.msra.mxu0 %v10350_v12  ;;  %6534 = vmatpush1.bf16.msra.mxu1 %v10352_v13  ;;  %v10415_v3 = vcombine.high %v3396_v61, %v3400_v63  ;;  %v10417_v4 = vcombine.high %v3397_v0, %v3401_v1  ;;  %v3404_v7 = vld [vmem:[%s13110_s17 + $0x400] sm:$0xff]  ;;  %v3405_v11 = vld [vmem:[%s13110_s17 + $0x408] sm:$0xff]  ;;  %v10414_v13 = vcombine.low %v3396_v61, %v3400_v63 }
 0x54e   : > { %6371 = vmatprep.subr.bf16.mxu0 %v10359_v14  ;;  %6535 = vmatprep.subr.bf16.mxu1 %v10361_v15  ;;  %v3408_v10 = vld [vmem:[%s13110_s17 + $0x420] sm:$0xff]  ;;  %v3409_v12 = vld [vmem:[%s13110_s17 + $0x428] sm:$0xff]  ;;  %v10416_v15 = vcombine.low %v3397_v0, %v3401_v1 }
 0x54f   : > { %v3268_v14 = vld [vmem:[#allocation2] sm:$0xff]  ;;  %v10423_v16 = vcombine.high %v3404_v7, %v3408_v10  ;;  %v10425_v17 = vcombine.high %v3405_v11, %v3409_v12  ;;  %v10422_v48 = vcombine.low %v3404_v7, %v3408_v10  ;;  %v10424_v24 = vcombine.low %v3405_v11, %v3409_v12  ;;  %v3425_v35 = vld [vmem:[%s13110_s17 + $0x4a8] sm:$0xff] }
 0x550   : > { %v3412_v18 = vld [vmem:[%s13110_s17 + $0x440] sm:$0xff]  ;;  %v3433_v9 = vld [vmem:[%s13110_s17 + $0x4e8] sm:$0xff] }
 0x551   : > { %6372 = vmatpush1.bf16.msra.mxu0 %v10358_v20  ;;  %6536 = vmatpush1.bf16.msra.mxu1 %v10360_v21  ;;  %v3416_v19 = vld [vmem:[%s13110_s17 + $0x460] sm:$0xff]  ;;  %v14045_v20 = vpack.c.bf16 %v3268_v14, %v3268_v14  ;;  %v3413_v21 = vld [vmem:[%s13110_s17 + $0x448] sm:$0xff] }
 0x552   : > { %6373 = vmatprep.subr.bf16.mxu0 %v10367_v22  ;;  %6537 = vmatprep.subr.bf16.mxu1 %v10369_v23  ;;  %v3417_v22 = vld [vmem:[%s13110_s17 + $0x468] sm:$0xff]  ;;  %v3271_v23 = vld [vmem:[#allocation2 + $0x18] sm:$0xff]  ;;  %v10431_v27 = vcombine.high %v3412_v18, %v3416_v19  ;;  %v10430_v36 = vcombine.low %v3412_v18, %v3416_v19  ;;  %v3468_v14 = vld [vmem:[%s13110_s17 + $0x600] sm:$0xff] }
 0x553   : > { %v10433_v28 = vcombine.high %v3413_v21, %v3417_v22  ;;  %v10432_v37 = vcombine.low %v3413_v21, %v3417_v22  ;;  %v3441_v8 = vld [vmem:[%s13110_s17 + $0x528] sm:$0xff] }
 0x554   : > { %v3449_v25 = vld [vmem:[%s13110_s17 + $0x568] sm:$0xff] }
 0x555   : > { %6374 = vmatpush1.bf16.msra.mxu0 %v10366_v29  ;;  %6538 = vmatpush1.bf16.msra.mxu1 %v10368_v30  ;;  %v3420_v29 = vld [vmem:[%s13110_s17 + $0x480] sm:$0xff]  ;;  %v3457_v61 = vld [vmem:[%s13110_s17 + $0x5a8] sm:$0xff] }
 0x556   : > { %6375 = vmatprep.subr.bf16.mxu0 %v10375_v32  ;;  %6539 = vmatprep.subr.bf16.mxu1 %v10377_v33  ;;  %v3424_v30 = vld [vmem:[%s13110_s17 + $0x4a0] sm:$0xff]  ;;  %v14051_v32 = vpack.c.bf16 %v3271_v23, %v3271_v23  ;;  %v3421_v33 = vld [vmem:[%s13110_s17 + $0x488] sm:$0xff] }
 0x557   : > { %v10439_v38 = vcombine.high %v3420_v29, %v3424_v30  ;;  %v10438_v42 = vcombine.low %v3420_v29, %v3424_v30  ;;  %v10440_v56 = vcombine.low %v3421_v33, %v3425_v35  ;;  %v3465_v7 = vld [vmem:[%s13110_s17 + $0x5e8] sm:$0xff]  ;;  %v3476_v23 = vld [vmem:[%s13110_s17 + $0x640] sm:$0xff] }
 0x559   : > { %6376 = vmatpush1.bf16.msra.mxu0 %v10374_v39  ;;  %6540 = vmatpush1.bf16.msra.mxu1 %v10376_v40  ;;  %v10441_v39 = vcombine.high %v3421_v33, %v3425_v35  ;;  %v3428_v40 = vld [vmem:[%s13110_s17 + $0x4c0] sm:$0xff] }
 0x55a   : > { %6377 = vmatprep.subr.bf16.mxu0 %v10383_v49  ;;  %6541 = vmatprep.subr.bf16.mxu1 %v10385_v41  ;;  %v3432_v49 = vld [vmem:[%s13110_s17 + $0x4e0] sm:$0xff]  ;;  %v3429_v41 = vld [vmem:[%s13110_s17 + $0x4c8] sm:$0xff] }
 0x55b   : > { %v10447_v6 = vcombine.high %v3428_v40, %v3432_v49  ;;  %v10446_v26 = vcombine.low %v3428_v40, %v3432_v49  ;;  %v10448_v46 = vcombine.low %v3429_v41, %v3433_v9  ;;  %v3484_v35 = vld [vmem:[%s13110_s17 + $0x680] sm:$0xff] }
 0x55d   : > { %6378 = vmatpush1.bf16.msra.mxu0 %v10382_v43  ;;  %6542 = vmatpush1.bf16.msra.mxu1 %v10384_v44  ;;  %v10449_v43 = vcombine.high %v3429_v41, %v3433_v9  ;;  %v3436_v44 = vld [vmem:[%s13110_s17 + $0x500] sm:$0xff] }
 0x55e   : > { %6379 = vmatprep.subr.bf16.mxu0 %v10391_v34  ;;  %6543 = vmatprep.subr.bf16.mxu1 %v10393_v45  ;;  %v3440_v34 = vld [vmem:[%s13110_s17 + $0x520] sm:$0xff]  ;;  %v3437_v45 = vld [vmem:[%s13110_s17 + $0x508] sm:$0xff] }
 0x55f   : > { %v10455_v47 = vcombine.high %v3436_v44, %v3440_v34  ;;  %v10454_v54 = vcombine.low %v3436_v44, %v3440_v34  ;;  %v10456_v55 = vcombine.low %v3437_v45, %v3441_v8  ;;  %v3492_v9 = vld [vmem:[%s13110_s17 + $0x6c0] sm:$0xff] }
 0x561   : > { %6380 = vmatpush1.bf16.msra.mxu0 %v10390_v50  ;;  %6544 = vmatpush1.bf16.msra.mxu1 %v10392_v51  ;;  %v10457_v50 = vcombine.high %v3437_v45, %v3441_v8  ;;  %v3444_v51 = vld [vmem:[%s13110_s17 + $0x540] sm:$0xff] }
 0x562   : > { %6381 = vmatprep.subr.bf16.mxu0 %v10399_v52  ;;  %6545 = vmatprep.subr.bf16.mxu1 %v10401_v53  ;;  %v3448_v52 = vld [vmem:[%s13110_s17 + $0x560] sm:$0xff]  ;;  %v3445_v53 = vld [vmem:[%s13110_s17 + $0x548] sm:$0xff] }
 0x563   : > { %v10463_v57 = vcombine.high %v3444_v51, %v3448_v52  ;;  %v10462_v63 = vcombine.low %v3444_v51, %v3448_v52  ;;  %v10464_v0 = vcombine.low %v3445_v53, %v3449_v25  ;;  %v3500_v8 = vld [vmem:[%s13110_s17 + $0x700] sm:$0xff] }
 0x565   : > { %6382 = vmatpush1.bf16.msra.mxu0 %v10398_v58  ;;  %6546 = vmatpush1.bf16.msra.mxu1 %v10400_v59  ;;  %v10465_v58 = vcombine.high %v3445_v53, %v3449_v25  ;;  %v3452_v59 = vld [vmem:[%s13110_s17 + $0x580] sm:$0xff] }
 0x566   : > { %6383 = vmatprep.subr.bf16.mxu0 %v10407_v31  ;;  %6547 = vmatprep.subr.bf16.mxu1 %v10409_v60  ;;  %v3456_v31 = vld [vmem:[%s13110_s17 + $0x5a0] sm:$0xff]  ;;  %v3453_v60 = vld [vmem:[%s13110_s17 + $0x588] sm:$0xff] }
 0x567   : > { %v10471_v1 = vcombine.high %v3452_v59, %v3456_v31  ;;  %v10470_v10 = vcombine.low %v3452_v59, %v3456_v31  ;;  %v10472_v11 = vcombine.low %v3453_v60, %v3457_v61  ;;  %v3508_v25 = vld [vmem:[%s13110_s17 + $0x740] sm:$0xff] }
 0x569   : > { %6384 = vmatpush1.bf16.msra.mxu0 %v10406_v2  ;;  %6548 = vmatpush1.bf16.msra.mxu1 %v10408_v5  ;;  %v10473_v2 = vcombine.high %v3453_v60, %v3457_v61  ;;  %v3460_v5 = vld [vmem:[%s13110_s17 + $0x5c0] sm:$0xff] }
 0x56a   : > { %6385 = vmatprep.subr.bf16.mxu0 %v10415_v3  ;;  %6549 = vmatprep.subr.bf16.mxu1 %v10417_v4  ;;  %v3464_v3 = vld [vmem:[%s13110_s17 + $0x5e0] sm:$0xff]  ;;  %v3461_v4 = vld [vmem:[%s13110_s17 + $0x5c8] sm:$0xff] }
 0x56b   : > { %v10479_v12 = vcombine.high %v3460_v5, %v3464_v3  ;;  %v10478_v18 = vcombine.low %v3460_v5, %v3464_v3  ;;  %v10480_v19 = vcombine.low %v3461_v4, %v3465_v7  ;;  %v3516_v61 = vld [vmem:[%s13110_s17 + $0x780] sm:$0xff] }
 0x56d   : > { %6386 = vmatpush1.bf16.msra.mxu0 %v10414_v13  ;;  %6550 = vmatpush1.bf16.msra.mxu1 %v10416_v15  ;;  %v10481_v13 = vcombine.high %v3461_v4, %v3465_v7  ;;  %v3472_v15 = vld [vmem:[%s13110_s17 + $0x620] sm:$0xff] }
 0x56e   : > { %6396 = vmatprep.subr.bf16.mxu0 %v10423_v16  ;;  %6560 = vmatprep.subr.bf16.mxu1 %v10425_v17  ;;  %v3469_v16 = vld [vmem:[%s13110_s17 + $0x608] sm:$0xff]  ;;  %v10487_v21 = vcombine.high %v3468_v14, %v3472_v15  ;;  %v3524_v7 = vld [vmem:[%s13110_s17 + $0x7c0] sm:$0xff] }
 0x56f   : > { %v3473_v17 = vld [vmem:[%s13110_s17 + $0x628] sm:$0xff] }
 0x570   : > { %6388 = vmatmul.mubr.bf16.vlgmr.msra.gmra.mrb[0].mxu0 %v14045_v20  ;;  %6552 = vmatmul.mubr.bf16.vlgmr.msra.gmra.mrb[0].mxu1 %v14045_v20  ;;  %v10489_v22 = vcombine.high %v3469_v16, %v3473_v17  ;;  %v10488_v29 = vcombine.low %v3469_v16, %v3473_v17  ;;  %v3532_v17 = vld [vmem:[%s13110_s17 + $0x800] sm:$0xff] }
 0x571   : > { %6397 = vmatpush1.bf16.msra.mxu0 %v10422_v48  ;;  %6561 = vmatpush1.bf16.msra.mxu1 %v10424_v24  ;;  %v3480_v48 = vld [vmem:[%s13110_s17 + $0x660] sm:$0xff]  ;;  %v3477_v24 = vld [vmem:[%s13110_s17 + $0x648] sm:$0xff] }
 0x572   : > { %6398 = vmatprep.subr.bf16.mxu0 %v10431_v27  ;;  %6562 = vmatprep.subr.bf16.mxu1 %v10433_v28  ;;  %v3481_v27 = vld [vmem:[%s13110_s17 + $0x668] sm:$0xff]  ;;  %v10486_v28 = vcombine.low %v3468_v14, %v3472_v15  ;;  %v10495_v30 = vcombine.high %v3476_v23, %v3480_v48 }
 0x573   : > { %6428 = vmatprep.mubr.bf16.mxu0 %v14051_v32  ;;  %6592 = vmatprep.mubr.bf16.mxu1 %v14051_v32  ;;  %v10497_v33 = vcombine.high %v3477_v24, %v3481_v27  ;;  %v10496_v40 = vcombine.low %v3477_v24, %v3481_v27 }
 0x575   : > { %6399 = vmatpush1.bf16.msra.mxu0 %v10430_v36  ;;  %6563 = vmatpush1.bf16.msra.mxu1 %v10432_v37  ;;  %v3488_v36 = vld [vmem:[%s13110_s17 + $0x6a0] sm:$0xff]  ;;  %v3485_v37 = vld [vmem:[%s13110_s17 + $0x688] sm:$0xff] }
 0x576   : > { %6400 = vmatprep.subr.bf16.mxu0 %v10439_v38  ;;  %6564 = vmatprep.subr.bf16.mxu1 %v10441_v39  ;;  %v3489_v38 = vld [vmem:[%s13110_s17 + $0x6a8] sm:$0xff]  ;;  %v10494_v39 = vcombine.low %v3476_v23, %v3480_v48  ;;  %v10503_v49 = vcombine.high %v3484_v35, %v3488_v36 }
 0x577   : > { %v10505_v41 = vcombine.high %v3485_v37, %v3489_v38  ;;  %v10504_v44 = vcombine.low %v3485_v37, %v3489_v38  ;;  %v3270_v23 = vld [vmem:[#allocation2 + $0x10] sm:$0xff] }
 0x579   : > { %6401 = vmatpush1.bf16.msra.mxu0 %v10438_v42  ;;  %6565 = vmatpush1.bf16.msra.mxu1 %v10440_v56  ;;  %v3496_v42 = vld [vmem:[%s13110_s17 + $0x6e0] sm:$0xff]  ;;  %v3493_v56 = vld [vmem:[%s13110_s17 + $0x6c8] sm:$0xff] }
 0x57a   : > { %6402 = vmatprep.subr.bf16.mxu0 %v10447_v6  ;;  %6566 = vmatprep.subr.bf16.mxu1 %v10449_v43  ;;  %v3497_v6 = vld [vmem:[%s13110_s17 + $0x6e8] sm:$0xff]  ;;  %v10502_v43 = vcombine.low %v3484_v35, %v3488_v36  ;;  %v10511_v34 = vcombine.high %v3492_v9, %v3496_v42 }
 0x57b   : > { %v10513_v45 = vcombine.high %v3493_v56, %v3497_v6  ;;  %v10512_v51 = vcombine.low %v3493_v56, %v3497_v6  ;;  %v3545_v35 = vld [vmem:[%s13110_s17 + $0x868] sm:$0xff] }
 0x57c   : > { %v3273_v36 = vld [vmem:[#allocation2 + $0x28] sm:$0xff] }
 0x57d   : > { %6403 = vmatpush1.bf16.msra.mxu0 %v10446_v26  ;;  %6567 = vmatpush1.bf16.msra.mxu1 %v10448_v46  ;;  %v3504_v26 = vld [vmem:[%s13110_s17 + $0x720] sm:$0xff]  ;;  %v3501_v46 = vld [vmem:[%s13110_s17 + $0x708] sm:$0xff] }
 0x57e   : > { %6404 = vmatprep.subr.bf16.mxu0 %v10455_v47  ;;  %6568 = vmatprep.subr.bf16.mxu1 %v10457_v50  ;;  %v3505_v47 = vld [vmem:[%s13110_s17 + $0x728] sm:$0xff]  ;;  %v10510_v50 = vcombine.low %v3492_v9, %v3496_v42  ;;  %v10519_v52 = vcombine.high %v3500_v8, %v3504_v26  ;;  %v14123_v9 = vpack.c.bf16 %v3273_v36, %v3273_v36 }
 0x57f   : > { %v10521_v53 = vcombine.high %v3501_v46, %v3505_v47  ;;  %v10520_v59 = vcombine.low %v3501_v46, %v3505_v47  ;;  %v3549_v42 = vld [vmem:[%s13110_s17 + $0x888] sm:$0xff] }
 0x580   : > { %v3553_v56 = vld [vmem:[%s13110_s17 + $0x8a8] sm:$0xff] }
 0x581   : > { %6405 = vmatpush1.bf16.msra.mxu0 %v10454_v54  ;;  %6569 = vmatpush1.bf16.msra.mxu1 %v10456_v55  ;;  %v3512_v54 = vld [vmem:[%s13110_s17 + $0x760] sm:$0xff]  ;;  %v3509_v55 = vld [vmem:[%s13110_s17 + $0x748] sm:$0xff] }
 0x582   : > { %6406 = vmatprep.subr.bf16.mxu0 %v10463_v57  ;;  %6570 = vmatprep.subr.bf16.mxu1 %v10465_v58  ;;  %v3513_v57 = vld [vmem:[%s13110_s17 + $0x768] sm:$0xff]  ;;  %v10518_v58 = vcombine.low %v3500_v8, %v3504_v26  ;;  %v10527_v31 = vcombine.high %v3508_v25, %v3512_v54  ;;  %v3560_v8 = vld [vmem:[%s13110_s17 + $0x8e0] sm:$0xff] }
 0x583   : > { %v10529_v60 = vcombine.high %v3509_v55, %v3513_v57  ;;  %v10528_v5 = vcombine.low %v3509_v55, %v3513_v57  ;;  %v3557_v26 = vld [vmem:[%s13110_s17 + $0x8c8] sm:$0xff] }
 0x584   : > { %v3561_v46 = vld [vmem:[%s13110_s17 + $0x8e8] sm:$0xff] }
 0x585   : > { %6407 = vmatpush1.bf16.msra.mxu0 %v10462_v63  ;;  %6571 = vmatpush1.bf16.msra.mxu1 %v10464_v0  ;;  %v3520_v63 = vld [vmem:[%s13110_s17 + $0x7a0] sm:$0xff]  ;;  %v3517_v0 = vld [vmem:[%s13110_s17 + $0x788] sm:$0xff] }
 0x586   : > { %6408 = vmatprep.subr.bf16.mxu0 %v10471_v1  ;;  %6572 = vmatprep.subr.bf16.mxu1 %v10473_v2  ;;  %v3521_v1 = vld [vmem:[%s13110_s17 + $0x7a8] sm:$0xff]  ;;  %v10526_v2 = vcombine.low %v3508_v25, %v3512_v54  ;;  %v10535_v3 = vcombine.high %v3516_v61, %v3520_v63  ;;  %v3568_v25 = vld [vmem:[%s13110_s17 + $0x920] sm:$0xff] }
 0x587   : > { %v10537_v4 = vcombine.high %v3517_v0, %v3521_v1  ;;  %v10536_v14 = vcombine.low %v3517_v0, %v3521_v1  ;;  %v3565_v54 = vld [vmem:[%s13110_s17 + $0x908] sm:$0xff] }
 0x588   : > { %v3569_v55 = vld [vmem:[%s13110_s17 + $0x928] sm:$0xff] }
 0x589   : > { %6409 = vmatpush1.bf16.msra.mxu0 %v10470_v10  ;;  %6573 = vmatpush1.bf16.msra.mxu1 %v10472_v11  ;;  %v3528_v10 = vld [vmem:[%s13110_s17 + $0x7e0] sm:$0xff]  ;;  %v3525_v11 = vld [vmem:[%s13110_s17 + $0x7c8] sm:$0xff] }
 0x58a   : > { %6410 = vmatprep.subr.bf16.mxu0 %v10479_v12  ;;  %6574 = vmatprep.subr.bf16.mxu1 %v10481_v13  ;;  %v3529_v12 = vld [vmem:[%s13110_s17 + $0x7e8] sm:$0xff]  ;;  %v10534_v13 = vcombine.low %v3516_v61, %v3520_v63  ;;  %v10543_v15 = vcombine.high %v3524_v7, %v3528_v10  ;;  %v3576_v61 = vld [vmem:[%s13110_s17 + $0x960] sm:$0xff] }
 0x58b   : > { %v10545_v16 = vcombine.high %v3525_v11, %v3529_v12  ;;  %v10544_v48 = vcombine.low %v3525_v11, %v3529_v12  ;;  %v3573_v63 = vld [vmem:[%s13110_s17 + $0x948] sm:$0xff] }
 0x58c   : > { %v3577_v0 = vld [vmem:[%s13110_s17 + $0x968] sm:$0xff] }
 0x58d   : > { %6411 = vmatpush1.bf16.msra.mxu0 %v10478_v18  ;;  %6575 = vmatpush1.bf16.msra.mxu1 %v10480_v19  ;;  %v3536_v18 = vld [vmem:[%s13110_s17 + $0x820] sm:$0xff]  ;;  %v3533_v19 = vld [vmem:[%s13110_s17 + $0x808] sm:$0xff] }
 0x58e   : > { %6412 = vmatprep.subr.bf16.mxu0 %v10487_v21  ;;  %6576 = vmatprep.subr.bf16.mxu1 %v10489_v22  ;;  %v3537_v21 = vld [vmem:[%s13110_s17 + $0x828] sm:$0xff]  ;;  %v10542_v22 = vcombine.low %v3524_v7, %v3528_v10  ;;  %v10551_v24 = vcombine.high %v3532_v17, %v3536_v18  ;;  %v10550_v37 = vcombine.low %v3532_v17, %v3536_v18  ;;  %v3584_v7 = vld [vmem:[%s13110_s17 + $0x9a0] sm:$0xff] }
 0x58f   : > { %v10553_v27 = vcombine.high %v3533_v19, %v3537_v21  ;;  %v10552_v38 = vcombine.low %v3533_v19, %v3537_v21  ;;  %v3581_v10 = vld [vmem:[%s13110_s17 + $0x988] sm:$0xff]  ;;  %v3592_v17 = vld [vmem:[%s13110_s17 + $0x9e0] sm:$0xff] }
 0x590   : > { %v3585_v11 = vld [vmem:[%s13110_s17 + $0x9a8] sm:$0xff] }
 0x591   : > { %6413 = vmatpush1.bf16.msra.mxu0 %v10486_v28  ;;  %6577 = vmatpush1.bf16.msra.mxu1 %v10488_v29  ;;  %v3540_v28 = vld [vmem:[%s13110_s17 + $0x840] sm:$0xff]  ;;  %v3589_v18 = vld [vmem:[%s13110_s17 + $0x9c8] sm:$0xff] }
 0x592   : > { %6414 = vmatprep.subr.bf16.mxu0 %v10495_v30  ;;  %6578 = vmatprep.subr.bf16.mxu1 %v10497_v33  ;;  %v3544_v29 = vld [vmem:[%s13110_s17 + $0x860] sm:$0xff]  ;;  %v14117_v30 = vpack.c.bf16 %v3270_v23, %v3270_v23  ;;  %v3541_v33 = vld [vmem:[%s13110_s17 + $0x848] sm:$0xff] }
 0x593   : > { %v10558_v6 = vcombine.low %v3540_v28, %v3544_v29  ;;  %v3593_v19 = vld [vmem:[%s13110_s17 + $0x9e8] sm:$0xff] }
 0x595   : > { %6415 = vmatpush1.bf16.msra.mxu0 %v10494_v39  ;;  %6579 = vmatpush1.bf16.msra.mxu1 %v10496_v40  ;;  %v10559_v39 = vcombine.high %v3540_v28, %v3544_v29  ;;  %v10561_v40 = vcombine.high %v3541_v33, %v3545_v35  ;;  %v3597_v28 = vld [vmem:[%s13110_s17 + $0xa08] sm:$0xff] }
 0x596   : > { %6416 = vmatprep.subr.bf16.mxu0 %v10503_v49  ;;  %6580 = vmatprep.subr.bf16.mxu1 %v10505_v41  ;;  %v3548_v49 = vld [vmem:[%s13110_s17 + $0x880] sm:$0xff]  ;;  %v3601_v29 = vld [vmem:[%s13110_s17 + $0xa28] sm:$0xff] }
 0x597   : > { %v3552_v41 = vld [vmem:[%s13110_s17 + $0x8a0] sm:$0xff] }
 0x598   : > { %v10566_v47 = vcombine.low %v3548_v49, %v3552_v41 }
 0x599   : > { %6417 = vmatpush1.bf16.msra.mxu0 %v10502_v43  ;;  %6581 = vmatpush1.bf16.msra.mxu1 %v10504_v44  ;;  %v10560_v43 = vcombine.low %v3541_v33, %v3545_v35  ;;  %v10567_v44 = vcombine.high %v3548_v49, %v3552_v41  ;;  %v10608_v35 = vcombine.low %v3589_v18, %v3593_v19  ;;  %v3609_v49 = vld [vmem:[%s13110_s17 + $0xa68] sm:$0xff] }
 0x59a   : > { %6418 = vmatprep.subr.bf16.mxu0 %v10511_v34  ;;  %6582 = vmatprep.subr.bf16.mxu1 %v10513_v45  ;;  %v10569_v34 = vcombine.high %v3549_v42, %v3553_v56  ;;  %v3556_v45 = vld [vmem:[%s13110_s17 + $0x8c0] sm:$0xff] }
 0x59b   : > { %v10574_v57 = vcombine.low %v3556_v45, %v3560_v8 }
 0x59d   : > { %6419 = vmatpush1.bf16.msra.mxu0 %v10510_v50  ;;  %6583 = vmatpush1.bf16.msra.mxu1 %v10512_v51  ;;  %v10568_v50 = vcombine.low %v3549_v42, %v3553_v56  ;;  %v10575_v51 = vcombine.high %v3556_v45, %v3560_v8  ;;  %v10616_v42 = vcombine.low %v3597_v28, %v3601_v29  ;;  %v3617_v45 = vld [vmem:[%s13110_s17 + $0xaa8] sm:$0xff] }
 0x59e   : > { %6420 = vmatprep.subr.bf16.mxu0 %v10519_v52  ;;  %6584 = vmatprep.subr.bf16.mxu1 %v10521_v53  ;;  %v10577_v52 = vcombine.high %v3557_v26, %v3561_v46  ;;  %v3564_v53 = vld [vmem:[%s13110_s17 + $0x900] sm:$0xff] }
 0x59f   : > { %v10582_v1 = vcombine.low %v3564_v53, %v3568_v25 }
 0x5a1   : > { %6421 = vmatpush1.bf16.msra.mxu0 %v10518_v58  ;;  %6585 = vmatpush1.bf16.msra.mxu1 %v10520_v59  ;;  %v10576_v58 = vcombine.low %v3557_v26, %v3561_v46  ;;  %v10583_v59 = vcombine.high %v3564_v53, %v3568_v25  ;;  %v3625_v53 = vld [vmem:[%s13110_s17 + $0xae8] sm:$0xff] }
 0x5a2   : > { %6422 = vmatprep.subr.bf16.mxu0 %v10527_v31  ;;  %6586 = vmatprep.subr.bf16.mxu1 %v10529_v60  ;;  %v10585_v31 = vcombine.high %v3565_v54, %v3569_v55  ;;  %v3572_v60 = vld [vmem:[%s13110_s17 + $0x940] sm:$0xff] }
 0x5a3   : > { %v10590_v12 = vcombine.low %v3572_v60, %v3576_v61 }
 0x5a5   : > { %6423 = vmatpush1.bf16.msra.mxu0 %v10526_v2  ;;  %6587 = vmatpush1.bf16.msra.mxu1 %v10528_v5  ;;  %v10584_v2 = vcombine.low %v3565_v54, %v3569_v55  ;;  %v10591_v5 = vcombine.high %v3572_v60, %v3576_v61  ;;  %v3633_v60 = vld [vmem:[%s13110_s17 + $0xb28] sm:$0xff] }
 0x5a6   : > { %6424 = vmatprep.subr.bf16.mxu0 %v10535_v3  ;;  %6588 = vmatprep.subr.bf16.mxu1 %v10537_v4  ;;  %v10593_v3 = vcombine.high %v3573_v63, %v3577_v0  ;;  %v3580_v4 = vld [vmem:[%s13110_s17 + $0x980] sm:$0xff] }
 0x5a7   : > { %v10598_v21 = vcombine.low %v3580_v4, %v3584_v7 }
 0x5a9   : > { %6425 = vmatpush1.bf16.msra.mxu0 %v10534_v13  ;;  %6589 = vmatpush1.bf16.msra.mxu1 %v10536_v14  ;;  %v10592_v13 = vcombine.low %v3573_v63, %v3577_v0  ;;  %v10599_v14 = vcombine.high %v3580_v4, %v3584_v7  ;;  %v3641_v4 = vld [vmem:[%s13110_s17 + $0xb68] sm:$0xff] }
 0x5aa   : > { %6426 = vmatprep.subr.bf16.mxu0 %v10543_v15  ;;  %6590 = vmatprep.subr.bf16.mxu1 %v10545_v16  ;;  %v10601_v15 = vcombine.high %v3581_v10, %v3585_v11  ;;  %v3588_v16 = vld [vmem:[%s13110_s17 + $0x9c0] sm:$0xff] }
 0x5ab   : > { %v10607_v23 = vcombine.high %v3588_v16, %v3592_v17  ;;  %v10606_v33 = vcombine.low %v3588_v16, %v3592_v17  ;;  %v3649_v16 = vld [vmem:[%s13110_s17 + $0xba8] sm:$0xff] }
 0x5ad   : > { %6427 = vmatpush1.bf16.msra.mxu0 %v10542_v22  ;;  %6591 = vmatpush1.bf16.msra.mxu1 %v10544_v48  ;;  %v10600_v22 = vcombine.low %v3581_v10, %v3585_v11  ;;  %v10609_v48 = vcombine.high %v3589_v18, %v3593_v19 }
 0x5ae   : > { %6437 = vmatprep.subr.bf16.mxu0 %v10551_v24  ;;  %6601 = vmatprep.subr.bf16.mxu1 %v10553_v27  ;;  %v3596_v24 = vld [vmem:[%s13110_s17 + $0xa00] sm:$0xff] }
 0x5af   : > { %v3600_v27 = vld [vmem:[%s13110_s17 + $0xa20] sm:$0xff] }
 0x5b0   : > { %6429 = vmatmul.mubr.bf16.vlgmr.msra.gmra.mrb[0].mxu0 %v14117_v30  ;;  %6593 = vmatmul.mubr.bf16.vlgmr.msra.gmra.mrb[0].mxu1 %v14117_v30  ;;  %v10615_v36 = vcombine.high %v3596_v24, %v3600_v27  ;;  %v10614_v41 = vcombine.low %v3596_v24, %v3600_v27  ;;  %v3657_v24 = vld [vmem:[%s13110_s17 + $0xbe8] sm:$0xff] }
 0x5b1   : > { %6438 = vmatpush1.bf16.msra.mxu0 %v10550_v37  ;;  %6602 = vmatpush1.bf16.msra.mxu1 %v10552_v38  ;;  %v10617_v37 = vcombine.high %v3597_v28, %v3601_v29  ;;  %v3604_v38 = vld [vmem:[%s13110_s17 + $0xa40] sm:$0xff] }
 0x5b2   : > { %6439 = vmatprep.subr.bf16.mxu0 %v10559_v39  ;;  %6603 = vmatprep.subr.bf16.mxu1 %v10561_v40  ;;  %v3608_v39 = vld [vmem:[%s13110_s17 + $0xa60] sm:$0xff]  ;;  %v3605_v40 = vld [vmem:[%s13110_s17 + $0xa48] sm:$0xff] }
 0x5b3   : > { %6469 = vmatprep.mubr.bf16.mxu0 %v14123_v9  ;;  %6633 = vmatprep.mubr.bf16.mxu1 %v14123_v9  ;;  %v10623_v56 = vcombine.high %v3604_v38, %v3608_v39  ;;  %v10622_v8 = vcombine.low %v3604_v38, %v3608_v39  ;;  %v10624_v26 = vcombine.low %v3605_v40, %v3609_v49  ;;  %v3665_v38 = vld [vmem:[%s13110_s17 + $0xc28] sm:$0xff] }
 0x5b5   : > { %6440 = vmatpush1.bf16.msra.mxu0 %v10558_v6  ;;  %6604 = vmatpush1.bf16.msra.mxu1 %v10560_v43  ;;  %v10625_v6 = vcombine.high %v3605_v40, %v3609_v49  ;;  %v3612_v43 = vld [vmem:[%s13110_s17 + $0xa80] sm:$0xff] }
 0x5b6   : > { %6441 = vmatprep.subr.bf16.mxu0 %v10567_v44  ;;  %6605 = vmatprep.subr.bf16.mxu1 %v10569_v34  ;;  %v3616_v44 = vld [vmem:[%s13110_s17 + $0xaa0] sm:$0xff]  ;;  %v3613_v34 = vld [vmem:[%s13110_s17 + $0xa88] sm:$0xff] }
 0x5b7   : > { %v10631_v46 = vcombine.high %v3612_v43, %v3616_v44  ;;  %v10630_v25 = vcombine.low %v3612_v43, %v3616_v44  ;;  %v10632_v54 = vcombine.low %v3613_v34, %v3617_v45  ;;  %v3272_v40 = vld [vmem:[#allocation2 + $0x20] sm:$0xff]  ;;  %v3669_v44 = vld [vmem:[%s13110_s17 + $0xc48] sm:$0xff] }
 0x5b8   : > { %v14189_v43 = vpack.c.bf16 %v3272_v40, %v3272_v40 }
 0x5b9   : > { %6442 = vmatpush1.bf16.msra.mxu0 %v10566_v47  ;;  %6606 = vmatpush1.bf16.msra.mxu1 %v10568_v50  ;;  %v10633_v47 = vcombine.high %v3613_v34, %v3617_v45  ;;  %v3620_v50 = vld [vmem:[%s13110_s17 + $0xac0] sm:$0xff]  ;;  %v3673_v34 = vld [vmem:[%s13110_s17 + $0xc68] sm:$0xff]  ;;  %v3275_v45 = vld [vmem:[#allocation2 + $0x38] sm:$0xff] }
 0x5ba   : > { %6443 = vmatprep.subr.bf16.mxu0 %v10575_v51  ;;  %6607 = vmatprep.subr.bf16.mxu1 %v10577_v52  ;;  %v3624_v51 = vld [vmem:[%s13110_s17 + $0xae0] sm:$0xff]  ;;  %v3621_v52 = vld [vmem:[%s13110_s17 + $0xac8] sm:$0xff] }
 0x5bb   : > { %v10639_v55 = vcombine.high %v3620_v50, %v3624_v51  ;;  %v10638_v61 = vcombine.low %v3620_v50, %v3624_v51  ;;  %v10640_v63 = vcombine.low %v3621_v52, %v3625_v53  ;;  %v3676_v50 = vld [vmem:[%s13110_s17 + $0xc80] sm:$0xff] }
 0x5bc   : > { %v3680_v51 = vld [vmem:[%s13110_s17 + $0xca0] sm:$0xff] }
 0x5bd   : > { %6444 = vmatpush1.bf16.msra.mxu0 %v10574_v57  ;;  %6608 = vmatpush1.bf16.msra.mxu1 %v10576_v58  ;;  %v10641_v57 = vcombine.high %v3621_v52, %v3625_v53  ;;  %v3628_v58 = vld [vmem:[%s13110_s17 + $0xb00] sm:$0xff]  ;;  %v14195_v52 = vpack.c.bf16 %v3275_v45, %v3275_v45  ;;  %v3677_v53 = vld [vmem:[%s13110_s17 + $0xc88] sm:$0xff] }
 0x5be   : > { %6445 = vmatprep.subr.bf16.mxu0 %v10583_v59  ;;  %6609 = vmatprep.subr.bf16.mxu1 %v10585_v31  ;;  %v3632_v59 = vld [vmem:[%s13110_s17 + $0xb20] sm:$0xff]  ;;  %v3629_v31 = vld [vmem:[%s13110_s17 + $0xb08] sm:$0xff] }
 0x5bf   : > { %v10647_v0 = vcombine.high %v3628_v58, %v3632_v59  ;;  %v10646_v7 = vcombine.low %v3628_v58, %v3632_v59  ;;  %v10648_v10 = vcombine.low %v3629_v31, %v3633_v60  ;;  %v3684_v59 = vld [vmem:[%s13110_s17 + $0xcc0] sm:$0xff] }
 0x5c1   : > { %6446 = vmatpush1.bf16.msra.mxu0 %v10582_v1  ;;  %6610 = vmatpush1.bf16.msra.mxu1 %v10584_v2  ;;  %v10649_v1 = vcombine.high %v3629_v31, %v3633_v60  ;;  %v3636_v2 = vld [vmem:[%s13110_s17 + $0xb40] sm:$0xff]  ;;  %v3685_v60 = vld [vmem:[%s13110_s17 + $0xcc8] sm:$0xff] }
 0x5c2   : > { %6447 = vmatprep.subr.bf16.mxu0 %v10591_v5  ;;  %6611 = vmatprep.subr.bf16.mxu1 %v10593_v3  ;;  %v3640_v5 = vld [vmem:[%s13110_s17 + $0xb60] sm:$0xff]  ;;  %v3637_v3 = vld [vmem:[%s13110_s17 + $0xb48] sm:$0xff] }
 0x5c3   : > { %v10655_v11 = vcombine.high %v3636_v2, %v3640_v5  ;;  %v10654_v17 = vcombine.low %v3636_v2, %v3640_v5  ;;  %v10656_v18 = vcombine.low %v3637_v3, %v3641_v4  ;;  %v3688_v31 = vld [vmem:[%s13110_s17 + $0xce0] sm:$0xff] }
 0x5c4   : > { %v3692_v5 = vld [vmem:[%s13110_s17 + $0xd00] sm:$0xff] }
 0x5c5   : > { %6448 = vmatpush1.bf16.msra.mxu0 %v10590_v12  ;;  %6612 = vmatpush1.bf16.msra.mxu1 %v10592_v13  ;;  %v10657_v12 = vcombine.high %v3637_v3, %v3641_v4  ;;  %v3644_v13 = vld [vmem:[%s13110_s17 + $0xb80] sm:$0xff]  ;;  %v3693_v4 = vld [vmem:[%s13110_s17 + $0xd08] sm:$0xff] }
 0x5c6   : > { %6449 = vmatprep.subr.bf16.mxu0 %v10599_v14  ;;  %6613 = vmatprep.subr.bf16.mxu1 %v10601_v15  ;;  %v3648_v14 = vld [vmem:[%s13110_s17 + $0xba0] sm:$0xff]  ;;  %v3645_v15 = vld [vmem:[%s13110_s17 + $0xb88] sm:$0xff] }
 0x5c7   : > { %v10663_v19 = vcombine.high %v3644_v13, %v3648_v14  ;;  %v10662_v27 = vcombine.low %v3644_v13, %v3648_v14  ;;  %v10664_v28 = vcombine.low %v3645_v15, %v3649_v16  ;;  %v3696_v3 = vld [vmem:[%s13110_s17 + $0xd20] sm:$0xff] }
 0x5c8   : > { %v3700_v14 = vld [vmem:[%s13110_s17 + $0xd40] sm:$0xff] }
 0x5c9   : > { %6450 = vmatpush1.bf16.msra.mxu0 %v10598_v21  ;;  %6614 = vmatpush1.bf16.msra.mxu1 %v10600_v22  ;;  %v10665_v21 = vcombine.high %v3645_v15, %v3649_v16  ;;  %v3652_v22 = vld [vmem:[%s13110_s17 + $0xbc0] sm:$0xff]  ;;  %v3701_v16 = vld [vmem:[%s13110_s17 + $0xd48] sm:$0xff] }
 0x5ca   : > { %6451 = vmatprep.subr.bf16.mxu0 %v10607_v23  ;;  %6615 = vmatprep.subr.bf16.mxu1 %v10609_v48  ;;  %v3656_v23 = vld [vmem:[%s13110_s17 + $0xbe0] sm:$0xff]  ;;  %v3653_v48 = vld [vmem:[%s13110_s17 + $0xbc8] sm:$0xff] }
 0x5cb   : > { %v10671_v29 = vcombine.high %v3652_v22, %v3656_v23  ;;  %v10670_v39 = vcombine.low %v3652_v22, %v3656_v23  ;;  %v10672_v49 = vcombine.low %v3653_v48, %v3657_v24  ;;  %v3704_v15 = vld [vmem:[%s13110_s17 + $0xd60] sm:$0xff] }
 0x5cc   : > { %v3708_v23 = vld [vmem:[%s13110_s17 + $0xd80] sm:$0xff] }
 0x5cd   : > { %6452 = vmatpush1.bf16.msra.mxu0 %v10606_v33  ;;  %6616 = vmatpush1.bf16.msra.mxu1 %v10608_v35  ;;  %v10673_v33 = vcombine.high %v3653_v48, %v3657_v24  ;;  %v3660_v35 = vld [vmem:[%s13110_s17 + $0xc00] sm:$0xff]  ;;  %v3709_v24 = vld [vmem:[%s13110_s17 + $0xd88] sm:$0xff] }
 0x5ce   : > { %6453 = vmatprep.subr.bf16.mxu0 %v10615_v36  ;;  %6617 = vmatprep.subr.bf16.mxu1 %v10617_v37  ;;  %v3664_v36 = vld [vmem:[%s13110_s17 + $0xc20] sm:$0xff]  ;;  %v3661_v37 = vld [vmem:[%s13110_s17 + $0xc08] sm:$0xff] }
 0x5cf   : > { %v3712_v48 = vld [vmem:[%s13110_s17 + $0xda0] sm:$0xff] }
 0x5d0   : > { %v10726_v40 = vcombine.low %v3708_v23, %v3712_v48 }
 0x5d1   : > { %6454 = vmatpush1.bf16.msra.mxu0 %v10614_v41  ;;  %6618 = vmatpush1.bf16.msra.mxu1 %v10616_v42  ;;  %v10679_v41 = vcombine.high %v3660_v35, %v3664_v36  ;;  %v10681_v42 = vcombine.high %v3661_v37, %v3665_v38 }
 0x5d2   : > { %6455 = vmatprep.subr.bf16.mxu0 %v10623_v56  ;;  %6619 = vmatprep.subr.bf16.mxu1 %v10625_v6  ;;  %v3668_v56 = vld [vmem:[%s13110_s17 + $0xc40] sm:$0xff] }
 0x5d3   : > { %v3672_v6 = vld [vmem:[%s13110_s17 + $0xc60] sm:$0xff] }
 0x5d5   : > { %6456 = vmatpush1.bf16.msra.mxu0 %v10622_v8  ;;  %6620 = vmatpush1.bf16.msra.mxu1 %v10624_v26  ;;  %v10678_v8 = vcombine.low %v3660_v35, %v3664_v36  ;;  %v10680_v26 = vcombine.low %v3661_v37, %v3665_v38  ;;  %v3716_v36 = vld [vmem:[%s13110_s17 + $0xdc0] sm:$0xff]  ;;  %v3717_v38 = vld [vmem:[%s13110_s17 + $0xdc8] sm:$0xff] }
 0x5d6   : > { %6457 = vmatprep.subr.bf16.mxu0 %v10631_v46  ;;  %6621 = vmatprep.subr.bf16.mxu1 %v10633_v47  ;;  %v10687_v46 = vcombine.high %v3668_v56, %v3672_v6  ;;  %v10689_v47 = vcombine.high %v3669_v44, %v3673_v34  ;;  %v3720_v37 = vld [vmem:[%s13110_s17 + $0xde0] sm:$0xff] }
 0x5d7   : > { %v10734_v45 = vcombine.low %v3716_v36, %v3720_v37 }
 0x5d9   : > { %6458 = vmatpush1.bf16.msra.mxu0 %v10630_v25  ;;  %6622 = vmatpush1.bf16.msra.mxu1 %v10632_v54  ;;  %v3681_v25 = vld [vmem:[%s13110_s17 + $0xca8] sm:$0xff]  ;;  %v10686_v54 = vcombine.low %v3668_v56, %v3672_v6  ;;  %v3724_v56 = vld [vmem:[%s13110_s17 + $0xe00] sm:$0xff] }
 0x5da   : > { %6459 = vmatprep.subr.bf16.mxu0 %v10639_v55  ;;  %6623 = vmatprep.subr.bf16.mxu1 %v10641_v57  ;;  %v10688_v55 = vcombine.low %v3669_v44, %v3673_v34  ;;  %v10695_v57 = vcombine.high %v3676_v50, %v3680_v51  ;;  %v10697_v58 = vcombine.high %v3677_v53, %v3681_v25  ;;  %v3728_v6 = vld [vmem:[%s13110_s17 + $0xe20] sm:$0xff]  ;;  %v3725_v44 = vld [vmem:[%s13110_s17 + $0xe08] sm:$0xff] }
 0x5db   : > { %v3729_v34 = vld [vmem:[%s13110_s17 + $0xe28] sm:$0xff] }
 0x5dd   : > { %6460 = vmatpush1.bf16.msra.mxu0 %v10638_v61  ;;  %6624 = vmatpush1.bf16.msra.mxu1 %v10640_v63  ;;  %v3689_v61 = vld [vmem:[%s13110_s17 + $0xce8] sm:$0xff]  ;;  %v10694_v63 = vcombine.low %v3676_v50, %v3680_v51  ;;  %v3736_v50 = vld [vmem:[%s13110_s17 + $0xe60] sm:$0xff] }
 0x5de   : > { %6461 = vmatprep.subr.bf16.mxu0 %v10647_v0  ;;  %6625 = vmatprep.subr.bf16.mxu1 %v10649_v1  ;;  %v10696_v0 = vcombine.low %v3677_v53, %v3681_v25  ;;  %v10703_v1 = vcombine.high %v3684_v59, %v3688_v31  ;;  %v10705_v2 = vcombine.high %v3685_v60, %v3689_v61  ;;  %v3733_v51 = vld [vmem:[%s13110_s17 + $0xe48] sm:$0xff] }
 0x5df   : > { %v3737_v53 = vld [vmem:[%s13110_s17 + $0xe68] sm:$0xff]  ;;  %v10742_v25 = vcombine.low %v3724_v56, %v3728_v6 }
 0x5e1   : > { %6462 = vmatpush1.bf16.msra.mxu0 %v10646_v7  ;;  %6626 = vmatpush1.bf16.msra.mxu1 %v10648_v10  ;;  %v3697_v7 = vld [vmem:[%s13110_s17 + $0xd28] sm:$0xff]  ;;  %v10702_v10 = vcombine.low %v3684_v59, %v3688_v31  ;;  %v3744_v59 = vld [vmem:[%s13110_s17 + $0xea0] sm:$0xff] }
 0x5e2   : > { %6463 = vmatprep.subr.bf16.mxu0 %v10655_v11  ;;  %6627 = vmatprep.subr.bf16.mxu1 %v10657_v12  ;;  %v10704_v11 = vcombine.low %v3685_v60, %v3689_v61  ;;  %v10711_v12 = vcombine.high %v3692_v5, %v3696_v3  ;;  %v10713_v13 = vcombine.high %v3693_v4, %v3697_v7  ;;  %v3741_v31 = vld [vmem:[%s13110_s17 + $0xe88] sm:$0xff] }
 0x5e3   : > { %v3745_v60 = vld [vmem:[%s13110_s17 + $0xea8] sm:$0xff] }
 0x5e5   : > { %6464 = vmatpush1.bf16.msra.mxu0 %v10654_v17  ;;  %6628 = vmatpush1.bf16.msra.mxu1 %v10656_v18  ;;  %v3705_v17 = vld [vmem:[%s13110_s17 + $0xd68] sm:$0xff]  ;;  %v10710_v18 = vcombine.low %v3692_v5, %v3696_v3  ;;  %v3752_v5 = vld [vmem:[%s13110_s17 + $0xee0] sm:$0xff] }
 0x5e6   : > { %6465 = vmatprep.subr.bf16.mxu0 %v10663_v19  ;;  %6629 = vmatprep.subr.bf16.mxu1 %v10665_v21  ;;  %v10712_v19 = vcombine.low %v3693_v4, %v3697_v7  ;;  %v10719_v21 = vcombine.high %v3700_v14, %v3704_v15  ;;  %v10721_v22 = vcombine.high %v3701_v16, %v3705_v17  ;;  %v3749_v3 = vld [vmem:[%s13110_s17 + $0xec8] sm:$0xff] }
 0x5e7   : > { %v3753_v4 = vld [vmem:[%s13110_s17 + $0xee8] sm:$0xff] }
 0x5e9   : > { %6466 = vmatpush1.bf16.msra.mxu0 %v10662_v27  ;;  %6630 = vmatpush1.bf16.msra.mxu1 %v10664_v28  ;;  %v3713_v27 = vld [vmem:[%s13110_s17 + $0xda8] sm:$0xff]  ;;  %v10718_v28 = vcombine.low %v3700_v14, %v3704_v15  ;;  %v3760_v14 = vld [vmem:[%s13110_s17 + $0xf20] sm:$0xff] }
 0x5ea   : > { %6467 = vmatprep.subr.bf16.mxu0 %v10671_v29  ;;  %6631 = vmatprep.subr.bf16.mxu1 %v10673_v33  ;;  %v10720_v29 = vcombine.low %v3701_v16, %v3705_v17  ;;  %v10727_v33 = vcombine.high %v3708_v23, %v3712_v48  ;;  %v10729_v35 = vcombine.high %v3709_v24, %v3713_v27  ;;  %v3757_v15 = vld [vmem:[%s13110_s17 + $0xf08] sm:$0xff]  ;;  %v3768_v23 = vld [vmem:[%s13110_s17 + $0xf60] sm:$0xff] }
 0x5eb   : > { %v3761_v16 = vld [vmem:[%s13110_s17 + $0xf28] sm:$0xff] }
 0x5ec   : > { %v3765_v48 = vld [vmem:[%s13110_s17 + $0xf48] sm:$0xff] }
 0x5ed   : > { %6468 = vmatpush1.bf16.msra.mxu0 %v10670_v39  ;;  %6632 = vmatpush1.bf16.msra.mxu1 %v10672_v49  ;;  %v3721_v39 = vld [vmem:[%s13110_s17 + $0xde8] sm:$0xff]  ;;  %v10728_v49 = vcombine.low %v3709_v24, %v3713_v27 }
 0x5ee   : > { %6478 = vmatprep.subr.bf16.mxu0 %v10679_v41  ;;  %6642 = vmatprep.subr.bf16.mxu1 %v10681_v42  ;;  %v10735_v41 = vcombine.high %v3716_v36, %v3720_v37  ;;  %v10737_v42 = vcombine.high %v3717_v38, %v3721_v39  ;;  %v3769_v24 = vld [vmem:[%s13110_s17 + $0xf68] sm:$0xff] }
 0x5ef   : > { %v3773_v36 = vld [vmem:[%s13110_s17 + $0xf88] sm:$0xff] }
 0x5f0   : > { %6470 = vmatmul.mubr.bf16.vlgmr.msra.gmra.mrb[0].mxu0 %v14189_v43  ;;  %6634 = vmatmul.mubr.bf16.vlgmr.msra.gmra.mrb[0].mxu1 %v14189_v43 }
 0x5f1   : > { %6479 = vmatpush1.bf16.msra.mxu0 %v10678_v8  ;;  %6643 = vmatpush1.bf16.msra.mxu1 %v10680_v26  ;;  %v10736_v8 = vcombine.low %v3717_v38, %v3721_v39  ;;  %v10743_v26 = vcombine.high %v3724_v56, %v3728_v6  ;;  %v10784_v38 = vcombine.low %v3765_v48, %v3769_v24  ;;  %v3282_v56 = vld [vmem:[%s13110_s17 + $0x30] sm:$0xff]  ;;  %v3279_v6 = vld [vmem:[%s13110_s17 + $0x18] sm:$0xff] }
 0x5f2   : > { %6480 = vmatprep.subr.bf16.mxu0 %v10687_v46  ;;  %6644 = vmatprep.subr.bf16.mxu1 %v10689_v47  ;;  %v10745_v46 = vcombine.high %v3725_v44, %v3729_v34  ;;  %v3732_v47 = vld [vmem:[%s13110_s17 + $0xe40] sm:$0xff] }
 0x5f3   : > { %10799 = vmatprep.mubr.msk.bf16.mxu0 %vm6326_vm6, %v14195_v52  ;;  %10801 = vmatprep.mubr.msk.bf16.mxu1 %vm6326_vm6, %v14195_v52  ;;  %v10750_v61 = vcombine.low %v3732_v47, %v3736_v50 }
 0x5f5   : > { %6481 = vmatpush1.bf16.msra.mxu0 %v10686_v54  ;;  %6645 = vmatpush1.bf16.msra.mxu1 %v10688_v55  ;;  %v10744_v54 = vcombine.low %v3725_v44, %v3729_v34  ;;  %v10751_v55 = vcombine.high %v3732_v47, %v3736_v50  ;;  %v3283_v44 = vld [vmem:[%s13110_s17 + $0x38] sm:$0xff]  ;;  %v3274_v34 = vld [vmem:[#allocation2 + $0x30] sm:$0xff] }
 0x5f6   : > { %6482 = vmatprep.subr.bf16.mxu0 %v10695_v57  ;;  %6646 = vmatprep.subr.bf16.mxu1 %v10697_v58  ;;  %v10753_v57 = vcombine.high %v3733_v51, %v3737_v53  ;;  %v3740_v58 = vld [vmem:[%s13110_s17 + $0xe80] sm:$0xff]  ;;  %v3286_v47 = vld [vmem:[%s13110_s17 + $0x50] sm:$0xff] }
 0x5f7   : > { %v10758_v7 = vcombine.low %v3740_v58, %v3744_v59  ;;  %v3290_v50 = vld [vmem:[%s13110_s17 + $0x70] sm:$0xff] }
 0x5f9   : > { %6483 = vmatpush1.bf16.msra.mxu0 %v10694_v63  ;;  %6647 = vmatpush1.bf16.msra.mxu1 %v10696_v0  ;;  %v10752_v63 = vcombine.low %v3733_v51, %v3737_v53  ;;  %v10759_v0 = vcombine.high %v3740_v58, %v3744_v59  ;;  %v14261_v51 = vpack.c.bf16 %v3274_v34, %v3274_v34  ;;  %v3287_v53 = vld [vmem:[%s13110_s17 + $0x58] sm:$0xff]  ;;  %v3294_v59 = vld [vmem:[%s13110_s17 + $0x90] sm:$0xff] }
 0x5fa   : > { %6484 = vmatprep.subr.bf16.mxu0 %v10703_v1  ;;  %6648 = vmatprep.subr.bf16.mxu1 %v10705_v2  ;;  %v10761_v1 = vcombine.high %v3741_v31, %v3745_v60  ;;  %v3748_v2 = vld [vmem:[%s13110_s17 + $0xec0] sm:$0xff] }
 0x5fb   : > { %v10766_v17 = vcombine.low %v3748_v2, %v3752_v5 }
 0x5fd   : > { %6485 = vmatpush1.bf16.msra.mxu0 %v10702_v10  ;;  %6649 = vmatpush1.bf16.msra.mxu1 %v10704_v11  ;;  %v10760_v10 = vcombine.low %v3741_v31, %v3745_v60  ;;  %v10767_v11 = vcombine.high %v3748_v2, %v3752_v5  ;;  %v3298_v31 = vld [vmem:[%s13110_s17 + $0xb0] sm:$0xff]  ;;  %v3295_v60 = vld [vmem:[%s13110_s17 + $0x98] sm:$0xff] }
 0x5fe   : > { %6486 = vmatprep.subr.bf16.mxu0 %v10711_v12  ;;  %6650 = vmatprep.subr.bf16.mxu1 %v10713_v13  ;;  %v10769_v12 = vcombine.high %v3749_v3, %v3753_v4  ;;  %v3756_v13 = vld [vmem:[%s13110_s17 + $0xf00] sm:$0xff]  ;;  %v3302_v5 = vld [vmem:[%s13110_s17 + $0xd0] sm:$0xff] }
 0x5ff   : > { %v10774_v27 = vcombine.low %v3756_v13, %v3760_v14 }
 0x601   : > { %6487 = vmatpush1.bf16.msra.mxu0 %v10710_v18  ;;  %6651 = vmatpush1.bf16.msra.mxu1 %v10712_v19  ;;  %v10768_v18 = vcombine.low %v3749_v3, %v3753_v4  ;;  %v10775_v19 = vcombine.high %v3756_v13, %v3760_v14  ;;  %v3306_v3 = vld [vmem:[%s13110_s17 + $0xf0] sm:$0xff]  ;;  %v3303_v4 = vld [vmem:[%s13110_s17 + $0xd8] sm:$0xff] }
 0x602   : > { %6488 = vmatprep.subr.bf16.mxu0 %v10719_v21  ;;  %6652 = vmatprep.subr.bf16.mxu1 %v10721_v22  ;;  %v10777_v21 = vcombine.high %v3757_v15, %v3761_v16  ;;  %v3764_v22 = vld [vmem:[%s13110_s17 + $0xf40] sm:$0xff]  ;;  %v3310_v14 = vld [vmem:[%s13110_s17 + $0x110] sm:$0xff] }
 0x603   : > { %v10782_v37 = vcombine.low %v3764_v22, %v3768_v23 }
 0x605   : > { %6489 = vmatpush1.bf16.msra.mxu0 %v10718_v28  ;;  %6653 = vmatpush1.bf16.msra.mxu1 %v10720_v29  ;;  %v10776_v28 = vcombine.low %v3757_v15, %v3761_v16  ;;  %v10783_v29 = vcombine.high %v3764_v22, %v3768_v23  ;;  %v3314_v15 = vld [vmem:[%s13110_s17 + $0x130] sm:$0xff]  ;;  %v3311_v16 = vld [vmem:[%s13110_s17 + $0x118] sm:$0xff] }
 0x606   : > { %6490 = vmatprep.subr.bf16.mxu0 %v10727_v33  ;;  %6654 = vmatprep.subr.bf16.mxu1 %v10729_v35  ;;  %v10785_v33 = vcombine.high %v3765_v48, %v3769_v24  ;;  %v3772_v35 = vld [vmem:[%s13110_s17 + $0xf80] sm:$0xff]  ;;  %v3318_v22 = vld [vmem:[%s13110_s17 + $0x150] sm:$0xff]  ;;  %v3319_v48 = vld [vmem:[%s13110_s17 + $0x158] sm:$0xff] }
 0x607   : > { %v10791_v39 = vcombine.high %v3772_v35, %v3772_v35  ;;  %v3322_v23 = vld [vmem:[%s13110_s17 + $0x170] sm:$0xff]  ;;  %v3323_v24 = vld [vmem:[%s13110_s17 + $0x178] sm:$0xff] }
 0x609   : > { %6491 = vmatpush1.bf16.msra.mxu0 %v10726_v40  ;;  %6655 = vmatpush1.bf16.msra.mxu1 %v10728_v49  ;;  %v10790_v40 = vcombine.low %v3772_v35, %v3772_v35  ;;  %v10793_v49 = vcombine.high %v3773_v36, %v3773_v36  ;;  %v3326_v35 = vld [vmem:[%s13110_s17 + $0x190] sm:$0xff] }
 0x60a   : > { %6492 = vmatprep.subr.bf16.mxu0 %v10735_v41  ;;  %6656 = vmatprep.subr.bf16.mxu1 %v10737_v42  ;;  %v10792_v41 = vcombine.low %v3773_v36, %v3773_v36  ;;  %v3278_v42 = vld [vmem:[%s13110_s17 + $0x10] sm:$0xff] }
 0x60b   : > { %v3330_v36 = vld [vmem:[%s13110_s17 + $0x1b0] sm:$0xff] }
 0x60c   : > { %v10346_v34 = vcombine.low %v3326_v35, %v3330_v36 }
 0x60d   : > { %6493 = vmatpush1.bf16.msra.mxu0 %v10734_v45  ;;  %6657 = vmatpush1.bf16.msra.mxu1 %v10736_v8  ;;  %v6332_v45 = vsel %vm6330_vm7, %v10790_v40, 0  ;;  %v10299_v8 = vcombine.high %v3278_v42, %v3282_v56  ;;  %v10340_v40 = vcombine.low %v3319_v48, %v3323_v24 }
 0x60e   : > { %6494 = vmatprep.subr.bf16.mxu0 %v10743_v26  ;;  %6658 = vmatprep.subr.bf16.mxu1 %v10745_v46  ;;  %v6338_v26 = vsel %vm6330_vm7, %v10792_v41, 0  ;;  %v10301_v46 = vcombine.high %v3279_v6, %v3283_v44 }
 0x611   : > { %6495 = vmatpush1.bf16.msra.mxu0 %v10742_v25  ;;  %6659 = vmatpush1.bf16.msra.mxu1 %v10744_v54  ;;  %v3291_v25 = vld [vmem:[%s13110_s17 + $0x78] sm:$0xff]  ;;  %v10298_v54 = vcombine.low %v3278_v42, %v3282_v56  ;;  %v3334_v42 = vld [vmem:[%s13110_s17 + $0x1d0] sm:$0xff] }
 0x612   : > { %6496 = vmatprep.subr.bf16.mxu0 %v10751_v55  ;;  %6660 = vmatprep.subr.bf16.mxu1 %v10753_v57  ;;  %v10300_v55 = vcombine.low %v3279_v6, %v3283_v44  ;;  %v10307_v57 = vcombine.high %v3286_v47, %v3290_v50  ;;  %v10309_v58 = vcombine.high %v3287_v53, %v3291_v25  ;;  %v3338_v56 = vld [vmem:[%s13110_s17 + $0x1f0] sm:$0xff]  ;;  %v3335_v6 = vld [vmem:[%s13110_s17 + $0x1d8] sm:$0xff] }
 0x613   : > { %v3339_v44 = vld [vmem:[%s13110_s17 + $0x1f8] sm:$0xff] }
 0x615   : > { %6497 = vmatpush1.bf16.msra.mxu0 %v10750_v61  ;;  %6661 = vmatpush1.bf16.msra.mxu1 %v10752_v63  ;;  %v3299_v61 = vld [vmem:[%s13110_s17 + $0xb8] sm:$0xff]  ;;  %v10306_v63 = vcombine.low %v3286_v47, %v3290_v50  ;;  %v3346_v47 = vld [vmem:[%s13110_s17 + $0x230] sm:$0xff] }
 0x616   : > { %6498 = vmatprep.subr.bf16.mxu0 %v10759_v0  ;;  %6662 = vmatprep.subr.bf16.mxu1 %v10761_v1  ;;  %v10308_v0 = vcombine.low %v3287_v53, %v3291_v25  ;;  %v10315_v1 = vcombine.high %v3294_v59, %v3298_v31  ;;  %v10317_v2 = vcombine.high %v3295_v60, %v3299_v61  ;;  %v3343_v50 = vld [vmem:[%s13110_s17 + $0x218] sm:$0xff] }
 0x617   : > { %v3347_v53 = vld [vmem:[%s13110_s17 + $0x238] sm:$0xff]  ;;  %v10354_v25 = vcombine.low %v3334_v42, %v3338_v56 }
 0x619   : > { %6499 = vmatpush1.bf16.msra.mxu0 %v10758_v7  ;;  %6663 = vmatpush1.bf16.msra.mxu1 %v10760_v10  ;;  %v3307_v7 = vld [vmem:[%s13110_s17 + $0xf8] sm:$0xff]  ;;  %v10314_v10 = vcombine.low %v3294_v59, %v3298_v31  ;;  %v3354_v59 = vld [vmem:[%s13110_s17 + $0x270] sm:$0xff] }
 0x61a   : > { %6500 = vmatprep.subr.bf16.mxu0 %v10767_v11  ;;  %6664 = vmatprep.subr.bf16.mxu1 %v10769_v12  ;;  %v10316_v11 = vcombine.low %v3295_v60, %v3299_v61  ;;  %v10323_v12 = vcombine.high %v3302_v5, %v3306_v3  ;;  %v10325_v13 = vcombine.high %v3303_v4, %v3307_v7  ;;  %v3351_v31 = vld [vmem:[%s13110_s17 + $0x258] sm:$0xff] }
 0x61b   : > { %v3355_v60 = vld [vmem:[%s13110_s17 + $0x278] sm:$0xff] }
 0x61d   : > { %6501 = vmatpush1.bf16.msra.mxu0 %v10766_v17  ;;  %6665 = vmatpush1.bf16.msra.mxu1 %v10768_v18  ;;  %v3315_v17 = vld [vmem:[%s13110_s17 + $0x138] sm:$0xff]  ;;  %v10322_v18 = vcombine.low %v3302_v5, %v3306_v3  ;;  %v3362_v5 = vld [vmem:[%s13110_s17 + $0x2b0] sm:$0xff] }
 0x61e   : > { %6502 = vmatprep.subr.bf16.mxu0 %v10775_v19  ;;  %6666 = vmatprep.subr.bf16.mxu1 %v10777_v21  ;;  %v10331_v19 = vcombine.high %v3310_v14, %v3314_v15  ;;  %v10333_v21 = vcombine.high %v3311_v16, %v3315_v17  ;;  %v3359_v3 = vld [vmem:[%s13110_s17 + $0x298] sm:$0xff] }
 0x621   : > { %6503 = vmatpush1.bf16.msra.mxu0 %v10774_v27  ;;  %6667 = vmatpush1.bf16.msra.mxu1 %v10776_v28  ;;  %v10330_v27 = vcombine.low %v3310_v14, %v3314_v15  ;;  %v10332_v28 = vcombine.low %v3311_v16, %v3315_v17  ;;  %v3370_v14 = vld [vmem:[%s13110_s17 + $0x2f0] sm:$0xff]  ;;  %v3367_v15 = vld [vmem:[%s13110_s17 + $0x2d8] sm:$0xff] }
 0x622   : > { %6504 = vmatprep.subr.bf16.mxu0 %v10783_v29  ;;  %6668 = vmatprep.subr.bf16.mxu1 %v10785_v33  ;;  %v10339_v29 = vcombine.high %v3318_v22, %v3322_v23  ;;  %v10341_v33 = vcombine.high %v3319_v48, %v3323_v24  ;;  %v3371_v16 = vld [vmem:[%s13110_s17 + $0x2f8] sm:$0xff] }
 0x623   : > { %v3379_v48 = vld [vmem:[%s13110_s17 + $0x338] sm:$0xff] }
 0x625   : > { %6505 = vmatpush1.bf16.msra.mxu0 %v10782_v37  ;;  %6669 = vmatpush1.bf16.msra.mxu1 %v10784_v38  ;;  %v3327_v37 = vld [vmem:[%s13110_s17 + $0x198] sm:$0xff] }
 0x626   : > { %10798 = vmatprep.subr.msk.bf16.mxu0 %vm6330_vm7, %v10791_v39  ;;  %10800 = vmatprep.subr.msk.bf16.mxu1 %vm6330_vm7, %v10793_v49  ;;  %v3331_v38 = vld [vmem:[%s13110_s17 + $0x1b8] sm:$0xff]  ;;  %v10338_v39 = vcombine.low %v3318_v22, %v3322_v23  ;;  %v10347_v49 = vcombine.high %v3326_v35, %v3330_v36  ;;  %v3378_v22 = vld [vmem:[%s13110_s17 + $0x330] sm:$0xff] }
 0x627   : > { %v10349_v41 = vcombine.high %v3327_v37, %v3331_v38  ;;  %v3375_v23 = vld [vmem:[%s13110_s17 + $0x318] sm:$0xff]  ;;  %v3386_v35 = vld [vmem:[%s13110_s17 + $0x370] sm:$0xff] }
 0x628   : > { %v3383_v36 = vld [vmem:[%s13110_s17 + $0x358] sm:$0xff] }
 0x629   : > { %6507 = vmatpush1.bf16.msra.mxu0 %v6332_v45  ;;  %6671 = vmatpush1.bf16.msra.mxu1 %v6338_v26  ;;  %v10348_v45 = vcombine.low %v3327_v37, %v3331_v38  ;;  %v10357_v26 = vcombine.high %v3335_v6, %v3339_v44  ;;  %v3387_v37 = vld [vmem:[%s13110_s17 + $0x378] sm:$0xff] }
 0x62a   : > { %6683 = vmatprep.subr.bf16.mxu0 %v10299_v8  ;;  %6847 = vmatprep.subr.bf16.mxu1 %v10301_v46  ;;  %v10355_v8 = vcombine.high %v3334_v42, %v3338_v56  ;;  %v3342_v46 = vld [vmem:[%s13110_s17 + $0x210] sm:$0xff]  ;;  %v3391_v56 = vld [vmem:[%s13110_s17 + $0x398] sm:$0xff] }
 0x62b   : > { %v10362_v61 = vcombine.low %v3342_v46, %v3346_v47  ;;  %v3394_v42 = vld [vmem:[%s13110_s17 + $0x3b0] sm:$0xff] }
 0x62c   : > { %6511 = vmatmul.mubr.bf16.vlgmr.msra.gmra.mrb[0].mxu0 %v14261_v51  ;;  %6675 = vmatmul.mubr.bf16.vlgmr.msra.gmra.mrb[0].mxu1 %v14261_v51 }
 0x62d   : > { %6684 = vmatpush1.bf16.msra.mxu0 %v10298_v54  ;;  %6848 = vmatpush1.bf16.msra.mxu1 %v10300_v55  ;;  %v10356_v54 = vcombine.low %v3335_v6, %v3339_v44  ;;  %v10363_v55 = vcombine.high %v3342_v46, %v3346_v47  ;;  %v3395_v6 = vld [vmem:[%s13110_s17 + $0x3b8] sm:$0xff]  ;;  %v3402_v46 = vld [vmem:[%s13110_s17 + $0x3f0] sm:$0xff] }
 0x62e   : > { %6685 = vmatprep.subr.bf16.mxu0 %v10307_v57  ;;  %6849 = vmatprep.subr.bf16.mxu1 %v10309_v58  ;;  %v10365_v57 = vcombine.high %v3343_v50, %v3347_v53  ;;  %v3350_v58 = vld [vmem:[%s13110_s17 + $0x250] sm:$0xff]  ;;  %v3399_v47 = vld [vmem:[%s13110_s17 + $0x3d8] sm:$0xff] }
 0x62f   : > { %6715 = vmatprep.mubr.bf16.mxu0 %v14001_v62  ;;  %6879 = vmatprep.mubr.bf16.mxu1 %v14001_v62  ;;  %v10324_v62 = vcombine.low %v3303_v4, %v3307_v7  ;;  %v3363_v4 = vld [vmem:[%s13110_s17 + $0x2b8] sm:$0xff]  ;;  %v10370_v7 = vcombine.low %v3350_v58, %v3354_v59 }
 0x631   : > { %6686 = vmatpush1.bf16.msra.mxu0 %v10306_v63  ;;  %6850 = vmatpush1.bf16.msra.mxu1 %v10308_v0  ;;  %v10364_v63 = vcombine.low %v3343_v50, %v3347_v53  ;;  %v10371_v0 = vcombine.high %v3350_v58, %v3354_v59  ;;  %v3403_v50 = vld [vmem:[%s13110_s17 + $0x3f8] sm:$0xff]  ;;  %v3410_v58 = vld [vmem:[%s13110_s17 + $0x430] sm:$0xff] }
 0x632   : > { %6687 = vmatprep.subr.bf16.mxu0 %v10315_v1  ;;  %6851 = vmatprep.subr.bf16.mxu1 %v10317_v2  ;;  %v10373_v1 = vcombine.high %v3351_v31, %v3355_v60  ;;  %v3358_v2 = vld [vmem:[%s13110_s17 + $0x290] sm:$0xff]  ;;  %v3407_v59 = vld [vmem:[%s13110_s17 + $0x418] sm:$0xff] }
 0x633   : > { %v10378_v17 = vcombine.low %v3358_v2, %v3362_v5 }
 0x635   : > { %6688 = vmatpush1.bf16.msra.mxu0 %v10314_v10  ;;  %6852 = vmatpush1.bf16.msra.mxu1 %v10316_v11  ;;  %v10372_v10 = vcombine.low %v3351_v31, %v3355_v60  ;;  %v10379_v11 = vcombine.high %v3358_v2, %v3362_v5  ;;  %v3411_v31 = vld [vmem:[%s13110_s17 + $0x438] sm:$0xff]  ;;  %v3418_v2 = vld [vmem:[%s13110_s17 + $0x470] sm:$0xff] }
 0x636   : > { %6689 = vmatprep.subr.bf16.mxu0 %v10323_v12  ;;  %6853 = vmatprep.subr.bf16.mxu1 %v10325_v13  ;;  %v10381_v12 = vcombine.high %v3359_v3, %v3363_v4  ;;  %v3366_v13 = vld [vmem:[%s13110_s17 + $0x2d0] sm:$0xff]  ;;  %v3415_v5 = vld [vmem:[%s13110_s17 + $0x458] sm:$0xff] }
 0x637   : > { %v10386_v24 = vcombine.low %v3366_v13, %v3370_v14 }
 0x639   : > { %6690 = vmatpush1.bf16.msra.mxu0 %v10322_v18  ;;  %6854 = vmatpush1.bf16.msra.mxu1 %v10324_v62  ;;  %v10380_v18 = vcombine.low %v3359_v3, %v3363_v4  ;;  %v10387_v62 = vcombine.high %v3366_v13, %v3370_v14  ;;  %v3419_v3 = vld [vmem:[%s13110_s17 + $0x478] sm:$0xff]  ;;  %v3426_v13 = vld [vmem:[%s13110_s17 + $0x4b0] sm:$0xff] }
 0x63a   : > { %6691 = vmatprep.subr.bf16.mxu0 %v10331_v19  ;;  %6855 = vmatprep.subr.bf16.mxu1 %v10333_v21  ;;  %v10389_v19 = vcombine.high %v3367_v15, %v3371_v16  ;;  %v3374_v21 = vld [vmem:[%s13110_s17 + $0x310] sm:$0xff]  ;;  %v3423_v14 = vld [vmem:[%s13110_s17 + $0x498] sm:$0xff] }
 0x63b   : > { %v10394_v38 = vcombine.low %v3374_v21, %v3378_v22 }
 0x63d   : > { %6692 = vmatpush1.bf16.msra.mxu0 %v10330_v27  ;;  %6856 = vmatpush1.bf16.msra.mxu1 %v10332_v28  ;;  %v10388_v27 = vcombine.low %v3367_v15, %v3371_v16  ;;  %v10395_v28 = vcombine.high %v3374_v21, %v3378_v22  ;;  %v3427_v15 = vld [vmem:[%s13110_s17 + $0x4b8] sm:$0xff]  ;;  %v3434_v21 = vld [vmem:[%s13110_s17 + $0x4f0] sm:$0xff] }
 0x63e   : > { %6693 = vmatprep.subr.bf16.mxu0 %v10339_v29  ;;  %6857 = vmatprep.subr.bf16.mxu1 %v10341_v33  ;;  %v10397_v29 = vcombine.high %v3375_v23, %v3379_v48  ;;  %v3382_v33 = vld [vmem:[%s13110_s17 + $0x350] sm:$0xff]  ;;  %v3431_v22 = vld [vmem:[%s13110_s17 + $0x4d8] sm:$0xff] }
 0x63f   : > { %v10402_v44 = vcombine.low %v3382_v33, %v3386_v35 }
 0x641   : > { %6694 = vmatpush1.bf16.msra.mxu0 %v10338_v39  ;;  %6858 = vmatpush1.bf16.msra.mxu1 %v10340_v40  ;;  %v10396_v39 = vcombine.low %v3375_v23, %v3379_v48  ;;  %v10403_v40 = vcombine.high %v3382_v33, %v3386_v35  ;;  %v3435_v23 = vld [vmem:[%s13110_s17 + $0x4f8] sm:$0xff]  ;;  %v10444_v48 = vcombine.low %v3423_v14, %v3427_v15 }
 0x642   : > { %6695 = vmatprep.subr.bf16.mxu0 %v10347_v49  ;;  %6859 = vmatprep.subr.bf16.mxu1 %v10349_v41  ;;  %v10405_v49 = vcombine.high %v3383_v36, %v3387_v37  ;;  %v3390_v41 = vld [vmem:[%s13110_s17 + $0x390] sm:$0xff]  ;;  %v3439_v33 = vld [vmem:[%s13110_s17 + $0x518] sm:$0xff] }
 0x643   : > { %v10410_v53 = vcombine.low %v3390_v41, %v3394_v42  ;;  %v3443_v35 = vld [vmem:[%s13110_s17 + $0x538] sm:$0xff] }
 0x645   : > { %6696 = vmatpush1.bf16.msra.mxu0 %v10346_v34  ;;  %6860 = vmatpush1.bf16.msra.mxu1 %v10348_v45  ;;  %v10404_v34 = vcombine.low %v3383_v36, %v3387_v37  ;;  %v10411_v45 = vcombine.high %v3390_v41, %v3394_v42  ;;  %v3451_v41 = vld [vmem:[%s13110_s17 + $0x578] sm:$0xff] }
 0x646   : > { %6697 = vmatprep.subr.bf16.mxu0 %v10355_v8  ;;  %6861 = vmatprep.subr.bf16.mxu1 %v10357_v26  ;;  %v10413_v8 = vcombine.high %v3391_v56, %v3395_v6  ;;  %v3398_v26 = vld [vmem:[%s13110_s17 + $0x3d0] sm:$0xff] }
 0x647   : > { %v10418_v60 = vcombine.low %v3398_v26, %v3402_v46 }
 0x649   : > { %6698 = vmatpush1.bf16.msra.mxu0 %v10354_v25  ;;  %6862 = vmatpush1.bf16.msra.mxu1 %v10356_v54  ;;  %v10412_v25 = vcombine.low %v3391_v56, %v3395_v6  ;;  %v10419_v54 = vcombine.high %v3398_v26, %v3402_v46  ;;  %v10460_v56 = vcombine.low %v3439_v33, %v3443_v35  ;;  %v3459_v26 = vld [vmem:[%s13110_s17 + $0x5b8] sm:$0xff] }
 0x64a   : > { %6699 = vmatprep.subr.bf16.mxu0 %v10363_v55  ;;  %6863 = vmatprep.subr.bf16.mxu1 %v10365_v57  ;;  %v10421_v55 = vcombine.high %v3399_v47, %v3403_v50  ;;  %v3406_v57 = vld [vmem:[%s13110_s17 + $0x410] sm:$0xff] }
 0x64b   : > { %v10426_v4 = vcombine.low %v3406_v57, %v3410_v58 }
 0x64d   : > { %6700 = vmatpush1.bf16.msra.mxu0 %v10362_v61  ;;  %6864 = vmatpush1.bf16.msra.mxu1 %v10364_v63  ;;  %v10420_v61 = vcombine.low %v3399_v47, %v3403_v50  ;;  %v10427_v63 = vcombine.high %v3406_v57, %v3410_v58  ;;  %v3467_v57 = vld [vmem:[%s13110_s17 + $0x5f8] sm:$0xff] }
 0x64e   : > { %6701 = vmatprep.subr.bf16.mxu0 %v10371_v0  ;;  %6865 = vmatprep.subr.bf16.mxu1 %v10373_v1  ;;  %v10429_v0 = vcombine.high %v3407_v59, %v3411_v31  ;;  %v3414_v1 = vld [vmem:[%s13110_s17 + $0x450] sm:$0xff] }
 0x64f   : > { %v10434_v16 = vcombine.low %v3414_v1, %v3418_v2 }
 0x651   : > { %6702 = vmatpush1.bf16.msra.mxu0 %v10370_v7  ;;  %6866 = vmatpush1.bf16.msra.mxu1 %v10372_v10  ;;  %v10428_v7 = vcombine.low %v3407_v59, %v3411_v31  ;;  %v10435_v10 = vcombine.high %v3414_v1, %v3418_v2  ;;  %v3475_v1 = vld [vmem:[%s13110_s17 + $0x638] sm:$0xff] }
 0x652   : > { %6703 = vmatprep.subr.bf16.mxu0 %v10379_v11  ;;  %6867 = vmatprep.subr.bf16.mxu1 %v10381_v12  ;;  %v10437_v11 = vcombine.high %v3415_v5, %v3419_v3  ;;  %v3422_v12 = vld [vmem:[%s13110_s17 + $0x490] sm:$0xff] }
 0x655   : > { %6704 = vmatpush1.bf16.msra.mxu0 %v10378_v17  ;;  %6868 = vmatpush1.bf16.msra.mxu1 %v10380_v18  ;;  %v10436_v17 = vcombine.low %v3415_v5, %v3419_v3  ;;  %v10443_v18 = vcombine.high %v3422_v12, %v3426_v13 }
 0x656   : > { %6705 = vmatprep.subr.bf16.mxu0 %v10387_v62  ;;  %6869 = vmatprep.subr.bf16.mxu1 %v10389_v19  ;;  %v10445_v62 = vcombine.high %v3423_v14, %v3427_v15  ;;  %v3430_v19 = vld [vmem:[%s13110_s17 + $0x4d0] sm:$0xff] }
 0x657   : > { %v10450_v36 = vcombine.low %v3430_v19, %v3434_v21 }
 0x659   : > { %6706 = vmatpush1.bf16.msra.mxu0 %v10386_v24  ;;  %6870 = vmatpush1.bf16.msra.mxu1 %v10388_v27  ;;  %v10451_v24 = vcombine.high %v3430_v19, %v3434_v21  ;;  %v10453_v27 = vcombine.high %v3431_v22, %v3435_v23  ;;  %v3491_v19 = vld [vmem:[%s13110_s17 + $0x6b8] sm:$0xff] }
 0x65a   : > { %6707 = vmatprep.subr.bf16.mxu0 %v10395_v28  ;;  %6871 = vmatprep.subr.bf16.mxu1 %v10397_v29  ;;  %v3438_v28 = vld [vmem:[%s13110_s17 + $0x510] sm:$0xff] }
 0x65b   : > { %v3442_v29 = vld [vmem:[%s13110_s17 + $0x530] sm:$0xff] }
 0x65c   : > { %v10459_v37 = vcombine.high %v3438_v28, %v3442_v29  ;;  %v10458_v42 = vcombine.low %v3438_v28, %v3442_v29  ;;  %v3499_v28 = vld [vmem:[%s13110_s17 + $0x6f8] sm:$0xff] }
 0x65d   : > { %6708 = vmatpush1.bf16.msra.mxu0 %v10394_v38  ;;  %6872 = vmatpush1.bf16.msra.mxu1 %v10396_v39  ;;  %v10461_v38 = vcombine.high %v3439_v33, %v3443_v35  ;;  %v3446_v39 = vld [vmem:[%s13110_s17 + $0x550] sm:$0xff] }
 0x65e   : > { %6709 = vmatprep.subr.bf16.mxu0 %v10403_v40  ;;  %6873 = vmatprep.subr.bf16.mxu1 %v10405_v49  ;;  %v3450_v40 = vld [vmem:[%s13110_s17 + $0x570] sm:$0xff]  ;;  %v3447_v49 = vld [vmem:[%s13110_s17 + $0x558] sm:$0xff] }
 0x65f   : > { %v10467_v6 = vcombine.high %v3446_v39, %v3450_v40  ;;  %v10466_v46 = vcombine.low %v3446_v39, %v3450_v40  ;;  %v10468_v47 = vcombine.low %v3447_v49, %v3451_v41  ;;  %v3507_v39 = vld [vmem:[%s13110_s17 + $0x738] sm:$0xff] }
 0x661   : > { %6710 = vmatpush1.bf16.msra.mxu0 %v10402_v44  ;;  %6874 = vmatpush1.bf16.msra.mxu1 %v10404_v34  ;;  %v10469_v44 = vcombine.high %v3447_v49, %v3451_v41  ;;  %v3454_v34 = vld [vmem:[%s13110_s17 + $0x590] sm:$0xff] }
 0x662   : > { %6711 = vmatprep.subr.bf16.mxu0 %v10411_v45  ;;  %6875 = vmatprep.subr.bf16.mxu1 %v10413_v8  ;;  %v3458_v45 = vld [vmem:[%s13110_s17 + $0x5b0] sm:$0xff]  ;;  %v3455_v8 = vld [vmem:[%s13110_s17 + $0x598] sm:$0xff] }
 0x663   : > { %v10475_v50 = vcombine.high %v3454_v34, %v3458_v45  ;;  %v10474_v58 = vcombine.low %v3454_v34, %v3458_v45  ;;  %v10476_v59 = vcombine.low %v3455_v8, %v3459_v26  ;;  %v3515_v34 = vld [vmem:[%s13110_s17 + $0x778] sm:$0xff] }
 0x665   : > { %6712 = vmatpush1.bf16.msra.mxu0 %v10410_v53  ;;  %6876 = vmatpush1.bf16.msra.mxu1 %v10412_v25  ;;  %v10477_v53 = vcombine.high %v3455_v8, %v3459_v26  ;;  %v3462_v25 = vld [vmem:[%s13110_s17 + $0x5d0] sm:$0xff] }
 0x666   : > { %6713 = vmatprep.subr.bf16.mxu0 %v10419_v54  ;;  %6877 = vmatprep.subr.bf16.mxu1 %v10421_v55  ;;  %v3466_v54 = vld [vmem:[%s13110_s17 + $0x5f0] sm:$0xff]  ;;  %v3463_v55 = vld [vmem:[%s13110_s17 + $0x5d8] sm:$0xff] }
 0x667   : > { %v10483_v31 = vcombine.high %v3462_v25, %v3466_v54  ;;  %v10482_v2 = vcombine.low %v3462_v25, %v3466_v54  ;;  %v10484_v5 = vcombine.low %v3463_v55, %v3467_v57  ;;  %v3523_v25 = vld [vmem:[%s13110_s17 + $0x7b8] sm:$0xff] }
 0x669   : > { %6714 = vmatpush1.bf16.msra.mxu0 %v10418_v60  ;;  %6878 = vmatpush1.bf16.msra.mxu1 %v10420_v61  ;;  %v10485_v60 = vcombine.high %v3463_v55, %v3467_v57  ;;  %v3470_v61 = vld [vmem:[%s13110_s17 + $0x610] sm:$0xff] }
 0x66a   : > { %6724 = vmatprep.subr.bf16.mxu0 %v10427_v63  ;;  %6888 = vmatprep.subr.bf16.mxu1 %v10429_v0  ;;  %v3474_v63 = vld [vmem:[%s13110_s17 + $0x630] sm:$0xff]  ;;  %v3471_v0 = vld [vmem:[%s13110_s17 + $0x618] sm:$0xff] }
 0x66b   : > { %v10491_v3 = vcombine.high %v3470_v61, %v3474_v63  ;;  %v10492_v14 = vcombine.low %v3471_v0, %v3475_v1 }
 0x66c   : > { %6716 = vmatmul.mubr.bf16.vlgmr.msra.gmra.mrb[4].mxu0 %v14045_v20  ;;  %6880 = vmatmul.mubr.bf16.vlgmr.msra.gmra.mrb[4].mxu1 %v14045_v20  ;;  %v10442_v20 = vcombine.low %v3422_v12, %v3426_v13  ;;  %v3483_v12 = vld [vmem:[%s13110_s17 + $0x678] sm:$0xff]  ;;  %v10490_v13 = vcombine.low %v3470_v61, %v3474_v63 }
 0x66d   : > { %6725 = vmatpush1.bf16.msra.mxu0 %v10426_v4  ;;  %6889 = vmatpush1.bf16.msra.mxu1 %v10428_v7  ;;  %v10493_v4 = vcombine.high %v3471_v0, %v3475_v1  ;;  %v3478_v7 = vld [vmem:[%s13110_s17 + $0x650] sm:$0xff]  ;;  %v3531_v61 = vld [vmem:[%s13110_s17 + $0x7f8] sm:$0xff] }
 0x66e   : > { %6726 = vmatprep.subr.bf16.mxu0 %v10435_v10  ;;  %6890 = vmatprep.subr.bf16.mxu1 %v10437_v11  ;;  %v3482_v10 = vld [vmem:[%s13110_s17 + $0x670] sm:$0xff]  ;;  %v3479_v11 = vld [vmem:[%s13110_s17 + $0x658] sm:$0xff] }
 0x66f   : > { %6756 = vmatprep.mubr.bf16.mxu0 %v14051_v32  ;;  %6920 = vmatprep.mubr.bf16.mxu1 %v14051_v32  ;;  %v10452_v32 = vcombine.low %v3431_v22, %v3435_v23  ;;  %v10499_v15 = vcombine.high %v3478_v7, %v3482_v10  ;;  %v10498_v21 = vcombine.low %v3478_v7, %v3482_v10  ;;  %v3539_v7 = vld [vmem:[%s13110_s17 + $0x838] sm:$0xff] }
 0x670   : > { %v10500_v22 = vcombine.low %v3479_v11, %v3483_v12 }
 0x671   : > { %6727 = vmatpush1.bf16.msra.mxu0 %v10434_v16  ;;  %6891 = vmatpush1.bf16.msra.mxu1 %v10436_v17  ;;  %v10501_v16 = vcombine.high %v3479_v11, %v3483_v12  ;;  %v3486_v17 = vld [vmem:[%s13110_s17 + $0x690] sm:$0xff] }
 0x672   : > { %6728 = vmatprep.subr.bf16.mxu0 %v10443_v18  ;;  %6892 = vmatprep.subr.bf16.mxu1 %v10445_v62  ;;  %v3490_v18 = vld [vmem:[%s13110_s17 + $0x6b0] sm:$0xff]  ;;  %v3487_v62 = vld [vmem:[%s13110_s17 + $0x698] sm:$0xff] }
 0x673   : > { %v10507_v23 = vcombine.high %v3486_v17, %v3490_v18  ;;  %v10506_v29 = vcombine.low %v3486_v17, %v3490_v18  ;;  %v10508_v33 = vcombine.low %v3487_v62, %v3491_v19  ;;  %v3547_v17 = vld [vmem:[%s13110_s17 + $0x878] sm:$0xff] }
 0x675   : > { %6729 = vmatpush1.bf16.msra.mxu0 %v10442_v20  ;;  %6893 = vmatpush1.bf16.msra.mxu1 %v10444_v48  ;;  %v10509_v20 = vcombine.high %v3487_v62, %v3491_v19  ;;  %v3494_v48 = vld [vmem:[%s13110_s17 + $0x6d0] sm:$0xff] }
 0x676   : > { %6730 = vmatprep.subr.bf16.mxu0 %v10451_v24  ;;  %6894 = vmatprep.subr.bf16.mxu1 %v10453_v27  ;;  %v3498_v24 = vld [vmem:[%s13110_s17 + $0x6f0] sm:$0xff]  ;;  %v3495_v27 = vld [vmem:[%s13110_s17 + $0x6d8] sm:$0xff] }
 0x677   : > { %v10515_v35 = vcombine.high %v3494_v48, %v3498_v24  ;;  %v10514_v40 = vcombine.low %v3494_v48, %v3498_v24  ;;  %v10516_v49 = vcombine.low %v3495_v27, %v3499_v28  ;;  %v3555_v48 = vld [vmem:[%s13110_s17 + $0x8b8] sm:$0xff] }
 0x679   : > { %6731 = vmatpush1.bf16.msra.mxu0 %v10450_v36  ;;  %6895 = vmatpush1.bf16.msra.mxu1 %v10452_v32  ;;  %v10517_v36 = vcombine.high %v3495_v27, %v3499_v28  ;;  %v3502_v32 = vld [vmem:[%s13110_s17 + $0x710] sm:$0xff] }
 0x67a   : > { %6732 = vmatprep.subr.bf16.mxu0 %v10459_v37  ;;  %6896 = vmatprep.subr.bf16.mxu1 %v10461_v38  ;;  %v3506_v37 = vld [vmem:[%s13110_s17 + $0x730] sm:$0xff]  ;;  %v3503_v38 = vld [vmem:[%s13110_s17 + $0x718] sm:$0xff] }
 0x67b   : > { %v10523_v41 = vcombine.high %v3502_v32, %v3506_v37  ;;  %v10522_v45 = vcombine.low %v3502_v32, %v3506_v37  ;;  %v10524_v8 = vcombine.low %v3503_v38, %v3507_v39  ;;  %v3563_v32 = vld [vmem:[%s13110_s17 + $0x8f8] sm:$0xff] }
 0x67d   : > { %6733 = vmatpush1.bf16.msra.mxu0 %v10458_v42  ;;  %6897 = vmatpush1.bf16.msra.mxu1 %v10460_v56  ;;  %v10525_v42 = vcombine.high %v3503_v38, %v3507_v39  ;;  %v3510_v56 = vld [vmem:[%s13110_s17 + $0x750] sm:$0xff] }
 0x67e   : > { %6734 = vmatprep.subr.bf16.mxu0 %v10467_v6  ;;  %6898 = vmatprep.subr.bf16.mxu1 %v10469_v44  ;;  %v3514_v6 = vld [vmem:[%s13110_s17 + $0x770] sm:$0xff]  ;;  %v3511_v44 = vld [vmem:[%s13110_s17 + $0x758] sm:$0xff] }
 0x67f   : > { %v10531_v26 = vcombine.high %v3510_v56, %v3514_v6  ;;  %v10530_v54 = vcombine.low %v3510_v56, %v3514_v6  ;;  %v10532_v55 = vcombine.low %v3511_v44, %v3515_v34 }
 0x681   : > { %6735 = vmatpush1.bf16.msra.mxu0 %v10466_v46  ;;  %6899 = vmatpush1.bf16.msra.mxu1 %v10468_v47  ;;  %v10533_v46 = vcombine.high %v3511_v44, %v3515_v34  ;;  %v3518_v47 = vld [vmem:[%s13110_s17 + $0x790] sm:$0xff] }
 0x682   : > { %6736 = vmatprep.subr.bf16.mxu0 %v10475_v50  ;;  %6900 = vmatprep.subr.bf16.mxu1 %v10477_v53  ;;  %v3522_v50 = vld [vmem:[%s13110_s17 + $0x7b0] sm:$0xff]  ;;  %v3519_v53 = vld [vmem:[%s13110_s17 + $0x798] sm:$0xff] }
 0x683   : > { %v10539_v57 = vcombine.high %v3518_v47, %v3522_v50  ;;  %v10538_v63 = vcombine.low %v3518_v47, %v3522_v50  ;;  %v10540_v0 = vcombine.low %v3519_v53, %v3523_v25  ;;  %v3574_v34 = vld [vmem:[%s13110_s17 + $0x950] sm:$0xff] }
 0x685   : > { %6737 = vmatpush1.bf16.msra.mxu0 %v10474_v58  ;;  %6901 = vmatpush1.bf16.msra.mxu1 %v10476_v59  ;;  %v10541_v58 = vcombine.high %v3519_v53, %v3523_v25  ;;  %v3526_v59 = vld [vmem:[%s13110_s17 + $0x7d0] sm:$0xff] }
 0x686   : > { %6738 = vmatprep.subr.bf16.mxu0 %v10483_v31  ;;  %6902 = vmatprep.subr.bf16.mxu1 %v10485_v60  ;;  %v3530_v31 = vld [vmem:[%s13110_s17 + $0x7f0] sm:$0xff]  ;;  %v3527_v60 = vld [vmem:[%s13110_s17 + $0x7d8] sm:$0xff] }
 0x687   : > { %v10547_v1 = vcombine.high %v3526_v59, %v3530_v31  ;;  %v10546_v10 = vcombine.low %v3526_v59, %v3530_v31  ;;  %v10548_v11 = vcombine.low %v3527_v60, %v3531_v61  ;;  %v3582_v25 = vld [vmem:[%s13110_s17 + $0x990] sm:$0xff] }
 0x689   : > { %6739 = vmatpush1.bf16.msra.mxu0 %v10482_v2  ;;  %6903 = vmatpush1.bf16.msra.mxu1 %v10484_v5  ;;  %v10549_v2 = vcombine.high %v3527_v60, %v3531_v61  ;;  %v3534_v5 = vld [vmem:[%s13110_s17 + $0x810] sm:$0xff] }
 0x68a   : > { %6740 = vmatprep.subr.bf16.mxu0 %v10491_v3  ;;  %6904 = vmatprep.subr.bf16.mxu1 %v10493_v4  ;;  %v3538_v3 = vld [vmem:[%s13110_s17 + $0x830] sm:$0xff]  ;;  %v3535_v4 = vld [vmem:[%s13110_s17 + $0x818] sm:$0xff] }
 0x68b   : > { %v10555_v12 = vcombine.high %v3534_v5, %v3538_v3  ;;  %v10554_v18 = vcombine.low %v3534_v5, %v3538_v3  ;;  %v10556_v62 = vcombine.low %v3535_v4, %v3539_v7  ;;  %v3590_v61 = vld [vmem:[%s13110_s17 + $0x9d0] sm:$0xff] }
 0x68d   : > { %6741 = vmatpush1.bf16.msra.mxu0 %v10490_v13  ;;  %6905 = vmatpush1.bf16.msra.mxu1 %v10492_v14  ;;  %v10557_v13 = vcombine.high %v3535_v4, %v3539_v7  ;;  %v3542_v14 = vld [vmem:[%s13110_s17 + $0x850] sm:$0xff] }
 0x68e   : > { %6742 = vmatprep.subr.bf16.mxu0 %v10499_v15  ;;  %6906 = vmatprep.subr.bf16.mxu1 %v10501_v16  ;;  %v3546_v15 = vld [vmem:[%s13110_s17 + $0x870] sm:$0xff]  ;;  %v3543_v16 = vld [vmem:[%s13110_s17 + $0x858] sm:$0xff] }
 0x68f   : > { %v10563_v19 = vcombine.high %v3542_v14, %v3546_v15  ;;  %v10562_v24 = vcombine.low %v3542_v14, %v3546_v15  ;;  %v10564_v27 = vcombine.low %v3543_v16, %v3547_v17  ;;  %v3598_v7 = vld [vmem:[%s13110_s17 + $0xa10] sm:$0xff] }
 0x691   : > { %6743 = vmatpush1.bf16.msra.mxu0 %v10498_v21  ;;  %6907 = vmatpush1.bf16.msra.mxu1 %v10500_v22  ;;  %v10565_v21 = vcombine.high %v3543_v16, %v3547_v17  ;;  %v3550_v22 = vld [vmem:[%s13110_s17 + $0x890] sm:$0xff] }
 0x692   : > { %6744 = vmatprep.subr.bf16.mxu0 %v10507_v23  ;;  %6908 = vmatprep.subr.bf16.mxu1 %v10509_v20  ;;  %v3554_v23 = vld [vmem:[%s13110_s17 + $0x8b0] sm:$0xff]  ;;  %v3551_v20 = vld [vmem:[%s13110_s17 + $0x898] sm:$0xff] }
 0x693   : > { %v10571_v28 = vcombine.high %v3550_v22, %v3554_v23  ;;  %v10572_v37 = vcombine.low %v3551_v20, %v3555_v48  ;;  %v3606_v17 = vld [vmem:[%s13110_s17 + $0xa50] sm:$0xff] }
 0x695   : > { %6745 = vmatpush1.bf16.msra.mxu0 %v10506_v29  ;;  %6909 = vmatpush1.bf16.msra.mxu1 %v10508_v33  ;;  %v10573_v29 = vcombine.high %v3551_v20, %v3555_v48  ;;  %v3558_v33 = vld [vmem:[%s13110_s17 + $0x8d0] sm:$0xff] }
 0x696   : > { %6746 = vmatprep.subr.bf16.mxu0 %v10515_v35  ;;  %6910 = vmatprep.subr.bf16.mxu1 %v10517_v36  ;;  %v3562_v35 = vld [vmem:[%s13110_s17 + $0x8f0] sm:$0xff]  ;;  %v3559_v36 = vld [vmem:[%s13110_s17 + $0x8d8] sm:$0xff] }
 0x697   : > { %v10579_v38 = vcombine.high %v3558_v33, %v3562_v35  ;;  %v10581_v39 = vcombine.high %v3559_v36, %v3563_v32  ;;  %v10578_v56 = vcombine.low %v3558_v33, %v3562_v35  ;;  %v3614_v48 = vld [vmem:[%s13110_s17 + $0xa90] sm:$0xff] }
 0x699   : > { %6747 = vmatpush1.bf16.msra.mxu0 %v10514_v40  ;;  %6911 = vmatpush1.bf16.msra.mxu1 %v10516_v49  ;;  %v3566_v40 = vld [vmem:[%s13110_s17 + $0x910] sm:$0xff] }
 0x69a   : > { %6748 = vmatprep.subr.bf16.mxu0 %v10523_v41  ;;  %6912 = vmatprep.subr.bf16.mxu1 %v10525_v42  ;;  %v3570_v49 = vld [vmem:[%s13110_s17 + $0x930] sm:$0xff]  ;;  %v3567_v41 = vld [vmem:[%s13110_s17 + $0x918] sm:$0xff] }
 0x69b   : > { %v3571_v42 = vld [vmem:[%s13110_s17 + $0x938] sm:$0xff]  ;;  %v10587_v6 = vcombine.high %v3566_v40, %v3570_v49 }
 0x69c   : > { %v10589_v44 = vcombine.high %v3567_v41, %v3571_v42  ;;  %v10588_v47 = vcombine.low %v3567_v41, %v3571_v42  ;;  %v3630_v42 = vld [vmem:[%s13110_s17 + $0xb10] sm:$0xff] }
 0x69d   : > { %6749 = vmatpush1.bf16.msra.mxu0 %v10522_v45  ;;  %6913 = vmatpush1.bf16.msra.mxu1 %v10524_v8  ;;  %v3578_v45 = vld [vmem:[%s13110_s17 + $0x970] sm:$0xff]  ;;  %v3575_v8 = vld [vmem:[%s13110_s17 + $0x958] sm:$0xff] }
 0x69e   : > { %6750 = vmatprep.subr.bf16.mxu0 %v10531_v26  ;;  %6914 = vmatprep.subr.bf16.mxu1 %v10533_v46  ;;  %v3579_v26 = vld [vmem:[%s13110_s17 + $0x978] sm:$0xff]  ;;  %v10586_v46 = vcombine.low %v3566_v40, %v3570_v49  ;;  %v10595_v50 = vcombine.high %v3574_v34, %v3578_v45 }
 0x69f   : > { %v10597_v53 = vcombine.high %v3575_v8, %v3579_v26  ;;  %v10596_v59 = vcombine.low %v3575_v8, %v3579_v26  ;;  %v3638_v26 = vld [vmem:[%s13110_s17 + $0xb50] sm:$0xff] }
 0x6a1   : > { %6751 = vmatpush1.bf16.msra.mxu0 %v10530_v54  ;;  %6915 = vmatpush1.bf16.msra.mxu1 %v10532_v55  ;;  %v3586_v54 = vld [vmem:[%s13110_s17 + $0x9b0] sm:$0xff]  ;;  %v3583_v55 = vld [vmem:[%s13110_s17 + $0x998] sm:$0xff] }
 0x6a2   : > { %6752 = vmatprep.subr.bf16.mxu0 %v10539_v57  ;;  %6916 = vmatprep.subr.bf16.mxu1 %v10541_v58  ;;  %v3587_v57 = vld [vmem:[%s13110_s17 + $0x9b8] sm:$0xff]  ;;  %v10594_v58 = vcombine.low %v3574_v34, %v3578_v45  ;;  %v10603_v31 = vcombine.high %v3582_v25, %v3586_v54 }
 0x6a3   : > { %v10605_v60 = vcombine.high %v3583_v55, %v3587_v57  ;;  %v10604_v5 = vcombine.low %v3583_v55, %v3587_v57  ;;  %v3646_v57 = vld [vmem:[%s13110_s17 + $0xb90] sm:$0xff] }
 0x6a5   : > { %6753 = vmatpush1.bf16.msra.mxu0 %v10538_v63  ;;  %6917 = vmatpush1.bf16.msra.mxu1 %v10540_v0  ;;  %v3594_v63 = vld [vmem:[%s13110_s17 + $0x9f0] sm:$0xff]  ;;  %v3591_v0 = vld [vmem:[%s13110_s17 + $0x9d8] sm:$0xff] }
 0x6a6   : > { %6754 = vmatprep.subr.bf16.mxu0 %v10547_v1  ;;  %6918 = vmatprep.subr.bf16.mxu1 %v10549_v2  ;;  %v3595_v1 = vld [vmem:[%s13110_s17 + $0x9f8] sm:$0xff]  ;;  %v10602_v2 = vcombine.low %v3582_v25, %v3586_v54  ;;  %v10611_v3 = vcombine.high %v3590_v61, %v3594_v63 }
 0x6a7   : > { %v10613_v4 = vcombine.high %v3591_v0, %v3595_v1  ;;  %v10612_v14 = vcombine.low %v3591_v0, %v3595_v1  ;;  %v3654_v1 = vld [vmem:[%s13110_s17 + $0xbd0] sm:$0xff] }
 0x6a9   : > { %6755 = vmatpush1.bf16.msra.mxu0 %v10546_v10  ;;  %6919 = vmatpush1.bf16.msra.mxu1 %v10548_v11  ;;  %v3602_v10 = vld [vmem:[%s13110_s17 + $0xa30] sm:$0xff]  ;;  %v3599_v11 = vld [vmem:[%s13110_s17 + $0xa18] sm:$0xff] }
 0x6aa   : > { %6765 = vmatprep.subr.bf16.mxu0 %v10555_v12  ;;  %6929 = vmatprep.subr.bf16.mxu1 %v10557_v13  ;;  %v3603_v12 = vld [vmem:[%s13110_s17 + $0xa38] sm:$0xff]  ;;  %v10610_v13 = vcombine.low %v3590_v61, %v3594_v63  ;;  %v10619_v15 = vcombine.high %v3598_v7, %v3602_v10 }
 0x6ab   : > { %v10621_v16 = vcombine.high %v3599_v11, %v3603_v12 }
 0x6ac   : > { %6757 = vmatmul.mubr.bf16.vlgmr.msra.gmra.mrb[4].mxu0 %v14117_v30  ;;  %6921 = vmatmul.mubr.bf16.vlgmr.msra.gmra.mrb[4].mxu1 %v14117_v30  ;;  %v10570_v30 = vcombine.low %v3550_v22, %v3554_v23  ;;  %v10620_v22 = vcombine.low %v3599_v11, %v3603_v12  ;;  %v3662_v12 = vld [vmem:[%s13110_s17 + $0xc10] sm:$0xff] }
 0x6ad   : > { %6766 = vmatpush1.bf16.msra.mxu0 %v10554_v18  ;;  %6930 = vmatpush1.bf16.msra.mxu1 %v10556_v62  ;;  %v3610_v18 = vld [vmem:[%s13110_s17 + $0xa70] sm:$0xff]  ;;  %v3607_v62 = vld [vmem:[%s13110_s17 + $0xa58] sm:$0xff] }
 0x6ae   : > { %6767 = vmatprep.subr.bf16.mxu0 %v10563_v19  ;;  %6931 = vmatprep.subr.bf16.mxu1 %v10565_v21  ;;  %v3611_v19 = vld [vmem:[%s13110_s17 + $0xa78] sm:$0xff]  ;;  %v10618_v21 = vcombine.low %v3598_v7, %v3602_v10  ;;  %v10627_v23 = vcombine.high %v3606_v17, %v3610_v18 }
 0x6af   : > { %6797 = vmatprep.mubr.bf16.mxu0 %v14123_v9  ;;  %6961 = vmatprep.mubr.bf16.mxu1 %v14123_v9  ;;  %v10580_v9 = vcombine.low %v3559_v36, %v3563_v32  ;;  %v10629_v20 = vcombine.high %v3607_v62, %v3611_v19  ;;  %v10628_v33 = vcombine.low %v3607_v62, %v3611_v19  ;;  %v3622_v32 = vld [vmem:[%s13110_s17 + $0xad0] sm:$0xff] }
 0x6b0   : > { %v3670_v19 = vld [vmem:[%s13110_s17 + $0xc50] sm:$0xff] }
 0x6b1   : > { %6768 = vmatpush1.bf16.msra.mxu0 %v10562_v24  ;;  %6932 = vmatpush1.bf16.msra.mxu1 %v10564_v27  ;;  %v3618_v24 = vld [vmem:[%s13110_s17 + $0xab0] sm:$0xff]  ;;  %v3615_v27 = vld [vmem:[%s13110_s17 + $0xa98] sm:$0xff] }
 0x6b2   : > { %6769 = vmatprep.subr.bf16.mxu0 %v10571_v28  ;;  %6933 = vmatprep.subr.bf16.mxu1 %v10573_v29  ;;  %v3619_v28 = vld [vmem:[%s13110_s17 + $0xab8] sm:$0xff]  ;;  %v10626_v29 = vcombine.low %v3606_v17, %v3610_v18  ;;  %v10635_v35 = vcombine.high %v3614_v48, %v3618_v24 }
 0x6b3   : > { %v10637_v36 = vcombine.high %v3615_v27, %v3619_v28  ;;  %v10636_v40 = vcombine.low %v3615_v27, %v3619_v28  ;;  %v3678_v28 = vld [vmem:[%s13110_s17 + $0xc90] sm:$0xff] }
 0x6b5   : > { %6770 = vmatpush1.bf16.msra.mxu0 %v10570_v30  ;;  %6934 = vmatpush1.bf16.msra.mxu1 %v10572_v37  ;;  %v3626_v30 = vld [vmem:[%s13110_s17 + $0xaf0] sm:$0xff]  ;;  %v3623_v37 = vld [vmem:[%s13110_s17 + $0xad8] sm:$0xff] }
 0x6b6   : > { %6771 = vmatprep.subr.bf16.mxu0 %v10579_v38  ;;  %6935 = vmatprep.subr.bf16.mxu1 %v10581_v39  ;;  %v3627_v38 = vld [vmem:[%s13110_s17 + $0xaf8] sm:$0xff]  ;;  %v10634_v39 = vcombine.low %v3614_v48, %v3618_v24  ;;  %v10643_v49 = vcombine.high %v3622_v32, %v3626_v30 }
 0x6b7   : > { %v10645_v41 = vcombine.high %v3623_v37, %v3627_v38  ;;  %v10644_v34 = vcombine.low %v3623_v37, %v3627_v38  ;;  %v3686_v38 = vld [vmem:[%s13110_s17 + $0xcd0] sm:$0xff] }
 0x6b9   : > { %6772 = vmatpush1.bf16.msra.mxu0 %v10578_v56  ;;  %6936 = vmatpush1.bf16.msra.mxu1 %v10580_v9  ;;  %v3634_v56 = vld [vmem:[%s13110_s17 + $0xb30] sm:$0xff]  ;;  %v3631_v9 = vld [vmem:[%s13110_s17 + $0xb18] sm:$0xff] }
 0x6ba   : > { %6773 = vmatprep.subr.bf16.mxu0 %v10587_v6  ;;  %6937 = vmatprep.subr.bf16.mxu1 %v10589_v44  ;;  %v3635_v6 = vld [vmem:[%s13110_s17 + $0xb38] sm:$0xff]  ;;  %v10642_v44 = vcombine.low %v3622_v32, %v3626_v30  ;;  %v10651_v45 = vcombine.high %v3630_v42, %v3634_v56 }
 0x6bb   : > { %v10653_v8 = vcombine.high %v3631_v9, %v3635_v6  ;;  %v10652_v25 = vcombine.low %v3631_v9, %v3635_v6  ;;  %v3694_v6 = vld [vmem:[%s13110_s17 + $0xd10] sm:$0xff] }
 0x6bd   : > { %6774 = vmatpush1.bf16.msra.mxu0 %v10586_v46  ;;  %6938 = vmatpush1.bf16.msra.mxu1 %v10588_v47  ;;  %v3642_v46 = vld [vmem:[%s13110_s17 + $0xb70] sm:$0xff]  ;;  %v3639_v47 = vld [vmem:[%s13110_s17 + $0xb58] sm:$0xff] }
 0x6be   : > { %6775 = vmatprep.subr.bf16.mxu0 %v10595_v50  ;;  %6939 = vmatprep.subr.bf16.mxu1 %v10597_v53  ;;  %v3643_v50 = vld [vmem:[%s13110_s17 + $0xb78] sm:$0xff]  ;;  %v10650_v53 = vcombine.low %v3630_v42, %v3634_v56  ;;  %v10659_v54 = vcombine.high %v3638_v26, %v3642_v46 }
 0x6bf   : > { %v10661_v55 = vcombine.high %v3639_v47, %v3643_v50  ;;  %v10660_v61 = vcombine.low %v3639_v47, %v3643_v50  ;;  %v3702_v50 = vld [vmem:[%s13110_s17 + $0xd50] sm:$0xff] }
 0x6c1   : > { %6776 = vmatpush1.bf16.msra.mxu0 %v10594_v58  ;;  %6940 = vmatpush1.bf16.msra.mxu1 %v10596_v59  ;;  %v3650_v58 = vld [vmem:[%s13110_s17 + $0xbb0] sm:$0xff]  ;;  %v3647_v59 = vld [vmem:[%s13110_s17 + $0xb98] sm:$0xff] }
 0x6c2   : > { %6777 = vmatprep.subr.bf16.mxu0 %v10603_v31  ;;  %6941 = vmatprep.subr.bf16.mxu1 %v10605_v60  ;;  %v3651_v31 = vld [vmem:[%s13110_s17 + $0xbb8] sm:$0xff]  ;;  %v10658_v60 = vcombine.low %v3638_v26, %v3642_v46  ;;  %v10667_v63 = vcombine.high %v3646_v57, %v3650_v58 }
 0x6c3   : > { %v10669_v0 = vcombine.high %v3647_v59, %v3651_v31  ;;  %v10668_v7 = vcombine.low %v3647_v59, %v3651_v31 }
 0x6c5   : > { %6778 = vmatpush1.bf16.msra.mxu0 %v10602_v2  ;;  %6942 = vmatpush1.bf16.msra.mxu1 %v10604_v5  ;;  %v3658_v2 = vld [vmem:[%s13110_s17 + $0xbf0] sm:$0xff]  ;;  %v3655_v5 = vld [vmem:[%s13110_s17 + $0xbd8] sm:$0xff] }
 0x6c6   : > { %6779 = vmatprep.subr.bf16.mxu0 %v10611_v3  ;;  %6943 = vmatprep.subr.bf16.mxu1 %v10613_v4  ;;  %v3659_v3 = vld [vmem:[%s13110_s17 + $0xbf8] sm:$0xff]  ;;  %v10666_v4 = vcombine.low %v3646_v57, %v3650_v58  ;;  %v10675_v10 = vcombine.high %v3654_v1, %v3658_v2  ;;  %v14498_v58 = vld [vmem:[%s717_s8] sm:$0xff]  ;;  %s14992_s8 = sld [smem:[#allocation51_spill]] (!%p10806_p5) }
 0x6c7   : > { %v10677_v11 = vcombine.high %v3655_v5, %v3659_v3  ;;  %v10676_v17 = vcombine.low %v3655_v5, %v3659_v3  ;;  %v3711_v3 = vld [vmem:[%s13110_s17 + $0xd98] sm:$0xff] }
 0x6c9   : > { %6780 = vmatpush1.bf16.msra.mxu0 %v10610_v13  ;;  %6944 = vmatpush1.bf16.msra.mxu1 %v10612_v14  ;;  %v3666_v13 = vld [vmem:[%s13110_s17 + $0xc30] sm:$0xff]  ;;  %v3663_v14 = vld [vmem:[%s13110_s17 + $0xc18] sm:$0xff] }
 0x6ca   : > { %6781 = vmatprep.subr.bf16.mxu0 %v10619_v15  ;;  %6945 = vmatprep.subr.bf16.mxu1 %v10621_v16  ;;  %v3667_v15 = vld [vmem:[%s13110_s17 + $0xc38] sm:$0xff]  ;;  %v10674_v16 = vcombine.low %v3654_v1, %v3658_v2  ;;  %v10683_v18 = vcombine.high %v3662_v12, %v3666_v13  ;;  %v3710_v1 = vld [vmem:[%s13110_s17 + $0xd90] sm:$0xff] }
 0x6cb   : > { %v10685_v62 = vcombine.high %v3663_v14, %v3667_v15  ;;  %v10684_v48 = vcombine.low %v3663_v14, %v3667_v15  ;;  %v3714_v2 = vld [vmem:[%s13110_s17 + $0xdb0] sm:$0xff] }
 0x6cc   : > { %v10731_v14 = vcombine.high %v3710_v1, %v3714_v2 }
 0x6cd   : > { %6782 = vmatpush1.bf16.msra.mxu0 %v10618_v21  ;;  %6946 = vmatpush1.bf16.msra.mxu1 %v10620_v22  ;;  %v3674_v21 = vld [vmem:[%s13110_s17 + $0xc70] sm:$0xff]  ;;  %v3671_v22 = vld [vmem:[%s13110_s17 + $0xc58] sm:$0xff] }
 0x6ce   : > { %6783 = vmatprep.subr.bf16.mxu0 %v10627_v23  ;;  %6947 = vmatprep.subr.bf16.mxu1 %v10629_v20  ;;  %v3675_v23 = vld [vmem:[%s13110_s17 + $0xc78] sm:$0xff]  ;;  %v10682_v20 = vcombine.low %v3662_v12, %v3666_v13  ;;  %v10691_v24 = vcombine.high %v3670_v19, %v3674_v21 }
 0x6cf   : > { %v10693_v27 = vcombine.high %v3671_v22, %v3675_v23  ;;  %v10692_v32 = vcombine.low %v3671_v22, %v3675_v23  ;;  %v3719_v22 = vld [vmem:[%s13110_s17 + $0xdd8] sm:$0xff] }
 0x6d0   : > { %v3723_v23 = vld [vmem:[%s13110_s17 + $0xdf8] sm:$0xff] }
 0x6d1   : > { %6784 = vmatpush1.bf16.msra.mxu0 %v10626_v29  ;;  %6948 = vmatpush1.bf16.msra.mxu1 %v10628_v33  ;;  %v3682_v29 = vld [vmem:[%s13110_s17 + $0xcb0] sm:$0xff]  ;;  %v3679_v33 = vld [vmem:[%s13110_s17 + $0xc98] sm:$0xff] }
 0x6d2   : > { %6785 = vmatprep.subr.bf16.mxu0 %v10635_v35  ;;  %6949 = vmatprep.subr.bf16.mxu1 %v10637_v36  ;;  %v3683_v35 = vld [vmem:[%s13110_s17 + $0xcb8] sm:$0xff]  ;;  %v10690_v36 = vcombine.low %v3670_v19, %v3674_v21  ;;  %v10699_v30 = vcombine.high %v3678_v28, %v3682_v29 }
 0x6d3   : > { %v10701_v37 = vcombine.high %v3679_v33, %v3683_v35  ;;  %v10700_v42 = vcombine.low %v3679_v33, %v3683_v35 }
 0x6d5   : > { %6786 = vmatpush1.bf16.msra.mxu0 %v10634_v39  ;;  %6950 = vmatpush1.bf16.msra.mxu1 %v10636_v40  ;;  %v3690_v39 = vld [vmem:[%s13110_s17 + $0xcf0] sm:$0xff]  ;;  %v3687_v40 = vld [vmem:[%s13110_s17 + $0xcd8] sm:$0xff] }
 0x6d6   : > { %6787 = vmatprep.subr.bf16.mxu0 %v10643_v49  ;;  %6951 = vmatprep.subr.bf16.mxu1 %v10645_v41  ;;  %v3691_v49 = vld [vmem:[%s13110_s17 + $0xcf8] sm:$0xff]  ;;  %v3786_v41 = vlaneseq  ;;  %v10707_v56 = vcombine.high %v3686_v38, %v3690_v39 }
 0x6d7   : > { %v10709_v9 = vcombine.high %v3687_v40, %v3691_v49  ;;  %v10708_v26 = vcombine.low %v3687_v40, %v3691_v49  ;;  %v10741_v40 = vcombine.high %v3719_v22, %v3723_v23  ;;  %v3726_v49 = vld [vmem:[%s13110_s17 + $0xe10] sm:$0xff] }
 0x6d9   : > { %6788 = vmatpush1.bf16.msra.mxu0 %v10642_v44  ;;  %6952 = vmatpush1.bf16.msra.mxu1 %v10644_v34  ;;  %v3698_v44 = vld [vmem:[%s13110_s17 + $0xd30] sm:$0xff]  ;;  %v3695_v34 = vld [vmem:[%s13110_s17 + $0xd18] sm:$0xff] }
 0x6da   : > { %6789 = vmatprep.subr.bf16.mxu0 %v10651_v45  ;;  %6953 = vmatprep.subr.bf16.mxu1 %v10653_v8  ;;  %v3699_v45 = vld [vmem:[%s13110_s17 + $0xd38] sm:$0xff]  ;;  %v14487_v8 = vshrl.u32 %v3786_v41, 7  ;;  %v10715_v46 = vcombine.high %v3694_v6, %v3698_v44  ;;  %v10714_v57 = vcombine.low %v3694_v6, %v3698_v44  ;;  %v3730_v41 = vld [vmem:[%s13110_s17 + $0xe30] sm:$0xff]  ;;  %v10740_v6 = vcombine.low %v3719_v22, %v3723_v23 }
 0x6db   : > { %v10717_v47 = vcombine.high %v3695_v34, %v3699_v45  ;;  %v10747_v44 = vcombine.high %v3726_v49, %v3730_v41  ;;  %v3766_v23 = vld [vmem:[%s13110_s17 + $0xf50] sm:$0xff] }
 0x6dc   : > { %v3796_v59 = vsub.s32 2, %v14487_v8  ;;  %v14502_v31 = vsub.s32 1, %v14487_v8 }
 0x6dd   : > { %6790 = vmatpush1.bf16.msra.mxu0 %v10650_v53  ;;  %6954 = vmatpush1.bf16.msra.mxu1 %v10652_v25  ;;  %v3706_v53 = vld [vmem:[%s13110_s17 + $0xd70] sm:$0xff]  ;;  %v14492_v25 = vsub.s32 0, %v14487_v8 }
 0x6de   : > { %6791 = vmatprep.subr.bf16.mxu0 %v10659_v54  ;;  %6955 = vmatprep.subr.bf16.mxu1 %v10661_v55  ;;  %v3703_v54 = vld [vmem:[%s13110_s17 + $0xd58] sm:$0xff] }
 0x6df   : > { %v3707_v55 = vld [vmem:[%s13110_s17 + $0xd78] sm:$0xff]  ;;  %v3789_v5 = vrot.slane %v14498_v58, %v14492_v25 }
 0x6e0   : > { %v10724_v13 = vcombine.low %v3703_v54, %v3707_v55 }
 0x6e1   : > { %6792 = vmatpush1.bf16.msra.mxu0 %v10658_v60  ;;  %6956 = vmatpush1.bf16.msra.mxu1 %v10660_v61  ;;  %v10716_v60 = vcombine.low %v3695_v34, %v3699_v45  ;;  %v3800_v61 = vsub.s32 3, %v14487_v8  ;;  %v3734_v45 = vld [vmem:[%s13110_s17 + $0xe50] sm:$0xff] }
 0x6e2   : > { %6793 = vmatprep.subr.bf16.mxu0 %v10667_v63  ;;  %6957 = vmatprep.subr.bf16.mxu1 %v10669_v0  ;;  %v10723_v63 = vcombine.high %v3702_v50, %v3706_v53  ;;  %v10725_v0 = vcombine.high %v3703_v54, %v3707_v55  ;;  %v3742_v55 = vld [vmem:[%s13110_s17 + $0xe90] sm:$0xff] }
 0x6e3   : > { %v3801_v12 = vrot.slane %v14498_v58, %v3800_v61 }
 0x6e5   : > { %6794 = vmatpush1.bf16.msra.mxu0 %v10666_v4  ;;  %6958 = vmatpush1.bf16.msra.mxu1 %v10668_v7  ;;  %v3715_v4 = vld [vmem:[%s13110_s17 + $0xdb8] sm:$0xff]  ;;  %v3797_v7 = vrot.slane %v14498_v58, %v3796_v59 }
 0x6e6   : > { %6795 = vmatprep.subr.bf16.mxu0 %v10675_v10  ;;  %6959 = vmatprep.subr.bf16.mxu1 %v10677_v11  ;;  %v3793_v10 = vrot.slane %v14498_v58, %v14502_v31  ;;  %v10722_v11 = vcombine.low %v3702_v50, %v3706_v53 }
 0x6e9   : > { %6796 = vmatpush1.bf16.msra.mxu0 %v10674_v16  ;;  %6960 = vmatpush1.bf16.msra.mxu1 %v10676_v17  ;;  %v10733_v16 = vcombine.high %v3711_v3, %v3715_v4  ;;  %v3718_v17 = vld [vmem:[%s13110_s17 + $0xdd0] sm:$0xff] }
 0x6ea   : > { %6806 = vmatprep.subr.bf16.mxu0 %v10683_v18  ;;  %6970 = vmatprep.subr.bf16.mxu1 %v10685_v62  ;;  %v3722_v18 = vld [vmem:[%s13110_s17 + $0xdf0] sm:$0xff] }
 0x6ec   : > { %6798 = vmatmul.mubr.bf16.vlgmr.msra.gmra.mrb[4].mxu0 %v14189_v43  ;;  %6962 = vmatmul.mubr.bf16.vlgmr.msra.gmra.mrb[4].mxu1 %v14189_v43  ;;  %v10698_v43 = vcombine.low %v3678_v28, %v3682_v29  ;;  %v10730_v28 = vcombine.low %v3710_v1, %v3714_v2 }
 0x6ed   : > { %6807 = vmatpush1.bf16.msra.mxu0 %v10682_v20  ;;  %6971 = vmatpush1.bf16.msra.mxu1 %v10684_v48 }
 0x6ee   : > { %6808 = vmatprep.subr.bf16.mxu0 %v10691_v24  ;;  %6972 = vmatprep.subr.bf16.mxu1 %v10693_v27 }
 0x6ef   : > { %10803 = vmatprep.mubr.msk.bf16.mxu0 %vm6326_vm6, %v14195_v52  ;;  %10805 = vmatprep.mubr.msk.bf16.mxu1 %vm6326_vm6, %v14195_v52  ;;  %v10706_v52 = vcombine.low %v3686_v38, %v3690_v39 }
 0x6f1   : > { %6809 = vmatpush1.bf16.msra.mxu0 %v10690_v36  ;;  %6973 = vmatpush1.bf16.msra.mxu1 %v10692_v32  ;;  %v10732_v32 = vcombine.low %v3711_v3, %v3715_v4  ;;  %v3750_v3 = vld [vmem:[%s13110_s17 + $0xed0] sm:$0xff] }
 0x6f2   : > { %6810 = vmatprep.subr.bf16.mxu0 %v10699_v30  ;;  %6974 = vmatprep.subr.bf16.mxu1 %v10701_v37  ;;  %v10739_v30 = vcombine.high %v3718_v17, %v3722_v18  ;;  %v3754_v4 = vld [vmem:[%s13110_s17 + $0xef0] sm:$0xff] }
 0x6f5   : > { %6811 = vmatpush1.bf16.msra.mxu0 %v10698_v43  ;;  %6975 = vmatpush1.bf16.msra.mxu1 %v10700_v42  ;;  %v3727_v42 = vld [vmem:[%s13110_s17 + $0xe18] sm:$0xff] }
 0x6f6   : > { %6812 = vmatprep.subr.bf16.mxu0 %v10707_v56  ;;  %6976 = vmatprep.subr.bf16.mxu1 %v10709_v9  ;;  %v3731_v56 = vld [vmem:[%s13110_s17 + $0xe38] sm:$0xff]  ;;  %v10738_v9 = vcombine.low %v3718_v17, %v3722_v18 }
 0x6f7   : > { %v10749_v34 = vcombine.high %v3727_v42, %v3731_v56  ;;  %v10748_v50 = vcombine.low %v3727_v42, %v3731_v56  ;;  %v3759_v17 = vld [vmem:[%s13110_s17 + $0xf18] sm:$0xff]  ;;  %v3812_v42 = vsub.s32 6, %v14487_v8  ;;  %v3808_v56 = vsub.s32 5, %v14487_v8 }
 0x6f8   : > { %v3763_v18 = vld [vmem:[%s13110_s17 + $0xf38] sm:$0xff] }
 0x6f9   : > { %6813 = vmatpush1.bf16.msra.mxu0 %v10706_v52  ;;  %6977 = vmatpush1.bf16.msra.mxu1 %v10708_v26  ;;  %v3738_v52 = vld [vmem:[%s13110_s17 + $0xe70] sm:$0xff]  ;;  %v3735_v26 = vld [vmem:[%s13110_s17 + $0xe58] sm:$0xff]  ;;  %v10781_v22 = vcombine.high %v3759_v17, %v3763_v18 }
 0x6fa   : > { %6814 = vmatprep.subr.bf16.mxu0 %v10715_v46  ;;  %6978 = vmatprep.subr.bf16.mxu1 %v10717_v47  ;;  %v3739_v46 = vld [vmem:[%s13110_s17 + $0xe78] sm:$0xff]  ;;  %v10746_v47 = vcombine.low %v3726_v49, %v3730_v41  ;;  %v10755_v53 = vcombine.high %v3734_v45, %v3738_v52 }
 0x6fb   : > { %v10757_v54 = vcombine.high %v3735_v26, %v3739_v46  ;;  %v10756_v1 = vcombine.low %v3735_v26, %v3739_v46 }
 0x6fd   : > { %6815 = vmatpush1.bf16.msra.mxu0 %v10714_v57  ;;  %6979 = vmatpush1.bf16.msra.mxu1 %v10716_v60  ;;  %v3746_v57 = vld [vmem:[%s13110_s17 + $0xeb0] sm:$0xff]  ;;  %v3743_v60 = vld [vmem:[%s13110_s17 + $0xe98] sm:$0xff] }
 0x6fe   : > { %6816 = vmatprep.subr.bf16.mxu0 %v10723_v63  ;;  %6980 = vmatprep.subr.bf16.mxu1 %v10725_v0  ;;  %v3747_v63 = vld [vmem:[%s13110_s17 + $0xeb8] sm:$0xff]  ;;  %v10754_v0 = vcombine.low %v3734_v45, %v3738_v52  ;;  %v10763_v2 = vcombine.high %v3742_v55, %v3746_v57 }
 0x6ff   : > { %v6512_v15 = vpop.f32.mrb[0].mxu0  ;;  %v6676_v19 = vpop.f32.mrb[0].mxu1 }
 0x700   : > { %v11272_v62 = vadd.f32 %v6512_v15, %v3789_v5  ;;  %v6514_v21 = vpop.f32.mrb[1].mxu0  ;;  %v11274_v20 = vadd.f32 %v6676_v19, %v3797_v7  ;;  %v6678_v24 = vpop.f32.mrb[1].mxu1  ;;  %v10765_v5 = vcombine.high %v3743_v60, %v3747_v63  ;;  %v3751_v7 = vld [vmem:[%s13110_s17 + $0xed8] sm:$0xff]  ;;  %v3758_v15 = vld [vmem:[%s13110_s17 + $0xf10] sm:$0xff] }
 0x701   : > { %v11273_v48 = vadd.f32 %v6514_v21, %v3793_v10  ;;  %v6516_v27 = vpop.f32.mrb[2].mxu0  ;;  %6817 = vmatpush1.bf16.msra.mxu0 %v10722_v11  ;;  %v11275_v33 = vadd.f32 %v6678_v24, %v3801_v12  ;;  %v6680_v35 = vpop.f32.mrb[2].mxu1  ;;  %6981 = vmatpush1.bf16.msra.mxu1 %v10724_v13  ;;  %v3755_v10 = vld [vmem:[%s13110_s17 + $0xef8] sm:$0xff]  ;;  %v10762_v11 = vcombine.low %v3742_v55, %v3746_v57 }
 0x702   : > { %v7011_v29 = vmax.f32 %v11272_v62, 0.0  ;;  %v6517_v36 = vpop.f32.mrb[3].mxu0  ;;  %6818 = vmatprep.subr.bf16.mxu0 %v10731_v14  ;;  %v7013_v37 = vmax.f32 %v11274_v20, 0.0  ;;  %v6681_v39 = vpop.f32.mrb[3].mxu1  ;;  %6982 = vmatprep.subr.bf16.mxu1 %v10733_v16  ;;  %v10764_v12 = vcombine.low %v3743_v60, %v3747_v63  ;;  %v10771_v13 = vcombine.high %v3750_v3, %v3754_v4  ;;  %v3762_v16 = vld [vmem:[%s13110_s17 + $0xf30] sm:$0xff]  ;;  %v3771_v24 = vld [vmem:[%s13110_s17 + $0xf78] sm:$0xff] }
 0x703   : > { %v7012_v38 = vmax.f32 %v11273_v48, 0.0  ;;  %v7014_v43 = vmax.f32 %v11275_v33, 0.0  ;;  %v10773_v14 = vcombine.high %v3751_v7, %v3755_v10  ;;  %v10770_v62 = vcombine.low %v3750_v3, %v3754_v4  ;;  %v3770_v20 = vld [vmem:[%s13110_s17 + $0xf70] sm:$0xff]  ;;  %v3767_v48 = vld [vmem:[%s13110_s17 + $0xf58] sm:$0xff] }
 0x704   : > { %7019 = vst [vmem:[#allocation2] sm:$0xff] %v7011_v29  ;;  %7021 = vst [vmem:[#allocation2 + $0x10] sm:$0xff] %v7013_v37  ;;  %v10772_v19 = vcombine.low %v3751_v7, %v3755_v10  ;;  %v10779_v21 = vcombine.high %v3758_v15, %v3762_v16  ;;  %v10778_v27 = vcombine.low %v3758_v15, %v3762_v16  ;;  %v3774_v35 = vld [vmem:[%s13110_s17 + $0xf90] sm:$0xff]  ;;  %v3775_v36 = vld [vmem:[%s13110_s17 + $0xf98] sm:$0xff] }
 0x705   : > { %7020 = vst [vmem:[#allocation2 + $0x8] sm:$0xff] %v7012_v38  ;;  %6819 = vmatpush1.bf16.msra.mxu0 %v10730_v28  ;;  %7022 = vst [vmem:[#allocation2 + $0x18] sm:$0xff] %v7014_v43  ;;  %6983 = vmatpush1.bf16.msra.mxu1 %v10732_v32  ;;  %v10780_v28 = vcombine.low %v3759_v17, %v3763_v18  ;;  %v10787_v29 = vcombine.high %v3766_v23, %v3770_v20  ;;  %v3804_v43 = vsub.s32 4, %v14487_v8  ;;  %v11635_v3 = vld [vmem:[#allocation14 + $0xc] ss:$16 sps:$4 sm:$0xff] (!%p10806_p5)  }
 0x706   : > { %6820 = vmatprep.subr.bf16.mxu0 %v10739_v30  ;;  %6984 = vmatprep.subr.bf16.mxu1 %v10741_v40  ;;  %v10789_v33 = vcombine.high %v3767_v48, %v3771_v24  ;;  %v10786_v32 = vcombine.low %v3766_v23, %v3770_v20  ;;  %v10788_v30 = vcombine.low %v3767_v48, %v3771_v24  ;;  %v11637_v4 = vld [vmem:[#allocation14] ss:$16 sps:$4 sm:$0xff] (!%p10806_p5)   ;;  %v11638_v7 = vld [vmem:[#allocation14 + $0x8] ss:$16 sps:$4 sm:$0xff] (!%p10806_p5)   ;;  %v11639_v10 = vld [vmem:[#allocation14 + $0x24] ss:$16 sps:$4 sm:$0xff] (!%p10806_p5)  }
 0x707   : > { %v10795_v37 = vcombine.high %v3774_v35, %v3774_v35  ;;  %v10794_v38 = vcombine.low %v3774_v35, %v3774_v35  ;;  %v10797_v39 = vcombine.high %v3775_v36, %v3775_v36  ;;  %v10796_v40 = vcombine.low %v3775_v36, %v3775_v36  ;;  %v11647_v15 = vld [vmem:[#allocation14 + $0x4c] ss:$16 sps:$4 sm:$0xff] (!%p10806_p5)   ;;  %v11649_v16 = vld [vmem:[#allocation14 + $0x40] ss:$16 sps:$4 sm:$0xff] (!%p10806_p5)   ;;  %v11650_v17 = vld [vmem:[#allocation14 + $0x48] ss:$16 sps:$4 sm:$0xff] (!%p10806_p5)  }
 0x708   : > { %v11651_v18 = vld [vmem:[#allocation14 + $0x64] ss:$16 sps:$4 sm:$0xff] (!%p10806_p5)   ;;  %v11659_v23 = vld [vmem:[#allocation14 + $0x8c] ss:$16 sps:$4 sm:$0xff] (!%p10806_p5)   ;;  %v11661_v20 = vld [vmem:[#allocation14 + $0x80] ss:$16 sps:$4 sm:$0xff] (!%p10806_p5)  }
 0x709   : > { %6821 = vmatpush1.bf16.msra.mxu0 %v10738_v9  ;;  %6985 = vmatpush1.bf16.msra.mxu1 %v10740_v6  ;;  %v6344_v49 = vsel %vm6330_vm7, %v10794_v38, 0  ;;  %v6350_v41 = vsel %vm6330_vm7, %v10796_v40, 0  ;;  %v3816_v9 = vsub.s32 7, %v14487_v8  ;;  %v3805_v6 = vrot.slane %v14498_v58, %v3804_v43  ;;  %v11662_v48 = vld [vmem:[#allocation14 + $0x88] ss:$16 sps:$4 sm:$0xff] (!%p10806_p5)  }
 0x70a   : > { %6822 = vmatprep.subr.bf16.mxu0 %v10747_v44  ;;  %6986 = vmatprep.subr.bf16.mxu1 %v10749_v34  ;;  %v3813_v44 = vrot.slane %v14498_v58, %v3812_v42  ;;  %v3809_v34 = vrot.slane %v14498_v58, %v3808_v56  ;;  %v11663_v24 = vld [vmem:[#allocation14 + $0xa4] ss:$16 sps:$4 sm:$0xff] (!%p10806_p5)   ;;  %v11671_v35 = vld [vmem:[#allocation14 + $0xcc] ss:$16 sps:$4 sm:$0xff] (!%p10806_p5)   ;;  %v11673_v36 = vld [vmem:[#allocation14 + $0xc0] ss:$16 sps:$4 sm:$0xff] (!%p10806_p5)  }
 0x70b   : > { %v3817_v45 = vrot.slane %v14498_v58, %v3816_v9  ;;  %v11633_v58 = vld [vmem:[#allocation14 + $0x4] ss:$16 sps:$4 sm:$0xff] (!%p10806_p5)   ;;  %v11679_v38 = vld [vmem:[#allocation14 + $0xe0] ss:$16 sps:$4 sm:$0xff] (!%p10806_p5)   ;;  %v11686_v43 = vld [vmem:[#allocation14 + $0x108] ss:$16 sps:$4 sm:$0xff] (!%p10806_p5)  }
 0x70c   : > { %v11681_v40 = vld [vmem:[#allocation14 + $0x104] ss:$16 sps:$4 sm:$0xff] (!%p10806_p5)   ;;  %v11689_v56 = vld [vmem:[#allocation14 + $0x12c] ss:$16 sps:$4 sm:$0xff] (!%p10806_p5)   ;;  %v11691_v9 = vld [vmem:[#allocation14 + $0x120] ss:$16 sps:$4 sm:$0xff] (!%p10806_p5)  }
 0x70d   : > { %6823 = vmatpush1.bf16.msra.mxu0 %v10746_v47  ;;  %6987 = vmatpush1.bf16.msra.mxu1 %v10748_v50  ;;  %v11687_v42 = vld [vmem:[#allocation14 + $0x124] ss:$16 sps:$4 sm:$0xff] (!%p10806_p5)  }
 0x70e   : > { %6824 = vmatprep.subr.bf16.mxu0 %v10755_v53  ;;  %6988 = vmatprep.subr.bf16.mxu1 %v10757_v54 }
 0x711   : > { %6825 = vmatpush1.bf16.msra.mxu0 %v10754_v0  ;;  %6989 = vmatpush1.bf16.msra.mxu1 %v10756_v1 }
 0x712   : > { %6826 = vmatprep.subr.bf16.mxu0 %v10763_v2  ;;  %6990 = vmatprep.subr.bf16.mxu1 %v10765_v5 }
 0x715   : > { %6827 = vmatpush1.bf16.msra.mxu0 %v10762_v11  ;;  %6991 = vmatpush1.bf16.msra.mxu1 %v10764_v12  ;;  %v11641_v11 = vld [vmem:[#allocation14 + $0x2c] ss:$16 sps:$4 sm:$0xff] (!%p10806_p5)   ;;  %v11643_v12 = vld [vmem:[#allocation14 + $0x20] ss:$16 sps:$4 sm:$0xff] (!%p10806_p5)  }
 0x716   : > { %6828 = vmatprep.subr.bf16.mxu0 %v10771_v13  ;;  %6992 = vmatprep.subr.bf16.mxu1 %v10773_v14  ;;  %v11644_v13 = vld [vmem:[#allocation14 + $0x28] ss:$16 sps:$4 sm:$0xff] (!%p10806_p5)   ;;  %v11645_v14 = vld [vmem:[#allocation14 + $0x44] ss:$16 sps:$4 sm:$0xff] (!%p10806_p5)  }
 0x719   : > { %6829 = vmatpush1.bf16.msra.mxu0 %v10770_v62  ;;  %6993 = vmatpush1.bf16.msra.mxu1 %v10772_v19  ;;  %v11653_v62 = vld [vmem:[#allocation14 + $0x6c] ss:$16 sps:$4 sm:$0xff] (!%p10806_p5)   ;;  %v11655_v19 = vld [vmem:[#allocation14 + $0x60] ss:$16 sps:$4 sm:$0xff] (!%p10806_p5)  }
 0x71a   : > { %6830 = vmatprep.subr.bf16.mxu0 %v10779_v21  ;;  %6994 = vmatprep.subr.bf16.mxu1 %v10781_v22  ;;  %v11656_v21 = vld [vmem:[#allocation14 + $0x68] ss:$16 sps:$4 sm:$0xff] (!%p10806_p5)   ;;  %v11657_v22 = vld [vmem:[#allocation14 + $0x84] ss:$16 sps:$4 sm:$0xff] (!%p10806_p5)  }
 0x71d   : > { %6831 = vmatpush1.bf16.msra.mxu0 %v10778_v27  ;;  %6995 = vmatpush1.bf16.msra.mxu1 %v10780_v28  ;;  %v11665_v27 = vld [vmem:[#allocation14 + $0xac] ss:$16 sps:$4 sm:$0xff] (!%p10806_p5)   ;;  %v11667_v28 = vld [vmem:[#allocation14 + $0xa0] ss:$16 sps:$4 sm:$0xff] (!%p10806_p5)  }
 0x71e   : > { %6832 = vmatprep.subr.bf16.mxu0 %v10787_v29  ;;  %6996 = vmatprep.subr.bf16.mxu1 %v10789_v33  ;;  %v11668_v29 = vld [vmem:[#allocation14 + $0xa8] ss:$16 sps:$4 sm:$0xff] (!%p10806_p5)   ;;  %v11669_v33 = vld [vmem:[#allocation14 + $0xc4] ss:$16 sps:$4 sm:$0xff] (!%p10806_p5)  }
 0x721   : > { %6833 = vmatpush1.bf16.msra.mxu0 %v10786_v32  ;;  %6997 = vmatpush1.bf16.msra.mxu1 %v10788_v30  ;;  %v11674_v32 = vld [vmem:[#allocation14 + $0xc8] ss:$16 sps:$4 sm:$0xff] (!%p10806_p5)   ;;  %v11675_v30 = vld [vmem:[#allocation14 + $0xe4] ss:$16 sps:$4 sm:$0xff] (!%p10806_p5)  }
 0x722   : > { %10802 = vmatprep.subr.msk.bf16.mxu0 %vm6330_vm7, %v10795_v37  ;;  %10804 = vmatprep.subr.msk.bf16.mxu1 %vm6330_vm7, %v10797_v39  ;;  %v11677_v37 = vld [vmem:[#allocation14 + $0xec] ss:$16 sps:$4 sm:$0xff] (!%p10806_p5)   ;;  %v11680_v39 = vld [vmem:[#allocation14 + $0xe8] ss:$16 sps:$4 sm:$0xff] (!%p10806_p5)  }
 0x725   : > { %6835 = vmatpush1.bf16.msra.mxu0 %v6344_v49  ;;  %6999 = vmatpush1.bf16.msra.mxu1 %v6350_v41  ;;  %v11683_v49 = vld [vmem:[#allocation14 + $0x10c] ss:$16 sps:$4 sm:$0xff] (!%p10806_p5)   ;;  %v11685_v41 = vld [vmem:[#allocation14 + $0x100] ss:$16 sps:$4 sm:$0xff] (!%p10806_p5)  }
 0x726   : > { %8584 = vmatprep.subr.bf16.mxu0 (!%p10806_p5), %v11633_v58  ;;  %8748 = vmatprep.subr.bf16.mxu1 (!%p10806_p5), %v11635_v3  ;;  %v11719_v58 = vld [vmem:[#allocation14 + $0x1cc] ss:$16 sps:$4 sm:$0xff] (!%p10806_p5)   ;;  %v11721_v3 = vld [vmem:[#allocation14 + $0x1c0] ss:$16 sps:$4 sm:$0xff] (!%p10806_p5)  }
 0x728   : > { %6839 = vmatmul.mubr.bf16.vlgmr.msra.gmra.mrb[4].mxu0 %v14261_v51  ;;  %7003 = vmatmul.mubr.bf16.vlgmr.msra.gmra.mrb[4].mxu1 %v14261_v51 }
 0x729   : > { %8585 = vmatpush1.bf16.msra.mxu0 (!%p10806_p5), %v11637_v4  ;;  %8749 = vmatpush1.bf16.msra.mxu1 (!%p10806_p5), %v11638_v7  ;;  %v11722_v4 = vld [vmem:[#allocation14 + $0x1c8] ss:$16 sps:$4 sm:$0xff] (!%p10806_p5)   ;;  %v11723_v7 = vld [vmem:[#allocation14 + $0x1e4] ss:$16 sps:$4 sm:$0xff] (!%p10806_p5)  }
 0x72a   : > { %8586 = vmatprep.subr.bf16.mxu0 (!%p10806_p5), %v11639_v10  ;;  %8750 = vmatprep.subr.bf16.mxu1 (!%p10806_p5), %v11641_v11  ;;  %v11725_v10 = vld [vmem:[#allocation14 + $0x1ec] ss:$16 sps:$4 sm:$0xff] (!%p10806_p5)   ;;  %v11727_v11 = vld [vmem:[#allocation14 + $0x1e0] ss:$16 sps:$4 sm:$0xff] (!%p10806_p5)  }
 0x72d   : > { %8587 = vmatpush1.bf16.msra.mxu0 (!%p10806_p5), %v11643_v12  ;;  %8751 = vmatpush1.bf16.msra.mxu1 (!%p10806_p5), %v11644_v13  ;;  %v11728_v12 = vld [vmem:[#allocation14 + $0x1e8] ss:$16 sps:$4 sm:$0xff] (!%p10806_p5)   ;;  %v7031_v13 = vld [vmem:[#allocation2] sm:$0xff] (!%p10806_p5) }
 0x72e   : > { %8588 = vmatprep.subr.bf16.mxu0 (!%p10806_p5), %v11645_v14  ;;  %8752 = vmatprep.subr.bf16.mxu1 (!%p10806_p5), %v11647_v15  ;;  %v11731_v14 = vld [vmem:[#allocation14 + $0x204] ss:$16 sps:$4 sm:$0xff] (!%p10806_p5)   ;;  %v11734_v15 = vld [vmem:[#allocation14 + $0x20c] ss:$16 sps:$4 sm:$0xff] (!%p10806_p5)  }
 0x731   : > { %8589 = vmatpush1.bf16.msra.mxu0 (!%p10806_p5), %v11649_v16  ;;  %8753 = vmatpush1.bf16.msra.mxu1 (!%p10806_p5), %v11650_v17  ;;  %v7290_v16 = vpack.c.bf16 (!%p10806_p5), %v7031_v13, %v7031_v13  ;;  %v11729_v17 = vld [vmem:[#allocation14 + $0x200] ss:$16 sps:$4 sm:$0xff] (!%p10806_p5)   ;;  %v11810_v13 = vld [vmem:[#allocation14 + $0x3a8] ss:$16 sps:$4 sm:$0xff] (!%p10806_p5)  }
 0x732   : > { %8590 = vmatprep.subr.bf16.mxu0 (!%p10806_p5), %v11651_v18  ;;  %8754 = vmatprep.subr.bf16.mxu1 (!%p10806_p5), %v11653_v62  ;;  %v11732_v18 = vld [vmem:[#allocation14 + $0x208] ss:$16 sps:$4 sm:$0xff] (!%p10806_p5)   ;;  %v11737_v62 = vld [vmem:[#allocation14 + $0x224] ss:$16 sps:$4 sm:$0xff] (!%p10806_p5)  }
 0x735   : > { %8591 = vmatpush1.bf16.msra.mxu0 (!%p10806_p5), %v11655_v19  ;;  %8755 = vmatpush1.bf16.msra.mxu1 (!%p10806_p5), %v11656_v21  ;;  %v11740_v19 = vld [vmem:[#allocation14 + $0x22c] ss:$16 sps:$4 sm:$0xff] (!%p10806_p5)   ;;  %v11735_v21 = vld [vmem:[#allocation14 + $0x220] ss:$16 sps:$4 sm:$0xff] (!%p10806_p5)  }
 0x736   : > { %8592 = vmatprep.subr.bf16.mxu0 (!%p10806_p5), %v11657_v22  ;;  %8756 = vmatprep.subr.bf16.mxu1 (!%p10806_p5), %v11659_v23  ;;  %v11738_v22 = vld [vmem:[#allocation14 + $0x228] ss:$16 sps:$4 sm:$0xff] (!%p10806_p5)   ;;  %v11743_v23 = vld [vmem:[#allocation14 + $0x244] ss:$16 sps:$4 sm:$0xff] (!%p10806_p5)  }
 0x739   : > { %8593 = vmatpush1.bf16.msra.mxu0 (!%p10806_p5), %v11661_v20  ;;  %8757 = vmatpush1.bf16.msra.mxu1 (!%p10806_p5), %v11662_v48  ;;  %v11746_v20 = vld [vmem:[#allocation14 + $0x24c] ss:$16 sps:$4 sm:$0xff] (!%p10806_p5)   ;;  %v11741_v48 = vld [vmem:[#allocation14 + $0x240] ss:$16 sps:$4 sm:$0xff] (!%p10806_p5)  }
 0x73a   : > { %8594 = vmatprep.subr.bf16.mxu0 (!%p10806_p5), %v11663_v24  ;;  %8758 = vmatprep.subr.bf16.mxu1 (!%p10806_p5), %v11665_v27  ;;  %v11744_v24 = vld [vmem:[#allocation14 + $0x248] ss:$16 sps:$4 sm:$0xff] (!%p10806_p5)   ;;  %v11749_v27 = vld [vmem:[#allocation14 + $0x264] ss:$16 sps:$4 sm:$0xff] (!%p10806_p5)  }
 0x73d   : > { %8595 = vmatpush1.bf16.msra.mxu0 (!%p10806_p5), %v11667_v28  ;;  %8759 = vmatpush1.bf16.msra.mxu1 (!%p10806_p5), %v11668_v29  ;;  %v11752_v28 = vld [vmem:[#allocation14 + $0x26c] ss:$16 sps:$4 sm:$0xff] (!%p10806_p5)   ;;  %v11747_v29 = vld [vmem:[#allocation14 + $0x260] ss:$16 sps:$4 sm:$0xff] (!%p10806_p5)  }
 0x73e   : > { %8596 = vmatprep.subr.bf16.mxu0 (!%p10806_p5), %v11669_v33  ;;  %8760 = vmatprep.subr.bf16.mxu1 (!%p10806_p5), %v11671_v35  ;;  %v11750_v33 = vld [vmem:[#allocation14 + $0x268] ss:$16 sps:$4 sm:$0xff] (!%p10806_p5)   ;;  %v11755_v35 = vld [vmem:[#allocation14 + $0x284] ss:$16 sps:$4 sm:$0xff] (!%p10806_p5)  }
 0x741   : > { %8597 = vmatpush1.bf16.msra.mxu0 (!%p10806_p5), %v11673_v36  ;;  %8761 = vmatpush1.bf16.msra.mxu1 (!%p10806_p5), %v11674_v32  ;;  %v11758_v36 = vld [vmem:[#allocation14 + $0x28c] ss:$16 sps:$4 sm:$0xff] (!%p10806_p5)   ;;  %v11753_v32 = vld [vmem:[#allocation14 + $0x280] ss:$16 sps:$4 sm:$0xff] (!%p10806_p5)  }
 0x742   : > { %8598 = vmatprep.subr.bf16.mxu0 (!%p10806_p5), %v11675_v30  ;;  %8762 = vmatprep.subr.bf16.mxu1 (!%p10806_p5), %v11677_v37  ;;  %v11756_v30 = vld [vmem:[#allocation14 + $0x288] ss:$16 sps:$4 sm:$0xff] (!%p10806_p5)   ;;  %v11761_v37 = vld [vmem:[#allocation14 + $0x2a4] ss:$16 sps:$4 sm:$0xff] (!%p10806_p5)  }
 0x745   : > { %8599 = vmatpush1.bf16.msra.mxu0 (!%p10806_p5), %v11679_v38  ;;  %8763 = vmatpush1.bf16.msra.mxu1 (!%p10806_p5), %v11680_v39  ;;  %v11764_v38 = vld [vmem:[#allocation14 + $0x2ac] ss:$16 sps:$4 sm:$0xff] (!%p10806_p5)   ;;  %v11759_v39 = vld [vmem:[#allocation14 + $0x2a0] ss:$16 sps:$4 sm:$0xff] (!%p10806_p5)  }
 0x746   : > { %8600 = vmatprep.subr.bf16.mxu0 (!%p10806_p5), %v11681_v40  ;;  %8764 = vmatprep.subr.bf16.mxu1 (!%p10806_p5), %v11683_v49  ;;  %v11762_v40 = vld [vmem:[#allocation14 + $0x2a8] ss:$16 sps:$4 sm:$0xff] (!%p10806_p5)   ;;  %v11767_v49 = vld [vmem:[#allocation14 + $0x2c4] ss:$16 sps:$4 sm:$0xff] (!%p10806_p5)  }
 0x749   : > { %8601 = vmatpush1.bf16.msra.mxu0 (!%p10806_p5), %v11685_v41  ;;  %8765 = vmatpush1.bf16.msra.mxu1 (!%p10806_p5), %v11686_v43  ;;  %v11770_v41 = vld [vmem:[#allocation14 + $0x2cc] ss:$16 sps:$4 sm:$0xff] (!%p10806_p5)  }
 0x74a   : > { %8602 = vmatprep.subr.bf16.mxu0 (!%p10806_p5), %v11687_v42  ;;  %8766 = vmatprep.subr.bf16.mxu1 (!%p10806_p5), %v11689_v56  ;;  %v7034_v43 = vld [vmem:[#allocation2 + $0x18] sm:$0xff] (!%p10806_p5)  ;;  %v11765_v42 = vld [vmem:[#allocation14 + $0x2c0] ss:$16 sps:$4 sm:$0xff] (!%p10806_p5)  }
 0x74b   : > { %v7293_v56 = vpack.c.bf16 (!%p10806_p5), %v7034_v43, %v7034_v43  ;;  %v11846_v43 = vld [vmem:[#allocation14 + $0x468] ss:$16 sps:$4 sm:$0xff] (!%p10806_p5)  }
 0x74d   : > { %8603 = vmatpush1.bf16.msra.mxu0 (!%p10806_p5), %v11691_v9  ;;  %v11768_v9 = vld [vmem:[#allocation14 + $0x2c8] ss:$16 sps:$4 sm:$0xff] (!%p10806_p5)  }
 0x7fb   : > { %v6840_v52 = vpop.f32.mrb[4].mxu0  ;;  %v7004_v46 = vpop.f32.mrb[4].mxu1  ;;  %7030 = sbr.rel (%p10806_p5) target bundleno = 3438 (0xd6e), region = 160 }
 0x7fc   : > { %v11276_v26 = vadd.f32 %v6840_v52, %v3805_v6  ;;  %v6842_v51 = vpop.f32.mrb[5].mxu0  ;;  %v11278_v47 = vadd.f32 %v7004_v46, %v3813_v44  ;;  %v7006_v53 = vpop.f32.mrb[5].mxu1  ;;  %v11692_v6 = vld [vmem:[#allocation14 + $0x128] ss:$16 sps:$4 sm:$0xff] (!%p10806_p5)   ;;  %v11693_v44 = vld [vmem:[#allocation14 + $0x144] ss:$16 sps:$4 sm:$0xff] (!%p10806_p5)  }
 0x7fd   : > { %v11277_v50 = vadd.f32 %v6842_v51, %v3809_v34  ;;  %v6844_v54 = vpop.f32.mrb[6].mxu0  ;;  %v11279_v57 = vadd.f32 %v7006_v53, %v3817_v45  ;;  %v7008_v60 = vpop.f32.mrb[6].mxu1  ;;  %v11695_v34 = vld [vmem:[#allocation14 + $0x14c] ss:$16 sps:$4 sm:$0xff] (!%p10806_p5)   ;;  %v11697_v45 = vld [vmem:[#allocation14 + $0x140] ss:$16 sps:$4 sm:$0xff] (!%p10806_p5)   ;;  %8767 = vmatpush1.bf16.msra.mxu1 (!%p10806_p5), %v11692_v6  ;;  %8604 = vmatprep.subr.bf16.mxu0 (!%p10806_p5), %v11693_v44 }
 0x7fe   : > { %v7015_v55 = vmax.f32 %v11276_v26, 0.0  ;;  %v6845_v63 = vpop.f32.mrb[7].mxu0  ;;  %v7017_v0 = vmax.f32 %v11278_v47, 0.0  ;;  %v7009_v2 = vpop.f32.mrb[7].mxu1  ;;  %v11698_v52 = vld [vmem:[#allocation14 + $0x148] ss:$16 sps:$4 sm:$0xff] (!%p10806_p5)   ;;  %8768 = vmatprep.subr.bf16.mxu1 (!%p10806_p5), %v11695_v34  ;;  %8605 = vmatpush1.bf16.msra.mxu0 (!%p10806_p5), %v11697_v45 }
 0x7ff   : > { %v7016_v1 = vmax.f32 %v11277_v50, 0.0  ;;  %v7018_v5 = vmax.f32 %v11279_v57, 0.0  ;;  %v11699_v26 = vld [vmem:[#allocation14 + $0x164] ss:$16 sps:$4 sm:$0xff] (!%p10806_p5)   ;;  %v11701_v46 = vld [vmem:[#allocation14 + $0x16c] ss:$16 sps:$4 sm:$0xff] (!%p10806_p5)  }
 0x800   : > { %7023 = vst [vmem:[#allocation2 + $0x20] sm:$0xff] %v7015_v55  ;;  %7025 = vst [vmem:[#allocation2 + $0x30] sm:$0xff] %v7017_v0  ;;  %v7032_v51 = vld [vmem:[#allocation2 + $0x8] sm:$0xff] (!%p10806_p5)  ;;  %v11703_v47 = vld [vmem:[#allocation14 + $0x160] ss:$16 sps:$4 sm:$0xff] (!%p10806_p5)   ;;  %8606 = vmatprep.subr.bf16.mxu0 (!%p10806_p5), %v11699_v26 }
 0x801   : > { %7024 = vst [vmem:[#allocation2 + $0x28] sm:$0xff] %v7016_v1  ;;  %7026 = vst.msk [vmem:[#allocation2 + $0x38] sm:$0xff] %vm6326_vm6, %v7018_v5  ;;  %v7291_v50 = vpack.c.bf16 (!%p10806_p5), %v7032_v51, %v7032_v51  ;;  %8769 = vmatpush1.bf16.msra.mxu1 (!%p10806_p5), %v11698_v52  ;;  %v11704_v53 = vld [vmem:[#allocation14 + $0x168] ss:$16 sps:$4 sm:$0xff] (!%p10806_p5)   ;;  %v11705_v54 = vld [vmem:[#allocation14 + $0x184] ss:$16 sps:$4 sm:$0xff] (!%p10806_p5)  }
 0x802   : > { %8770 = vmatprep.subr.bf16.mxu1 %v11701_v46  ;;  %v11707_v55 = vld [vmem:[#allocation14 + $0x18c] ss:$16 sps:$4 sm:$0xff]   ;;  %8607 = vmatpush1.bf16.msra.mxu0 %v11703_v47  ;;  %v11709_v57 = vld [vmem:[#allocation14 + $0x180] ss:$16 sps:$4 sm:$0xff]   ;;  %v11710_v60 = vld [vmem:[#allocation14 + $0x188] ss:$16 sps:$4 sm:$0xff]  }
 0x803   : > { %8616 = vmatprep.mubr.bf16.mxu0 %v7291_v50  ;;  %8780 = vmatprep.mubr.bf16.mxu1 %v7291_v50  ;;  %v11711_v63 = vld [vmem:[#allocation14 + $0x1a4] ss:$16 sps:$4 sm:$0xff]   ;;  %v11713_v0 = vld [vmem:[#allocation14 + $0x1ac] ss:$16 sps:$4 sm:$0xff]   ;;  %v11715_v1 = vld [vmem:[#allocation14 + $0x1a0] ss:$16 sps:$4 sm:$0xff]  }
 0x804   : > { %8608 = vmatprep.subr.bf16.mxu0 %v11705_v54  ;;  %v11716_v2 = vld [vmem:[#allocation14 + $0x1a8] ss:$16 sps:$4 sm:$0xff]   ;;  %v11717_v5 = vld [vmem:[#allocation14 + $0x1c4] ss:$16 sps:$4 sm:$0xff]   ;;  %v11776_v44 = vld [vmem:[#allocation14 + $0x2ec] ss:$16 sps:$4 sm:$0xff]  }
 0x805   : > { %8771 = vmatpush1.bf16.msra.mxu1 %v11704_v53  ;;  %v11773_v6 = vld [vmem:[#allocation14 + $0x2e4] ss:$16 sps:$4 sm:$0xff]   ;;  %v11771_v34 = vld [vmem:[#allocation14 + $0x2e0] ss:$16 sps:$4 sm:$0xff]   ;;  %v11774_v45 = vld [vmem:[#allocation14 + $0x2e8] ss:$16 sps:$4 sm:$0xff]  }
 0x806   : > { %8772 = vmatprep.subr.bf16.mxu1 %v11707_v55  ;;  %8609 = vmatpush1.bf16.msra.mxu0 %v11709_v57  ;;  %v11779_v52 = vld [vmem:[#allocation14 + $0x304] ss:$16 sps:$4 sm:$0xff]   ;;  %v11782_v26 = vld [vmem:[#allocation14 + $0x30c] ss:$16 sps:$4 sm:$0xff]   ;;  %v11777_v46 = vld [vmem:[#allocation14 + $0x300] ss:$16 sps:$4 sm:$0xff]  }
 0x807   : > { %8610 = vmatprep.subr.bf16.mxu0 %v11711_v63  ;;  %v11780_v51 = vld [vmem:[#allocation14 + $0x308] ss:$16 sps:$4 sm:$0xff]   ;;  %v11785_v47 = vld [vmem:[#allocation14 + $0x324] ss:$16 sps:$4 sm:$0xff]   ;;  %v11788_v50 = vld [vmem:[#allocation14 + $0x32c] ss:$16 sps:$4 sm:$0xff]  }
 0x808   : > { %v11783_v53 = vld [vmem:[#allocation14 + $0x320] ss:$16 sps:$4 sm:$0xff]   ;;  %v11786_v54 = vld [vmem:[#allocation14 + $0x328] ss:$16 sps:$4 sm:$0xff]   ;;  %v11791_v55 = vld [vmem:[#allocation14 + $0x344] ss:$16 sps:$4 sm:$0xff]  }
 0x809   : > { %8773 = vmatpush1.bf16.msra.mxu1 %v11710_v60  ;;  %v11794_v57 = vld [vmem:[#allocation14 + $0x34c] ss:$16 sps:$4 sm:$0xff]   ;;  %v11789_v60 = vld [vmem:[#allocation14 + $0x340] ss:$16 sps:$4 sm:$0xff]   ;;  %v11792_v63 = vld [vmem:[#allocation14 + $0x348] ss:$16 sps:$4 sm:$0xff]  }
 0x80a   : > { %8774 = vmatprep.subr.bf16.mxu1 %v11713_v0  ;;  %8611 = vmatpush1.bf16.msra.mxu0 %v11715_v1  ;;  %v11797_v0 = vld [vmem:[#allocation14 + $0x364] ss:$16 sps:$4 sm:$0xff]   ;;  %v11800_v1 = vld [vmem:[#allocation14 + $0x36c] ss:$16 sps:$4 sm:$0xff]  }
 0x80b   : > { %8612 = vmatprep.subr.bf16.mxu0 %v11717_v5  ;;  %v11798_v5 = vld [vmem:[#allocation14 + $0x368] ss:$16 sps:$4 sm:$0xff]  }
 0x80d   : > { %8775 = vmatpush1.bf16.msra.mxu1 %v11716_v2  ;;  %v11795_v2 = vld [vmem:[#allocation14 + $0x360] ss:$16 sps:$4 sm:$0xff]  }
 0x80e   : > { %8776 = vmatprep.subr.bf16.mxu1 %v11719_v58  ;;  %8613 = vmatpush1.bf16.msra.mxu0 %v11721_v3  ;;  %v11803_v58 = vld [vmem:[#allocation14 + $0x384] ss:$16 sps:$4 sm:$0xff]   ;;  %v11806_v3 = vld [vmem:[#allocation14 + $0x38c] ss:$16 sps:$4 sm:$0xff]  }
 0x80f   : > { %8614 = vmatprep.subr.bf16.mxu0 %v11723_v7  ;;  %v11804_v7 = vld [vmem:[#allocation14 + $0x388] ss:$16 sps:$4 sm:$0xff]  }
 0x811   : > { %8777 = vmatpush1.bf16.msra.mxu1 %v11722_v4  ;;  %v11801_v4 = vld [vmem:[#allocation14 + $0x380] ss:$16 sps:$4 sm:$0xff]  }
 0x812   : > { %8778 = vmatprep.subr.bf16.mxu1 %v11725_v10  ;;  %8615 = vmatpush1.bf16.msra.mxu0 %v11727_v11  ;;  %v11809_v10 = vld [vmem:[#allocation14 + $0x3a4] ss:$16 sps:$4 sm:$0xff]   ;;  %v11812_v11 = vld [vmem:[#allocation14 + $0x3ac] ss:$16 sps:$4 sm:$0xff]  }
 0x813   : > { %8625 = vmatprep.subr.bf16.mxu0 %v11731_v14  ;;  %v11815_v14 = vld [vmem:[#allocation14 + $0x3c4] ss:$16 sps:$4 sm:$0xff]  }
 0x815   : > { %8779 = vmatpush1.bf16.msra.mxu1 %v11728_v12  ;;  %8617 = vmatmul.mubr.bf16.vlgmr.msra.gmra.mrb[0].mxu0 %v7290_v16  ;;  %v11807_v12 = vld [vmem:[#allocation14 + $0x3a0] ss:$16 sps:$4 sm:$0xff]  }
 0x816   : > { %8789 = vmatprep.subr.bf16.mxu1 %v11734_v15  ;;  %8626 = vmatpush1.bf16.msra.mxu0 %v11729_v17  ;;  %v11818_v15 = vld [vmem:[#allocation14 + $0x3cc] ss:$16 sps:$4 sm:$0xff]   ;;  %v11816_v17 = vld [vmem:[#allocation14 + $0x3c8] ss:$16 sps:$4 sm:$0xff]  }
 0x817   : > { %8627 = vmatprep.subr.bf16.mxu0 %v11737_v62  ;;  %8657 = vmatprep.mubr.bf16.mxu0 %v7293_v56  ;;  %v11824_v62 = vld [vmem:[#allocation14 + $0x3ec] ss:$16 sps:$4 sm:$0xff]  }
 0x818   : > { %8781 = vmatmul.mubr.bf16.vlgmr.msra.gmra.mrb[0].mxu1 %v7290_v16  ;;  %v11813_v16 = vld [vmem:[#allocation14 + $0x3c0] ss:$16 sps:$4 sm:$0xff]  }
 0x819   : > { %8790 = vmatpush1.bf16.msra.mxu1 %v11732_v18  ;;  %8821 = vmatprep.mubr.bf16.mxu1 %v7293_v56  ;;  %v11821_v18 = vld [vmem:[#allocation14 + $0x3e4] ss:$16 sps:$4 sm:$0xff]   ;;  %v11854_v56 = vld [vmem:[#allocation14 + $0x48c] ss:$16 sps:$4 sm:$0xff]  }
 0x81a   : > { %8791 = vmatprep.subr.bf16.mxu1 %v11740_v19  ;;  %8628 = vmatpush1.bf16.msra.mxu0 %v11735_v21  ;;  %v11819_v19 = vld [vmem:[#allocation14 + $0x3e0] ss:$16 sps:$4 sm:$0xff]   ;;  %v11822_v21 = vld [vmem:[#allocation14 + $0x3e8] ss:$16 sps:$4 sm:$0xff]  }
 0x81b   : > { %8629 = vmatprep.subr.bf16.mxu0 %v11743_v23  ;;  %v7033_v23 = vld [vmem:[#allocation2 + $0x10] sm:$0xff] }
 0x81d   : > { %8792 = vmatpush1.bf16.msra.mxu1 %v11738_v22  ;;  %v11827_v22 = vld [vmem:[#allocation14 + $0x404] ss:$16 sps:$4 sm:$0xff]  }
 0x81e   : > { %8793 = vmatprep.subr.bf16.mxu1 %v11746_v20  ;;  %8630 = vmatpush1.bf16.msra.mxu0 %v11741_v48  ;;  %v11830_v20 = vld [vmem:[#allocation14 + $0x40c] ss:$16 sps:$4 sm:$0xff]   ;;  %v11825_v48 = vld [vmem:[#allocation14 + $0x400] ss:$16 sps:$4 sm:$0xff]  }
 0x81f   : > { %8631 = vmatprep.subr.bf16.mxu0 %v11749_v27  ;;  %v7292_v27 = vpack.c.bf16 %v7033_v23, %v7033_v23  ;;  %v11911_v23 = vld [vmem:[#allocation14 + $0x5c4] ss:$16 sps:$4 sm:$0xff]  }
 0x821   : > { %8794 = vmatpush1.bf16.msra.mxu1 %v11744_v24  ;;  %v11828_v24 = vld [vmem:[#allocation14 + $0x408] ss:$16 sps:$4 sm:$0xff]  }
 0x822   : > { %8795 = vmatprep.subr.bf16.mxu1 %v11752_v28  ;;  %8632 = vmatpush1.bf16.msra.mxu0 %v11747_v29  ;;  %v11833_v28 = vld [vmem:[#allocation14 + $0x424] ss:$16 sps:$4 sm:$0xff]   ;;  %v11836_v29 = vld [vmem:[#allocation14 + $0x42c] ss:$16 sps:$4 sm:$0xff]  }
 0x823   : > { %8633 = vmatprep.subr.bf16.mxu0 %v11755_v35 }
 0x825   : > { %8796 = vmatpush1.bf16.msra.mxu1 %v11750_v33  ;;  %v7036_v33 = vld [vmem:[#allocation2 + $0x28] sm:$0xff] }
 0x826   : > { %8797 = vmatprep.subr.bf16.mxu1 %v11758_v36  ;;  %8634 = vmatpush1.bf16.msra.mxu0 %v11753_v32  ;;  %v7295_v35 = vpack.c.bf16 %v7036_v33, %v7036_v33  ;;  %v11831_v36 = vld [vmem:[#allocation14 + $0x420] ss:$16 sps:$4 sm:$0xff]   ;;  %v11834_v32 = vld [vmem:[#allocation14 + $0x428] ss:$16 sps:$4 sm:$0xff]  }
 0x827   : > { %8635 = vmatprep.subr.bf16.mxu0 %v11761_v37  ;;  %v11842_v37 = vld [vmem:[#allocation14 + $0x44c] ss:$16 sps:$4 sm:$0xff]   ;;  %v11918_v33 = vld [vmem:[#allocation14 + $0x5e8] ss:$16 sps:$4 sm:$0xff]  }
 0x829   : > { %8798 = vmatpush1.bf16.msra.mxu1 %v11756_v30  ;;  %v11839_v30 = vld [vmem:[#allocation14 + $0x444] ss:$16 sps:$4 sm:$0xff]  }
 0x82a   : > { %8799 = vmatprep.subr.bf16.mxu1 %v11764_v38  ;;  %8636 = vmatpush1.bf16.msra.mxu0 %v11759_v39  ;;  %v11837_v38 = vld [vmem:[#allocation14 + $0x440] ss:$16 sps:$4 sm:$0xff]   ;;  %v11840_v39 = vld [vmem:[#allocation14 + $0x448] ss:$16 sps:$4 sm:$0xff]  }
 0x82b   : > { %8637 = vmatprep.subr.bf16.mxu0 %v11767_v49  ;;  %v11848_v49 = vld [vmem:[#allocation14 + $0x46c] ss:$16 sps:$4 sm:$0xff]  }
 0x82d   : > { %8800 = vmatpush1.bf16.msra.mxu1 %v11762_v40  ;;  %v11845_v40 = vld [vmem:[#allocation14 + $0x464] ss:$16 sps:$4 sm:$0xff]  }
 0x82e   : > { %8801 = vmatprep.subr.bf16.mxu1 %v11770_v41  ;;  %8638 = vmatpush1.bf16.msra.mxu0 %v11765_v42  ;;  %v11843_v41 = vld [vmem:[#allocation14 + $0x460] ss:$16 sps:$4 sm:$0xff]   ;;  %v11851_v42 = vld [vmem:[#allocation14 + $0x484] ss:$16 sps:$4 sm:$0xff]  }
 0x82f   : > { %8639 = vmatprep.subr.bf16.mxu0 %v11773_v6  ;;  %v11852_v6 = vld [vmem:[#allocation14 + $0x488] ss:$16 sps:$4 sm:$0xff]  }
 0x831   : > { %8802 = vmatpush1.bf16.msra.mxu1 %v11768_v9  ;;  %v11849_v9 = vld [vmem:[#allocation14 + $0x480] ss:$16 sps:$4 sm:$0xff]  }
 0x832   : > { %8803 = vmatprep.subr.bf16.mxu1 %v11776_v44  ;;  %8640 = vmatpush1.bf16.msra.mxu0 %v11771_v34  ;;  %v11857_v44 = vld [vmem:[#allocation14 + $0x4a4] ss:$16 sps:$4 sm:$0xff]   ;;  %v11860_v34 = vld [vmem:[#allocation14 + $0x4ac] ss:$16 sps:$4 sm:$0xff]  }
 0x833   : > { %8641 = vmatprep.subr.bf16.mxu0 %v11779_v52  ;;  %v11858_v52 = vld [vmem:[#allocation14 + $0x4a8] ss:$16 sps:$4 sm:$0xff]  }
 0x835   : > { %8804 = vmatpush1.bf16.msra.mxu1 %v11774_v45  ;;  %v11855_v45 = vld [vmem:[#allocation14 + $0x4a0] ss:$16 sps:$4 sm:$0xff]  }
 0x836   : > { %8805 = vmatprep.subr.bf16.mxu1 %v11782_v26  ;;  %8642 = vmatpush1.bf16.msra.mxu0 %v11777_v46  ;;  %v11863_v26 = vld [vmem:[#allocation14 + $0x4c4] ss:$16 sps:$4 sm:$0xff]   ;;  %v11866_v46 = vld [vmem:[#allocation14 + $0x4cc] ss:$16 sps:$4 sm:$0xff]  }
 0x837   : > { %8643 = vmatprep.subr.bf16.mxu0 %v11785_v47  ;;  %v11864_v47 = vld [vmem:[#allocation14 + $0x4c8] ss:$16 sps:$4 sm:$0xff]  }
 0x839   : > { %8806 = vmatpush1.bf16.msra.mxu1 %v11780_v51  ;;  %v11861_v51 = vld [vmem:[#allocation14 + $0x4c0] ss:$16 sps:$4 sm:$0xff]  }
 0x83a   : > { %8807 = vmatprep.subr.bf16.mxu1 %v11788_v50  ;;  %8644 = vmatpush1.bf16.msra.mxu0 %v11783_v53  ;;  %v11869_v50 = vld [vmem:[#allocation14 + $0x4e4] ss:$16 sps:$4 sm:$0xff]   ;;  %v11872_v53 = vld [vmem:[#allocation14 + $0x4ec] ss:$16 sps:$4 sm:$0xff]  }
 0x83b   : > { %8645 = vmatprep.subr.bf16.mxu0 %v11791_v55  ;;  %v11870_v55 = vld [vmem:[#allocation14 + $0x4e8] ss:$16 sps:$4 sm:$0xff]  }
 0x83d   : > { %8808 = vmatpush1.bf16.msra.mxu1 %v11786_v54  ;;  %v11867_v54 = vld [vmem:[#allocation14 + $0x4e0] ss:$16 sps:$4 sm:$0xff]  }
 0x83e   : > { %8809 = vmatprep.subr.bf16.mxu1 %v11794_v57  ;;  %8646 = vmatpush1.bf16.msra.mxu0 %v11789_v60  ;;  %v11875_v57 = vld [vmem:[#allocation14 + $0x504] ss:$16 sps:$4 sm:$0xff]   ;;  %v11878_v60 = vld [vmem:[#allocation14 + $0x50c] ss:$16 sps:$4 sm:$0xff]  }
 0x83f   : > { %8647 = vmatprep.subr.bf16.mxu0 %v11797_v0  ;;  %v11876_v0 = vld [vmem:[#allocation14 + $0x508] ss:$16 sps:$4 sm:$0xff]  }
 0x841   : > { %8810 = vmatpush1.bf16.msra.mxu1 %v11792_v63  ;;  %v11873_v63 = vld [vmem:[#allocation14 + $0x500] ss:$16 sps:$4 sm:$0xff]  }
 0x842   : > { %8811 = vmatprep.subr.bf16.mxu1 %v11800_v1  ;;  %8648 = vmatpush1.bf16.msra.mxu0 %v11795_v2  ;;  %v11881_v1 = vld [vmem:[#allocation14 + $0x524] ss:$16 sps:$4 sm:$0xff]   ;;  %v11884_v2 = vld [vmem:[#allocation14 + $0x52c] ss:$16 sps:$4 sm:$0xff]  }
 0x843   : > { %8649 = vmatprep.subr.bf16.mxu0 %v11803_v58  ;;  %v11882_v58 = vld [vmem:[#allocation14 + $0x528] ss:$16 sps:$4 sm:$0xff]  }
 0x845   : > { %8812 = vmatpush1.bf16.msra.mxu1 %v11798_v5  ;;  %v11879_v5 = vld [vmem:[#allocation14 + $0x520] ss:$16 sps:$4 sm:$0xff]  }
 0x846   : > { %8813 = vmatprep.subr.bf16.mxu1 %v11806_v3  ;;  %8650 = vmatpush1.bf16.msra.mxu0 %v11801_v4  ;;  %v11887_v3 = vld [vmem:[#allocation14 + $0x544] ss:$16 sps:$4 sm:$0xff]   ;;  %v11890_v4 = vld [vmem:[#allocation14 + $0x54c] ss:$16 sps:$4 sm:$0xff]  }
 0x847   : > { %8651 = vmatprep.subr.bf16.mxu0 %v11809_v10  ;;  %v11888_v10 = vld [vmem:[#allocation14 + $0x548] ss:$16 sps:$4 sm:$0xff]  }
 0x849   : > { %8814 = vmatpush1.bf16.msra.mxu1 %v11804_v7  ;;  %v11885_v7 = vld [vmem:[#allocation14 + $0x540] ss:$16 sps:$4 sm:$0xff]  }
 0x84a   : > { %8815 = vmatprep.subr.bf16.mxu1 %v11812_v11  ;;  %8652 = vmatpush1.bf16.msra.mxu0 %v11807_v12  ;;  %v11893_v11 = vld [vmem:[#allocation14 + $0x564] ss:$16 sps:$4 sm:$0xff]   ;;  %v11896_v12 = vld [vmem:[#allocation14 + $0x56c] ss:$16 sps:$4 sm:$0xff]  }
 0x84b   : > { %8653 = vmatprep.subr.bf16.mxu0 %v11815_v14  ;;  %v11894_v14 = vld [vmem:[#allocation14 + $0x568] ss:$16 sps:$4 sm:$0xff]  }
 0x84d   : > { %8816 = vmatpush1.bf16.msra.mxu1 %v11810_v13  ;;  %v11891_v13 = vld [vmem:[#allocation14 + $0x560] ss:$16 sps:$4 sm:$0xff]  }
 0x84e   : > { %8817 = vmatprep.subr.bf16.mxu1 %v11818_v15  ;;  %8654 = vmatpush1.bf16.msra.mxu0 %v11813_v16  ;;  %v11899_v15 = vld [vmem:[#allocation14 + $0x584] ss:$16 sps:$4 sm:$0xff]   ;;  %v11902_v16 = vld [vmem:[#allocation14 + $0x58c] ss:$16 sps:$4 sm:$0xff]  }
 0x84f   : > { %8655 = vmatprep.subr.bf16.mxu0 %v11821_v18  ;;  %v11900_v18 = vld [vmem:[#allocation14 + $0x588] ss:$16 sps:$4 sm:$0xff]  }
 0x851   : > { %8818 = vmatpush1.bf16.msra.mxu1 %v11816_v17  ;;  %v11897_v17 = vld [vmem:[#allocation14 + $0x580] ss:$16 sps:$4 sm:$0xff]  }
 0x852   : > { %8819 = vmatprep.subr.bf16.mxu1 %v11824_v62  ;;  %8656 = vmatpush1.bf16.msra.mxu0 %v11819_v19  ;;  %v11905_v62 = vld [vmem:[#allocation14 + $0x5a4] ss:$16 sps:$4 sm:$0xff]   ;;  %v11908_v19 = vld [vmem:[#allocation14 + $0x5ac] ss:$16 sps:$4 sm:$0xff]  }
 0x853   : > { %8666 = vmatprep.subr.bf16.mxu0 %v11827_v22  ;;  %v11906_v22 = vld [vmem:[#allocation14 + $0x5a8] ss:$16 sps:$4 sm:$0xff]  }
 0x855   : > { %8820 = vmatpush1.bf16.msra.mxu1 %v11822_v21  ;;  %8658 = vmatmul.mubr.bf16.vlgmr.msra.gmra.mrb[0].mxu0 %v7292_v27  ;;  %v11903_v21 = vld [vmem:[#allocation14 + $0x5a0] ss:$16 sps:$4 sm:$0xff]  }
 0x856   : > { %8830 = vmatprep.subr.bf16.mxu1 %v11830_v20  ;;  %8667 = vmatpush1.bf16.msra.mxu0 %v11825_v48  ;;  %v11914_v20 = vld [vmem:[#allocation14 + $0x5cc] ss:$16 sps:$4 sm:$0xff]   ;;  %v11909_v48 = vld [vmem:[#allocation14 + $0x5c0] ss:$16 sps:$4 sm:$0xff]  }
 0x857   : > { %8668 = vmatprep.subr.bf16.mxu0 %v11833_v28  ;;  %8698 = vmatprep.mubr.bf16.mxu0 %v7295_v35  ;;  %v11920_v28 = vld [vmem:[#allocation14 + $0x5ec] ss:$16 sps:$4 sm:$0xff]  }
 0x858   : > { %8822 = vmatmul.mubr.bf16.vlgmr.msra.gmra.mrb[0].mxu1 %v7292_v27  ;;  %v11917_v27 = vld [vmem:[#allocation14 + $0x5e4] ss:$16 sps:$4 sm:$0xff]  }
 0x859   : > { %8831 = vmatpush1.bf16.msra.mxu1 %v11828_v24  ;;  %8862 = vmatprep.mubr.bf16.mxu1 %v7295_v35  ;;  %v11912_v24 = vld [vmem:[#allocation14 + $0x5c8] ss:$16 sps:$4 sm:$0xff]   ;;  %v11923_v35 = vld [vmem:[#allocation14 + $0x604] ss:$16 sps:$4 sm:$0xff]  }
 0x85a   : > { %8832 = vmatprep.subr.bf16.mxu1 %v11836_v29  ;;  %8669 = vmatpush1.bf16.msra.mxu0 %v11831_v36  ;;  %v11915_v29 = vld [vmem:[#allocation14 + $0x5e0] ss:$16 sps:$4 sm:$0xff]   ;;  %v11926_v36 = vld [vmem:[#allocation14 + $0x60c] ss:$16 sps:$4 sm:$0xff]  }
 0x85b   : > { %8670 = vmatprep.subr.bf16.mxu0 %v11839_v30  ;;  %v7038_v30 = vld [vmem:[#allocation2 + $0x38] sm:$0xff] }
 0x85d   : > { %8833 = vmatpush1.bf16.msra.mxu1 %v11834_v32  ;;  %v7035_v32 = vld [vmem:[#allocation2 + $0x20] sm:$0xff] }
 0x85e   : > { %8834 = vmatprep.subr.bf16.mxu1 %v11842_v37  ;;  %8671 = vmatpush1.bf16.msra.mxu0 %v11837_v38  ;;  %v11921_v37 = vld [vmem:[#allocation14 + $0x600] ss:$16 sps:$4 sm:$0xff]   ;;  %v11924_v38 = vld [vmem:[#allocation14 + $0x608] ss:$16 sps:$4 sm:$0xff]  }
 0x85f   : > { %8672 = vmatprep.subr.bf16.mxu0 %v11845_v40  ;;  %v11929_v40 = vld [vmem:[#allocation14 + $0x624] ss:$16 sps:$4 sm:$0xff]  }
 0x861   : > { %8835 = vmatpush1.bf16.msra.mxu1 %v11840_v39  ;;  %v7294_v39 = vpack.c.bf16 %v7035_v32, %v7035_v32  ;;  %v12002_v32 = vld [vmem:[#allocation14 + $0x7a8] ss:$16 sps:$4 sm:$0xff]  }
 0x862   : > { %8836 = vmatprep.subr.bf16.mxu1 %v11848_v49  ;;  %8673 = vmatpush1.bf16.msra.mxu0 %v11843_v41  ;;  %v11932_v49 = vld [vmem:[#allocation14 + $0x62c] ss:$16 sps:$4 sm:$0xff]   ;;  %v11927_v41 = vld [vmem:[#allocation14 + $0x620] ss:$16 sps:$4 sm:$0xff]  }
 0x863   : > { %8674 = vmatprep.subr.bf16.mxu0 %v11851_v42  ;;  %v7297_v42 = vpack.c.bf16 %v7038_v30, %v7038_v30 }
 0x865   : > { %8837 = vmatpush1.bf16.msra.mxu1 %v11846_v43  ;;  %v11930_v43 = vld [vmem:[#allocation14 + $0x628] ss:$16 sps:$4 sm:$0xff]  }
 0x866   : > { %8838 = vmatprep.subr.bf16.mxu1 %v11854_v56  ;;  %8675 = vmatpush1.bf16.msra.mxu0 %v11849_v9  ;;  %v11935_v56 = vld [vmem:[#allocation14 + $0x644] ss:$16 sps:$4 sm:$0xff]   ;;  %v11938_v9 = vld [vmem:[#allocation14 + $0x64c] ss:$16 sps:$4 sm:$0xff]  }
 0x867   : > { %8676 = vmatprep.subr.bf16.mxu0 %v11857_v44  ;;  %v11936_v44 = vld [vmem:[#allocation14 + $0x648] ss:$16 sps:$4 sm:$0xff]  }
 0x869   : > { %8839 = vmatpush1.bf16.msra.mxu1 %v11852_v6  ;;  %v11933_v6 = vld [vmem:[#allocation14 + $0x640] ss:$16 sps:$4 sm:$0xff]  }
 0x86a   : > { %8840 = vmatprep.subr.bf16.mxu1 %v11860_v34  ;;  %8677 = vmatpush1.bf16.msra.mxu0 %v11855_v45  ;;  %v11941_v34 = vld [vmem:[#allocation14 + $0x664] ss:$16 sps:$4 sm:$0xff]   ;;  %v11944_v45 = vld [vmem:[#allocation14 + $0x66c] ss:$16 sps:$4 sm:$0xff]  }
 0x86b   : > { %8678 = vmatprep.subr.bf16.mxu0 %v11863_v26  ;;  %v11942_v26 = vld [vmem:[#allocation14 + $0x668] ss:$16 sps:$4 sm:$0xff]  }
 0x86d   : > { %8841 = vmatpush1.bf16.msra.mxu1 %v11858_v52  ;;  %v11939_v52 = vld [vmem:[#allocation14 + $0x660] ss:$16 sps:$4 sm:$0xff]  }
 0x86e   : > { %8842 = vmatprep.subr.bf16.mxu1 %v11866_v46  ;;  %8679 = vmatpush1.bf16.msra.mxu0 %v11861_v51  ;;  %v11947_v46 = vld [vmem:[#allocation14 + $0x684] ss:$16 sps:$4 sm:$0xff]   ;;  %v11950_v51 = vld [vmem:[#allocation14 + $0x68c] ss:$16 sps:$4 sm:$0xff]  }
 0x86f   : > { %8680 = vmatprep.subr.bf16.mxu0 %v11869_v50  ;;  %v11948_v50 = vld [vmem:[#allocation14 + $0x688] ss:$16 sps:$4 sm:$0xff]  }
 0x871   : > { %8843 = vmatpush1.bf16.msra.mxu1 %v11864_v47  ;;  %v11945_v47 = vld [vmem:[#allocation14 + $0x680] ss:$16 sps:$4 sm:$0xff]  }
 0x872   : > { %8844 = vmatprep.subr.bf16.mxu1 %v11872_v53  ;;  %8681 = vmatpush1.bf16.msra.mxu0 %v11867_v54  ;;  %v11953_v53 = vld [vmem:[#allocation14 + $0x6a4] ss:$16 sps:$4 sm:$0xff]   ;;  %v11956_v54 = vld [vmem:[#allocation14 + $0x6ac] ss:$16 sps:$4 sm:$0xff]  }
 0x873   : > { %8682 = vmatprep.subr.bf16.mxu0 %v11875_v57  ;;  %v11954_v57 = vld [vmem:[#allocation14 + $0x6a8] ss:$16 sps:$4 sm:$0xff]  }
 0x875   : > { %8845 = vmatpush1.bf16.msra.mxu1 %v11870_v55  ;;  %v11951_v55 = vld [vmem:[#allocation14 + $0x6a0] ss:$16 sps:$4 sm:$0xff]  }
 0x876   : > { %8846 = vmatprep.subr.bf16.mxu1 %v11878_v60  ;;  %8683 = vmatpush1.bf16.msra.mxu0 %v11873_v63  ;;  %v11959_v60 = vld [vmem:[#allocation14 + $0x6c4] ss:$16 sps:$4 sm:$0xff]   ;;  %v11962_v63 = vld [vmem:[#allocation14 + $0x6cc] ss:$16 sps:$4 sm:$0xff]  }
 0x877   : > { %8684 = vmatprep.subr.bf16.mxu0 %v11881_v1  ;;  %v11960_v1 = vld [vmem:[#allocation14 + $0x6c8] ss:$16 sps:$4 sm:$0xff]  }
 0x879   : > { %8847 = vmatpush1.bf16.msra.mxu1 %v11876_v0  ;;  %v11957_v0 = vld [vmem:[#allocation14 + $0x6c0] ss:$16 sps:$4 sm:$0xff]  }
 0x87a   : > { %8848 = vmatprep.subr.bf16.mxu1 %v11884_v2  ;;  %8685 = vmatpush1.bf16.msra.mxu0 %v11879_v5  ;;  %v11965_v2 = vld [vmem:[#allocation14 + $0x6e4] ss:$16 sps:$4 sm:$0xff]   ;;  %v11968_v5 = vld [vmem:[#allocation14 + $0x6ec] ss:$16 sps:$4 sm:$0xff]  }
 0x87b   : > { %8686 = vmatprep.subr.bf16.mxu0 %v11887_v3  ;;  %v11966_v3 = vld [vmem:[#allocation14 + $0x6e8] ss:$16 sps:$4 sm:$0xff]  }
 0x87d   : > { %8849 = vmatpush1.bf16.msra.mxu1 %v11882_v58  ;;  %v11963_v58 = vld [vmem:[#allocation14 + $0x6e0] ss:$16 sps:$4 sm:$0xff]  }
 0x87e   : > { %8850 = vmatprep.subr.bf16.mxu1 %v11890_v4  ;;  %8687 = vmatpush1.bf16.msra.mxu0 %v11885_v7  ;;  %v11971_v4 = vld [vmem:[#allocation14 + $0x704] ss:$16 sps:$4 sm:$0xff]   ;;  %v11974_v7 = vld [vmem:[#allocation14 + $0x70c] ss:$16 sps:$4 sm:$0xff]  }
 0x87f   : > { %8688 = vmatprep.subr.bf16.mxu0 %v11893_v11  ;;  %v11972_v11 = vld [vmem:[#allocation14 + $0x708] ss:$16 sps:$4 sm:$0xff]  }
 0x881   : > { %8851 = vmatpush1.bf16.msra.mxu1 %v11888_v10  ;;  %v11969_v10 = vld [vmem:[#allocation14 + $0x700] ss:$16 sps:$4 sm:$0xff]  }
 0x882   : > { %8852 = vmatprep.subr.bf16.mxu1 %v11896_v12  ;;  %8689 = vmatpush1.bf16.msra.mxu0 %v11891_v13  ;;  %v11977_v12 = vld [vmem:[#allocation14 + $0x724] ss:$16 sps:$4 sm:$0xff]   ;;  %v11980_v13 = vld [vmem:[#allocation14 + $0x72c] ss:$16 sps:$4 sm:$0xff]  }
 0x883   : > { %8690 = vmatprep.subr.bf16.mxu0 %v11899_v15  ;;  %v11978_v15 = vld [vmem:[#allocation14 + $0x728] ss:$16 sps:$4 sm:$0xff]  }
 0x885   : > { %8853 = vmatpush1.bf16.msra.mxu1 %v11894_v14  ;;  %v11975_v14 = vld [vmem:[#allocation14 + $0x720] ss:$16 sps:$4 sm:$0xff]  }
 0x886   : > { %8854 = vmatprep.subr.bf16.mxu1 %v11902_v16  ;;  %8691 = vmatpush1.bf16.msra.mxu0 %v11897_v17  ;;  %v11983_v16 = vld [vmem:[#allocation14 + $0x744] ss:$16 sps:$4 sm:$0xff]   ;;  %v11986_v17 = vld [vmem:[#allocation14 + $0x74c] ss:$16 sps:$4 sm:$0xff]  }
 0x887   : > { %8692 = vmatprep.subr.bf16.mxu0 %v11905_v62  ;;  %v11984_v62 = vld [vmem:[#allocation14 + $0x748] ss:$16 sps:$4 sm:$0xff]  }
 0x889   : > { %8855 = vmatpush1.bf16.msra.mxu1 %v11900_v18  ;;  %v11981_v18 = vld [vmem:[#allocation14 + $0x740] ss:$16 sps:$4 sm:$0xff]  }
 0x88a   : > { %8856 = vmatprep.subr.bf16.mxu1 %v11908_v19  ;;  %8693 = vmatpush1.bf16.msra.mxu0 %v11903_v21  ;;  %v11989_v19 = vld [vmem:[#allocation14 + $0x764] ss:$16 sps:$4 sm:$0xff]   ;;  %v11992_v21 = vld [vmem:[#allocation14 + $0x76c] ss:$16 sps:$4 sm:$0xff]  }
 0x88b   : > { %8694 = vmatprep.subr.bf16.mxu0 %v11911_v23  ;;  %v11990_v23 = vld [vmem:[#allocation14 + $0x768] ss:$16 sps:$4 sm:$0xff]  }
 0x88d   : > { %8857 = vmatpush1.bf16.msra.mxu1 %v11906_v22  ;;  %v11987_v22 = vld [vmem:[#allocation14 + $0x760] ss:$16 sps:$4 sm:$0xff]  }
 0x88e   : > { %8858 = vmatprep.subr.bf16.mxu1 %v11914_v20  ;;  %8695 = vmatpush1.bf16.msra.mxu0 %v11909_v48  ;;  %v11995_v20 = vld [vmem:[#allocation14 + $0x784] ss:$16 sps:$4 sm:$0xff]   ;;  %v11998_v48 = vld [vmem:[#allocation14 + $0x78c] ss:$16 sps:$4 sm:$0xff]  }
 0x88f   : > { %8696 = vmatprep.subr.bf16.mxu0 %v11917_v27  ;;  %v11996_v27 = vld [vmem:[#allocation14 + $0x788] ss:$16 sps:$4 sm:$0xff]  }
 0x891   : > { %8859 = vmatpush1.bf16.msra.mxu1 %v11912_v24  ;;  %v11993_v24 = vld [vmem:[#allocation14 + $0x780] ss:$16 sps:$4 sm:$0xff]  }
 0x892   : > { %8860 = vmatprep.subr.bf16.mxu1 %v11920_v28  ;;  %8697 = vmatpush1.bf16.msra.mxu0 %v11915_v29  ;;  %v12001_v28 = vld [vmem:[#allocation14 + $0x7a4] ss:$16 sps:$4 sm:$0xff]   ;;  %v12004_v29 = vld [vmem:[#allocation14 + $0x7ac] ss:$16 sps:$4 sm:$0xff]  }
 0x893   : > { %8707 = vmatprep.subr.bf16.mxu0 %v11923_v35  ;;  %v7288_v35 = vld [vmem:[#allocation14 + $0x7c8] sm:$0xff] }
 0x895   : > { %8861 = vmatpush1.bf16.msra.mxu1 %v11918_v33  ;;  %8699 = vmatmul.mubr.bf16.vlgmr.msra.gmra.mrb[0].mxu0 %v7294_v39  ;;  %v7287_v33 = vld [vmem:[#allocation14 + $0x7c0] sm:$0xff] }
 0x896   : > { %8871 = vmatprep.subr.bf16.mxu1 %v11926_v36  ;;  %8708 = vmatpush1.bf16.msra.mxu0 %v11921_v37  ;;  %v11999_v36 = vld [vmem:[#allocation14 + $0x7a0] ss:$16 sps:$4 sm:$0xff]   ;;  %v11056_v30 = vcombine.high %v7287_v33, %v7287_v33  ;;  %v11058_v37 = vcombine.high %v7288_v35, %v7288_v35 }
 0x897   : > { %8709 = vmatprep.subr.bf16.mxu0 %v11929_v40  ;;  %11060 = vmatprep.mubr.msk.bf16.mxu0 %vm6326_vm6, %v7297_v42  ;;  %v7037_v40 = vld [vmem:[#allocation2 + $0x30] sm:$0xff] }
 0x898   : > { %8863 = vmatmul.mubr.bf16.vlgmr.msra.gmra.mrb[0].mxu1 %v7294_v39  ;;  %v11057_v39 = vcombine.low %v7288_v35, %v7288_v35 }
 0x899   : > { %8872 = vmatpush1.bf16.msra.mxu1 %v11924_v38  ;;  %11062 = vmatprep.mubr.msk.bf16.mxu1 %vm6326_vm6, %v7297_v42  ;;  %v11055_v38 = vcombine.low %v7287_v33, %v7287_v33  ;;  %v7296_v42 = vpack.c.bf16 %v7037_v40, %v7037_v40 }
 0x89a   : > { %8873 = vmatprep.subr.bf16.mxu1 %v11932_v49  ;;  %8710 = vmatpush1.bf16.msra.mxu0 %v11927_v41  ;;  %v8579_v41 = vsel %vm6330_vm7, %v11057_v39, 0 }
 0x89b   : > { %8711 = vmatprep.subr.bf16.mxu0 %v11935_v56  ;;  %v8573_v49 = vsel %vm6330_vm7, %v11055_v38, 0  ;;  %v12009_v56 = vld [vmem:[%s14988_s11] ss:$8 sps:$4 sm:$0xff]  }
 0x89d   : > { %8874 = vmatpush1.bf16.msra.mxu1 %v11930_v43  ;;  %v12011_v43 = vld [vmem:[%s14988_s11 + $0x4] ss:$8 sps:$4 sm:$0xff]  }
 0x89e   : > { %8875 = vmatprep.subr.bf16.mxu1 %v11938_v9  ;;  %8712 = vmatpush1.bf16.msra.mxu0 %v11933_v6  ;;  %v12014_v9 = vld [vmem:[%s14988_s11 + $0x14] ss:$8 sps:$4 sm:$0xff]   ;;  %v12012_v6 = vld [vmem:[%s14988_s11 + $0x10] ss:$8 sps:$4 sm:$0xff]  }
 0x89f   : > { %8713 = vmatprep.subr.bf16.mxu0 %v11941_v34  ;;  %v12015_v34 = vld [vmem:[%s14988_s11 + $0x20] ss:$8 sps:$4 sm:$0xff]  }
 0x8a1   : > { %8876 = vmatpush1.bf16.msra.mxu1 %v11936_v44  ;;  %v12017_v44 = vld [vmem:[%s14988_s11 + $0x24] ss:$8 sps:$4 sm:$0xff]  }
 0x8a2   : > { %8877 = vmatprep.subr.bf16.mxu1 %v11944_v45  ;;  %8714 = vmatpush1.bf16.msra.mxu0 %v11939_v52  ;;  %v12020_v45 = vld [vmem:[%s14988_s11 + $0x34] ss:$8 sps:$4 sm:$0xff]   ;;  %v12018_v52 = vld [vmem:[%s14988_s11 + $0x30] ss:$8 sps:$4 sm:$0xff]  }
 0x8a3   : > { %8715 = vmatprep.subr.bf16.mxu0 %v11947_v46  ;;  %v12021_v46 = vld [vmem:[%s14988_s11 + $0x40] ss:$8 sps:$4 sm:$0xff]  }
 0x8a5   : > { %8878 = vmatpush1.bf16.msra.mxu1 %v11942_v26  ;;  %v12023_v26 = vld [vmem:[%s14988_s11 + $0x44] ss:$8 sps:$4 sm:$0xff]  }
 0x8a6   : > { %8879 = vmatprep.subr.bf16.mxu1 %v11950_v51  ;;  %8716 = vmatpush1.bf16.msra.mxu0 %v11945_v47  ;;  %v12026_v51 = vld [vmem:[%s14988_s11 + $0x54] ss:$8 sps:$4 sm:$0xff]   ;;  %v12024_v47 = vld [vmem:[%s14988_s11 + $0x50] ss:$8 sps:$4 sm:$0xff]  }
 0x8a7   : > { %8717 = vmatprep.subr.bf16.mxu0 %v11953_v53  ;;  %v12027_v53 = vld [vmem:[%s14988_s11 + $0x60] ss:$8 sps:$4 sm:$0xff]  }
 0x8a9   : > { %8880 = vmatpush1.bf16.msra.mxu1 %v11948_v50  ;;  %v12029_v50 = vld [vmem:[%s14988_s11 + $0x64] ss:$8 sps:$4 sm:$0xff]  }
 0x8aa   : > { %8881 = vmatprep.subr.bf16.mxu1 %v11956_v54  ;;  %8718 = vmatpush1.bf16.msra.mxu0 %v11951_v55  ;;  %v12032_v54 = vld [vmem:[%s14988_s11 + $0x74] ss:$8 sps:$4 sm:$0xff]   ;;  %v12030_v55 = vld [vmem:[%s14988_s11 + $0x70] ss:$8 sps:$4 sm:$0xff]  }
 0x8ab   : > { %8719 = vmatprep.subr.bf16.mxu0 %v11959_v60  ;;  %v12033_v60 = vld [vmem:[%s14988_s11 + $0x80] ss:$8 sps:$4 sm:$0xff]  }
 0x8ad   : > { %8882 = vmatpush1.bf16.msra.mxu1 %v11954_v57  ;;  %v12035_v57 = vld [vmem:[%s14988_s11 + $0x84] ss:$8 sps:$4 sm:$0xff]  }
 0x8ae   : > { %8883 = vmatprep.subr.bf16.mxu1 %v11962_v63  ;;  %8720 = vmatpush1.bf16.msra.mxu0 %v11957_v0  ;;  %v12038_v63 = vld [vmem:[%s14988_s11 + $0x94] ss:$8 sps:$4 sm:$0xff]   ;;  %v12036_v0 = vld [vmem:[%s14988_s11 + $0x90] ss:$8 sps:$4 sm:$0xff]  }
 0x8af   : > { %8721 = vmatprep.subr.bf16.mxu0 %v11965_v2  ;;  %v12039_v2 = vld [vmem:[%s14988_s11 + $0xa0] ss:$8 sps:$4 sm:$0xff]  }
 0x8b1   : > { %8884 = vmatpush1.bf16.msra.mxu1 %v11960_v1  ;;  %v12041_v1 = vld [vmem:[%s14988_s11 + $0xa4] ss:$8 sps:$4 sm:$0xff]  }
 0x8b2   : > { %8885 = vmatprep.subr.bf16.mxu1 %v11968_v5  ;;  %8722 = vmatpush1.bf16.msra.mxu0 %v11963_v58  ;;  %v12044_v5 = vld [vmem:[%s14988_s11 + $0xb4] ss:$8 sps:$4 sm:$0xff]   ;;  %v12042_v58 = vld [vmem:[%s14988_s11 + $0xb0] ss:$8 sps:$4 sm:$0xff]  }
 0x8b3   : > { %8723 = vmatprep.subr.bf16.mxu0 %v11971_v4  ;;  %v12045_v4 = vld [vmem:[%s14988_s11 + $0xc0] ss:$8 sps:$4 sm:$0xff]  }
 0x8b5   : > { %8886 = vmatpush1.bf16.msra.mxu1 %v11966_v3  ;;  %v12047_v3 = vld [vmem:[%s14988_s11 + $0xc4] ss:$8 sps:$4 sm:$0xff]  }
 0x8b6   : > { %8887 = vmatprep.subr.bf16.mxu1 %v11974_v7  ;;  %8724 = vmatpush1.bf16.msra.mxu0 %v11969_v10  ;;  %v12050_v7 = vld [vmem:[%s14988_s11 + $0xd4] ss:$8 sps:$4 sm:$0xff]   ;;  %v12048_v10 = vld [vmem:[%s14988_s11 + $0xd0] ss:$8 sps:$4 sm:$0xff]  }
 0x8b7   : > { %8725 = vmatprep.subr.bf16.mxu0 %v11977_v12  ;;  %v12051_v12 = vld [vmem:[%s14988_s11 + $0xe0] ss:$8 sps:$4 sm:$0xff]  }
 0x8b9   : > { %8888 = vmatpush1.bf16.msra.mxu1 %v11972_v11  ;;  %v12053_v11 = vld [vmem:[%s14988_s11 + $0xe4] ss:$8 sps:$4 sm:$0xff]  }
 0x8ba   : > { %8889 = vmatprep.subr.bf16.mxu1 %v11980_v13  ;;  %8726 = vmatpush1.bf16.msra.mxu0 %v11975_v14  ;;  %v12056_v13 = vld [vmem:[%s14988_s11 + $0xf4] ss:$8 sps:$4 sm:$0xff]   ;;  %v12054_v14 = vld [vmem:[%s14988_s11 + $0xf0] ss:$8 sps:$4 sm:$0xff]  }
 0x8bb   : > { %8727 = vmatprep.subr.bf16.mxu0 %v11983_v16  ;;  %v12104_v16 = vld [vmem:[#allocation19] sm:$0xff]  }
 0x8bd   : > { %8890 = vmatpush1.bf16.msra.mxu1 %v11978_v15  ;;  %v12059_v15 = vld [vmem:[%s14988_s11 + $0x104] ss:$8 sps:$4 sm:$0xff]  }
 0x8be   : > { %8891 = vmatprep.subr.bf16.mxu1 %v11986_v17  ;;  %8728 = vmatpush1.bf16.msra.mxu0 %v11981_v18  ;;  %v12602_v17 = vmov 0   ;;  %v12105_v18 = vld [vmem:[#allocation19 + $0x8] sm:$0xff]  }
 0x8bf   : > { %8729 = vmatprep.subr.bf16.mxu0 %v11989_v19  ;;  %v12107_v19 = vld [vmem:[#allocation19 + $0x18] sm:$0xff]  }
 0x8c1   : > { %8892 = vmatpush1.bf16.msra.mxu1 %v11984_v62  ;;  %v12106_v62 = vld [vmem:[#allocation19 + $0x10] sm:$0xff]  }
 0x8c2   : > { %8893 = vmatprep.subr.bf16.mxu1 %v11992_v21  ;;  %8730 = vmatpush1.bf16.msra.mxu0 %v11987_v22  ;;  %v12108_v21 = vld [vmem:[#allocation19 + $0x20] sm:$0xff]   ;;  %v12109_v22 = vld [vmem:[#allocation19 + $0x28] sm:$0xff]  }
 0x8c3   : > { %8731 = vmatprep.subr.bf16.mxu0 %v11995_v20  ;;  %v12111_v20 = vld [vmem:[#allocation19 + $0x38] sm:$0xff]  }
 0x8c5   : > { %8894 = vmatpush1.bf16.msra.mxu1 %v11990_v23  ;;  %v12110_v23 = vld [vmem:[#allocation19 + $0x30] sm:$0xff]  }
 0x8c6   : > { %8895 = vmatprep.subr.bf16.mxu1 %v11998_v48  ;;  %8732 = vmatpush1.bf16.msra.mxu0 %v11993_v24  ;;  %v12112_v48 = vld [vmem:[#allocation19 + $0x40] sm:$0xff]   ;;  %v12113_v24 = vld [vmem:[#allocation19 + $0x48] sm:$0xff]  }
 0x8c7   : > { %8733 = vmatprep.subr.bf16.mxu0 %v12001_v28  ;;  %v14682_v28 = vld [vmem:[#allocation16] sm:$0xf] }
 0x8c8   : > { %v7306_v33 = vrot.slane %v14682_v28, %v14502_v31  ;;  %v7314_v35 = vrot.slane %v14682_v28, %v3800_v61  ;;  %v12057_v61 = vld [vmem:[%s14988_s11 + $0x100] ss:$8 sps:$4 sm:$0xff]  }
 0x8c9   : > { %8896 = vmatpush1.bf16.msra.mxu1 %v11996_v27  ;;  %v12114_v27 = vld [vmem:[#allocation19 + $0x50] sm:$0xff]  }
 0x8ca   : > { %8897 = vmatprep.subr.bf16.mxu1 %v12004_v29  ;;  %8734 = vmatpush1.bf16.msra.mxu0 %v11999_v36  ;;  %v7302_v29 = vrot.slane %v14682_v28, %v14492_v25 }
 0x8cb   : > { %11059 = vmatprep.subr.msk.bf16.mxu0 %vm6330_vm7, %v11056_v30 }
 0x8cd   : > { %8898 = vmatpush1.bf16.msra.mxu1 %v12002_v32 }
 0x8ce   : > { %11061 = vmatprep.subr.msk.bf16.mxu1 %vm6330_vm7, %v11058_v37  ;;  %8736 = vmatpush1.bf16.msra.mxu0 %v8573_v49 }
 0x8cf   : > { %9321 = vmatprep.subr.bf16.mxu0 %v12011_v43 }
 0x8d1   : > { %8900 = vmatpush1.bf16.msra.mxu1 %v8579_v41  ;;  %8740 = vmatmul.mubr.bf16.vlgmr.msra.gmra.mrb[0].mxu0 %v7296_v42 }
 0x8d2   : > { %9322 = vmatpush1.bf16.msra.mxu0 %v12009_v56  ;;  %9521 = vmatprep.subr.bf16.mxu1 %v12602_v17 }
 0x8d3   : > { %9323 = vmatprep.subr.bf16.mxu0 %v12014_v9 }
 0x8d4   : > { %8904 = vmatmul.mubr.bf16.vlgmr.msra.gmra.mrb[0].mxu1 %v7296_v42 }
 0x8d5   : > { %9522 = vmatpush1.bf16.msra.mxu1 %v12104_v16  ;;  %v7310_v16 = vrot.slane %v14682_v28, %v3796_v59  ;;  %v12603_v28 = vmov 0.0|0.0  }
 0x8d6   : > { %9324 = vmatpush1.bf16.msra.mxu0 %v12012_v6  ;;  %9523 = vmatprep.subr.bf16.mxu1 %v12602_v17 }
 0x8d7   : > { %9325 = vmatprep.subr.bf16.mxu0 %v12017_v44 }
 0x8d9   : > { %9524 = vmatpush1.bf16.msra.mxu1 %v12105_v18  ;;  %v12101_v18 = vld [vmem:[%s14988_s11 + $0x1e4] ss:$8 sps:$4 sm:$0xff]  }
 0x8da   : > { %9326 = vmatpush1.bf16.msra.mxu0 %v12015_v34  ;;  %9525 = vmatprep.subr.bf16.mxu1 %v12602_v17 }
 0x8db   : > { %9327 = vmatprep.subr.bf16.mxu0 %v12020_v45  ;;  %v12062_v45 = vld [vmem:[%s14988_s11 + $0x114] ss:$8 sps:$4 sm:$0xff]  }
 0x8dd   : > { %9526 = vmatpush1.bf16.msra.mxu1 %v12106_v62  ;;  %v8978_v62 = vld [vmem:[%s14988_s11 + $0x1f0] sm:$0x33] }
 0x8de   : > { %9328 = vmatpush1.bf16.msra.mxu0 %v12018_v52  ;;  %9527 = vmatprep.subr.bf16.mxu1 %v12602_v17  ;;  %v11126_v8 = vcombine.high %v8978_v62, %v8978_v62 }
 0x8df   : > { %9329 = vmatprep.subr.bf16.mxu0 %v12023_v26  ;;  %v12060_v26 = vld [vmem:[%s14988_s11 + $0x110] ss:$8 sps:$4 sm:$0xff]  }
 0x8e1   : > { %9528 = vmatpush1.bf16.msra.mxu1 %v12107_v19  ;;  %v12099_v19 = vld [vmem:[%s14988_s11 + $0x1e0] ss:$8 sps:$4 sm:$0xff]  }
 0x8e2   : > { %9330 = vmatpush1.bf16.msra.mxu0 %v12021_v46  ;;  %9529 = vmatprep.subr.bf16.mxu1 %v12602_v17  ;;  %v12065_v46 = vld [vmem:[%s14988_s11 + $0x124] ss:$8 sps:$4 sm:$0xff]  }
 0x8e3   : > { %9331 = vmatprep.subr.bf16.mxu0 %v12026_v51  ;;  %v12063_v51 = vld [vmem:[%s14988_s11 + $0x120] ss:$8 sps:$4 sm:$0xff]  }
 0x8e5   : > { %9530 = vmatpush1.bf16.msra.mxu1 %v12108_v21 }
 0x8e6   : > { %9332 = vmatpush1.bf16.msra.mxu0 %v12024_v47  ;;  %9531 = vmatprep.subr.bf16.mxu1 %v12602_v17  ;;  %v12068_v47 = vld [vmem:[%s14988_s11 + $0x134] ss:$8 sps:$4 sm:$0xff]  }
 0x8e7   : > { %9333 = vmatprep.subr.bf16.mxu0 %v12029_v50  ;;  %v12066_v50 = vld [vmem:[%s14988_s11 + $0x130] ss:$8 sps:$4 sm:$0xff]  }
 0x8e9   : > { %9532 = vmatpush1.bf16.msra.mxu1 %v12109_v22  ;;  %v11125_v22 = vcombine.low %v8978_v62, %v8978_v62 }
 0x8ea   : > { %9334 = vmatpush1.bf16.msra.mxu0 %v12027_v53  ;;  %9533 = vmatprep.subr.bf16.mxu1 %v12602_v17  ;;  %v12071_v53 = vld [vmem:[%s14988_s11 + $0x144] ss:$8 sps:$4 sm:$0xff]  }
 0x8eb   : > { %9335 = vmatprep.subr.bf16.mxu0 %v12032_v54  ;;  %v12069_v54 = vld [vmem:[%s14988_s11 + $0x140] ss:$8 sps:$4 sm:$0xff]  }
 0x8ed   : > { %9534 = vmatpush1.bf16.msra.mxu1 %v12110_v23  ;;  %v9316_v23 = vsel %vm9314_vm9, %v11125_v22, 0 }
 0x8ee   : > { %9336 = vmatpush1.bf16.msra.mxu0 %v12030_v55  ;;  %9535 = vmatprep.subr.bf16.mxu1 %v12602_v17  ;;  %v12074_v55 = vld [vmem:[%s14988_s11 + $0x154] ss:$8 sps:$4 sm:$0xff]  }
 0x8ef   : > { %9337 = vmatprep.subr.bf16.mxu0 %v12035_v57  ;;  %v12072_v57 = vld [vmem:[%s14988_s11 + $0x150] ss:$8 sps:$4 sm:$0xff]  }
 0x8f1   : > { %9536 = vmatpush1.bf16.msra.mxu1 %v12111_v20 }
 0x8f2   : > { %9338 = vmatpush1.bf16.msra.mxu0 %v12033_v60  ;;  %9537 = vmatprep.subr.bf16.mxu1 %v12602_v17  ;;  %v12077_v60 = vld [vmem:[%s14988_s11 + $0x164] ss:$8 sps:$4 sm:$0xff]  }
 0x8f3   : > { %9339 = vmatprep.subr.bf16.mxu0 %v12038_v63  ;;  %v12075_v63 = vld [vmem:[%s14988_s11 + $0x160] ss:$8 sps:$4 sm:$0xff]  }
 0x8f5   : > { %9538 = vmatpush1.bf16.msra.mxu1 %v12112_v48  ;;  %v12115_v48 = vld [vmem:[#allocation19 + $0x58] sm:$0xff]  }
 0x8f6   : > { %9340 = vmatpush1.bf16.msra.mxu0 %v12036_v0  ;;  %9539 = vmatprep.subr.bf16.mxu1 %v12602_v17  ;;  %v12080_v0 = vld [vmem:[%s14988_s11 + $0x174] ss:$8 sps:$4 sm:$0xff]  }
 0x8f7   : > { %9341 = vmatprep.subr.bf16.mxu0 %v12041_v1  ;;  %v12078_v1 = vld [vmem:[%s14988_s11 + $0x170] ss:$8 sps:$4 sm:$0xff]  }
 0x8f9   : > { %9540 = vmatpush1.bf16.msra.mxu1 %v12113_v24  ;;  %v12116_v24 = vld [vmem:[#allocation19 + $0x60] ss:$0 sps:$4 sm:$0xff]  }
 0x8fa   : > { %9342 = vmatpush1.bf16.msra.mxu0 %v12039_v2  ;;  %9541 = vmatprep.subr.bf16.mxu1 %v12602_v17  ;;  %v12083_v2 = vld [vmem:[%s14988_s11 + $0x184] ss:$8 sps:$4 sm:$0xff]  }
 0x8fb   : > { %9343 = vmatprep.subr.bf16.mxu0 %v12044_v5  ;;  %v12081_v5 = vld [vmem:[%s14988_s11 + $0x180] ss:$8 sps:$4 sm:$0xff]  }
 0x8fd   : > { %9542 = vmatpush1.bf16.msra.mxu1 %v12114_v27  ;;  %v9519_v27 = vsel %vm6330_vm7, %v12116_v24, 0 }
 0x8fe   : > { %9344 = vmatpush1.bf16.msra.mxu0 %v12042_v58  ;;  %9543 = vmatprep.subr.bf16.mxu1 %v12602_v17  ;;  %v12086_v58 = vld [vmem:[%s14988_s11 + $0x194] ss:$8 sps:$4 sm:$0xff]  }
 0x8ff   : > { %9345 = vmatprep.subr.bf16.mxu0 %v12047_v3  ;;  %v12084_v3 = vld [vmem:[%s14988_s11 + $0x190] ss:$8 sps:$4 sm:$0xff]  }
 0x901   : > { %9544 = vmatpush1.bf16.msra.mxu1 %v12115_v48 }
 0x902   : > { %9346 = vmatpush1.bf16.msra.mxu0 %v12045_v4  ;;  %v12089_v4 = vld [vmem:[%s14988_s11 + $0x1a4] ss:$8 sps:$4 sm:$0xff]   ;;  %9545 = vmatprep.subr.bf16.mxu1 %v12602_v17 }
 0x903   : > { %9347 = vmatprep.subr.bf16.mxu0 %v12050_v7  ;;  %v12087_v7 = vld [vmem:[%s14988_s11 + $0x1a0] ss:$8 sps:$4 sm:$0xff]  }
 0x904   : > { %v9562_v17 = vld [vmem:[%s14989_s0] sm:$0xff] }
 0x905   : > { %9546 = vmatpush1.bf16.msra.mxu1 %v9519_v27 }
 0x906   : > { %9348 = vmatpush1.bf16.msra.mxu0 %v12048_v10  ;;  %v12092_v10 = vld [vmem:[%s14988_s11 + $0x1b4] ss:$8 sps:$4 sm:$0xff]   ;;  %11221 = vmatprep.subr.bf16.mxu1 %v12603_v28 }
 0x907   : > { %9349 = vmatprep.subr.bf16.mxu0 %v12053_v11  ;;  %v12090_v11 = vld [vmem:[%s14988_s11 + $0x1b0] ss:$8 sps:$4 sm:$0xff]  }
 0x90a   : > { %9350 = vmatpush1.bf16.msra.mxu0 %v12051_v12  ;;  %v12095_v12 = vld [vmem:[%s14988_s11 + $0x1c4] ss:$8 sps:$4 sm:$0xff]  }
 0x90b   : > { %9351 = vmatprep.subr.bf16.mxu0 %v12056_v13  ;;  %v12093_v13 = vld [vmem:[%s14988_s11 + $0x1c0] ss:$8 sps:$4 sm:$0xff]  }
 0x90e   : > { %9352 = vmatpush1.bf16.msra.mxu0 %v12054_v14  ;;  %v12098_v14 = vld [vmem:[%s14988_s11 + $0x1d4] ss:$8 sps:$4 sm:$0xff]  }
 0x90f   : > { %9362 = vmatprep.subr.bf16.mxu0 %v12059_v15  ;;  %v12096_v15 = vld [vmem:[%s14988_s11 + $0x1d0] ss:$8 sps:$4 sm:$0xff]  }
 0x9a4   : > { %v8741_v36 = vpop.f32.mrb[0].mxu0 }
 0x9a5   : > { %v11328_v30 = vadd.f32 %v8741_v36, %v7302_v29  ;;  %v8743_v37 = vpop.f32.mrb[1].mxu0  ;;  %v8979_v29 = vld [vmem:[#allocation17] sm:$0x3] }
 0x9a6   : > { %v11329_v39 = vadd.f32 %v8743_v37, %v7306_v33  ;;  %v8745_v49 = vpop.f32.mrb[2].mxu0  ;;  %v8988_v33 = vrot.slane %v8979_v29, %v14492_v25 }
 0x9a7   : > { %v14691_v32 = vpop.f32.mrb[0].mxu1  ;;  %v8912_v43 = vmax.f32 %v11328_v30, 0.0  ;;  %v8746_v42 = vpop.f32.mrb[3].mxu0  ;;  %v9563_v49 = vld [vmem:[%s14990_s10 + $0x8] sm:$0xff] }
 0x9a8   : > { %v8907_v38 = vpop.f32.mrb[1].mxu1  ;;  %v8913_v9 = vmax.f32 %v11329_v39, 0.0  ;;  %v11330_v21 = vadd.f32 %v14691_v32, %v7310_v16  ;;  %v9564_v42 = vld [vmem:[%s14990_s10 + $0x10] sm:$0xff]  ;;  %v11144_v16 = vld [vmem:[#allocation22] ss:$0 sm:$0xff] }
 0x9a9   : > { %v11331_v40 = vadd.f32 %v8907_v38, %v7314_v35  ;;  %v8909_v41 = vpop.f32.mrb[2].mxu1  ;;  %v8980_v34 = vpack.c.bf16 %v8912_v43, %v8912_v43  ;;  %v8992_v35 = vrot.slane %v8979_v29, %v14502_v31  ;;  %v11222_v43 = vpack.c.bf16 %v9563_v49, %v9562_v17 }
 0x9aa   : > { %v8910_v56 = vpop.f32.mrb[3].mxu1  ;;  %v8981_v44 = vpack.c.bf16 %v8913_v9, %v8913_v9  ;;  %v8914_v59 = vmax.f32 %v11330_v21, 0.0 }
 0x9ab   : > { %v8915_v6 = vmax.f32 %v11331_v40, 0.0  ;;  %v9565_v56 = vld [vmem:[%s14990_s10 + $0x18] sm:$0xff] }
 0x9ac   : > { %9353 = vmatprep.mubr.bf16.mxu0 %v8981_v44  ;;  %v8982_v20 = vpack.c.bf16 %v8914_v59, %v8914_v59  ;;  %v11225_v9 = vpack.c.bf16 %v9565_v56, %v9564_v42  ;;  %v9567_v44 = vld [vmem:[%s14990_s10 + $0x28] sm:$0xff] }
 0x9ad   : > { %v8983_v52 = vpack.c.bf16 %v8915_v6, %v8915_v6  ;;  %9354 = vmatmul.mubr.bf16.vlgmr.msra.gmra.mrb[4].mxu0 %v8980_v34  ;;  %v9566_v6 = vld [vmem:[%s14990_s10 + $0x20] sm:$0xff]  ;;  %v9568_v34 = vld [vmem:[%s14990_s10 + $0x30] sm:$0xff] }
 0x9ae   : > { %9363 = vmatpush1.bf16.msra.mxu0 %v12057_v61  ;;  %v11228_v61 = vpack.c.bf16 %v9567_v44, %v9566_v6 }
 0x9af   : > { %11128 = vmatprep.mubr.msk.bf16.mxu0 %vm9310_vm8, %v8983_v52  ;;  %9364 = vmatprep.subr.bf16.mxu0 %v12062_v45  ;;  %v9569_v45 = vld [vmem:[%s14990_s10 + $0x38] sm:$0xff] }
 0x9b0   : > { %v11231_v52 = vpack.c.bf16 %v9569_v45, %v9568_v34 }
 0x9b2   : > { %9365 = vmatpush1.bf16.msra.mxu0 %v12060_v26  ;;  %v9570_v26 = vld [vmem:[%s14990_s10 + $0x40] sm:$0xff] }
 0x9b3   : > { %9366 = vmatprep.subr.bf16.mxu0 %v12065_v46  ;;  %v9571_v46 = vld [vmem:[%s14990_s10 + $0x48] sm:$0xff] }
 0x9b6   : > { %9367 = vmatpush1.bf16.msra.mxu0 %v12063_v51  ;;  %v11234_v51 = vpack.c.bf16 %v9571_v46, %v9570_v26 }
 0x9b7   : > { %9368 = vmatprep.subr.bf16.mxu0 %v12068_v47  ;;  %v9572_v47 = vld [vmem:[%s14990_s10 + $0x50] sm:$0xff] }
 0x9ba   : > { %9369 = vmatpush1.bf16.msra.mxu0 %v12066_v50  ;;  %v9573_v50 = vld [vmem:[%s14990_s10 + $0x58] sm:$0xff] }
 0x9bb   : > { %9370 = vmatprep.subr.bf16.mxu0 %v12071_v53  ;;  %v11237_v53 = vpack.c.bf16 %v9573_v50, %v9572_v47 }
 0x9be   : > { %9371 = vmatpush1.bf16.msra.mxu0 %v12069_v54  ;;  %v12604_v54 = vmov 0.0  }
 0x9bf   : > { %9372 = vmatprep.subr.bf16.mxu0 %v12074_v55  ;;  %v9574_v55 = vld [vmem:[%s14990_s10 + $0x60] sm:$0xf] }
 0x9c2   : > { %9373 = vmatpush1.bf16.msra.mxu0 %v12072_v57  ;;  %v11129_v57 = vld [vmem:[#allocation20] ss:$0 sm:$0xff] }
 0x9c3   : > { %9374 = vmatprep.subr.bf16.mxu0 %v12077_v60  ;;  %v9660_v60 = vld [vmem:[%s14991_s1] sm:$0xff] }
 0x9c6   : > { %9375 = vmatpush1.bf16.msra.mxu0 %v12075_v63  ;;  %v9661_v63 = vld [vmem:[%s14991_s1 + $0x8] sm:$0xff] }
 0x9c7   : > { %9376 = vmatprep.subr.bf16.mxu0 %v12080_v0 }
 0x9ca   : > { %9377 = vmatpush1.bf16.msra.mxu0 %v12078_v1 }
 0x9cb   : > { %9378 = vmatprep.subr.bf16.mxu0 %v12083_v2 }
 0x9ce   : > { %9379 = vmatpush1.bf16.msra.mxu0 %v12081_v5 }
 0x9cf   : > { %9380 = vmatprep.subr.bf16.mxu0 %v12086_v58  ;;  %v11240_v58 = vpack.c.bf16 %v9661_v63, %v9660_v60 }
 0x9d2   : > { %9381 = vmatpush1.bf16.msra.mxu0 %v12084_v3 }
 0x9d3   : > { %9382 = vmatprep.subr.bf16.mxu0 %v12089_v4 }
 0x9d6   : > { %9383 = vmatpush1.bf16.msra.mxu0 %v12087_v7  ;;  %v9662_v7 = vld [vmem:[%s14991_s1 + $0x10] sm:$0xff] }
 0x9d7   : > { %9384 = vmatprep.subr.bf16.mxu0 %v12092_v10  ;;  %v9663_v10 = vld [vmem:[%s14991_s1 + $0x18] sm:$0xff] }
 0x9da   : > { %9385 = vmatpush1.bf16.msra.mxu0 %v12090_v11  ;;  %v11243_v11 = vpack.c.bf16 %v9663_v10, %v9662_v7 }
 0x9db   : > { %9386 = vmatprep.subr.bf16.mxu0 %v12095_v12  ;;  %v9664_v12 = vld [vmem:[%s14991_s1 + $0x20] sm:$0xff] }
 0x9de   : > { %9387 = vmatpush1.bf16.msra.mxu0 %v12093_v13  ;;  %v9665_v13 = vld [vmem:[%s14991_s1 + $0x28] sm:$0xff] }
 0x9df   : > { %9388 = vmatprep.subr.bf16.mxu0 %v12098_v14  ;;  %v11246_v14 = vpack.c.bf16 %v9665_v13, %v9664_v12 }
 0x9e2   : > { %9389 = vmatpush1.bf16.msra.mxu0 %v12096_v15  ;;  %v9666_v15 = vld [vmem:[%s14991_s1 + $0x30] sm:$0x3] }
 0x9e3   : > { %9390 = vmatprep.subr.bf16.mxu0 %v12101_v18 }
 0x9e6   : > { %9391 = vmatpush1.bf16.msra.mxu0 %v12099_v19 }
 0x9e7   : > { %11127 = vmatprep.subr.msk.bf16.mxu0 %vm9314_vm9, %v11126_v8  ;;  %v11147_v8 = vld [vmem:[#allocation23] ss:$0 sm:$0xff] }
 0x9ea   : > { %9393 = vmatpush1.bf16.msra.mxu0 %v9316_v23 }
 0x9ed   : > { %9395 = vmatmul.mubr.bf16.vlgmr.msra.gmra.mrb[4].mxu0 %v8982_v20 }
 0xac0   : > { %v9396_v36 = vpop.f32.mrb[4].mxu0 }
 0xac1   : > { %v11332_v32 = vadd.f32 %v9396_v36, %v8988_v33  ;;  %v9398_v30 = vpop.f32.mrb[5].mxu0 }
 0xac2   : > { %v11333_v37 = vadd.f32 %v9398_v30, %v8992_v35  ;;  %v9400_v38 = vpop.f32.mrb[6].mxu0 }
 0xac3   : > { %v9403_v39 = vmax.f32 %v11332_v32, 0.0  ;;  %v9401_v40 = vpop.f32.mrb[7].mxu0 }
 0xac4   : > { %v9404_v41 = vmax.f32 %v11333_v37, 0.0 }
 0xac5   : > { %v9431_v31 = vpack.c.bf16 %v9403_v39, %v9403_v39 }
 0xac6   : > { %v9432_v25 = vpack.c.bf16 %v9404_v41, %v9404_v41 }
 0xac8   : > { %11143 = vmatprep.mubr.msk.bf16.mxu1 %vm9514_vm10, %v9432_v25 }
 0xac9   : > { %9554 = vmatmul.mubr.bf16.vlgmr.msra.gmra.mrb[4].mxu1 %v9431_v31 }
 0xaca   : > { %11223 = vmatpush3.bf16.msra.mxu1 %v11222_v43  ;;  %11201 = vmatprep.mubr.msk.f32.mxu1 %vm12605_vm11, %v12604_v54 }
 0xacb   : > { %11224 = vmatprep.subr.bf16.mxu1 %v12603_v28 }
 0xace   : > { %11226 = vmatpush3.bf16.msra.mxu1 %v11225_v9 }
 0xacf   : > { %11227 = vmatprep.subr.bf16.mxu1 %v12603_v28 }
 0xad2   : > { %11229 = vmatpush3.bf16.msra.mxu1 %v11228_v61 }
 0xad3   : > { %11230 = vmatprep.subr.bf16.mxu1 %v12603_v28 }
 0xad6   : > { %11232 = vmatpush3.bf16.msra.mxu1 %v11231_v52 }
 0xad7   : > { %11233 = vmatprep.subr.bf16.mxu1 %v12603_v28 }
 0xada   : > { %11235 = vmatpush3.bf16.msra.mxu1 %v11234_v51 }
 0xadb   : > { %11236 = vmatprep.subr.bf16.mxu1 %v12603_v28 }
 0xade   : > { %11238 = vmatpush3.bf16.msra.mxu1 %v11237_v53 }
 0xadf   : > { %11199 = vmatprep.subr.mxu1 %v12604_v54 }
 0xae2   : > { %11200 = vmatpush3.msk.msra.mxu1 %vm6330_vm7, %v9574_v55 }
 0xae3   : > { %11239 = vmatprep.subr.bf16.mxu1 %v12603_v28 }
 0xb9c   : > { %v9555_v0 = vpop.f32.mrb[4].mxu1 }
 0xb9d   : > { %v9556_v1 = vadd.f32 %v11129_v57, %v9555_v0  ;;  %v9557_v2 = vpop.f32.mrb[5].mxu1 }
 0xb9e   : > { %v9558_v5 = vpop.f32.mrb[6].mxu1 }
 0xb9f   : > { %v9561_v3 = vmax.f32 %v9556_v1, 0.0  ;;  %v9559_v4 = vpop.f32.mrb[7].mxu1 }
 0xba1   : > { %11202 = vmatmul.mubr.msk.f32.vlgmr.msra.gmra.mrb[8].mxu1 %vm9582_vm12, %v9561_v3 }
 0xba2   : > { %11241 = vmatpush3.bf16.msra.mxu1 %v11240_v58  ;;  %11218 = vmatprep.mubr.msk.f32.mxu1 %vm12605_vm11, %v12604_v54 }
 0xba3   : > { %11242 = vmatprep.subr.bf16.mxu1 %v12603_v28 }
 0xba6   : > { %11244 = vmatpush3.bf16.msra.mxu1 %v11243_v11 }
 0xba7   : > { %11245 = vmatprep.subr.bf16.mxu1 %v12603_v28 }
 0xbaa   : > { %11247 = vmatpush3.bf16.msra.mxu1 %v11246_v14 }
 0xbab   : > { %11216 = vmatprep.subr.mxu1 %v12604_v54 }
 0xbae   : > { %11217 = vmatpush3.msk.msra.mxu1 %vm9314_vm9, %v9666_v15 }
 0xc74   : > { %v9655_v18 = vpop.f32.mrb[8].mxu1 }
 0xc75   : > { %v9656_v62 = vadd.f32 %v11144_v16, %v9655_v18  ;;  %v11203_v19 = vpop.f32.mrb[9].mxu1 }
 0xc77   : > { %v9659_v21 = vmax.f32 %v9656_v62, 0.0 }
 0xc79   : > { %11219 = vmatmul.mubr.msk.f32.vlgmr.msra.gmra.mrb[10].mxu1 %vm9674_vm13, %v9659_v21 }
 0xd4c   : > { %v9747_v22 = vpop.f32.mrb[10].mxu1 }
 0xd4d   : > { %v9748_v59 = vadd.f32 %v11147_v8, %v9747_v22  ;;  %v11220_v23 = vpop.f32.mrb[11].mxu1 }
 0xd4f   : > { %v9751_v20 = vmax.f32 %v9748_v59, 0.0 }
 0xd51   : > { %v9752_v48 = vsub.f32 0.0, %v9751_v20 }
 0xd53   : > { %v9753_v24 = vmul.f32 1.442695, %v9752_v48 }
 0xd55   : > { %12117 = vpow2.f32 %v9753_v24 }
 0xd5f   : > { %v12118_v27 = vpop.eup %12117 }
 0xd60   : > { %v9755_v28 = vadd.f32 1.0, %v12118_v27 }
 0xd62   : > { %12119 = vrcp.f32 %v9755_v28 }
 0xd6c   : > { %v12120_v29 = vpop.eup %12119 }
 0xd6d   : > { %9759 = vst.msk [vmem:[%s14992_s8] sm:$0xff] %vm9758_vm14, %v12120_v29 }
 0xd6e PF: > { %p36_p9 = scmp.ge.s32.totalorder %s12859_s4, 10   ;;  %s14993_s0 = smov %s12571_s30 }
 0xd6f   : > { %s14994_s30 = smov %s12575_s20  ;;  %s14995_s20 = smov %s12870_s18 }
 0xd70   : > { %s14996_s21 = smov %s12859_s4  ;;  %38 = sbr.rel (!%p36_p9) target bundleno = 29 (0x1d), region = 200 }
 0xd77   :  { %9771 = vsyncpa [#allocation4], 1 }
 0xd78   :  { %9773 = vsyncpa [#allocation4 + $0x1], 1 }
 0xd79   :  { %9774 = vsyncpa [#allocation6], 1 }
 0xd7a   :  { %9775 = vsyncpa [#allocation9], 1 }
 0xd7b   :  { %9776 = vsyncpa [#allocation12], 1 }
 0xd7c   :  { %9778 = vsyncpa [#allocation12 + $0x1], 1 }
 0xd7d   :  { %9779 = vsyncpa [#allocation15], 1 }
 0xd7e   :  { %9780 = vsyncpa [#allocation18], 1 }
 0xd7f   :  { %9781 = vsyncpa [#allocation21], 1 }
 0xd80   :  { %9782 = vsyncpa [#allocation24], 1 }

</bundles_post_ra>
